<compile_context>
chip_gen: v7x
topology: tpu7x:2x2x1
jax: 0.10.0
libtpu: 0.0.40
codegen_flags: <defaults>
</compile_context>

<pallas_src>
import functools
import random

import numpy as np
import jax
import jax.numpy as jnp
from jax import lax
from jax.experimental import pallas as pl
from jax.experimental.pallas import tpu as pltpu


# Tile sizes: multiples of 256 on the matmul M/N dims fill the v6e/v7x
# 2x(256x256) MXU (128-aligned is only enough on v5e).  VMEM footprint per
# grid step is a few MiB, independent of Np^2.
_TM = 256          # rows per grid step
_TN = 512          # columns per inner fori_loop step
_BUCKET = 512      # Np rounded up to a multiple of this (compile-cache buckets)


# -----------------------------------------------------------------------------
# Pallas kernel: one row tile of the `_contrastive` computation.
# -----------------------------------------------------------------------------
def _contrastive_kernel(f_row_ref, lab_row_ref, f_all_ref, lab_tile_ref, o_ref,
                        *, temperature, tm, tn):
    """Row-tiled contrastive loss.

    f_row_ref   : (TM, Dp)       bf16  row tile of contrast features
    lab_row_ref : (TM, 1)        f32   labels of the row tile (padded rows = -2)
    f_all_ref   : (Np, Dp)       bf16  full contrast features (VMEM resident)
    lab_tile_ref: (Np/TN, TN)    f32   labels reshaped per column tile
    o_ref       : (1, 8, 128)    f32   lane-dense partial (sum of this tile's
                                       per-row losses, broadcast)
    """
    i = pl.program_id(0)
    inv_t = 1.0 / temperature
    n_col_tiles = f_all_ref.shape[0] // tn

    fr = f_row_ref[...]                                    # (TM, Dp) bf16
    lab_r = lab_row_ref[...]                               # (TM, 1)  f32
    valid_r = (lab_r > -1.5).astype(jnp.float32)           # (TM, 1)
    row_base = i * tm

    def _tile(c):
        # bf16 Gram matmul tile with f32 accumulation on the MXU.
        col0 = pl.multiple_of(c * tn, tn)
        fc = f_all_ref[pl.ds(col0, tn), :]                 # (TN, Dp) bf16
        adc = lax.dot_general(
            fr, fc, dimension_numbers=(((1,), (1,)), ((), ())),
            preferred_element_type=jnp.float32) * inv_t    # (TM, TN) f32
        lab_c = lab_tile_ref[pl.ds(c, 1), :]               # (1, TN) f32
        eq = lab_r == lab_c                                # (TM, TN) label equality
        validc = lab_c > -1.5                              # (1, TN)  real columns
        # Diagonal handled with a small per-tile iota (never a full NxN mask).
        rg = row_base + lax.broadcasted_iota(jnp.int32, (tm, tn), 0)
        cg = c * tn + lax.broadcasted_iota(jnp.int32, (tm, tn), 1)
        not_diag = rg != cg
        pos = jnp.logical_and(jnp.logical_and(eq, validc), not_diag).astype(jnp.float32)
        neg = jnp.logical_and(jnp.logical_not(eq), validc).astype(jnp.float32)
        return adc, pos, neg

    # ---- sweep 1: online row max + neg exp-sum + positive logit sum/count ----
    # Row-max INVARIANT (do not break): padded F rows/columns are exactly zero,
    # so adc over padded columns is 0, and the diagonal adc[i,i] = ||f_i||^2/T
    # >= 0 is included in the max; therefore the unmasked running max
    # (initialized to 0.0) equals the valid-column-only max of the PyTorch
    # reference for every valid row.
    def sweep1(c, carry):
        m, s_neg, p_dot, p_cnt = carry
        adc, pos, neg = _tile(c)
        m_new = jnp.maximum(m, jnp.max(adc, axis=1, keepdims=True))
        scale = jnp.exp(m - m_new)                         # <= 1, rescale old sums
        e = jnp.exp(adc - m_new)                           # (TM, TN), <= 1
        s_neg = s_neg * scale + jnp.sum(e * neg, axis=1, keepdims=True)
        p_dot = p_dot + jnp.sum(pos * adc, axis=1, keepdims=True)
        p_cnt = p_cnt + jnp.sum(pos, axis=1, keepdims=True)
        return m_new, s_neg, p_dot, p_cnt

    zeros = jnp.zeros((tm, 1), jnp.float32)
    m_f, s_neg, p_dot, p_cnt = lax.fori_loop(
        0, n_col_tiles, sweep1, (zeros, zeros, zeros, zeros))

    # ---- sweep 2: sum_j pos_ij * log(exp(logits_ij) + neg_sum_i + eps) -------
    # Needs the finalized row max and neg_sum, hence a second pass over column
    # tiles (one extra exp per Gram element; avoids any O(TM*Np) slab so VMEM
    # stays bounded on v7x's 64 MiB).
    def sweep2(c, p_log):
        adc, pos, _ = _tile(c)
        e = jnp.exp(adc - m_f)
        lp = jnp.log(e + s_neg + 1e-6)
        return p_log + jnp.sum(pos * lp, axis=1, keepdims=True)

    p_log = lax.fori_loop(0, n_col_tiles, zeros.__class__ is None or sweep2, zeros) \
        if False else lax.fori_loop(0, n_col_tiles, sweep2, zeros)

    denom = jnp.where(p_cnt > 0, p_cnt, 1.0)        # guard only trips on padded rows
    # sum_j pos * logits = p_dot - p_cnt * m_f  (logits = adc - row_max)
    mean_log_prob_pos = (p_dot - p_cnt * m_f - p_log) / denom
    per_row = -temperature * mean_log_prob_pos * valid_r   # (TM, 1); padded rows -> 0
    tile_sum = jnp.sum(per_row)
    # Lane-dense partial output (unmasked vst); final tiny reduction done in XLA.
    o_ref[...] = jnp.full((1, 8, 128), tile_sum, dtype=jnp.float32)


# -----------------------------------------------------------------------------
# Build + cache one jitted pallas_call per (Np, Dp) bucket.
# -----------------------------------------------------------------------------
@functools.lru_cache(maxsize=None)
def _build_contrastive_fn(Np, Dp, temperature, tm=_TM, tn=_TN):
    assert Np % tm == 0 and Np % tn == 0 and Dp % 128 == 0
    n_row_tiles = Np // tm
    n_col_tiles = Np // tn

    kernel = functools.partial(
        _contrastive_kernel, temperature=float(temperature), tm=tm, tn=tn)

    pc = pl.pallas_call(
        kernel,
        out_shape=jax.ShapeDtypeStruct((n_row_tiles, 8, 128), jnp.float32),
        grid=(n_row_tiles,),
        in_specs=[
            pl.BlockSpec((tm, Dp), lambda i: (i, 0)),           # row tile of F
            pl.BlockSpec((tm, 1), lambda i: (i, 0)),            # row-tile labels
            pl.BlockSpec((Np, Dp), lambda i: (0, 0)),           # full F (VMEM resident)
            pl.BlockSpec((n_col_tiles, tn), lambda i: (0, 0)),  # labels per column tile
        ],
        out_specs=pl.BlockSpec((1, 8, 128), lambda i: (i, 0, 0)),
        compiler_params=pltpu.CompilerParams(
            dimension_semantics=("parallel",),        # shard row tiles over v7x cores
            vmem_limit_bytes=48 * 1024 * 1024),       # explicit budget (fits v7x 64MiB)
    )

    @jax.jit
    def run(f_bf16, lab_col, lab_tiles, n_valid):
        partials = pc(f_bf16, lab_col, f_bf16, lab_tiles)     # (n_row_tiles, 8, 128)
        return jnp.sum(partials[:, 0, 0]) / n_valid

    return run


def contrastive_pallas(contrast_feature, labels_rep, temperature):
    """contrast_feature: (N, D) f32 numpy; labels_rep: (N,) f32 numpy. -> scalar loss."""
    cf = np.asarray(contrast_feature, np.float32)
    lab = np.asarray(labels_rep, np.float32)
    N, D = cf.shape

    # Bucketed padding (host-side numpy; avoids device scatter + per-N recompiles).
    Np = max(_BUCKET, ((N + _BUCKET - 1) // _BUCKET) * _BUCKET)
    Dp = 128 if D <= 128 else ((D + 255) // 256) * 256   # 256-chunk K for v6e/v7x MXU

    f_pad = np.zeros((Np, Dp), np.float32)
    f_pad[:N, :D] = cf
    lab_pad = np.full((Np,), -2.0, np.float32)
    lab_pad[:N] = lab

    f_bf16 = jnp.asarray(f_pad).astype(jnp.bfloat16)     # bf16 MXU inputs, f32 accum
    lab_col = jnp.asarray(lab_pad.reshape(Np, 1))
    lab_tiles = jnp.asarray(lab_pad.reshape(Np // _TN, _TN))

    run = _build_contrastive_fn(Np, Dp, float(temperature))
    return run(f_bf16, lab_col, lab_tiles, jnp.float32(N))


# -----------------------------------------------------------------------------
# Host-side glue: _hard_anchor_sampling (data-dependent shapes, Python random)
# -----------------------------------------------------------------------------
# TODO(synk): _hard_anchor_sampling has data-dependent output shapes and uses
# Python random / randperm; kept host-side in numpy (no clean Pallas equivalent).
def _hard_anchor_sampling_np(X, y_hat, y, n_view, ignore_label=-1):
    B, _, D = X.shape
    Xs, ys = [], []
    for ii in range(B):
        this_y_hat = y_hat[ii]
        this_y = y[ii]
        this_classes = [int(c) for c in np.unique(this_y_hat) if c != ignore_label]
        for cls_id in this_classes:
            hard = np.nonzero((this_y_hat == cls_id) & (this_y != cls_id))[0]
            easy = np.nonzero((this_y_hat == cls_id) & (this_y == cls_id))[0]
            nh, ne = len(hard), len(easy)
            if nh + ne >= n_view:
                x_tmp = int(random.random() * n_view)
                if nh >= x_tmp and ne >= n_view - x_tmp:
                    nhk, nek = x_tmp, n_view - x_tmp
                elif n_view >= nh:
                    nhk, nek = nh, n_view - nh
                elif n_view >= ne:
                    nhk, nek = n_view - ne, ne
                else:
                    continue
            else:
                continue
            perm = np.random.permutation(nh)
            hard_sel = hard[perm[:nhk]]
            perm = np.random.permutation(ne)
            easy_sel = easy[perm[:nek]]
            idx = np.concatenate([hard_sel, easy_sel], axis=0)
            Xs.append(X[ii, idx, :])
            ys.append(float(cls_id))
    if not Xs:
        return np.zeros((0, n_view, D), np.float32), np.zeros((0,), np.float32)
    return np.stack(Xs, axis=0).astype(np.float32), np.asarray(ys, np.float32)


def pixel_contrast_loss(feats, labels, predict, temperature=0.07, n_view=8):
    """feats: (B, C, H, W) NCHW; labels/predict: (B, H, W) int class maps."""
    B, C = feats.shape[0], feats.shape[1]
    labels2 = np.asarray(labels).reshape(B, -1)
    predict2 = np.asarray(predict).reshape(B, -1)
    feats_np = np.asarray(jnp.transpose(feats, (0, 2, 3, 1))).reshape(B, -1, C)

    X_, y_ = _hard_anchor_sampling_np(feats_np, labels2, predict2, n_view)
    if X_.shape[0] == 0:
        return jnp.float32(np.nan), (np.zeros((0, C), np.float32),
                                     np.zeros((0,), np.float32))

    A, V, D = X_.shape
    # torch.cat(torch.unbind(feats_, dim=1), dim=0)  -> view-major stacking
    contrast_feature = np.transpose(X_, (1, 0, 2)).reshape(V * A, D)
    labels_rep = np.tile(y_, V).astype(np.float32)

    loss = contrastive_pallas(contrast_feature, labels_rep, temperature)
    return loss, (contrast_feature, labels_rep)


# -----------------------------------------------------------------------------
# Pure-numpy reference of `_contrastive` (for sanity check).
# -----------------------------------------------------------------------------
def _contrastive_ref_np(contrast_feature, labels_rep, temperature):
    cf = contrast_feature.astype(np.float64)
    lab = labels_rep
    N = cf.shape[0]
    adc = (cf @ cf.T) / temperature
    logits = adc - adc.max(axis=1, keepdims=True)
    mask = (lab[:, None] == lab[None, :]).astype(np.float64)
    neg_mask = 1.0 - mask
    mask = mask * (1.0 - np.eye(N))
    exp_l = np.exp(logits)
    neg_logits = (exp_l * neg_mask).sum(1, keepdims=True)
    log_prob = logits - np.log(exp_l + neg_logits + 1e-6)
    mlpp = (mask * log_prob).sum(1) / mask.sum(1)
    return float((-temperature * mlpp).mean())


if __name__ == "__main__":
    random.seed(0)
    np.random.seed(0)

    key = jax.random.PRNGKey(0)
    k1, k2, k3, k4 = jax.random.split(key, 4)

    B, C, H, W = 2, 4, 16, 16
    n_classes, n_view, temperature = 3, 8, 0.07

    feats = jax.random.normal(k1, (B, C, H, W), jnp.float32)
    labels = jax.random.randint(k2, (B, H, W), 0, n_classes)
    predict = jax.random.randint(k3, (B, H, W), 0, n_classes)
    # sprinkle a few ignore labels (-1)
    ignore = jax.random.uniform(k4, (B, H, W)) < 0.05
    labels = jnp.where(ignore, -1, labels)

    loss, (cf_np, lab_np) = pixel_contrast_loss(
        feats, labels, predict, temperature=temperature, n_view=n_view)
    loss = jax.block_until_ready(loss)
    loss_f = float(loss)

    # Tight check against the reference evaluated on the same bf16-quantized
    # features (isolates kernel math from the intentional bf16 matmul inputs).
    cf_q = np.asarray(jnp.asarray(cf_np, jnp.float32)
                      .astype(jnp.bfloat16).astype(jnp.float32))
    ref_q = _contrastive_ref_np(cf_q, lab_np, temperature)
    # Looser check against the full-f32-feature reference.
    ref_f = _contrastive_ref_np(cf_np, lab_np, temperature)

    assert np.isfinite(loss_f)
    assert abs(loss_f - ref_q) <= 5e-3 * (abs(ref_q) + 1e-3), (loss_f, ref_q)
    assert abs(loss_f - ref_f) <= 5e-2 * (abs(ref_f) + 1e-3), (loss_f, ref_f)

    print("KERNEL_OK")
</pallas_src>

<mosaic_0001>
module attributes {stable_mosaic.version = 11 : i64} {
  func.func @_contrastive_kernel(%arg0: i32, %arg1: memref<256x128xbf16, #tpu.memory_space<vmem>>, %arg2: memref<256x1xf32, #tpu.memory_space<vmem>>, %arg3: memref<512x128xbf16, #tpu.memory_space<vmem>>, %arg4: memref<1x512xf32, #tpu.memory_space<vmem>>, %arg5: memref<1x8x128xf32, #tpu.memory_space<vmem>>) attributes {dimension_semantics = [#tpu.dimension_semantics<parallel>], iteration_bounds = array<i64: 2>, scalar_prefetch = 0 : i64, scratch_operands = 0 : i64, tpu.core_type = #tpu.core_type<tc>, window_params = [{transform_indices = @transform_0, window_bounds = array<i64: 256, 128>}, {transform_indices = @transform_1, window_bounds = array<i64: 256, 1>}, {pipeline_mode = #tpu.pipeline_mode<synchronous>, transform_indices = @transform_2, window_bounds = array<i64: 512, 128>}, {pipeline_mode = #tpu.pipeline_mode<synchronous>, transform_indices = @transform_3, window_bounds = array<i64: 1, 512>}, {transform_indices = @transform_4, window_bounds = array<i64: 1, 8, 128>}]} {
    %c0 = arith.constant 0 : index
    %c0_0 = arith.constant 0 : index
    %0 = vector.load %arg1[%c0, %c0_0] : memref<256x128xbf16, #tpu.memory_space<vmem>>, vector<256x128xbf16>
    %c0_1 = arith.constant 0 : index
    %c0_2 = arith.constant 0 : index
    %1 = vector.load %arg2[%c0_1, %c0_2] : memref<256x1xf32, #tpu.memory_space<vmem>>, vector<256x1xf32>
    %cst = arith.constant -1.500000e+00 : f32
    %2 = vector.broadcast %cst : f32 to vector<256x1xf32>
    %3 = arith.cmpf ogt, %1, %2 : vector<256x1xf32>
    %4 = arith.extui %3 : vector<256x1xi1> to vector<256x1xi32>
    %5 = arith.sitofp %4 : vector<256x1xi32> to vector<256x1xf32>
    %c256_i32 = arith.constant 256 : i32
    %6 = arith.muli %arg0, %c256_i32 : i32
    %cst_3 = arith.constant 0.000000e+00 : f32
    %7 = vector.broadcast %cst_3 : f32 to vector<256x1xf32>
    %c0_i32 = arith.constant 0 : i32
    %c512_i32 = arith.constant 512 : i32
    %8 = arith.muli %c0_i32, %c512_i32 : i32
    %9 = tpu.assume_multiple %8, 512 : i32
    %10 = arith.index_cast %9 : i32 to index
    %c0_4 = arith.constant 0 : index
    %11 = vector.load %arg3[%10, %c0_4] : memref<512x128xbf16, #tpu.memory_space<vmem>>, vector<512x128xbf16>
    %cst_5 = arith.constant dense<0.000000e+00> : vector<256x512xf32>
    %12 = tpu.matmul %0, %11, %cst_5 {dimension_numbers = #tpu.dot_dimension_numbers<[1], [1], [0], [0], [0, 0, 1, 0], [], []>} : vector<256x128xbf16>, vector<512x128xbf16>, vector<256x512xf32> -> vector<256x512xf32>
    %cst_6 = arith.constant 14.2857141 : f32
    %13 = vector.broadcast %cst_6 : f32 to vector<256x512xf32>
    %14 = arith.mulf %12, %13 : vector<256x512xf32>
    %15 = arith.index_cast %c0_i32 : i32 to index
    %c0_7 = arith.constant 0 : index
    %16 = vector.load %arg4[%15, %c0_7] : memref<1x512xf32, #tpu.memory_space<vmem>>, vector<1x512xf32>
    %17 = vector.broadcast %1 : vector<256x1xf32> to vector<256x512xf32>
    %18 = vector.broadcast %16 : vector<1x512xf32> to vector<256x512xf32>
    %19 = arith.cmpf oeq, %17, %18 : vector<256x512xf32>
    %cst_8 = arith.constant -1.500000e+00 : f32
    %20 = vector.broadcast %cst_8 : f32 to vector<1x512xf32>
    %21 = arith.cmpf ogt, %16, %20 : vector<1x512xf32>
    %22 = tpu.iota {dimensions = array<i32: 0>} : vector<256x512xi32>
    %23 = vector.broadcast %6 : i32 to vector<256x512xi32>
    %24 = arith.addi %23, %22 : vector<256x512xi32>
    %c512_i32_9 = arith.constant 512 : i32
    %25 = arith.muli %c0_i32, %c512_i32_9 : i32
    %26 = tpu.iota {dimensions = array<i32: 1>} : vector<256x512xi32>
    %27 = vector.broadcast %25 : i32 to vector<256x512xi32>
    %28 = arith.addi %27, %26 : vector<256x512xi32>
    %29 = arith.cmpi ne, %24, %28 : vector<256x512xi32>
    %30 = vector.broadcast %21 : vector<1x512xi1> to vector<256x512xi1>
    %31 = arith.andi %19, %30 : vector<256x512xi1>
    %32 = arith.andi %31, %29 : vector<256x512xi1>
    %33 = arith.extui %32 : vector<256x512xi1> to vector<256x512xi32>
    %34 = arith.sitofp %33 : vector<256x512xi32> to vector<256x512xf32>
    %cst_10 = arith.constant dense<true> : vector<256x512xi1>
    %35 = arith.xori %19, %cst_10 : vector<256x512xi1>
    %36 = vector.broadcast %21 : vector<1x512xi1> to vector<256x512xi1>
    %37 = arith.andi %35, %36 : vector<256x512xi1>
    %38 = arith.extui %37 : vector<256x512xi1> to vector<256x512xi32>
    %39 = arith.sitofp %38 : vector<256x512xi32> to vector<256x512xf32>
    %cst_11 = arith.constant dense<0xFF800000> : vector<256xf32>
    %40 = vector.multi_reduction <maximumf>, %14, %cst_11 [1] : vector<256x512xf32> to vector<256xf32>
    %41 = vector.shape_cast %40 : vector<256xf32> to vector<256x1xf32>
    %42 = arith.maximumf %7, %41 : vector<256x1xf32>
    %43 = arith.subf %7, %42 : vector<256x1xf32>
    %44 = math.exp %43 : vector<256x1xf32>
    %45 = vector.broadcast %42 : vector<256x1xf32> to vector<256x512xf32>
    %46 = arith.subf %14, %45 : vector<256x512xf32>
    %47 = math.exp %46 : vector<256x512xf32>
    %48 = arith.mulf %7, %44 : vector<256x1xf32>
    %49 = arith.mulf %47, %39 : vector<256x512xf32>
    %cst_12 = arith.constant dense<0.000000e+00> : vector<256xf32>
    %50 = vector.multi_reduction <add>, %49, %cst_12 [1] : vector<256x512xf32> to vector<256xf32>
    %51 = vector.shape_cast %50 : vector<256xf32> to vector<256x1xf32>
    %52 = arith.addf %48, %51 : vector<256x1xf32>
    %53 = arith.mulf %34, %14 : vector<256x512xf32>
    %cst_13 = arith.constant dense<0.000000e+00> : vector<256xf32>
    %54 = vector.multi_reduction <add>, %53, %cst_13 [1] : vector<256x512xf32> to vector<256xf32>
    %55 = vector.shape_cast %54 : vector<256xf32> to vector<256x1xf32>
    %56 = arith.addf %7, %55 : vector<256x1xf32>
    %cst_14 = arith.constant dense<0.000000e+00> : vector<256xf32>
    %57 = vector.multi_reduction <add>, %34, %cst_14 [1] : vector<256x512xf32> to vector<256xf32>
    %58 = vector.shape_cast %57 : vector<256xf32> to vector<256x1xf32>
    %59 = arith.addf %7, %58 : vector<256x1xf32>
    %c1_i32 = arith.constant 1 : i32
    %c0_i32_15 = arith.constant 0 : i32
    %c512_i32_16 = arith.constant 512 : i32
    %60 = arith.muli %c0_i32_15, %c512_i32_16 : i32
    %61 = tpu.assume_multiple %60, 512 : i32
    %62 = arith.index_cast %61 : i32 to index
    %c0_17 = arith.constant 0 : index
    %63 = vector.load %arg3[%62, %c0_17] : memref<512x128xbf16, #tpu.memory_space<vmem>>, vector<512x128xbf16>
    %cst_18 = arith.constant dense<0.000000e+00> : vector<256x512xf32>
    %64 = tpu.matmul %0, %63, %cst_18 {dimension_numbers = #tpu.dot_dimension_numbers<[1], [1], [0], [0], [0, 0, 1, 0], [], []>} : vector<256x128xbf16>, vector<512x128xbf16>, vector<256x512xf32> -> vector<256x512xf32>
    %cst_19 = arith.constant 14.2857141 : f32
    %65 = vector.broadcast %cst_19 : f32 to vector<256x512xf32>
    %66 = arith.mulf %64, %65 : vector<256x512xf32>
    %67 = arith.index_cast %c0_i32_15 : i32 to index
    %c0_20 = arith.constant 0 : index
    %68 = vector.load %arg4[%67, %c0_20] : memref<1x512xf32, #tpu.memory_space<vmem>>, vector<1x512xf32>
    %69 = vector.broadcast %1 : vector<256x1xf32> to vector<256x512xf32>
    %70 = vector.broadcast %68 : vector<1x512xf32> to vector<256x512xf32>
    %71 = arith.cmpf oeq, %69, %70 : vector<256x512xf32>
    %cst_21 = arith.constant -1.500000e+00 : f32
    %72 = vector.broadcast %cst_21 : f32 to vector<1x512xf32>
    %73 = arith.cmpf ogt, %68, %72 : vector<1x512xf32>
    %74 = tpu.iota {dimensions = array<i32: 0>} : vector<256x512xi32>
    %75 = vector.broadcast %6 : i32 to vector<256x512xi32>
    %76 = arith.addi %75, %74 : vector<256x512xi32>
    %c512_i32_22 = arith.constant 512 : i32
    %77 = arith.muli %c0_i32_15, %c512_i32_22 : i32
    %78 = tpu.iota {dimensions = array<i32: 1>} : vector<256x512xi32>
    %79 = vector.broadcast %77 : i32 to vector<256x512xi32>
    %80 = arith.addi %79, %78 : vector<256x512xi32>
    %81 = arith.cmpi ne, %76, %80 : vector<256x512xi32>
    %82 = vector.broadcast %73 : vector<1x512xi1> to vector<256x512xi1>
    %83 = arith.andi %71, %82 : vector<256x512xi1>
    %84 = arith.andi %83, %81 : vector<256x512xi1>
    %85 = arith.extui %84 : vector<256x512xi1> to vector<256x512xi32>
    %86 = arith.sitofp %85 : vector<256x512xi32> to vector<256x512xf32>
    %87 = vector.broadcast %42 : vector<256x1xf32> to vector<256x512xf32>
    %88 = arith.subf %66, %87 : vector<256x512xf32>
    %89 = math.exp %88 : vector<256x512xf32>
    %90 = vector.broadcast %52 : vector<256x1xf32> to vector<256x512xf32>
    %91 = arith.addf %89, %90 : vector<256x512xf32>
    %cst_23 = arith.constant 9.99999997E-7 : f32
    %92 = vector.broadcast %cst_23 : f32 to vector<256x512xf32>
    %93 = arith.addf %91, %92 : vector<256x512xf32>
    %94 = math.log %93 : vector<256x512xf32>
    %95 = arith.mulf %86, %94 : vector<256x512xf32>
    %cst_24 = arith.constant dense<0.000000e+00> : vector<256xf32>
    %96 = vector.multi_reduction <add>, %95, %cst_24 [1] : vector<256x512xf32> to vector<256xf32>
    %97 = vector.shape_cast %96 : vector<256xf32> to vector<256x1xf32>
    %98 = arith.addf %7, %97 : vector<256x1xf32>
    %c1_i32_25 = arith.constant 1 : i32
    %cst_26 = arith.constant 0.000000e+00 : f32
    %99 = vector.broadcast %cst_26 : f32 to vector<256x1xf32>
    %100 = arith.cmpf ogt, %59, %99 : vector<256x1xf32>
    %cst_27 = arith.constant 1.000000e+00 : f32
    %101 = vector.broadcast %cst_27 : f32 to vector<256x1xf32>
    %102 = arith.select %100, %59, %101 : vector<256x1xi1>, vector<256x1xf32>
    %103 = arith.mulf %59, %42 : vector<256x1xf32>
    %104 = arith.subf %56, %103 : vector<256x1xf32>
    %105 = arith.subf %104, %98 : vector<256x1xf32>
    %106 = arith.divf %105, %102 : vector<256x1xf32>
    %cst_28 = arith.constant -7.000000e-02 : f32
    %107 = vector.broadcast %cst_28 : f32 to vector<256x1xf32>
    %108 = arith.mulf %107, %106 : vector<256x1xf32>
    %109 = arith.mulf %108, %5 : vector<256x1xf32>
    %110 = vector.shape_cast %109 : vector<256x1xf32> to vector<1x256x1xf32>
    %cst_29 = arith.constant dense<0.000000e+00> : vector<1xf32>
    %111 = vector.multi_reduction <add>, %110, %cst_29 [1, 2] : vector<1x256x1xf32> to vector<1xf32>
    %112 = vector.shape_cast %111 : vector<1xf32> to vector<1x1x1xf32>
    %113 = vector.extract %112[0, 0, 0] : f32 from vector<1x1x1xf32>
    %114 = vector.broadcast %113 : f32 to vector<1x8x128xf32>
    %c0_30 = arith.constant 0 : index
    %c0_31 = arith.constant 0 : index
    %c0_32 = arith.constant 0 : index
    %115 = vector.load %arg5[%c0_30, %c0_31, %c0_32] : memref<1x8x128xf32, #tpu.memory_space<vmem>>, vector<1x8x128xf32>
    tpu.vector_store %arg5[%c0_30, %c0_31, %c0_32], %114 {strides = array<i32>} : memref<1x8x128xf32, #tpu.memory_space<vmem>>, vector<1x8x128xf32>,
    return
  }
  func.func @transform_0(%arg0: i32) -> (i32, i32) {
    %c0_i32 = arith.constant 0 : i32
    %c0_i32_0 = arith.constant 0 : i32
    return %arg0, %c0_i32 : i32, i32
  }
  func.func @transform_1(%arg0: i32) -> (i32, i32) {
    %c0_i32 = arith.constant 0 : i32
    %c0_i32_0 = arith.constant 0 : i32
    return %arg0, %c0_i32 : i32, i32
  }
  func.func @transform_2(%arg0: i32) -> (i32, i32) {
    %c0_i32 = arith.constant 0 : i32
    %c0_i32_0 = arith.constant 0 : i32
    %c0_i32_1 = arith.constant 0 : i32
    return %c0_i32, %c0_i32_0 : i32, i32
  }
  func.func @transform_3(%arg0: i32) -> (i32, i32) {
    %c0_i32 = arith.constant 0 : i32
    %c0_i32_0 = arith.constant 0 : i32
    %c0_i32_1 = arith.constant 0 : i32
    return %c0_i32, %c0_i32_0 : i32, i32
  }
  func.func @transform_4(%arg0: i32) -> (i32, i32, i32) {
    %c0_i32 = arith.constant 0 : i32
    %c0_i32_0 = arith.constant 0 : i32
    %c0_i32_1 = arith.constant 0 : i32
    return %arg0, %c0_i32, %c0_i32_0 : i32, i32, i32
  }
}

</mosaic_0001>

<bundles_post_ra>
// kernel: run.1
= control target key start
LH: loop header
LB: loop body
LE: loop exit
PB: predicated region body
PF: predicated region fallthrough
CT: control target
= control target key end

     0   :  { %s6808_s15 = smov 0   ;;  %s15046_s0 = inlined_call_operand.vmem [shape: bf16[512,128], index: 0, kind: input, shape index: {}, may-alias: {0,2}]   ;;  %s15047_s1 = inlined_call_operand.vmem [shape: f32[512,1], index: 1, kind: input, shape index: {}]   ;;  %s15048_s2 = inlined_call_operand.vmem [shape: bf16[512,128], index: 2, kind: input, shape index: {}, may-alias: {0,2}]   ;;  %s15049_s3 = inlined_call_operand.vmem [shape: f32[1,512], index: 3, kind: input, shape index: {}]   ;;  %s15050_s4 = inlined_call_operand.vmem [shape: f32[2,8,128], index: 4, kind: output, shape index: {}]  }
   0x1 LB: > { %s6814_s16 = sadd.s32 4294967295, %s6778_s15   ;;  %p5603_p0 = scmp.ge.s32.totalorder %s6778_s15, 1  ;;  %s6778_s15 = sphi %s6808_s15, %s14_s15  }
   0x2   : > { %p174_p1 = scmp.lt.s32.totalorder %s6778_s15, 3 }
   0x4   : > { %p175_p2 = pnand %p5603_p0, %p174_p1 }
   0x6   : > { %178 = sbr.rel (%p175_p2) target bundleno = 1650 (0x672), region = 36 }
   0xd   : > { %v6059_v0 = vld [vmem:[%s15048_s2 + $0x40] sm:$0xff]   ;;  %v6063_v4 = vld [vmem:[%s15048_s2 + $0x48] sm:$0xff]   ;;  %v6067_v8 = vld [vmem:[%s15048_s2 + $0x50] sm:$0xff]   ;;  %s5604_s13 = sshll.u32 %s6814_s16, 5  ;;  %v6780_v14 = vmov 0   ;;  %v1410_v52 = vlaneseq  ;;  %p216_p4 = scmp.lt.s32.totalorder %s6814_s16, 1 }
   0xe   : > { %v6060_v1 = vld [vmem:[%s15048_s2 + $0xc0] sm:$0xff]   ;;  %5948 = vmatprep.subr.bf16.mxu0 %v6059_v0  ;;  %v6064_v5 = vld [vmem:[%s15048_s2 + $0xc8] sm:$0xff]   ;;  %v6068_v9 = vld [vmem:[%s15048_s2 + $0xd0] sm:$0xff]   ;;  %p205_p3 = scmp.lt.s32.totalorder %s5604_s13, 63  ;;  %6057 = vset.pattern.permute.xlu0 %v6780_v14 }
   0xf   : > { %v6061_v2 = vld [vmem:[%s15048_s2] sm:$0xff]   ;;  %5996 = vmatprep.subr.bf16.mxu1 %v6060_v1  ;;  %v6065_v6 = vld [vmem:[%s15048_s2 + $0x8] sm:$0xff]   ;;  %v6069_v10 = vld [vmem:[%s15048_s2 + $0x10] sm:$0xff]   ;;  %6058 = vset.pattern.permute.xlu1 %v6780_v14  ;;  %v6953_v54 = vshrl.u32 %v1410_v52, 7  ;;  %v6971_v63 = vand.u32 127, %v1410_v52 }
  0x10   : > { %v6062_v3 = vld [vmem:[%s15048_s2 + $0x80] sm:$0xff]   ;;  %5949 = vmatpush3.bf16.xpose.msra.mxu0 %v6061_v2  ;;  %v6066_v7 = vld [vmem:[%s15048_s2 + $0x88] sm:$0xff]   ;;  %v6070_v11 = vld [vmem:[%s15048_s2 + $0x90] sm:$0xff]   ;;  %s18288_s13 = smov (!%p205_p3, %s5604_s13), 63 }
  0x11   : > { %5997 = vmatpush3.bf16.xpose.msra.mxu1 %v6062_v3  ;;  %5950 = vmatprep.subr.bf16.mxu0 %v6063_v4  ;;  %v6071_v12 = vld [vmem:[%s15048_s2 + $0x58] sm:$0xff]   ;;  %v6075_v17 = vld [vmem:[%s15048_s2 + $0x60] sm:$0xff]   ;;  %s5605_s30 = sshll.u32 %s18288_s13, 2  ;;  %v6079_v22 = vld [vmem:[%s15048_s2 + $0x68] sm:$0xff]   ;;  %s5607_s19 = sshll.u32 %s18288_s13, 3  ;;  %15803 = vst [vmem:[#allocation2_spill] sm:$0xff] %v6953_v54 }
  0x12   : > { %5998 = vmatprep.subr.bf16.mxu1 %v6064_v5  ;;  %v6072_v13 = vld [vmem:[%s15048_s2 + $0xd8] sm:$0xff]   ;;  %v6076_v18 = vld [vmem:[%s15048_s2 + $0xe0] sm:$0xff]   ;;  %s6881_s7 = scalar_lea.vmem %s15046_s0, %s5605_s30  ;;  %v6080_v23 = vld [vmem:[%s15048_s2 + $0xe8] sm:$0xff]   ;;  %s6906_s26 = scalar_lea.vmem %s15047_s1, %s5607_s19  ;;  %v1412_v55 = vsub.s32 0, %v6953_v54  ;;  %v1416_v57 = vsub.s32 1, %v6953_v54  ;;  %v1561_v58 = vadd.s32 8, %v6953_v54 }
  0x13   : > { %v6073_v15 = vld [vmem:[%s15048_s2 + $0x18] sm:$0xff]   ;;  %v6077_v19 = vld [vmem:[%s15048_s2 + $0x20] sm:$0xff]   ;;  %v6081_v24 = vld [vmem:[%s15048_s2 + $0x28] sm:$0xff]   ;;  %15805 = vst [vmem:[#allocation4_spill] sm:$0xff] %v6971_v63  ;;  %v6985_v3 = vadd.s32 128, %v6971_v63  ;;  %v1562_v4 = vadd.s32 16, %v6953_v54 }
  0x14   : > { %v6074_v16 = vld [vmem:[%s15048_s2 + $0x98] sm:$0xff]   ;;  %v6078_v20 = vld [vmem:[%s15048_s2 + $0xa0] sm:$0xff]   ;;  %v6082_v25 = vld [vmem:[%s15048_s2 + $0xa8] sm:$0xff]  }
  0x15   : > { %v6091_v21 = vld [vmem:[%s6881_s7] sm:$0xff]   ;;  %v6083_v26 = vld [vmem:[%s15048_s2 + $0x70] sm:$0xff]   ;;  %v254_v28 = vld [vmem:[%s6906_s26 + $0x8] sm:$0xff]  ;;  %15806 = vst [vmem:[#allocation5_spill] sm:$0xff] %v6985_v3 }
  0x16   : > { %5964 = vmatprep.mubr.bf16.mxu0 %v6091_v21  ;;  %6012 = vmatprep.mubr.bf16.mxu1 %v6091_v21  ;;  %v6084_v27 = vld [vmem:[%s15048_s2 + $0xf0] sm:$0xff]   ;;  %v6087_v32 = vld [vmem:[%s15048_s2 + $0x78] sm:$0xff]   ;;  %v257_v34 = vld [vmem:[%s6906_s26 + $0x20] sm:$0xff] }
  0x17   : > { %1256 = vperm.xlu0 %6057, %v254_v28   ;;  %v255_v29 = vld [vmem:[%s6906_s26 + $0x10] sm:$0xff]  ;;  %v6088_v33 = vld [vmem:[%s15048_s2 + $0xf8] sm:$0xff]   ;;  %v6092_v37 = vld [vmem:[%s6881_s7 + $0x8] sm:$0xff]  }
  0x18   : > { %5951 = vmatpush3.bf16.xpose.msra.mxu0 %v6065_v6  ;;  %v6085_v30 = vld [vmem:[%s15048_s2 + $0x30] sm:$0xff]   ;;  %v6089_v35 = vld [vmem:[%s15048_s2 + $0x38] sm:$0xff]   ;;  %v6095_v40 = vld [vmem:[%s6881_s7 + $0x20] sm:$0xff]  }
  0x19   : > { %5999 = vmatpush3.bf16.xpose.msra.mxu1 %v6066_v7  ;;  %5952 = vmatprep.subr.bf16.mxu0 %v6067_v8  ;;  %v6086_v31 = vld [vmem:[%s15048_s2 + $0xb0] sm:$0xff]   ;;  %v6090_v36 = vld [vmem:[%s15048_s2 + $0xb8] sm:$0xff]   ;;  %v6096_v41 = vld [vmem:[%s6881_s7 + $0x28] sm:$0xff]  }
  0x1a   : > { %6000 = vmatprep.subr.bf16.mxu1 %v6068_v9  ;;  %v6093_v38 = vld [vmem:[%s6881_s7 + $0x10] sm:$0xff]   ;;  %v6094_v39 = vld [vmem:[%s6881_s7 + $0x18] sm:$0xff]   ;;  %v6099_v44 = vld [vmem:[%s6881_s7 + $0x40] sm:$0xff]  }
  0x1b   : > { %1261 = vperm.xlu0 %6057, %v255_v29   ;;  %v6097_v42 = vld [vmem:[%s6881_s7 + $0x30] sm:$0xff]   ;;  %v6098_v43 = vld [vmem:[%s6881_s7 + $0x38] sm:$0xff]   ;;  %v6100_v45 = vld [vmem:[%s6881_s7 + $0x48] sm:$0xff]  }
  0x1c   : > { %v6101_v46 = vld [vmem:[%s6881_s7 + $0x50] sm:$0xff]   ;;  %v6102_v47 = vld [vmem:[%s6881_s7 + $0x58] sm:$0xff]   ;;  %v6103_v48 = vld [vmem:[%s6881_s7 + $0x60] sm:$0xff]  }
  0x1d   : > { %v6104_v49 = vld [vmem:[%s6881_s7 + $0x68] sm:$0xff]   ;;  %v6105_v50 = vld [vmem:[%s6881_s7 + $0x70] sm:$0xff]   ;;  %v6106_v51 = vld [vmem:[%s6881_s7 + $0x78] sm:$0xff]   ;;  %s5641_s7 = sshll.u32 %s6814_s16, 8  ;;  %s18290_s16 = smov (!%p216_p4, %s6814_s16), 1 }
  0x1e   : > { %v1248_v53 = vld [vmem:[%s15049_s3] sm:$0xf]  ;;  %v6967_v61 = vstv %s5641_s7  ;;  %s5608_s24 = sshll.u32 %s18290_s16, 3 }
  0x1f   : > { %1271 = vperm.xlu0 %6057, %v257_v34   ;;  %vm1558_vm0 = vcmp.gt.f32.partialorder %v1248_v53, -1.5  ;;  %v6962_v59 = vrot.slane %v1248_v53, %v1412_v55  ;;  %15804 = vst [vmem:[#allocation3_spill] sm:$0xff] %v6967_v61  ;;  %v6973_v0 = vrot.slane %v1248_v53, %v1416_v57  ;;  %v6979_v2 = vadd.s32 %v6967_v61, %v1561_v58  ;;  %s219_s27 = scalar_lea.vmem %s15050_s4, %s5608_s24 }
  0x20   : > { %5953 = vmatpush3.bf16.xpose.msra.mxu0 %v6069_v10  ;;  %v6957_v56 = vsel %vm1558_vm0, 1, %v6780_v14  ;;  %v7008_v6 = vadd.s32 %v6967_v61, %v1562_v4  ;;  %v1564_v14 = vadd.s32 32, %v6953_v54 }
  0x21   : > { %6001 = vmatpush3.bf16.xpose.msra.mxu1 %v6070_v11  ;;  %5954 = vmatprep.subr.bf16.mxu0 %v6071_v12  ;;  %v6965_v60 = vrot.slane %v6957_v56, %v1412_v55  ;;  %v6976_v1 = vrot.slane %v6957_v56, %v1416_v57  ;;  %vm1634_vm5 = vcmp.ne.s32.totalorder %v6979_v2, %v6971_v63  ;;  %v15051_v12 = vmov 0.0  }
  0x22   : > { %6002 = vmatprep.subr.bf16.mxu1 %v6072_v13  ;;  %vm1635_vm7 = vcmp.ne.s32.totalorder %v6979_v2, %v6985_v3  ;;  %vm1638_vm13 = vcmp.ne.s32.totalorder %v7008_v6, %v6971_v63  ;;  %vm1639_vm15 = vcmp.ne.s32.totalorder %v7008_v6, %v6985_v3  ;;  %v7060_v29 = vadd.s32 %v6967_v61, %v1564_v14 }
  0x23   : > { %vm15332_vm1 = vcmp.eq.s32.totalorder %v6965_v60, 1  ;;  %vm15612_vm3 = vcmp.eq.s32.totalorder %v6976_v1, 1 }
  0x28   : > { %5955 = vmatpush3.bf16.xpose.msra.mxu0 %v6073_v15 }
  0x29   : > { %6003 = vmatpush3.bf16.xpose.msra.mxu1 %v6074_v16  ;;  %5956 = vmatprep.subr.bf16.mxu0 %v6075_v17 }
  0x2a   : > { %6004 = vmatprep.subr.bf16.mxu1 %v6076_v18 }
  0x30   : > { %5957 = vmatpush3.bf16.xpose.msra.mxu0 %v6077_v19 }
  0x31   : > { %6005 = vmatpush3.bf16.xpose.msra.mxu1 %v6078_v20  ;;  %5958 = vmatprep.subr.bf16.mxu0 %v6079_v22 }
  0x32   : > { %6006 = vmatprep.subr.bf16.mxu1 %v6080_v23 }
  0x38   : > { %5959 = vmatpush3.bf16.xpose.msra.mxu0 %v6081_v24 }
  0x39   : > { %6007 = vmatpush3.bf16.xpose.msra.mxu1 %v6082_v25  ;;  %5960 = vmatprep.subr.bf16.mxu0 %v6083_v26 }
  0x3a   : > { %6008 = vmatprep.subr.bf16.mxu1 %v6084_v27 }
  0x40   : > { %5961 = vmatpush3.bf16.xpose.msra.mxu0 %v6085_v30 }
  0x41   : > { %6009 = vmatpush3.bf16.xpose.msra.mxu1 %v6086_v31  ;;  %5962 = vmatprep.subr.bf16.mxu0 %v6087_v32 }
  0x42   : > { %6010 = vmatprep.subr.bf16.mxu1 %v6088_v33 }
  0x48   : > { %5963 = vmatpush3.bf16.xpose.msra.mxu0 %v6089_v35 }
  0x49   : > { %6011 = vmatpush3.bf16.xpose.msra.mxu1 %v6090_v36 }
  0x4f   : > { %5965 = vmatmul.mubr.bf16.vlgmr.msra.gmra.mrb[0].mxu0 %v6091_v21 }
  0x50   : > { %6013 = vmatmul.mubr.bf16.vlgmr.msra.gmra.mrb[0].mxu1 %v6091_v21  ;;  %5966 = vmatprep.mubr.bf16.mxu0 %v6092_v37 }
  0x51   : > { %6014 = vmatprep.mubr.bf16.mxu1 %v6092_v37 }
  0x57   : > { %5967 = vmatmul.mubr.bf16.gmra.mrb[4].mxu0 %v6092_v37 }
  0x58   : > { %6015 = vmatmul.mubr.bf16.gmra.mrb[4].mxu1 %v6092_v37  ;;  %5968 = vmatprep.mubr.bf16.mxu0 %v6093_v38 }
  0x59   : > { %6016 = vmatprep.mubr.bf16.mxu1 %v6093_v38 }
  0x5f   : > { %5969 = vmatmul.mubr.bf16.gmra.mrb[8].mxu0 %v6093_v38 }
  0x60   : > { %6017 = vmatmul.mubr.bf16.gmra.mrb[8].mxu1 %v6093_v38  ;;  %5970 = vmatprep.mubr.bf16.mxu0 %v6094_v39 }
  0x61   : > { %6018 = vmatprep.mubr.bf16.mxu1 %v6094_v39 }
  0x67   : > { %5971 = vmatmul.mubr.bf16.gmra.mrb[12].mxu0 %v6094_v39 }
  0x68   : > { %6019 = vmatmul.mubr.bf16.gmra.mrb[12].mxu1 %v6094_v39  ;;  %5972 = vmatprep.mubr.bf16.mxu0 %v6095_v40 }
  0x69   : > { %6020 = vmatprep.mubr.bf16.mxu1 %v6095_v40 }
  0x6f   : > { %5973 = vmatmul.mubr.bf16.gmra.mrb[16].mxu0 %v6095_v40 }
  0x70   : > { %6021 = vmatmul.mubr.bf16.gmra.mrb[16].mxu1 %v6095_v40  ;;  %5974 = vmatprep.mubr.bf16.mxu0 %v6096_v41 }
  0x71   : > { %6022 = vmatprep.mubr.bf16.mxu1 %v6096_v41 }
  0x77   : > { %5975 = vmatmul.mubr.bf16.gmra.mrb[20].mxu0 %v6096_v41 }
  0x78   : > { %6023 = vmatmul.mubr.bf16.gmra.mrb[20].mxu1 %v6096_v41  ;;  %5976 = vmatprep.mubr.bf16.mxu0 %v6097_v42 }
  0x79   : > { %6024 = vmatprep.mubr.bf16.mxu1 %v6097_v42 }
  0x7f   : > { %5977 = vmatmul.mubr.bf16.gmra.mrb[24].mxu0 %v6097_v42 }
  0x80   : > { %6025 = vmatmul.mubr.bf16.gmra.mrb[24].mxu1 %v6097_v42  ;;  %5978 = vmatprep.mubr.bf16.mxu0 %v6098_v43 }
  0x81   : > { %6026 = vmatprep.mubr.bf16.mxu1 %v6098_v43 }
  0x87   : > { %5979 = vmatmul.mubr.bf16.gmra.mrb[28].mxu0 %v6098_v43 }
  0x88   : > { %6027 = vmatmul.mubr.bf16.gmra.mrb[28].mxu1 %v6098_v43  ;;  %5980 = vmatprep.mubr.bf16.mxu0 %v6099_v44 }
  0x89   : > { %6028 = vmatprep.mubr.bf16.mxu1 %v6099_v44 }
  0x8f   : > { %5981 = vmatmul.mubr.bf16.gmra.mrb[32].mxu0 %v6099_v44 }
  0x90   : > { %6029 = vmatmul.mubr.bf16.gmra.mrb[32].mxu1 %v6099_v44  ;;  %5982 = vmatprep.mubr.bf16.mxu0 %v6100_v45 }
  0x91   : > { %6030 = vmatprep.mubr.bf16.mxu1 %v6100_v45 }
  0x96   : > { %v6969_v62 = vpop.permute.xlu0 %1256 }
  0x97   : > { %5983 = vmatmul.mubr.bf16.gmra.mrb[36].mxu0 %v6100_v45  ;;  %vm1434_vm2 = vcmp.eq.f32.partialorder %v6969_v62, %v6962_v59  ;;  %vm1435_vm4 = vcmp.eq.f32.partialorder %v6969_v62, %v6973_v0 }
  0x98   : > { %6031 = vmatmul.mubr.bf16.gmra.mrb[36].mxu1 %v6100_v45  ;;  %5984 = vmatprep.mubr.bf16.mxu0 %v6101_v46  ;;  %vm1783_vm6 = vmand %vm1434_vm2, %vm15332_vm1 }
  0x99   : > { %6032 = vmatprep.mubr.bf16.mxu1 %v6101_v46  ;;  %vm1784_vm8 = vmand %vm1435_vm4, %vm15612_vm3 }
  0x9a   : > { %v6998_v5 = vpop.permute.xlu0 %1261  ;;  %vm1911_vm9 = vmand %vm1783_vm6, %vm1634_vm5 }
  0x9b   : > { %vm1438_vm10 = vcmp.eq.f32.partialorder %v6998_v5, %v6962_v59  ;;  %vm7012_vm11 = vmand %vm1784_vm8, %vm1635_vm7  ;;  %vm1439_vm12 = vcmp.eq.f32.partialorder %v6998_v5, %v6973_v0  ;;  %v7021_v13 = vsel %vm1911_vm9, 1.0, %v15051_v12  ;;  %vm1646_vm9 = vcmp.ne.s32.totalorder %v7060_v29, %v6971_v63 }
  0x9c   : > { %15810 = vst [vmem:[#allocation7_spill] sm:$0xff] %v7021_v13  ;;  %vm1787_vm14 = vmand %vm1438_vm10, %vm15332_vm1  ;;  %v7040_v22 = vsel %vm7012_vm11, 1.0, %v15051_v12 }
  0x9d   : > { %15813 = vst [vmem:[#allocation10_spill] sm:$0xff] %v7040_v22  ;;  %vm1788_vm0 = vmand %vm1439_vm12, %vm15612_vm3 }
  0x9e   : > { %v7053_v26 = vpop.permute.xlu0 %1271  ;;  %vm1915_vm5 = vmand %vm1787_vm14, %vm1638_vm13  ;;  %vm1647_vm13 = vcmp.ne.s32.totalorder %v7060_v29, %v6985_v3 }
  0x9f   : > { %5985 = vmatmul.mubr.bf16.gmra.mrb[40].mxu0 %v6101_v46  ;;  %vm1916_vm6 = vmand %vm1788_vm0, %vm1639_vm15  ;;  %vm1446_vm7 = vcmp.eq.f32.partialorder %v7053_v26, %v6962_v59  ;;  %vm1447_vm8 = vcmp.eq.f32.partialorder %v7053_v26, %v6973_v0  ;;  %v7076_v36 = vsel %vm1915_vm5, 1.0, %v15051_v12  ;;  %vm15328_vm5 = vmmov 1  }
  0xa0   : > { %6033 = vmatmul.mubr.bf16.gmra.mrb[40].mxu1 %v6101_v46  ;;  %5986 = vmatprep.mubr.bf16.mxu0 %v6102_v47  ;;  %15816 = vst [vmem:[#allocation13_spill] sm:$0xff] %v7076_v36  ;;  %v7083_v42 = vsel %vm1916_vm6, 1.0, %v15051_v12  ;;  %vm1795_vm11 = vmand %vm1446_vm7, %vm15332_vm1 }
  0xa1   : > { %6034 = vmatprep.mubr.bf16.mxu1 %v6102_v47  ;;  %15817 = vst [vmem:[#allocation14_spill] sm:$0xff] %v7083_v42  ;;  %vm1796_vm14 = vmand %vm1447_vm8, %vm15612_vm3 }
  0xa2   : > { %vm1923_vm15 = vmand %vm1795_vm11, %vm1646_vm9 }
  0xa3   : > { %vm1924_vm0 = vmand %vm1796_vm14, %vm1647_vm13 }
  0xa4   : > { %vm2295_vm6 = vmxor %vm1434_vm2, %vm15328_vm5 }
  0xa5   : > { %vm2296_vm9 = vmxor %vm1435_vm4, %vm15328_vm5 }
  0xa6   : > { %vm7570_vm11 = vmxor %vm1446_vm7, %vm15328_vm5 }
  0xa7   : > { %5987 = vmatmul.mubr.bf16.gmra.mrb[44].mxu0 %v6102_v47  ;;  %vm2423_vm2 = vmand %vm2295_vm6, %vm15332_vm1 }
  0xa8   : > { %6035 = vmatmul.mubr.bf16.gmra.mrb[44].mxu1 %v6102_v47  ;;  %5988 = vmatprep.mubr.bf16.mxu0 %v6103_v48  ;;  %vm2424_vm4 = vmand %vm2296_vm9, %vm15612_vm3 }
  0xa9   : > { %6036 = vmatprep.mubr.bf16.mxu1 %v6103_v48  ;;  %vm2308_vm13 = vmxor %vm1447_vm8, %vm15328_vm5 }
  0xaa   : > { %vm7609_vm8 = vmand %vm7570_vm11, %vm15332_vm1 }
  0xaf   : > { %5989 = vmatmul.mubr.bf16.gmra.mrb[48].mxu0 %v6103_v48 }
  0xb0   : > { %6037 = vmatmul.mubr.bf16.gmra.mrb[48].mxu1 %v6103_v48  ;;  %5990 = vmatprep.mubr.bf16.mxu0 %v6104_v49 }
  0xb1   : > { %6038 = vmatprep.mubr.bf16.mxu1 %v6104_v49 }
  0xb7   : > { %5991 = vmatmul.mubr.bf16.gmra.mrb[52].mxu0 %v6104_v49 }
  0xb8   : > { %6039 = vmatmul.mubr.bf16.gmra.mrb[52].mxu1 %v6104_v49  ;;  %5992 = vmatprep.mubr.bf16.mxu0 %v6105_v50 }
  0xb9   : > { %6040 = vmatprep.mubr.bf16.mxu1 %v6105_v50 }
  0xbf   : > { %5993 = vmatmul.mubr.bf16.gmra.mrb[56].mxu0 %v6105_v50 }
  0xc0   : > { %6041 = vmatmul.mubr.bf16.gmra.mrb[56].mxu1 %v6105_v50  ;;  %5994 = vmatprep.mubr.bf16.mxu0 %v6106_v51 }
  0xc1   : > { %6042 = vmatprep.mubr.bf16.mxu1 %v6106_v51 }
  0xc7   : > { %5995 = vmatmul.mubr.bf16.gmra.mrb[60].mxu0 %v6106_v51 }
  0xc8   : > { %6043 = vmatmul.mubr.bf16.gmra.mrb[60].mxu1 %v6106_v51 }
 0x122   : > { %v768_v7 = vpop.f32.mrb[0].mxu0 }
 0x123   : > { %v7018_v9 = vmul.f32 14.285714, %v768_v7  ;;  %v961_v10 = vpop.f32.mrb[0].mxu1  ;;  %v770_v11 = vpop.f32.mrb[1].mxu0 }
 0x124   : > { %v7024_v15 = vmul.f32 14.285714, %v961_v10  ;;  %v7026_v16 = vmul.f32 14.285714, %v770_v11  ;;  %v963_v17 = vpop.f32.mrb[1].mxu1  ;;  %v772_v18 = vpop.f32.mrb[2].mxu0 }
 0x125   : > { %15809 = vst [vmem:[#allocation6_spill] sm:$0xff] %v7018_v9  ;;  %v7035_v19 = vmul.f32 14.285714, %v772_v18  ;;  %v965_v20 = vpop.f32.mrb[2].mxu1  ;;  %v774_v21 = vpop.f32.mrb[3].mxu0 }
 0x126   : > { %15811 = vst [vmem:[#allocation8_spill] sm:$0xff] %v7024_v15  ;;  %15812 = vst [vmem:[#allocation9_spill] sm:$0xff] %v7026_v16  ;;  %v2803_v23 = vmax.f32 %v7018_v9, %v7026_v16  ;;  %v7051_v24 = vmul.f32 14.285714, %v774_v21  ;;  %v967_v25 = vpop.f32.mrb[3].mxu1 }
 0x127   : > { %v7055_v27 = vmul.f32 14.285714, %v963_v17  ;;  %v3831_v28 = vmul.f32 %v7021_v13, %v7035_v19  ;;  %v7062_v30 = vmul.f32 14.285714, %v965_v20  ;;  %v7085_v43 = vmul.f32 14.285714, %v967_v25 }
 0x128   : > { %v2808_v31 = vmax.f32 %v7035_v19, %v7051_v24  ;;  %v3832_v32 = vmul.f32 %v7040_v22, %v7051_v24  ;;  %v2804_v33 = vmax.f32 %v2803_v23, %v7024_v15  ;;  %v7126_v17 = vsel %vm1923_vm15, 1.0, %v15051_v12 }
 0x129   : > { %15814 = vst [vmem:[#allocation11_spill] sm:$0xff] %v7055_v27  ;;  %15823 = vst [vmem:[#allocation20_spill] sm:$0xff] %v7126_v17  ;;  %v7131_v23 = vsel %vm1924_vm0, 1.0, %v15051_v12 }
 0x12a   : > { %v7073_v34 = vadd.f32 %v3832_v32, %v3831_v28  ;;  %v778_v35 = vpop.f32.mrb[4].mxu0  ;;  %v2805_v37 = vmax.f32 %v2804_v33, %v7055_v27  ;;  %v2809_v38 = vmax.f32 %v2808_v31, %v7062_v30  ;;  %15824 = vst [vmem:[#allocation21_spill] sm:$0xff] %v7131_v23  ;;  %vm2436_vm0 = vmand %vm2308_vm13, %vm15612_vm3 }
 0x12b   : > { %v7080_v39 = vmul.f32 14.285714, %v778_v35  ;;  %v971_v40 = vpop.f32.mrb[4].mxu1  ;;  %v780_v41 = vpop.f32.mrb[5].mxu0 }
 0x12c   : > { %15815 = vst [vmem:[#allocation12_spill] sm:$0xff] %v7073_v34  ;;  %v7087_v44 = vmul.f32 14.285714, %v780_v41  ;;  %v973_v45 = vpop.f32.mrb[5].mxu1  ;;  %2806 = vmax.xlane.f32.xlu0 %v2805_v37  ;;  %v782_v46 = vpop.f32.mrb[6].mxu0  ;;  %v2810_v57 = vmax.f32 %v2809_v38, %v7085_v43 }
 0x12d   : > { %v3835_v47 = vmul.f32 %v7076_v36, %v7080_v39  ;;  %v7098_v48 = vmul.f32 14.285714, %v971_v40  ;;  %v975_v49 = vpop.f32.mrb[6].mxu1  ;;  %v7100_v50 = vmul.f32 14.285714, %v782_v46  ;;  %v784_v51 = vpop.f32.mrb[7].mxu0 }
 0x12e   : > { %v3836_v52 = vmul.f32 %v7083_v42, %v7087_v44  ;;  %v7111_v53 = vmul.f32 14.285714, %v784_v51  ;;  %v977_v55 = vpop.f32.mrb[7].mxu1  ;;  %v2813_v58 = vmax.f32 %v7080_v39, %v7087_v44  ;;  %v7120_v8 = vmul.f32 14.285714, %v973_v45 }
 0x12f   : > { %15818 = vst [vmem:[#allocation15_spill] sm:$0xff] %v7100_v50  ;;  %v7122_v10 = vmul.f32 14.285714, %v975_v49  ;;  %v7139_v37 = vmul.f32 14.285714, %v977_v55 }
 0x130   : > { %15819 = vst [vmem:[#allocation16_spill] sm:$0xff] %v7111_v53  ;;  %v7116_v4 = vadd.f32 %v3836_v52, %v3835_v47  ;;  %v2818_v7 = vmax.f32 %v7100_v50, %v7111_v53  ;;  %2811 = vmax.xlane.f32.xlu0 %v2810_v57  ;;  %15821 = vst [vmem:[#allocation18_spill] sm:$0xff] %v7120_v8  ;;  %v2814_v11 = vmax.f32 %v2813_v58, %v7098_v48 }
 0x131   : > { %15822 = vst [vmem:[#allocation19_spill] sm:$0xff] %v7122_v10  ;;  %15826 = vst [vmem:[#allocation23_spill] sm:$0xff] %v7139_v37 }
 0x132   : > { %15820 = vst [vmem:[#allocation17_spill] sm:$0xff] %v7116_v4  ;;  %v788_v14 = vpop.f32.mrb[8].mxu0  ;;  %v2815_v25 = vmax.f32 %v2814_v11, %v7120_v8  ;;  %v2819_v28 = vmax.f32 %v2818_v7, %v7122_v10 }
 0x133   : > { %v7128_v18 = vmul.f32 14.285714, %v788_v14  ;;  %v981_v20 = vpop.f32.mrb[8].mxu1  ;;  %v790_v21 = vpop.f32.mrb[9].mxu0 }
 0x134   : > { %v7135_v31 = vmul.f32 14.285714, %v981_v20  ;;  %v7137_v32 = vmul.f32 14.285714, %v790_v21  ;;  %v983_v33 = vpop.f32.mrb[9].mxu1  ;;  %v792_v35 = vpop.f32.mrb[10].mxu0  ;;  %2816 = vmax.xlane.f32.xlu1 %v2815_v25  ;;  %v2820_v52 = vmax.f32 %v2819_v28, %v7139_v37 }
 0x135   : > { %v3843_v38 = vmul.f32 %v7126_v17, %v7128_v18  ;;  %v985_v40 = vpop.f32.mrb[10].mxu1  ;;  %v7143_v41 = vmul.f32 14.285714, %v792_v35  ;;  %v794_v45 = vpop.f32.mrb[11].mxu0  ;;  %v7154_v57 = vmul.f32 14.285714, %v983_v33 }
 0x136   : > { %15825 = vst [vmem:[#allocation22_spill] sm:$0xff] %v7135_v31  ;;  %v2823_v46 = vmax.f32 %v7128_v18, %v7137_v32  ;;  %v3844_v47 = vmul.f32 %v7131_v23, %v7137_v32  ;;  %v987_v49 = vpop.f32.mrb[11].mxu1  ;;  %v7149_v51 = vmul.f32 14.285714, %v794_v45  ;;  %v7157_v7 = vmul.f32 14.285714, %v985_v40 }
 0x137   : > { %15827 = vst [vmem:[#allocation24_spill] sm:$0xff] %v7143_v41  ;;  %15830 = vst [vmem:[#allocation27_spill] sm:$0xff] %v7154_v57  ;;  %v7162_v21 = vmul.f32 14.285714, %v987_v49 }
 0x138   : > { %15828 = vst [vmem:[#allocation25_spill] sm:$0xff] %v7149_v51  ;;  %v7152_v55 = vadd.f32 %v3844_v47, %v3843_v38  ;;  %v2824_v58 = vmax.f32 %v2823_v46, %v7135_v31  ;;  %15831 = vst [vmem:[#allocation28_spill] sm:$0xff] %v7157_v7  ;;  %v2828_v11 = vmax.f32 %v7143_v41, %v7149_v51  ;;  %2821 = vmax.xlane.f32.xlu1 %v2820_v52 }
 0x139   : > { %15832 = vst [vmem:[#allocation29_spill] sm:$0xff] %v7162_v21 }
 0x13a   : > { %15829 = vst [vmem:[#allocation26_spill] sm:$0xff] %v7152_v55  ;;  %v798_v14 = vpop.f32.mrb[12].mxu0  ;;  %v2825_v20 = vmax.f32 %v2824_v58, %v7154_v57  ;;  %v2829_v33 = vmax.f32 %v2828_v11, %v7157_v7 }
 0x13b   : > { %v7164_v25 = vmul.f32 14.285714, %v798_v14  ;;  %v991_v28 = vpop.f32.mrb[12].mxu1  ;;  %v800_v35 = vpop.f32.mrb[13].mxu0 }
 0x13c   : > { %v7167_v38 = vmul.f32 14.285714, %v991_v28  ;;  %v7169_v45 = vmul.f32 14.285714, %v800_v35  ;;  %v993_v40 = vpop.f32.mrb[13].mxu1  ;;  %2826 = vmax.xlane.f32.xlu0 %v2825_v20  ;;  %v802_v46 = vpop.f32.mrb[14].mxu0  ;;  %v2830_v49 = vmax.f32 %v2829_v33, %v7162_v21 }
 0x13d   : > { %15833 = vst [vmem:[#allocation30_spill] sm:$0xff] %v7164_v25  ;;  %v995_v47 = vpop.f32.mrb[14].mxu1  ;;  %v7171_v52 = vmul.f32 14.285714, %v802_v46  ;;  %v804_v12 = vpop.f32.mrb[15].mxu0 }
 0x13e   : > { %15834 = vst [vmem:[#allocation31_spill] sm:$0xff] %v7167_v38  ;;  %15835 = vst [vmem:[#allocation32_spill] sm:$0xff] %v7169_v45  ;;  %v2833_v58 = vmax.f32 %v7164_v25, %v7169_v45  ;;  %v7176_v14 = vmul.f32 14.285714, %v804_v12  ;;  %v997_v3 = vpop.f32.mrb[15].mxu1  ;;  %2831 = vmax.xlane.f32.xlu1 %v2830_v49 }
 0x13f   : > { %15836 = vst [vmem:[#allocation33_spill] sm:$0xff] %v7171_v52  ;;  %v7178_v11 = vmul.f32 14.285714, %v993_v40  ;;  %v7180_v28 = vmul.f32 14.285714, %v995_v47 }
 0x140   : > { %15837 = vst [vmem:[#allocation34_spill] sm:$0xff] %v7176_v14  ;;  %v2838_v20 = vmax.f32 %v7171_v52, %v7176_v14  ;;  %v2834_v35 = vmax.f32 %v2833_v58, %v7167_v38  ;;  %v7185_v46 = vmul.f32 14.285714, %v997_v3 }
 0x141   : > { %15838 = vst [vmem:[#allocation35_spill] sm:$0xff] %v7178_v11  ;;  %15839 = vst [vmem:[#allocation36_spill] sm:$0xff] %v7180_v28 }
 0x142   : > { %15840 = vst [vmem:[#allocation37_spill] sm:$0xff] %v7185_v46  ;;  %v808_v55 = vpop.f32.mrb[16].mxu0  ;;  %v2835_v33 = vmax.f32 %v2834_v35, %v7178_v11  ;;  %v2839_v23 = vmax.f32 %v2838_v20, %v7180_v28 }
 0x143   : > { %v7189_v12 = vmul.f32 14.285714, %v808_v55  ;;  %v1001_v17 = vpop.f32.mrb[16].mxu1  ;;  %v810_v49 = vpop.f32.mrb[17].mxu0 }
 0x144   : > { %v7191_v40 = vmul.f32 14.285714, %v1001_v17  ;;  %v7193_v47 = vmul.f32 14.285714, %v810_v49  ;;  %v1003_v22 = vpop.f32.mrb[17].mxu1  ;;  %2836 = vmax.xlane.f32.xlu0 %v2835_v33  ;;  %v812_v13 = vpop.f32.mrb[18].mxu0  ;;  %v2840_v58 = vmax.f32 %v2839_v23, %v7185_v46 }
 0x145   : > { %15841 = vst [vmem:[#allocation38_spill] sm:$0xff] %v7189_v12  ;;  %v1005_v3 = vpop.f32.mrb[18].mxu1  ;;  %v7196_v42 = vmul.f32 14.285714, %v812_v13  ;;  %v814_v36 = vpop.f32.mrb[19].mxu0 }
 0x146   : > { %15842 = vst [vmem:[#allocation39_spill] sm:$0xff] %v7191_v40  ;;  %15843 = vst [vmem:[#allocation40_spill] sm:$0xff] %v7193_v47  ;;  %v2843_v20 = vmax.f32 %v7189_v12, %v7193_v47  ;;  %v7200_v55 = vmul.f32 14.285714, %v814_v36  ;;  %v1007_v35 = vpop.f32.mrb[19].mxu1  ;;  %2841 = vmax.xlane.f32.xlu1 %v2840_v58 }
 0x147   : > { %15844 = vst [vmem:[#allocation41_spill] sm:$0xff] %v7196_v42  ;;  %v7202_v17 = vmul.f32 14.285714, %v1003_v22  ;;  %v7204_v49 = vmul.f32 14.285714, %v1005_v3 }
 0x148   : > { %15845 = vst [vmem:[#allocation42_spill] sm:$0xff] %v7200_v55  ;;  %v2848_v33 = vmax.f32 %v7196_v42, %v7200_v55  ;;  %v2844_v23 = vmax.f32 %v2843_v20, %v7191_v40  ;;  %v7209_v4 = vmul.f32 14.285714, %v1007_v35 }
 0x149   : > { %15846 = vst [vmem:[#allocation43_spill] sm:$0xff] %v7202_v17  ;;  %15847 = vst [vmem:[#allocation44_spill] sm:$0xff] %v7204_v49 }
 0x14a   : > { %15848 = vst [vmem:[#allocation45_spill] sm:$0xff] %v7209_v4  ;;  %v818_v13 = vpop.f32.mrb[20].mxu0  ;;  %v2845_v34 = vmax.f32 %v2844_v23, %v7202_v17  ;;  %v2849_v46 = vmax.f32 %v2848_v33, %v7204_v49 }
 0x14b   : > { %v7213_v36 = vmul.f32 14.285714, %v818_v13  ;;  %v1011_v28 = vpop.f32.mrb[20].mxu1  ;;  %v820_v58 = vpop.f32.mrb[21].mxu0 }
 0x14c   : > { %v7215_v22 = vmul.f32 14.285714, %v1011_v28  ;;  %v7217_v3 = vmul.f32 14.285714, %v820_v58  ;;  %v1013_v14 = vpop.f32.mrb[21].mxu1  ;;  %2846 = vmax.xlane.f32.xlu0 %v2845_v34  ;;  %v822_v55 = vpop.f32.mrb[22].mxu0  ;;  %v2850_v20 = vmax.f32 %v2849_v46, %v7209_v4 }
 0x14d   : > { %15849 = vst [vmem:[#allocation46_spill] sm:$0xff] %v7213_v36  ;;  %v1015_v35 = vpop.f32.mrb[22].mxu1  ;;  %v7220_v42 = vmul.f32 14.285714, %v822_v55  ;;  %v824_v61 = vpop.f32.mrb[23].mxu0 }
 0x14e   : > { %15850 = vst [vmem:[#allocation47_spill] sm:$0xff] %v7215_v22  ;;  %15851 = vst [vmem:[#allocation48_spill] sm:$0xff] %v7217_v3  ;;  %v2853_v33 = vmax.f32 %v7213_v36, %v7217_v3  ;;  %v7224_v23 = vmul.f32 14.285714, %v824_v61  ;;  %v1017_v13 = vpop.f32.mrb[23].mxu1  ;;  %2851 = vmax.xlane.f32.xlu1 %v2850_v20 }
 0x14f   : > { %15852 = vst [vmem:[#allocation49_spill] sm:$0xff] %v7220_v42  ;;  %v7226_v28 = vmul.f32 14.285714, %v1013_v14  ;;  %v7228_v58 = vmul.f32 14.285714, %v1015_v35 }
 0x150   : > { %15853 = vst [vmem:[#allocation50_spill] sm:$0xff] %v7224_v23  ;;  %v2858_v34 = vmax.f32 %v7220_v42, %v7224_v23  ;;  %v2854_v46 = vmax.f32 %v2853_v33, %v7215_v22  ;;  %v7233_v4 = vmul.f32 14.285714, %v1017_v13 }
 0x151   : > { %15854 = vst [vmem:[#allocation51_spill] sm:$0xff] %v7226_v28  ;;  %15855 = vst [vmem:[#allocation52_spill] sm:$0xff] %v7228_v58 }
 0x152   : > { %15856 = vst [vmem:[#allocation53_spill] sm:$0xff] %v7233_v4  ;;  %v828_v55 = vpop.f32.mrb[24].mxu0  ;;  %v2855_v49 = vmax.f32 %v2854_v46, %v7226_v28  ;;  %v2859_v52 = vmax.f32 %v2858_v34, %v7228_v58 }
 0x153   : > { %v7237_v61 = vmul.f32 14.285714, %v828_v55  ;;  %v1021_v21 = vpop.f32.mrb[24].mxu1  ;;  %v830_v20 = vpop.f32.mrb[25].mxu0 }
 0x154   : > { %v7239_v14 = vmul.f32 14.285714, %v1021_v21  ;;  %v7241_v35 = vmul.f32 14.285714, %v830_v20  ;;  %v1023_v7 = vpop.f32.mrb[25].mxu1  ;;  %2856 = vmax.xlane.f32.xlu0 %v2855_v49  ;;  %v832_v23 = vpop.f32.mrb[26].mxu0  ;;  %v2860_v33 = vmax.f32 %v2859_v52, %v7233_v4 }
 0x155   : > { %15857 = vst [vmem:[#allocation54_spill] sm:$0xff] %v7237_v61  ;;  %v1025_v13 = vpop.f32.mrb[26].mxu1  ;;  %v7244_v42 = vmul.f32 14.285714, %v832_v23  ;;  %v834_v51 = vpop.f32.mrb[27].mxu0 }
 0x156   : > { %15858 = vst [vmem:[#allocation55_spill] sm:$0xff] %v7239_v14  ;;  %15859 = vst [vmem:[#allocation56_spill] sm:$0xff] %v7241_v35  ;;  %v2863_v34 = vmax.f32 %v7237_v61, %v7241_v35  ;;  %v7248_v46 = vmul.f32 14.285714, %v834_v51  ;;  %v1027_v55 = vpop.f32.mrb[27].mxu1  ;;  %2861 = vmax.xlane.f32.xlu1 %v2860_v33 }
 0x157   : > { %15860 = vst [vmem:[#allocation57_spill] sm:$0xff] %v7244_v42  ;;  %v7250_v21 = vmul.f32 14.285714, %v1023_v7  ;;  %v7252_v20 = vmul.f32 14.285714, %v1025_v13 }
 0x158   : > { %15861 = vst [vmem:[#allocation58_spill] sm:$0xff] %v7248_v46  ;;  %v2868_v49 = vmax.f32 %v7244_v42, %v7248_v46  ;;  %v2864_v52 = vmax.f32 %v2863_v34, %v7239_v14  ;;  %v7257_v4 = vmul.f32 14.285714, %v1027_v55 }
 0x159   : > { %15862 = vst [vmem:[#allocation59_spill] sm:$0xff] %v7250_v21  ;;  %15863 = vst [vmem:[#allocation60_spill] sm:$0xff] %v7252_v20 }
 0x15a   : > { %15864 = vst [vmem:[#allocation61_spill] sm:$0xff] %v7257_v4  ;;  %v838_v23 = vpop.f32.mrb[28].mxu0  ;;  %v2865_v58 = vmax.f32 %v2864_v52, %v7250_v21  ;;  %v2869_v35 = vmax.f32 %v2868_v49, %v7252_v20 }
 0x15b   : > { %v7261_v51 = vmul.f32 14.285714, %v838_v23  ;;  %v1031_v61 = vpop.f32.mrb[28].mxu1  ;;  %v840_v33 = vpop.f32.mrb[29].mxu0 }
 0x15c   : > { %v7263_v7 = vmul.f32 14.285714, %v1031_v61  ;;  %v7265_v13 = vmul.f32 14.285714, %v840_v33  ;;  %v1033_v41 = vpop.f32.mrb[29].mxu1  ;;  %2866 = vmax.xlane.f32.xlu0 %v2865_v58  ;;  %v842_v46 = vpop.f32.mrb[30].mxu0  ;;  %v2870_v34 = vmax.f32 %v2869_v35, %v7257_v4 }
 0x15d   : > { %15865 = vst [vmem:[#allocation62_spill] sm:$0xff] %v7261_v51  ;;  %v1035_v55 = vpop.f32.mrb[30].mxu1  ;;  %v7268_v42 = vmul.f32 14.285714, %v842_v46  ;;  %v844_v14 = vpop.f32.mrb[31].mxu0 }
 0x15e   : > { %15866 = vst [vmem:[#allocation63_spill] sm:$0xff] %v7263_v7  ;;  %15867 = vst [vmem:[#allocation64_spill] sm:$0xff] %v7265_v13  ;;  %v2873_v49 = vmax.f32 %v7261_v51, %v7265_v13  ;;  %v7272_v52 = vmul.f32 14.285714, %v844_v14  ;;  %v1037_v23 = vpop.f32.mrb[31].mxu1  ;;  %2871 = vmax.xlane.f32.xlu1 %v2870_v34 }
 0x15f   : > { %15868 = vst [vmem:[#allocation65_spill] sm:$0xff] %v7268_v42  ;;  %v7274_v61 = vmul.f32 14.285714, %v1033_v41  ;;  %v7276_v33 = vmul.f32 14.285714, %v1035_v55 }
 0x160   : > { %15869 = vst [vmem:[#allocation66_spill] sm:$0xff] %v7272_v52  ;;  %v2878_v58 = vmax.f32 %v7268_v42, %v7272_v52  ;;  %v2874_v35 = vmax.f32 %v2873_v49, %v7263_v7  ;;  %v7281_v4 = vmul.f32 14.285714, %v1037_v23 }
 0x161   : > { %15870 = vst [vmem:[#allocation67_spill] sm:$0xff] %v7274_v61  ;;  %15871 = vst [vmem:[#allocation68_spill] sm:$0xff] %v7276_v33 }
 0x162   : > { %15872 = vst [vmem:[#allocation69_spill] sm:$0xff] %v7281_v4  ;;  %v848_v46 = vpop.f32.mrb[32].mxu0  ;;  %v2875_v20 = vmax.f32 %v2874_v35, %v7274_v61  ;;  %v2879_v13 = vmax.f32 %v2878_v58, %v7276_v33 }
 0x163   : > { %v7285_v14 = vmul.f32 14.285714, %v848_v46  ;;  %v1041_v51 = vpop.f32.mrb[32].mxu1  ;;  %v850_v34 = vpop.f32.mrb[33].mxu0 }
 0x164   : > { %v7287_v41 = vmul.f32 14.285714, %v1041_v51  ;;  %v7289_v55 = vmul.f32 14.285714, %v850_v34  ;;  %v1043_v21 = vpop.f32.mrb[33].mxu1  ;;  %2876 = vmax.xlane.f32.xlu0 %v2875_v20  ;;  %v852_v52 = vpop.f32.mrb[34].mxu0  ;;  %v2880_v49 = vmax.f32 %v2879_v13, %v7281_v4 }
 0x165   : > { %15873 = vst [vmem:[#allocation70_spill] sm:$0xff] %v7285_v14  ;;  %v1045_v23 = vpop.f32.mrb[34].mxu1  ;;  %v7292_v42 = vmul.f32 14.285714, %v852_v52  ;;  %v854_v7 = vpop.f32.mrb[35].mxu0 }
 0x166   : > { %15874 = vst [vmem:[#allocation71_spill] sm:$0xff] %v7287_v41  ;;  %15875 = vst [vmem:[#allocation72_spill] sm:$0xff] %v7289_v55  ;;  %v2883_v58 = vmax.f32 %v7285_v14, %v7289_v55  ;;  %v7296_v35 = vmul.f32 14.285714, %v854_v7  ;;  %v1047_v46 = vpop.f32.mrb[35].mxu1  ;;  %2881 = vmax.xlane.f32.xlu1 %v2880_v49 }
 0x167   : > { %15876 = vst [vmem:[#allocation73_spill] sm:$0xff] %v7292_v42  ;;  %v7298_v51 = vmul.f32 14.285714, %v1043_v21  ;;  %v7300_v34 = vmul.f32 14.285714, %v1045_v23 }
 0x168   : > { %15877 = vst [vmem:[#allocation74_spill] sm:$0xff] %v7296_v35  ;;  %v2888_v20 = vmax.f32 %v7292_v42, %v7296_v35  ;;  %v2884_v13 = vmax.f32 %v2883_v58, %v7287_v41  ;;  %v7305_v4 = vmul.f32 14.285714, %v1047_v46 }
 0x169   : > { %15878 = vst [vmem:[#allocation75_spill] sm:$0xff] %v7298_v51  ;;  %15879 = vst [vmem:[#allocation76_spill] sm:$0xff] %v7300_v34 }
 0x16a   : > { %15880 = vst [vmem:[#allocation77_spill] sm:$0xff] %v7305_v4  ;;  %v858_v52 = vpop.f32.mrb[36].mxu0  ;;  %v2885_v33 = vmax.f32 %v2884_v13, %v7298_v51  ;;  %v2889_v55 = vmax.f32 %v2888_v20, %v7300_v34 }
 0x16b   : > { %v7309_v7 = vmul.f32 14.285714, %v858_v52  ;;  %v1051_v14 = vpop.f32.mrb[36].mxu1  ;;  %v860_v49 = vpop.f32.mrb[37].mxu0 }
 0x16c   : > { %v7311_v21 = vmul.f32 14.285714, %v1051_v14  ;;  %v7313_v23 = vmul.f32 14.285714, %v860_v49  ;;  %v1053_v61 = vpop.f32.mrb[37].mxu1  ;;  %2886 = vmax.xlane.f32.xlu0 %v2885_v33  ;;  %v862_v35 = vpop.f32.mrb[38].mxu0  ;;  %v2890_v58 = vmax.f32 %v2889_v55, %v7305_v4 }
 0x16d   : > { %15881 = vst [vmem:[#allocation78_spill] sm:$0xff] %v7309_v7  ;;  %v1055_v46 = vpop.f32.mrb[38].mxu1  ;;  %v7316_v42 = vmul.f32 14.285714, %v862_v35  ;;  %v864_v41 = vpop.f32.mrb[39].mxu0 }
 0x16e   : > { %15882 = vst [vmem:[#allocation79_spill] sm:$0xff] %v7311_v21  ;;  %15883 = vst [vmem:[#allocation80_spill] sm:$0xff] %v7313_v23  ;;  %v2893_v20 = vmax.f32 %v7309_v7, %v7313_v23  ;;  %v7320_v13 = vmul.f32 14.285714, %v864_v41  ;;  %v1057_v52 = vpop.f32.mrb[39].mxu1  ;;  %2891 = vmax.xlane.f32.xlu1 %v2890_v58 }
 0x16f   : > { %15884 = vst [vmem:[#allocation81_spill] sm:$0xff] %v7316_v42  ;;  %v7322_v14 = vmul.f32 14.285714, %v1053_v61  ;;  %v7324_v49 = vmul.f32 14.285714, %v1055_v46 }
 0x170   : > { %15885 = vst [vmem:[#allocation82_spill] sm:$0xff] %v7320_v13  ;;  %v2898_v33 = vmax.f32 %v7316_v42, %v7320_v13  ;;  %v2894_v55 = vmax.f32 %v2893_v20, %v7311_v21  ;;  %v7329_v4 = vmul.f32 14.285714, %v1057_v52 }
 0x171   : > { %15886 = vst [vmem:[#allocation83_spill] sm:$0xff] %v7322_v14  ;;  %15887 = vst [vmem:[#allocation84_spill] sm:$0xff] %v7324_v49 }
 0x172   : > { %15888 = vst [vmem:[#allocation85_spill] sm:$0xff] %v7329_v4  ;;  %v868_v35 = vpop.f32.mrb[40].mxu0  ;;  %v2895_v34 = vmax.f32 %v2894_v55, %v7322_v14  ;;  %v2899_v23 = vmax.f32 %v2898_v33, %v7324_v49 }
 0x173   : > { %v7333_v41 = vmul.f32 14.285714, %v868_v35  ;;  %v1061_v7 = vpop.f32.mrb[40].mxu1  ;;  %v870_v58 = vpop.f32.mrb[41].mxu0 }
 0x174   : > { %v7335_v61 = vmul.f32 14.285714, %v1061_v7  ;;  %v7337_v46 = vmul.f32 14.285714, %v870_v58  ;;  %v1063_v51 = vpop.f32.mrb[41].mxu1  ;;  %2896 = vmax.xlane.f32.xlu0 %v2895_v34  ;;  %v872_v13 = vpop.f32.mrb[42].mxu0  ;;  %v2900_v20 = vmax.f32 %v2899_v23, %v7329_v4 }
 0x175   : > { %15889 = vst [vmem:[#allocation86_spill] sm:$0xff] %v7333_v41  ;;  %v1065_v52 = vpop.f32.mrb[42].mxu1  ;;  %v7340_v42 = vmul.f32 14.285714, %v872_v13  ;;  %v874_v21 = vpop.f32.mrb[43].mxu0 }
 0x176   : > { %15890 = vst [vmem:[#allocation87_spill] sm:$0xff] %v7335_v61  ;;  %15891 = vst [vmem:[#allocation88_spill] sm:$0xff] %v7337_v46  ;;  %v2903_v33 = vmax.f32 %v7333_v41, %v7337_v46  ;;  %v7344_v55 = vmul.f32 14.285714, %v874_v21  ;;  %v1067_v35 = vpop.f32.mrb[43].mxu1  ;;  %2901 = vmax.xlane.f32.xlu1 %v2900_v20 }
 0x177   : > { %15892 = vst [vmem:[#allocation89_spill] sm:$0xff] %v7340_v42  ;;  %v7346_v7 = vmul.f32 14.285714, %v1063_v51  ;;  %v7348_v58 = vmul.f32 14.285714, %v1065_v52 }
 0x178   : > { %15893 = vst [vmem:[#allocation90_spill] sm:$0xff] %v7344_v55  ;;  %v2908_v34 = vmax.f32 %v7340_v42, %v7344_v55  ;;  %v2904_v23 = vmax.f32 %v2903_v33, %v7335_v61  ;;  %v7353_v4 = vmul.f32 14.285714, %v1067_v35 }
 0x179   : > { %15894 = vst [vmem:[#allocation91_spill] sm:$0xff] %v7346_v7  ;;  %15895 = vst [vmem:[#allocation92_spill] sm:$0xff] %v7348_v58 }
 0x17a   : > { %15896 = vst [vmem:[#allocation93_spill] sm:$0xff] %v7353_v4  ;;  %v878_v13 = vpop.f32.mrb[44].mxu0  ;;  %v2905_v49 = vmax.f32 %v2904_v23, %v7346_v7  ;;  %v2909_v46 = vmax.f32 %v2908_v34, %v7348_v58 }
 0x17b   : > { %v7357_v21 = vmul.f32 14.285714, %v878_v13  ;;  %v1071_v41 = vpop.f32.mrb[44].mxu1  ;;  %v880_v20 = vpop.f32.mrb[45].mxu0 }
 0x17c   : > { %v7359_v51 = vmul.f32 14.285714, %v1071_v41  ;;  %v7361_v52 = vmul.f32 14.285714, %v880_v20  ;;  %v1073_v14 = vpop.f32.mrb[45].mxu1  ;;  %2906 = vmax.xlane.f32.xlu0 %v2905_v49  ;;  %v882_v55 = vpop.f32.mrb[46].mxu0  ;;  %v2910_v33 = vmax.f32 %v2909_v46, %v7353_v4 }
 0x17d   : > { %15897 = vst [vmem:[#allocation94_spill] sm:$0xff] %v7357_v21  ;;  %v1075_v35 = vpop.f32.mrb[46].mxu1  ;;  %v7364_v42 = vmul.f32 14.285714, %v882_v55  ;;  %v884_v61 = vpop.f32.mrb[47].mxu0 }
 0x17e   : > { %15898 = vst [vmem:[#allocation95_spill] sm:$0xff] %v7359_v51  ;;  %15899 = vst [vmem:[#allocation96_spill] sm:$0xff] %v7361_v52  ;;  %v2913_v34 = vmax.f32 %v7357_v21, %v7361_v52  ;;  %v7368_v23 = vmul.f32 14.285714, %v884_v61  ;;  %v1077_v13 = vpop.f32.mrb[47].mxu1  ;;  %2911 = vmax.xlane.f32.xlu1 %v2910_v33 }
 0x17f   : > { %15900 = vst [vmem:[#allocation97_spill] sm:$0xff] %v7364_v42  ;;  %v7370_v41 = vmul.f32 14.285714, %v1073_v14  ;;  %v7372_v20 = vmul.f32 14.285714, %v1075_v35 }
 0x180   : > { %15901 = vst [vmem:[#allocation98_spill] sm:$0xff] %v7368_v23  ;;  %v2918_v49 = vmax.f32 %v7364_v42, %v7368_v23  ;;  %v2914_v46 = vmax.f32 %v2913_v34, %v7359_v51  ;;  %v7377_v4 = vmul.f32 14.285714, %v1077_v13 }
 0x181   : > { %15902 = vst [vmem:[#allocation99_spill] sm:$0xff] %v7370_v41  ;;  %15903 = vst [vmem:[#allocation100_spill] sm:$0xff] %v7372_v20 }
 0x182   : > { %15904 = vst [vmem:[#allocation101_spill] sm:$0xff] %v7377_v4  ;;  %v888_v55 = vpop.f32.mrb[48].mxu0  ;;  %v2915_v58 = vmax.f32 %v2914_v46, %v7370_v41  ;;  %v2919_v52 = vmax.f32 %v2918_v49, %v7372_v20 }
 0x183   : > { %v7381_v61 = vmul.f32 14.285714, %v888_v55  ;;  %v1081_v21 = vpop.f32.mrb[48].mxu1  ;;  %v890_v33 = vpop.f32.mrb[49].mxu0 }
 0x184   : > { %v7383_v14 = vmul.f32 14.285714, %v1081_v21  ;;  %v7385_v35 = vmul.f32 14.285714, %v890_v33  ;;  %v1083_v7 = vpop.f32.mrb[49].mxu1  ;;  %2916 = vmax.xlane.f32.xlu0 %v2915_v58  ;;  %v892_v23 = vpop.f32.mrb[50].mxu0  ;;  %v2920_v34 = vmax.f32 %v2919_v52, %v7377_v4 }
 0x185   : > { %15905 = vst [vmem:[#allocation102_spill] sm:$0xff] %v7381_v61  ;;  %v1085_v13 = vpop.f32.mrb[50].mxu1  ;;  %v7388_v42 = vmul.f32 14.285714, %v892_v23  ;;  %v894_v51 = vpop.f32.mrb[51].mxu0 }
 0x186   : > { %15906 = vst [vmem:[#allocation103_spill] sm:$0xff] %v7383_v14  ;;  %15907 = vst [vmem:[#allocation104_spill] sm:$0xff] %v7385_v35  ;;  %v2923_v49 = vmax.f32 %v7381_v61, %v7385_v35  ;;  %v7392_v46 = vmul.f32 14.285714, %v894_v51  ;;  %v1087_v55 = vpop.f32.mrb[51].mxu1  ;;  %2921 = vmax.xlane.f32.xlu1 %v2920_v34 }
 0x187   : > { %15908 = vst [vmem:[#allocation105_spill] sm:$0xff] %v7388_v42  ;;  %v7394_v21 = vmul.f32 14.285714, %v1083_v7  ;;  %v7396_v33 = vmul.f32 14.285714, %v1085_v13 }
 0x188   : > { %15909 = vst [vmem:[#allocation106_spill] sm:$0xff] %v7392_v46  ;;  %v2928_v58 = vmax.f32 %v7388_v42, %v7392_v46  ;;  %v2924_v52 = vmax.f32 %v2923_v49, %v7383_v14  ;;  %v7401_v4 = vmul.f32 14.285714, %v1087_v55 }
 0x189   : > { %15910 = vst [vmem:[#allocation107_spill] sm:$0xff] %v7394_v21  ;;  %15911 = vst [vmem:[#allocation108_spill] sm:$0xff] %v7396_v33 }
 0x18a   : > { %15912 = vst [vmem:[#allocation109_spill] sm:$0xff] %v7401_v4  ;;  %v898_v23 = vpop.f32.mrb[52].mxu0  ;;  %v2925_v20 = vmax.f32 %v2924_v52, %v7394_v21  ;;  %v2929_v35 = vmax.f32 %v2928_v58, %v7396_v33 }
 0x18b   : > { %v7405_v51 = vmul.f32 14.285714, %v898_v23  ;;  %v1091_v61 = vpop.f32.mrb[52].mxu1  ;;  %v900_v34 = vpop.f32.mrb[53].mxu0 }
 0x18c   : > { %v7407_v7 = vmul.f32 14.285714, %v1091_v61  ;;  %v7409_v13 = vmul.f32 14.285714, %v900_v34  ;;  %v1093_v41 = vpop.f32.mrb[53].mxu1  ;;  %2926 = vmax.xlane.f32.xlu0 %v2925_v20  ;;  %v902_v46 = vpop.f32.mrb[54].mxu0  ;;  %v2930_v49 = vmax.f32 %v2929_v35, %v7401_v4 }
 0x18d   : > { %15913 = vst [vmem:[#allocation110_spill] sm:$0xff] %v7405_v51  ;;  %v1095_v55 = vpop.f32.mrb[54].mxu1  ;;  %v7412_v42 = vmul.f32 14.285714, %v902_v46  ;;  %v904_v14 = vpop.f32.mrb[55].mxu0 }
 0x18e   : > { %15914 = vst [vmem:[#allocation111_spill] sm:$0xff] %v7407_v7  ;;  %15915 = vst [vmem:[#allocation112_spill] sm:$0xff] %v7409_v13  ;;  %v2933_v58 = vmax.f32 %v7405_v51, %v7409_v13  ;;  %v7416_v52 = vmul.f32 14.285714, %v904_v14  ;;  %v1097_v23 = vpop.f32.mrb[55].mxu1  ;;  %2931 = vmax.xlane.f32.xlu1 %v2930_v49 }
 0x18f   : > { %15916 = vst [vmem:[#allocation113_spill] sm:$0xff] %v7412_v42  ;;  %v7418_v61 = vmul.f32 14.285714, %v1093_v41  ;;  %v7420_v34 = vmul.f32 14.285714, %v1095_v55 }
 0x190   : > { %15917 = vst [vmem:[#allocation114_spill] sm:$0xff] %v7416_v52  ;;  %v2938_v20 = vmax.f32 %v7412_v42, %v7416_v52  ;;  %v2934_v35 = vmax.f32 %v2933_v58, %v7407_v7  ;;  %v7425_v4 = vmul.f32 14.285714, %v1097_v23 }
 0x191   : > { %15918 = vst [vmem:[#allocation115_spill] sm:$0xff] %v7418_v61  ;;  %15919 = vst [vmem:[#allocation116_spill] sm:$0xff] %v7420_v34 }
 0x192   : > { %15920 = vst [vmem:[#allocation117_spill] sm:$0xff] %v7425_v4  ;;  %v908_v46 = vpop.f32.mrb[56].mxu0  ;;  %v2935_v33 = vmax.f32 %v2934_v35, %v7418_v61  ;;  %v2939_v13 = vmax.f32 %v2938_v20, %v7420_v34 }
 0x193   : > { %v7429_v14 = vmul.f32 14.285714, %v908_v46  ;;  %v1101_v51 = vpop.f32.mrb[56].mxu1  ;;  %v910_v49 = vpop.f32.mrb[57].mxu0 }
 0x194   : > { %v7431_v41 = vmul.f32 14.285714, %v1101_v51  ;;  %v7433_v55 = vmul.f32 14.285714, %v910_v49  ;;  %v1103_v21 = vpop.f32.mrb[57].mxu1  ;;  %2936 = vmax.xlane.f32.xlu0 %v2935_v33  ;;  %v912_v52 = vpop.f32.mrb[58].mxu0  ;;  %v2940_v58 = vmax.f32 %v2939_v13, %v7425_v4 }
 0x195   : > { %15921 = vst [vmem:[#allocation118_spill] sm:$0xff] %v7429_v14  ;;  %v1105_v23 = vpop.f32.mrb[58].mxu1  ;;  %v7436_v42 = vmul.f32 14.285714, %v912_v52  ;;  %v914_v7 = vpop.f32.mrb[59].mxu0 }
 0x196   : > { %15922 = vst [vmem:[#allocation119_spill] sm:$0xff] %v7431_v41  ;;  %15923 = vst [vmem:[#allocation120_spill] sm:$0xff] %v7433_v55  ;;  %v2943_v20 = vmax.f32 %v7429_v14, %v7433_v55  ;;  %v7440_v35 = vmul.f32 14.285714, %v914_v7  ;;  %v1107_v46 = vpop.f32.mrb[59].mxu1  ;;  %2941 = vmax.xlane.f32.xlu1 %v2940_v58 }
 0x197   : > { %15924 = vst [vmem:[#allocation121_spill] sm:$0xff] %v7436_v42  ;;  %v7442_v51 = vmul.f32 14.285714, %v1103_v21  ;;  %v7444_v49 = vmul.f32 14.285714, %v1105_v23 }
 0x198   : > { %15925 = vst [vmem:[#allocation122_spill] sm:$0xff] %v7440_v35  ;;  %v2948_v33 = vmax.f32 %v7436_v42, %v7440_v35  ;;  %v2944_v13 = vmax.f32 %v2943_v20, %v7431_v41  ;;  %v7449_v4 = vmul.f32 14.285714, %v1107_v46 }
 0x199   : > { %15926 = vst [vmem:[#allocation123_spill] sm:$0xff] %v7442_v51  ;;  %15927 = vst [vmem:[#allocation124_spill] sm:$0xff] %v7444_v49 }
 0x19a   : > { %15928 = vst [vmem:[#allocation125_spill] sm:$0xff] %v7449_v4  ;;  %v918_v52 = vpop.f32.mrb[60].mxu0  ;;  %v2945_v34 = vmax.f32 %v2944_v13, %v7442_v51  ;;  %v2949_v55 = vmax.f32 %v2948_v33, %v7444_v49  ;;  %v271_v51 = vld [vmem:[%s6906_s26 + $0x90] sm:$0xff]  ;;  %v282_v49 = vld [vmem:[%s6906_s26 + $0xe8] sm:$0xff] }
 0x19b   : > { %v7453_v7 = vmul.f32 14.285714, %v918_v52  ;;  %v1111_v14 = vpop.f32.mrb[60].mxu1  ;;  %v920_v58 = vpop.f32.mrb[61].mxu0 }
 0x19c   : > { %v7455_v21 = vmul.f32 14.285714, %v1111_v14  ;;  %v7457_v23 = vmul.f32 14.285714, %v920_v58  ;;  %v1113_v61 = vpop.f32.mrb[61].mxu1  ;;  %2946 = vmax.xlane.f32.xlu0 %v2945_v34  ;;  %v922_v35 = vpop.f32.mrb[62].mxu0  ;;  %v2950_v20 = vmax.f32 %v2949_v55, %v7449_v4 }
 0x19d   : > { %15929 = vst [vmem:[#allocation126_spill] sm:$0xff] %v7453_v7  ;;  %v1115_v46 = vpop.f32.mrb[62].mxu1  ;;  %v7460_v41 = vmul.f32 14.285714, %v922_v35  ;;  %v924_v13 = vpop.f32.mrb[63].mxu0 }
 0x19e   : > { %15930 = vst [vmem:[#allocation127_spill] sm:$0xff] %v7455_v21  ;;  %15931 = vst [vmem:[#allocation128_spill] sm:$0xff] %v7457_v23  ;;  %v2953_v33 = vmax.f32 %v7453_v7, %v7457_v23  ;;  %v7464_v52 = vmul.f32 14.285714, %v924_v13  ;;  %v1117_v14 = vpop.f32.mrb[63].mxu1  ;;  %2951 = vmax.xlane.f32.xlu1 %v2950_v20  ;;  %v7479_v20 = vld [vmem:[%s6906_s26] sm:$0xff] }
 0x19f   : > { %15932 = vst [vmem:[#allocation129_spill] sm:$0xff] %v7460_v41  ;;  %v7466_v58 = vmul.f32 14.285714, %v1113_v61  ;;  %v7468_v34 = vmul.f32 14.285714, %v1115_v46  ;;  %v7483_v46 = vld [vmem:[%s6906_s26 + $0x30] sm:$0xff] }
 0x1a0   : > { %15933 = vst [vmem:[#allocation130_spill] sm:$0xff] %v7464_v52  ;;  %v2958_v55 = vmax.f32 %v7460_v41, %v7464_v52  ;;  %v2954_v35 = vmax.f32 %v2953_v33, %v7455_v21  ;;  %v7473_v4 = vmul.f32 14.285714, %v1117_v14  ;;  %v7486_v33 = vld [vmem:[%s6906_s26 + $0x18] sm:$0xff]  ;;  %v7491_v14 = vld [vmem:[%s6906_s26 + $0x40] sm:$0xff]  ;;  %v266_v7 = vld [vmem:[%s6906_s26 + $0x68] sm:$0xff] }
 0x1a1   : > { %15934 = vst [vmem:[#allocation131_spill] sm:$0xff] %v7466_v58  ;;  %15935 = vst [vmem:[#allocation132_spill] sm:$0xff] %v7468_v34  ;;  %v269_v21 = vld [vmem:[%s6906_s26 + $0x80] sm:$0xff]  ;;  %v270_v52 = vld [vmem:[%s6906_s26 + $0x88] sm:$0xff] }
 0x1a2   : > { %15936 = vst [vmem:[#allocation133_spill] sm:$0xff] %v7473_v4  ;;  %v2955_v13 = vmax.f32 %v2954_v35, %v7466_v58  ;;  %v2959_v23 = vmax.f32 %v2958_v55, %v7468_v34  ;;  %v7499_v55 = vld [vmem:[%s6906_s26 + $0x50] sm:$0xff]  ;;  %v7502_v35 = vld [vmem:[%s6906_s26 + $0x38] sm:$0xff] }
 0x1a3   : > { %15938 = vst [vmem:[#allocation135_spill] sm:$0xff] %v7499_v55  ;;  %15939 = vst [vmem:[#allocation136_spill] sm:$0xff] %v7502_v35  ;;  %v264_v58 = vld [vmem:[%s6906_s26 + $0x58] sm:$0xff] }
 0x1a4   : > { %2956 = vmax.xlane.f32.xlu0 %v2955_v13  ;;  %v2960_v61 = vmax.f32 %v2959_v23, %v7473_v4  ;;  %v7494_v23 = vld [vmem:[%s6906_s26 + $0x28] sm:$0xff]  ;;  %v265_v13 = vld [vmem:[%s6906_s26 + $0x60] sm:$0xff]  ;;  %v267_v4 = vld [vmem:[%s6906_s26 + $0x70] sm:$0xff] }
 0x1a5   : > { %15937 = vst [vmem:[#allocation134_spill] sm:$0xff] %v7494_v23  ;;  %v268_v34 = vld [vmem:[%s6906_s26 + $0x78] sm:$0xff] }
 0x1a6   : > { %2961 = vmax.xlane.f32.xlu1 %v2960_v61  ;;  %v7508_v61 = vld [vmem:[%s6906_s26 + $0x48] sm:$0xff]  ;;  %v276_v41 = vld [vmem:[%s6906_s26 + $0xb8] sm:$0xff] }
 0x1a7   : > { %15940 = vst [vmem:[#allocation137_spill] sm:$0xff] %v7508_v61 }
 0x1b7   : > { %1251 = vperm.xlu1 %6058, %v7479_v20  }
 0x1ba   : > { %1281 = vperm.xlu0 %6057, %v7483_v46  }
 0x1bb   : > { %1266 = vperm.xlu1 %6058, %v7486_v33  }
 0x1be   : > { %1291 = vperm.xlu0 %6057, %v7491_v14  }
 0x1bf   : > { %1276 = vperm.xlu1 %6058, %v7494_v23  }
 0x1c2   : > { %1301 = vperm.xlu0 %6057, %v7499_v55  }
 0x1c3   : > { %1286 = vperm.xlu1 %6058, %v7502_v35  }
 0x1c6   : > { %1311 = vperm.xlu0 %6057, %v265_v13   ;;  %v273_v13 = vld [vmem:[%s6906_s26 + $0xa0] sm:$0xff] }
 0x1c7   : > { %1296 = vperm.xlu1 %6058, %v7508_v61   ;;  %v284_v61 = vld [vmem:[%s6906_s26 + $0xf8] sm:$0xff] }
 0x1ca   : > { %1321 = vperm.xlu0 %6057, %v267_v4   ;;  %v275_v4 = vld [vmem:[%s6906_s26 + $0xb0] sm:$0xff] }
 0x1cb   : > { %1306 = vperm.xlu1 %6058, %v264_v58   ;;  %v272_v58 = vld [vmem:[%s6906_s26 + $0x98] sm:$0xff] }
 0x1ce   : > { %1331 = vperm.xlu0 %6057, %v269_v21   ;;  %v274_v21 = vld [vmem:[%s6906_s26 + $0xa8] sm:$0xff] }
 0x1cf   : > { %1316 = vperm.xlu1 %6058, %v266_v7   ;;  %v7523_v7 = vpop.xlane.xlu0 %2806 }
 0x1d2   : > { %1341 = vperm.xlu0 %6057, %v271_v51   ;;  %v278_v51 = vld [vmem:[%s6906_s26 + $0xc8] sm:$0xff] }
 0x1d3   : > { %1326 = vperm.xlu1 %6058, %v268_v34   ;;  %v277_v34 = vld [vmem:[%s6906_s26 + $0xc0] sm:$0xff] }
 0x1d6   : > { %1351 = vperm.xlu0 %6057, %v273_v13   ;;  %v279_v13 = vld [vmem:[%s6906_s26 + $0xd0] sm:$0xff] }
 0x1d7   : > { %1336 = vperm.xlu1 %6058, %v270_v52   ;;  %v2812_v52 = vpop.xlane.xlu0 %2811 }
 0x1da   : > { %1361 = vperm.xlu0 %6057, %v275_v4   ;;  %v7529_v4 = vmax.f32 %v2812_v52, 0.0 }
 0x1db   : > { %1346 = vperm.xlu1 %6058, %v272_v58   ;;  %v280_v58 = vld [vmem:[%s6906_s26 + $0xd8] sm:$0xff]  ;;  %v2827_v42 = vpop.xlane.xlu0 %2826 }
 0x1dc   : > { %15941 = vst [vmem:[#allocation138_spill] sm:$0xff] %v7529_v4  ;;  %v7533_v35 = vmax.f32 %v2827_v42, 0.0  ;;  %v3097_v42 = vsub.f32 %v7062_v30, %v7529_v4 }
 0x1de   : > { %1366 = vperm.xlu0 %6057, %v276_v41   ;;  %15942 = vst [vmem:[#allocation139_spill] sm:$0xff] %v7533_v35  ;;  %v281_v41 = vld [vmem:[%s6906_s26 + $0xe0] sm:$0xff] }
 0x1df   : > { %1356 = vperm.xlu1 %6058, %v274_v21   ;;  %v3095_v21 = vsub.f32 %v7035_v19, %v7529_v4  ;;  %v1420_v19 = vsub.s32 2, %v6953_v54 }
 0x1e2   : > { %1376 = vperm.xlu0 %6057, %v278_v51   ;;  %v3096_v51 = vsub.f32 %v7051_v24, %v7529_v4 }
 0x1e3   : > { %1371 = vperm.xlu1 %6058, %v277_v34   ;;  %v283_v34 = vld [vmem:[%s6906_s26 + $0xf0] sm:$0xff] }
 0x1e4   : > { %v3229_v52 = vmul.f32 1.442695, %v3096_v51  ;;  %v1424_v51 = vsub.s32 3, %v6953_v54 }
 0x1e6   : > { %1381 = vperm.xlu0 %6057, %v279_v13   ;;  %v3227_v13 = vmul.f32 1.442695, %v3095_v21  ;;  %v3231_v21 = vmul.f32 1.442695, %v3097_v42 }
 0x1e7   : > { %1396 = vperm.xlu1 %6058, %v282_v49   ;;  %v3107_v49 = vsub.f32 %v7128_v18, %v7533_v35  ;;  %v3109_v18 = vsub.f32 %v7135_v31, %v7533_v35 }
 0x1e8   : > { %6107 = vpow2.f32 %v3227_v13 }
 0x1e9   : > { %6109 = vpow2.f32 %v3229_v52  ;;  %v3110_v52 = vsub.f32 %v7154_v57, %v7533_v35  ;;  %v7614_v57 = vrot.slane %v6957_v56, %v1424_v51 }
 0x1ea   : > { %1386 = vperm.xlu0 %6057, %v280_v58   ;;  %v3108_v58 = vsub.f32 %v7137_v32, %v7533_v35  ;;  %v6747_v32 = vld [vmem:[%s15049_s3] sm:$0xf] }
 0x1eb   : > { %1406 = vperm.xlu1 %6058, %v284_v61   ;;  %v3251_v61 = vmul.f32 1.442695, %v3107_v49  ;;  %v7578_v42 = vrot.slane %v6747_v32, %v1424_v51  ;;  %vm15323_vm13 = vcmp.eq.s32.totalorder %v7614_v57, 1 }
 0x1ec   : > { %v3253_v24 = vmul.f32 1.442695, %v3108_v58  ;;  %v3255_v58 = vmul.f32 1.442695, %v3109_v18 }
 0x1ed   : > { %6111 = vpow2.f32 %v3251_v61  ;;  %v7583_v61 = vrot.slane %v6957_v56, %v1420_v19  ;;  %vm15271_vm15 = vcmp.eq.f32.partialorder %v6969_v62, %v7578_v42 }
 0x1ee   : > { %1391 = vperm.xlu0 %6057, %v281_v41   ;;  %v3098_v41 = vsub.f32 %v7085_v43, %v7529_v4  ;;  %6113 = vpow2.f32 %v3253_v24  ;;  %v3257_v4 = vmul.f32 1.442695, %v3110_v52  ;;  %vm2298_vm9 = vmxor %vm15271_vm15, %vm15328_vm5 }
 0x1ef   : > { %6115 = vpow2.f32 %v3231_v21  ;;  %v15949_v21 = vmov 0.0   ;;  %vm15600_vm6 = vcmp.eq.s32.totalorder %v7583_v61, 1 }
 0x1f0   : > { %v3233_v49 = vmul.f32 1.442695, %v3098_v41  ;;  %v5822_v18 = vsel %vm2423_vm2, 1.0, %v15949_v21  ;;  %v5834_v52 = vsel %vm7609_vm8, 1.0, %v15949_v21 }
 0x1f2   : > { %1401 = vperm.xlu0 %6057, %v283_v34   ;;  %v7560_v34 = vrot.slane %v6747_v32, %v1420_v19  ;;  %v7591_v24 = vpop.eup %6107  ;;  %6117 = vpow2.f32 %v3233_v49  ;;  %v5823_v32 = vsel %vm2424_vm4, 1.0, %v15949_v21 }
 0x1f3   : > { %15945 = vst [vmem:[#allocation140_spill] sm:$0xff] %v7591_v24  ;;  %v7601_v19 = vpop.eup %6109  ;;  %6119 = vpow2.f32 %v3255_v58  ;;  %v3511_v56 = vmul.f32 %v7591_v24, %v5822_v18  ;;  %v5835_v58 = vsel %vm2436_vm0, 1.0, %v15949_v21 }
 0x1f4   : > { %vm1436_vm7 = vcmp.eq.f32.partialorder %v6969_v62, %v7560_v34  ;;  %15948 = vst [vmem:[#allocation141_spill] sm:$0xff] %v7601_v19  ;;  %vm15270_vm11 = vcmp.eq.f32.partialorder %v7053_v26, %v7560_v34  ;;  %v3512_v51 = vmul.f32 %v7601_v19, %v5823_v32  ;;  %6121 = vpow2.f32 %v3257_v4 }
 0x1f5   : > { %vm7597_vm14 = vmxor %vm1436_vm7, %vm15328_vm5 }
 0x1f6   : > { %vm2425_vm2 = vmand %vm7597_vm14, %vm15600_vm6  ;;  %v3640_v32 = vadd.f32 %v3512_v51, %v3511_v56 }
 0x1f7   : > { %v7625_v13 = vpop.eup %6111  ;;  %vm2309_vm4 = vmxor %vm15270_vm11, %vm15328_vm5  ;;  %v5824_v18 = vsel %vm2425_vm2, 1.0, %v15949_v21  ;;  %vm15292_vm11 = vcmp.eq.f32.partialorder %v7053_v26, %v7578_v42 }
 0x1f8   : > { %15952 = vst [vmem:[#allocation142_spill] sm:$0xff] %v7625_v13  ;;  %v7635_v49 = vpop.eup %6113  ;;  %vm2426_vm14 = vmand %vm2298_vm9, %vm15323_vm13  ;;  %v3523_v35 = vmul.f32 %v7625_v13, %v5834_v52  ;;  %vm15293_vm9 = vcmp.eq.f32.partialorder %v6998_v5, %v7560_v34 }
 0x1f9   : > { %15953 = vst [vmem:[#allocation143_spill] sm:$0xff] %v7635_v49  ;;  %v7646_v41 = vpop.eup %6115  ;;  %vm2437_vm15 = vmand %vm2309_vm4, %vm15600_vm6  ;;  %v3524_v4 = vmul.f32 %v7635_v49, %v5835_v58  ;;  %v5825_v51 = vsel %vm2426_vm14, 1.0, %v15949_v21  ;;  %vm15294_vm14 = vcmp.eq.f32.partialorder %v6998_v5, %v7578_v42 }
 0x1fa   : > { %15954 = vst [vmem:[#allocation144_spill] sm:$0xff] %v7646_v41  ;;  %vm2310_vm8 = vmxor %vm15292_vm11, %vm15328_vm5  ;;  %v3513_v24 = vmul.f32 %v7646_v41, %v5824_v18  ;;  %v5836_v54 = vsel %vm2437_vm15, 1.0, %v15949_v21 }
 0x1fb   : > { %vm2438_vm0 = vmand %vm2310_vm8, %vm15323_vm13  ;;  %v3655_v52 = vadd.f32 %v3524_v4, %v3523_v35 }
 0x1fc   : > { %v7661_v19 = vpop.eup %6117  ;;  %v3641_v28 = vadd.f32 %v3640_v32, %v3513_v24  ;;  %v5837_v22 = vsel %vm2438_vm0, 1.0, %v15949_v21  ;;  %v2817_v24 = vpop.xlane.xlu1 %2816  ;;  %vm2299_vm15 = vmxor %vm1438_vm10, %vm15328_vm5 }
 0x1fd   : > { %15955 = vst [vmem:[#allocation145_spill] sm:$0xff] %v7661_v19  ;;  %v7664_v56 = vpop.eup %6119  ;;  %v3514_v58 = vmul.f32 %v7661_v19, %v5825_v51  ;;  %vm2300_vm2 = vmxor %vm1439_vm12, %vm15328_vm5 }
 0x1fe   : > { %15956 = vst [vmem:[#allocation146_spill] sm:$0xff] %v7664_v56  ;;  %v3525_v49 = vmul.f32 %v7664_v56, %v5836_v54  ;;  %v7672_v13 = vpop.eup %6121  ;;  %vm2301_vm10 = vmxor %vm15293_vm9, %vm15328_vm5 }
 0x1ff   : > { %15957 = vst [vmem:[#allocation147_spill] sm:$0xff] %v7672_v13  ;;  %v3642_v18 = vadd.f32 %v3641_v28, %v3514_v58  ;;  %v3526_v55 = vmul.f32 %v7672_v13, %v5837_v22  ;;  %v2837_v28 = vpop.xlane.xlu0 %2836  ;;  %vm7771_vm12 = vmand %vm2299_vm15, %vm15332_vm1 }
 0x200   : > { %v3656_v41 = vadd.f32 %v3655_v52, %v3525_v49  ;;  %v7676_v32 = vpop.xlane.xlu1 %2821  ;;  %vm7781_vm0 = vmxor %vm15294_vm14, %vm15328_vm5 }
 0x201   : > { %vm2428_vm11 = vmand %vm2300_vm2, %vm15612_vm3 }
 0x202   : > { %v3657_v31 = vadd.f32 %v3656_v41, %v3526_v55  ;;  %vm7793_vm9 = vmand %vm2301_vm10, %vm15600_vm6 }
 0x203   : > { %v7690_v52 = vpop.xlane.xlu0 %2846 }
 0x204   : > { %v7678_v23 = vpop.xlane.xlu1 %2831 }
 0x208   : > { %v7680_v35 = vpop.xlane.xlu1 %2841 }
 0x20c   : > { %v7682_v4 = vpop.xlane.xlu1 %2851 }
 0x20f   : > { %3643 = vadd.xlane.f32.xlu1 %v3642_v18 }
 0x210   : > { %v7684_v54 = vpop.xlane.xlu1 %2861 }
 0x211   : > { %15958 = vst [vmem:[#allocation148_spill] sm:$0xff] %v7684_v54 }
 0x213   : > { %3658 = vadd.xlane.f32.xlu1 %v3657_v31  ;;  %v7694_v31 = vpop.xlane.xlu0 %2856 }
 0x214   : > { %v7686_v51 = vpop.xlane.xlu1 %2871 }
 0x215   : > { %15959 = vst [vmem:[#allocation149_spill] sm:$0xff] %v7686_v51 }
 0x217   : > { %v7698_v41 = vpop.xlane.xlu0 %2866 }
 0x218   : > { %v7688_v49 = vpop.xlane.xlu1 %2881 }
 0x219   : > { %15960 = vst [vmem:[#allocation150_spill] sm:$0xff] %v7688_v49  ;;  %v7710_v49 = vmax.f32 %v2817_v24, 0.0 }
 0x21b   : > { %v7702_v18 = vpop.xlane.xlu0 %2876  ;;  %15968 = vst [vmem:[#allocation158_spill] sm:$0xff] %v7710_v49 }
 0x21c   : > { %v7692_v22 = vpop.xlane.xlu1 %2891  ;;  %15964 = vst [vmem:[#allocation154_spill] sm:$0xff] %v7702_v18 }
 0x21d   : > { %15961 = vst [vmem:[#allocation151_spill] sm:$0xff] %v7692_v22 }
 0x21f   : > { %v7706_v56 = vpop.xlane.xlu0 %2886 }
 0x220   : > { %v7696_v55 = vpop.xlane.xlu1 %2901  ;;  %15966 = vst [vmem:[#allocation156_spill] sm:$0xff] %v7706_v56 }
 0x221   : > { %15962 = vst [vmem:[#allocation152_spill] sm:$0xff] %v7696_v55  ;;  %v7717_v55 = vmax.f32 %v7523_v7, 0.0 }
 0x223   : > { %v7712_v51 = vpop.xlane.xlu0 %2896  ;;  %15971 = vst [vmem:[#allocation161_spill] sm:$0xff] %v7717_v55  ;;  %v3091_v24 = vsub.f32 %v7018_v9, %v7717_v55  ;;  %v3092_v7 = vsub.f32 %v7026_v16, %v7717_v55  ;;  %v3094_v9 = vsub.f32 %v7055_v27, %v7717_v55  ;;  %v5826_v27 = vsel %vm7771_vm12, 1.0, %v15949_v21 }
 0x224   : > { %v7700_v58 = vpop.xlane.xlu1 %2911  ;;  %15969 = vst [vmem:[#allocation159_spill] sm:$0xff] %v7712_v51 }
 0x225   : > { %15963 = vst [vmem:[#allocation153_spill] sm:$0xff] %v7700_v58  ;;  %v3099_v58 = vsub.f32 %v7080_v39, %v7710_v49  ;;  %v3101_v39 = vsub.f32 %v7098_v48, %v7710_v49 }
 0x227   : > { %v7719_v54 = vpop.xlane.xlu0 %2906  ;;  %v3235_v51 = vmul.f32 1.442695, %v3099_v58  ;;  %v3221_v58 = vmul.f32 1.442695, %v3092_v7 }
 0x228   : > { %v7704_v13 = vpop.xlane.xlu1 %2921  ;;  %15972 = vst [vmem:[#allocation162_spill] sm:$0xff] %v7719_v54 }
 0x229   : > { %15965 = vst [vmem:[#allocation155_spill] sm:$0xff] %v7704_v13  ;;  %v3100_v13 = vsub.f32 %v7087_v44, %v7710_v49  ;;  %v3219_v44 = vmul.f32 1.442695, %v3091_v24  ;;  %6123 = vpow2.f32 %v3235_v51  ;;  %v7759_v51 = vmax.f32 %v2837_v28, 0.0 }
 0x22a   : > { %v3225_v24 = vmul.f32 1.442695, %v3094_v9 }
 0x22b   : > { %v3237_v54 = vmul.f32 1.442695, %v3100_v13  ;;  %15978 = vst [vmem:[#allocation168_spill] sm:$0xff] %v7759_v51 }
 0x22c   : > { %v7708_v19 = vpop.xlane.xlu1 %2931 }
 0x22d   : > { %15967 = vst [vmem:[#allocation157_spill] sm:$0xff] %v7708_v19  ;;  %v7727_v19 = vpop.xlane.xlu0 %2916  ;;  %6125 = vpow2.f32 %v3237_v54 }
 0x22e   : > { %6127 = vpow2.f32 %v3219_v44  ;;  %v3116_v44 = vsub.f32 %v7169_v45, %v7759_v51 }
 0x22f   : > { %6129 = vpow2.f32 %v3221_v58 }
 0x230   : > { %v7714_v22 = vpop.xlane.xlu1 %2941 }
 0x231   : > { %15970 = vst [vmem:[#allocation160_spill] sm:$0xff] %v7714_v22  ;;  %v7739_v56 = vpop.xlane.xlu0 %2926 }
 0x232   : > { %15975 = vst [vmem:[#allocation165_spill] sm:$0xff] %v7739_v56 }
 0x234   : > { %v7723_v18 = vpop.xlane.xlu1 %2951 }
 0x235   : > { %15973 = vst [vmem:[#allocation163_spill] sm:$0xff] %v7723_v18  ;;  %v3093_v18 = vsub.f32 %v7024_v15, %v7717_v55  ;;  %v3102_v15 = vsub.f32 %v7120_v8, %v7710_v49  ;;  %v7757_v54 = vpop.xlane.xlu0 %2936  ;;  %v3117_v55 = vsub.f32 %v7167_v38, %v7759_v51  ;;  %v3269_v8 = vmul.f32 1.442695, %v3116_v44 }
 0x236   : > { %15977 = vst [vmem:[#allocation167_spill] sm:$0xff] %v7757_v54 }
 0x237   : > { %v3223_v16 = vmul.f32 1.442695, %v3093_v18  ;;  %v3241_v28 = vmul.f32 1.442695, %v3102_v15  ;;  %v3115_v15 = vsub.f32 %v7164_v25, %v7759_v51  ;;  %v5827_v25 = vsel %vm2428_vm11, 1.0, %v15949_v21 }
 0x238   : > { %v7731_v22 = vpop.xlane.xlu1 %2961  ;;  %v3118_v18 = vsub.f32 %v7178_v11, %v7759_v51  ;;  %v3271_v44 = vmul.f32 1.442695, %v3117_v55 }
 0x239   : > { %15974 = vst [vmem:[#allocation164_spill] sm:$0xff] %v7731_v22  ;;  %v3239_v22 = vmul.f32 1.442695, %v3101_v39  ;;  %v7787_v7 = vpop.xlane.xlu0 %2946  ;;  %v7809_v39 = vpop.eup %6123 }
 0x23a   : > { %15983 = vst [vmem:[#allocation169_spill] sm:$0xff] %v7787_v7  ;;  %15988 = vst [vmem:[#allocation170_spill] sm:$0xff] %v7809_v39  ;;  %v7817_v58 = vpop.eup %6125  ;;  %v3515_v7 = vmul.f32 %v7809_v39, %v5826_v27  ;;  %v3273_v39 = vmul.f32 1.442695, %v3118_v18 }
 0x23b   : > { %6131 = vpow2.f32 %v3239_v22  ;;  %15989 = vst [vmem:[#allocation171_spill] sm:$0xff] %v7817_v58  ;;  %v3516_v38 = vmul.f32 %v7817_v58, %v5827_v25 }
 0x23c   : > { %v7747_v13 = vpop.permute.xlu1 %1251  ;;  %6133 = vpow2.f32 %v3223_v16 }
 0x23d   : > { %15976 = vst [vmem:[#allocation166_spill] sm:$0xff] %v7747_v13  ;;  %vm15295_vm4 = vcmp.eq.f32.partialorder %v7747_v13, %v6962_v59  ;;  %vm15300_vm8 = vcmp.eq.f32.partialorder %v7747_v13, %v6973_v0  ;;  %vm15315_vm15 = vcmp.eq.f32.partialorder %v7747_v13, %v7560_v34  ;;  %vm15314_vm2 = vcmp.eq.f32.partialorder %v7747_v13, %v7578_v42  ;;  %v7831_v49 = vpop.xlane.xlu0 %2956 }
 0x23e   : > { %vm7801_vm14 = vmxor %vm15295_vm4, %vm15328_vm5  ;;  %6135 = vpow2.f32 %v3225_v24  ;;  %15992 = vst [vmem:[#allocation172_spill] sm:$0xff] %v7831_v49  ;;  %v7849_v49 = vpop.eup %6127  ;;  %v5828_v24 = vsel %vm7793_vm9, 1.0, %v15949_v21  ;;  %v3645_v45 = vadd.f32 %v3516_v38, %v3515_v7 }
 0x23f   : > { %vm2292_vm10 = vmxor %vm15300_vm8, %vm15328_vm5  ;;  %6137 = vpow2.f32 %v3241_v28  ;;  %v3267_v28 = vmul.f32 1.442695, %v3115_v15  ;;  %15995 = vst [vmem:[#allocation173_spill] sm:$0xff] %v7849_v49  ;;  %v7856_v54 = vpop.eup %6129 }
 0x240   : > { %vm7823_vm4 = vmxor %vm15315_vm15, %vm15328_vm5  ;;  %15996 = vst [vmem:[#allocation174_spill] sm:$0xff] %v7856_v54 }
 0x241   : > { %vm7837_vm8 = vmxor %vm15314_vm2, %vm15328_vm5  ;;  %v7866_v51 = vpop.permute.xlu0 %1281  ;;  %6139 = vpow2.f32 %v3267_v28 }
 0x242   : > { %vm2419_vm12 = vmand %vm7801_vm14, %vm15332_vm1  ;;  %15998 = vst [vmem:[#allocation176_spill] sm:$0xff] %v7866_v51  ;;  %6141 = vpow2.f32 %v3269_v8  ;;  %vm15322_vm9 = vcmp.eq.f32.partialorder %v7866_v51, %v6962_v59 }
 0x243   : > { %vm2420_vm11 = vmand %vm2292_vm10, %vm15612_vm3  ;;  %v5818_v13 = vsel %vm2419_vm12, 1.0, %v15949_v21  ;;  %6143 = vpow2.f32 %v3271_v44 }
 0x244   : > { %vm2421_vm14 = vmand %vm7823_vm4, %vm15600_vm6  ;;  %v5819_v22 = vsel %vm2420_vm11, 1.0, %v15949_v21  ;;  %v3507_v15 = vmul.f32 %v7849_v49, %v5818_v13  ;;  %vm15320_vm11 = vcmp.eq.f32.partialorder %v7866_v51, %v7578_v42  ;;  %6145 = vpow2.f32 %v3273_v39 }
 0x245   : > { %v7864_v11 = vpop.eup %6131  ;;  %vm2422_vm10 = vmand %vm7837_vm8, %vm15323_vm13  ;;  %v5820_v27 = vsel %vm2421_vm14, 1.0, %v15949_v21  ;;  %v3508_v25 = vmul.f32 %v7856_v54, %v5819_v22  ;;  %vm15321_vm8 = vcmp.eq.f32.partialorder %v7866_v51, %v6973_v0  ;;  %v8345_v54 = vmax.f32 %v7682_v4, 0.0 }
 0x246   : > { %15997 = vst [vmem:[#allocation175_spill] sm:$0xff] %v7864_v11  ;;  %v7877_v58 = vpop.eup %6133  ;;  %v5821_v13 = vsel %vm2422_vm10, 1.0, %v15949_v21  ;;  %vm2430_vm4 = vmand %vm7781_vm0, %vm15323_vm13  ;;  %v3517_v16 = vmul.f32 %v7864_v11, %v5828_v24  ;;  %vm15316_vm0 = vcmp.eq.f32.partialorder %v7866_v51, %v7560_v34 }
 0x247   : > { %15999 = vst [vmem:[#allocation177_spill] sm:$0xff] %v7877_v58  ;;  %v3509_v49 = vmul.f32 %v7877_v58, %v5820_v27  ;;  %v3635_v56 = vadd.f32 %v3508_v25, %v3507_v15  ;;  %v5829_v38 = vsel %vm2430_vm4, 1.0, %v15949_v21  ;;  %vm2315_vm12 = vmxor %vm15322_vm9, %vm15328_vm5 }
 0x248   : > { %v7885_v55 = vpop.eup %6135  ;;  %v3646_v7 = vadd.f32 %v3645_v45, %v3517_v16  ;;  %vm2316_vm14 = vmxor %vm15321_vm8, %vm15328_vm5  ;;  %16097 = vst [vmem:[#allocation215_spill] sm:$0xff] %v8345_v54 }
 0x249   : > { %16000 = vst [vmem:[#allocation178_spill] sm:$0xff] %v7885_v55  ;;  %v3510_v18 = vmul.f32 %v7885_v55, %v5821_v13  ;;  %v3636_v28 = vadd.f32 %v3635_v56, %v3509_v49  ;;  %v7893_v8 = vpop.eup %6137  ;;  %vm2317_vm10 = vmxor %vm15316_vm0, %vm15328_vm5  ;;  %v7914_v49 = vmax.f32 %v7690_v52, 0.0 }
 0x24a   : > { %16001 = vst [vmem:[#allocation179_spill] sm:$0xff] %v7893_v8  ;;  %v3518_v56 = vmul.f32 %v7893_v8, %v5829_v38  ;;  %vm2318_vm4 = vmxor %vm15320_vm11, %vm15328_vm5  ;;  %v7954_v8 = vadd.s32 384, %v6971_v63 }
 0x24b   : > { %v3637_v9 = vadd.f32 %v3636_v28, %v3510_v18  ;;  %16002 = vst [vmem:[#allocation180_spill] sm:$0xff] %v7914_v49  ;;  %vm2443_vm2 = vmand %vm2315_vm12, %vm15332_vm1  ;;  %v7922_v22 = vpop.eup %6139  ;;  %v3123_v13 = vsub.f32 %v7189_v12, %v7914_v49  ;;  %v3124_v18 = vsub.f32 %v7193_v47, %v7914_v49  ;;  %v3126_v11 = vsub.f32 %v7202_v17, %v7914_v49 }
 0x24c   : > { %v3647_v39 = vadd.f32 %v3646_v7, %v3518_v56  ;;  %16003 = vst [vmem:[#allocation181_spill] sm:$0xff] %v7922_v22  ;;  %vm2444_vm15 = vmand %vm2316_vm14, %vm15612_vm3  ;;  %v5842_v15 = vsel %vm2443_vm2, 1.0, %v15949_v21  ;;  %v7927_v27 = vpop.eup %6141  ;;  %v3125_v7 = vsub.f32 %v7191_v40, %v7914_v49  ;;  %vm16011_vm14 = vcmp.eq.f32.partialorder %v6969_v62, %v7578_v42  ;;  %v6750_v40 = vld [vmem:[%s6906_s26 + $0x20] sm:$0xff] }
 0x24d   : > { %3638 = vadd.xlane.f32.xlu0 %v3637_v9  ;;  %16004 = vst [vmem:[#allocation182_spill] sm:$0xff] %v7927_v27  ;;  %vm2445_vm0 = vmand %vm2317_vm10, %vm15600_vm6  ;;  %v5843_v52 = vsel %vm2444_vm15, 1.0, %v15949_v21  ;;  %v3531_v25 = vmul.f32 %v7922_v22, %v5842_v15  ;;  %v7939_v45 = vpop.eup %6143  ;;  %v3283_v15 = vmul.f32 1.442695, %v3123_v13  ;;  %v7966_v13 = vmax.f32 %v7676_v32, 0.0 }
 0x24e   : > { %vm2446_vm12 = vmand %vm2318_vm4, %vm15323_vm13  ;;  %v5844_v44 = vsel %vm2445_vm0, 1.0, %v15949_v21  ;;  %v3532_v24 = vmul.f32 %v7927_v27, %v5843_v52  ;;  %16005 = vst [vmem:[#allocation183_spill] sm:$0xff] %v7939_v45  ;;  %v7945_v9 = vpop.eup %6145  ;;  %v7951_v52 = vadd.s32 256, %v6971_v63  ;;  %vm1637_vm0 = vcmp.ne.s32.totalorder %v6979_v2, %v7954_v8  ;;  %v16200_v63 = vld [vmem:[#allocation163_spill] sm:$0xff] }
 0x24f   : > { %v5845_v16 = vsel %vm2446_vm12, 1.0, %v15949_v21  ;;  %v3533_v28 = vmul.f32 %v7939_v45, %v5844_v44  ;;  %16006 = vst [vmem:[#allocation184_spill] sm:$0xff] %v7945_v9  ;;  %16008 = vst [vmem:[#allocation186_spill] sm:$0xff] %v7954_v8  ;;  %v3285_v44 = vmul.f32 1.442695, %v3124_v18  ;;  %6147 = vpow2.f32 %v3283_v15 }
 0x250   : > { %v3665_v38 = vadd.f32 %v3532_v24, %v3531_v25  ;;  %v3534_v56 = vmul.f32 %v7945_v9, %v5845_v16  ;;  %16007 = vst [vmem:[#allocation185_spill] sm:$0xff] %v7951_v52  ;;  %v7958_v24 = vpop.permute.xlu0 %1291  ;;  %v3287_v45 = vmul.f32 1.442695, %v3125_v7  ;;  %vm1785_vm15 = vmand %vm1436_vm7, %vm15600_vm6  ;;  %vm1636_vm2 = vcmp.ne.s32.totalorder %v6979_v2, %v7951_v52  ;;  %v8065_v9 = vpop.permute.xlu1 %1266 }
 0x251   : > { %3648 = vadd.xlane.f32.xlu0 %v3647_v39  ;;  %16009 = vst [vmem:[#allocation187_spill] sm:$0xff] %v7958_v24  ;;  %16010 = vst [vmem:[#allocation188_spill] sm:$0xff] %v7966_v13  ;;  %6149 = vpow2.f32 %v3285_v44  ;;  %v3289_v16 = vmul.f32 1.442695, %v3126_v11  ;;  %vm15326_vm7 = vcmp.eq.f32.partialorder %v7958_v24, %v6962_v59  ;;  %vm16012_vm4 = vcmp.eq.f32.partialorder %v6998_v5, %v7560_v34 }
 0x252   : > { %v3666_v39 = vadd.f32 %v3665_v38, %v3533_v28  ;;  %vm1786_vm10 = vmand %vm16011_vm14, %vm15323_vm13  ;;  %vm15324_vm11 = vcmp.eq.f32.partialorder %v7958_v24, %v6973_v0  ;;  %6151 = vpow2.f32 %v3287_v45  ;;  %vm15325_vm13 = vcmp.eq.f32.partialorder %v7958_v24, %v7560_v34  ;;  %16028 = vst [vmem:[#allocation191_spill] sm:$0xff] %v8065_v9 }
 0x253   : > { %vm7984_vm12 = vmand %vm16012_vm4, %vm15600_vm6  ;;  %vm16019_vm4 = vcmp.eq.f32.partialorder %v7053_v26, %v7560_v34  ;;  %v3103_v45 = vsub.f32 %v7100_v50, %v7966_v13  ;;  %6153 = vpow2.f32 %v3289_v16  ;;  %v3104_v18 = vsub.f32 %v7111_v53, %v7966_v13 }
 0x254   : > { %v3667_v25 = vadd.f32 %v3666_v39, %v3534_v56  ;;  %vm7990_vm14 = vmand %vm1785_vm15, %vm1636_vm2  ;;  %vm15327_vm2 = vcmp.eq.f32.partialorder %v7958_v24, %v7578_v42  ;;  %v3105_v7 = vsub.f32 %v7122_v10, %v7966_v13  ;;  %v6748_v39 = vld [vmem:[%s6906_s26 + $0x8] sm:$0xff] }
 0x255   : > { %vm7994_vm8 = vmand %vm1786_vm10, %vm1637_vm0  ;;  %v3243_v56 = vmul.f32 1.442695, %v3103_v45  ;;  %v3245_v15 = vmul.f32 1.442695, %v3104_v18  ;;  %v3106_v45 = vsub.f32 %v7139_v37, %v7966_v13  ;;  %v16274_v13 = vld [vmem:[#allocation21_spill] sm:$0xff] }
 0x256   : > { %3668 = vadd.xlane.f32.xlu1 %v3667_v25  ;;  %vm8003_vm9 = vmand %vm16019_vm4, %vm15600_vm6  ;;  %v6749_v25 = vld [vmem:[%s6906_s26 + $0x10] sm:$0xff]  ;;  %v3247_v22 = vmul.f32 1.442695, %v3105_v7 }
 0x257   : > { %vm2323_vm15 = vmxor %vm15326_vm7, %vm15328_vm5  ;;  %vm287_vm7 = vcmp.gt.f32.partialorder %v6749_v25, -1.5  ;;  %6155 = vpow2.f32 %v3243_v56  ;;  %v8099_v56 = vmax.f32 %v7694_v31, 0.0  ;;  %v3249_v32 = vmul.f32 1.442695, %v3106_v45 }
 0x258   : > { %vm2324_vm0 = vmxor %vm15324_vm11, %vm15328_vm5  ;;  %vm286_vm11 = vcmp.gt.f32.partialorder %v6748_v39, -1.5  ;;  %6157 = vpow2.f32 %v3245_v15  ;;  %v8111_v15 = vsel %vm7990_vm14, 1.0, %v15949_v21  ;;  %v8116_v31 = vsel %vm7994_vm8, 1.0, %v15949_v21 }
 0x259   : > { %vm8027_vm10 = vmxor %vm15325_vm13, %vm15328_vm5  ;;  %v8044_v44 = vpop.eup %6147  ;;  %v8077_v28 = vsel %vm286_vm11, 1.0, %v15949_v21  ;;  %16036 = vst [vmem:[#allocation195_spill] sm:$0xff] %v8099_v56  ;;  %6159 = vpow2.f32 %v3247_v22  ;;  %vm285_vm8 = vcmp.gt.f32.partialorder %v7479_v20, -1.5  ;;  %v3131_v2 = vsub.f32 %v7213_v36, %v8099_v56 }
 0x25a   : > { %vm8035_vm4 = vmxor %vm15327_vm2, %vm15328_vm5  ;;  %16026 = vst [vmem:[#allocation189_spill] sm:$0xff] %v8044_v44  ;;  %6161 = vpow2.f32 %v3249_v32  ;;  %v3132_v11 = vsub.f32 %v7217_v3, %v8099_v56  ;;  %v8161_v45 = vmul.f32 %v8111_v15, %v7062_v30  ;;  %v8165_v38 = vmul.f32 %v8116_v31, %v7085_v43  ;;  %v16052_v43 = vld [vmem:[#allocation22_spill] sm:$0xff] }
 0x25b   : > { %vm2451_vm13 = vmand %vm2323_vm15, %vm15332_vm1  ;;  %v8054_v17 = vpop.eup %6149  ;;  %vm289_vm15 = vcmp.gt.f32.partialorder %v6750_v40, -1.5  ;;  %vm1648_vm1 = vcmp.ne.s32.totalorder %v7060_v29, %v7951_v52  ;;  %16031 = vst [vmem:[#allocation193_spill] sm:$0xff] %v8077_v28  ;;  %v16072_v3 = vld [vmem:[#allocation2_spill] sm:$0xff] }
 0x25c   : > { %vm2452_vm5 = vmand %vm2324_vm0, %vm15612_vm3  ;;  %v5850_v16 = vsel %vm2451_vm13, 1.0, %v15949_v21  ;;  %16027 = vst [vmem:[#allocation190_spill] sm:$0xff] %v8054_v17  ;;  %vm16029_vm13 = vcmp.eq.s32.totalorder %v7614_v57, 1  ;;  %v8073_v55 = vpop.eup %6151 }
 0x25d   : > { %vm2453_vm2 = vmand %vm8027_vm10, %vm15600_vm6  ;;  %v5851_v18 = vsel %vm2452_vm5, 1.0, %v15949_v21  ;;  %v3539_v10 = vmul.f32 %v8044_v44, %v5850_v16  ;;  %16030 = vst [vmem:[#allocation192_spill] sm:$0xff] %v8073_v55  ;;  %v8081_v16 = vsel %vm287_vm7, 1.0, %v15949_v21  ;;  %vm16033_vm5 = vcmp.ne.s32.totalorder %v7008_v6, %v7951_v52 }
 0x25e   : > { %vm2454_vm0 = vmand %vm8035_vm4, %vm16029_vm13  ;;  %v5852_v37 = vsel %vm2453_vm2, 1.0, %v15949_v21  ;;  %v3540_v27 = vmul.f32 %v8054_v17, %v5851_v18  ;;  %16032 = vst [vmem:[#allocation194_spill] sm:$0xff] %v8081_v16  ;;  %v8102_v18 = vpop.eup %6153  ;;  %v8106_v16 = vsel %vm289_vm15, 1.0, %v15949_v21  ;;  %vm15340_vm7 = vcmp.eq.f32.partialorder %v8065_v9, %v7560_v34  ;;  %v16087_v17 = vld [vmem:[#allocation3_spill] sm:$0xff] }
 0x25f   : > { %vm8088_vm2 = vmand %vm7984_vm12, %vm16033_vm5  ;;  %v5853_v7 = vsel %vm2454_vm0, 1.0, %v15949_v21  ;;  %v3541_v39 = vmul.f32 %v8073_v55, %v5852_v37  ;;  %16037 = vst [vmem:[#allocation196_spill] sm:$0xff] %v8102_v18  ;;  %vm16043_vm12 = vmmov 1   ;;  %vm15339_vm10 = vcmp.eq.f32.partialorder %v8065_v9, %v7578_v42 }
 0x260   : > { %vm1925_vm11 = vmand %vm8003_vm9, %vm1648_vm1  ;;  %v3675_v25 = vadd.f32 %v3540_v27, %v3539_v10  ;;  %16038 = vst [vmem:[#allocation197_spill] sm:$0xff] %v8106_v16  ;;  %vm1442_vm1 = vcmp.eq.f32.partialorder %v8065_v9, %v6962_v59  ;;  %vm1443_vm9 = vcmp.eq.f32.partialorder %v8065_v9, %v6973_v0  ;;  %v3542_v10 = vmul.f32 %v8102_v18, %v5853_v7 }
 0x261   : > { %16039 = vst [vmem:[#allocation198_spill] sm:$0xff] %v8111_v15  ;;  %16040 = vst [vmem:[#allocation199_spill] sm:$0xff] %v8116_v31  ;;  %v8126_v40 = vsel %vm8088_vm2, 1.0, %v15949_v21  ;;  %v8129_v27 = vsel %vm1925_vm11, 1.0, %v15949_v21  ;;  %vm291_vm4 = vcmp.gt.f32.partialorder %v7483_v46, -1.5  ;;  %vm288_vm15 = vcmp.gt.f32.partialorder %v7486_v33, -1.5  ;;  %v8198_v16 = vpop.eup %6155 }
 0x262   : > { %v3676_v37 = vadd.f32 %v3675_v25, %v3541_v39  ;;  %16041 = vst [vmem:[#allocation200_spill] sm:$0xff] %v8126_v40  ;;  %16042 = vst [vmem:[#allocation201_spill] sm:$0xff] %v8129_v27  ;;  %vm293_vm13 = vcmp.gt.f32.partialorder %v7491_v14, -1.5  ;;  %v8168_v7 = vsel %vm285_vm8, 1.0, %v15949_v21  ;;  %v16049_v39 = vld [vmem:[#allocation134_spill] sm:$0xff]  ;;  %v8181_v30 = vmul.f32 %v8126_v40, %v7098_v48  ;;  %v8219_v28 = vpop.eup %6157  ;;  %v16064_v14 = vld [vmem:[#allocation51_spill] sm:$0xff] }
 0x263   : > { %vm8138_vm14 = vmxor %vm1442_vm1, %vm16043_vm12  ;;  %16048 = vst [vmem:[#allocation202_spill] sm:$0xff] %v8168_v7  ;;  %vm290_vm5 = vcmp.gt.f32.partialorder %v16049_v39, -1.5  ;;  %v8185_v32 = vmul.f32 %v8129_v27, %v16052_v43  ;;  %v8203_v48 = vsel %vm291_vm4, 1.0, %v15949_v21  ;;  %v8208_v43 = vsel %vm288_vm15, 1.0, %v15949_v21  ;;  %v8252_v25 = vpop.eup %6159  ;;  %v16141_v31 = vld [vmem:[#allocation156_spill] sm:$0xff] }
 0x264   : > { %v3677_v22 = vadd.f32 %v3676_v37, %v3542_v10  ;;  %vm8153_vm0 = vmxor %vm1443_vm9, %vm16043_vm12  ;;  %v16053_v10 = vld [vmem:[#allocation135_spill] sm:$0xff]  ;;  %16057 = vst [vmem:[#allocation134_spill] sm:$0xff] %v8198_v16  ;;  %v3299_v7 = vmul.f32 1.442695, %v3131_v2  ;;  %v8222_v46 = vsel %vm290_vm5, 1.0, %v15949_v21  ;;  %v8235_v2 = vmax.f32 %v7678_v23, 0.0  ;;  %v8258_v18 = vpop.eup %6161 }
 0x265   : > { %vm8175_vm2 = vmxor %vm15340_vm7, %vm16043_vm12  ;;  %vm295_vm11 = vcmp.gt.f32.partialorder %v16053_v10, -1.5  ;;  %16058 = vst [vmem:[#allocation22_spill] sm:$0xff] %v8203_v48  ;;  %v8213_v10 = vsel %vm293_vm13, 1.0, %v15949_v21  ;;  %v3301_v48 = vmul.f32 1.442695, %v3132_v11  ;;  %v8261_v55 = vmax.f32 %v7680_v35, 0.0 }
 0x266   : > { %3678 = vadd.xlane.f32.xlu1 %v3677_v22  ;;  %vm8192_vm8 = vmxor %vm15339_vm10, %vm16043_vm12  ;;  %v16056_v22 = vld [vmem:[#allocation47_spill] sm:$0xff]  ;;  %16059 = vst [vmem:[#allocation135_spill] sm:$0xff] %v8208_v43  ;;  %vm16061_vm10 = vcmp.eq.s32.totalorder %v6965_v60, 1  ;;  %v8232_v62 = vsel %vm295_vm11, 1.0, %v15949_v21  ;;  %v16067_v43 = vld [vmem:[#allocation136_spill] sm:$0xff]  ;;  %6163 = vpow2.f32 %v3299_v7  ;;  %v1565_v35 = vadd.s32 40, %v16072_v3 }
 0x267   : > { %v3133_v39 = vsub.f32 %v16056_v22, %v8099_v56  ;;  %16060 = vst [vmem:[#allocation203_spill] sm:$0xff] %v8213_v10  ;;  %vm2431_vm7 = vmand %vm8138_vm14, %vm16061_vm10  ;;  %v3134_v10 = vsub.f32 %v16064_v14, %v8099_v56  ;;  %v8244_v22 = vpop.permute.xlu0 %1301  ;;  %vm16069_vm10 = vcmp.eq.s32.totalorder %v7614_v57, 1  ;;  %v16071_v14 = vld [vmem:[#allocation137_spill] sm:$0xff]  ;;  %6165 = vpow2.f32 %v3301_v48 }
 0x268   : > { %16062 = vst [vmem:[#allocation204_spill] sm:$0xff] %v8219_v28  ;;  %16063 = vst [vmem:[#allocation205_spill] sm:$0xff] %v8222_v46  ;;  %v5830_v33 = vsel %vm2431_vm7, 1.0, %v15949_v21  ;;  %vm292_vm7 = vcmp.gt.f32.partialorder %v16067_v43, -1.5  ;;  %vm294_vm13 = vcmp.gt.f32.partialorder %v16071_v14, -1.5  ;;  %vm15416_vm5 = vcmp.eq.f32.partialorder %v8244_v22, %v6973_v0 }
 0x269   : > { %vm2432_vm4 = vmand %vm8153_vm0, %vm15612_vm3  ;;  %16065 = vst [vmem:[#allocation206_spill] sm:$0xff] %v8232_v62  ;;  %v3519_v46 = vmul.f32 %v8198_v16, %v5830_v33  ;;  %v3303_v62 = vmul.f32 1.442695, %v3133_v39  ;;  %v1566_v33 = vadd.s32 48, %v16072_v3  ;;  %v3305_v37 = vmul.f32 1.442695, %v3134_v10 }
 0x26a   : > { %16066 = vst [vmem:[#allocation207_spill] sm:$0xff] %v8235_v2  ;;  %vm2433_vm14 = vmand %vm8175_vm2, %vm15600_vm6  ;;  %v5831_v20 = vsel %vm2432_vm4, 1.0, %v15949_v21  ;;  %v1563_v39 = vadd.s32 24, %v16072_v3  ;;  %vm15419_vm0 = vcmp.eq.f32.partialorder %v8244_v22, %v6962_v59  ;;  %v1568_v10 = vadd.s32 64, %v16072_v3 }
 0x26b   : > { %16068 = vst [vmem:[#allocation136_spill] sm:$0xff] %v8244_v22  ;;  %vm2434_vm15 = vmand %vm8192_vm8, %vm16069_vm10  ;;  %v5832_v23 = vsel %vm2433_vm14, 1.0, %v15949_v21  ;;  %v3520_v11 = vmul.f32 %v8219_v28, %v5831_v20  ;;  %v16075_v20 = vld [vmem:[#allocation24_spill] sm:$0xff]  ;;  %6167 = vpow2.f32 %v3303_v62  ;;  %vm15365_vm2 = vcmp.eq.f32.partialorder %v8244_v22, %v7560_v34 }
 0x26c   : > { %16070 = vst [vmem:[#allocation208_spill] sm:$0xff] %v8252_v25  ;;  %v5833_v36 = vsel %vm2434_vm15, 1.0, %v15949_v21  ;;  %v3521_v52 = vmul.f32 %v8252_v25, %v5832_v23  ;;  %16073 = vst [vmem:[#allocation137_spill] sm:$0xff] %v8258_v18  ;;  %v3111_v28 = vsub.f32 %v16075_v20, %v8235_v2  ;;  %vm15364_vm8 = vcmp.eq.f32.partialorder %v8244_v22, %v7578_v42  ;;  %v16084_v25 = vld [vmem:[#allocation33_spill] sm:$0xff]  ;;  %v8371_v20 = vpop.permute.xlu1 %1276  ;;  %v16108_v22 = vld [vmem:[#allocation59_spill] sm:$0xff] }
 0x26d   : > { %v3650_v16 = vadd.f32 %v3520_v11, %v3519_v46  ;;  %16074 = vst [vmem:[#allocation2_spill] sm:$0xff] %v8261_v55  ;;  %v3522_v7 = vmul.f32 %v8258_v18, %v5833_v36  ;;  %v16076_v46 = vld [vmem:[#allocation25_spill] sm:$0xff]  ;;  %vm8281_vm11 = vmxor %vm15419_vm0, %vm16043_vm12  ;;  %6169 = vpow2.f32 %v3305_v37  ;;  %v8292_v62 = vsel %vm292_vm7, 1.0, %v15949_v21 }
 0x26e   : > { %v3112_v23 = vsub.f32 %v16076_v46, %v8235_v2  ;;  %16080 = vst [vmem:[#allocation209_spill] sm:$0xff] %v8292_v62  ;;  %vm8298_vm4 = vmxor %vm15416_vm5, %vm16043_vm12  ;;  %v3259_v37 = vmul.f32 1.442695, %v3111_v28  ;;  %v8309_v43 = vsel %vm294_vm13, 1.0, %v15949_v21  ;;  %v8312_v62 = vmax.f32 %v7698_v41, 0.0 }
 0x26f   : > { %v3651_v48 = vadd.f32 %v3650_v16, %v3521_v52  ;;  %v16079_v52 = vld [vmem:[#allocation28_spill] sm:$0xff]  ;;  %16085 = vst [vmem:[#allocation210_spill] sm:$0xff] %v8309_v43  ;;  %v8315_v44 = vadd.s32 %v16087_v17, %v1566_v33  ;;  %vm8321_vm14 = vmxor %vm15365_vm2, %vm16043_vm12  ;;  %v8328_v43 = vadd.s32 %v16087_v17, %v1563_v39  ;;  %v8331_v41 = vadd.s32 %v16087_v17, %v1568_v10 }
 0x270   : > { %v3113_v16 = vsub.f32 %v16079_v52, %v8235_v2  ;;  %v3119_v52 = vsub.f32 %v16084_v25, %v8261_v55  ;;  %16086 = vst [vmem:[#allocation211_spill] sm:$0xff] %v8312_v62  ;;  %v8334_v33 = vadd.s32 %v16087_v17, %v1565_v35  ;;  %vm8340_vm7 = vmxor %vm15364_vm8, %vm16043_vm12  ;;  %v3261_v58 = vmul.f32 1.442695, %v3112_v23  ;;  %v16099_v35 = vld [vmem:[#allocation36_spill] sm:$0xff]  ;;  %v8354_v12 = vpop.eup %6163 }
 0x271   : > { %v3652_v36 = vadd.f32 %v3651_v48, %v3522_v7  ;;  %v16083_v7 = vld [vmem:[#allocation29_spill] sm:$0xff]  ;;  %16088 = vst [vmem:[#allocation3_spill] sm:$0xff] %v8315_v44  ;;  %16092 = vst [vmem:[#allocation212_spill] sm:$0xff] %v8328_v43  ;;  %v1570_v39 = vadd.s32 80, %v16072_v3  ;;  %vm16098_vm10 = vcmp.eq.s32.totalorder %v6965_v60, 1  ;;  %v3121_v47 = vsub.f32 %v16099_v35, %v8261_v55  ;;  %v8361_v25 = vpop.eup %6165  ;;  %v16102_v35 = vld [vmem:[#allocation54_spill] sm:$0xff] }
 0x272   : > { %v3114_v48 = vsub.f32 %v16083_v7, %v8235_v2  ;;  %v16091_v7 = vld [vmem:[#allocation34_spill] sm:$0xff]  ;;  %16093 = vst [vmem:[#allocation213_spill] sm:$0xff] %v8331_v41  ;;  %16094 = vst [vmem:[#allocation214_spill] sm:$0xff] %v8334_v33  ;;  %v3263_v10 = vmul.f32 1.442695, %v3113_v16  ;;  %6171 = vpow2.f32 %v3259_v37  ;;  %v3139_v18 = vsub.f32 %v16102_v35, %v8312_v62  ;;  %v16105_v37 = vld [vmem:[#allocation56_spill] sm:$0xff] }
 0x273   : > { %3653 = vadd.xlane.f32.xlu0 %v3652_v36  ;;  %v3120_v14 = vsub.f32 %v16091_v7, %v8261_v55  ;;  %vm2459_vm15 = vmand %vm8281_vm11, %vm16098_vm10  ;;  %16100 = vst [vmem:[#allocation216_spill] sm:$0xff] %v8354_v12  ;;  %v3275_v7 = vmul.f32 1.442695, %v3119_v52  ;;  %6173 = vpow2.f32 %v3261_v58  ;;  %v3140_v28 = vsub.f32 %v16105_v37, %v8312_v62  ;;  %v16148_v33 = vld [vmem:[#allocation67_spill] sm:$0xff] }
 0x274   : > { %vm2460_vm13 = vmand %vm8298_vm4, %vm15612_vm3  ;;  %v5858_v4 = vsel %vm2459_vm15, 1.0, %v15949_v21  ;;  %v3265_v23 = vmul.f32 1.442695, %v3114_v48  ;;  %16101 = vst [vmem:[#allocation217_spill] sm:$0xff] %v8361_v25  ;;  %vm16104_vm4 = vcmp.eq.s32.totalorder %v7614_v57, 1  ;;  %6175 = vpow2.f32 %v3263_v10 }
 0x275   : > { %vm2461_vm11 = vmand %vm8321_vm14, %vm15600_vm6  ;;  %v5859_v11 = vsel %vm2460_vm13, 1.0, %v15949_v21  ;;  %v3547_v16 = vmul.f32 %v8354_v12, %v5858_v4  ;;  %v3277_v46 = vmul.f32 1.442695, %v3120_v14  ;;  %16103 = vst [vmem:[#allocation218_spill] sm:$0xff] %v8371_v20  ;;  %v8381_v4 = vpop.eup %6167  ;;  %v16107_v14 = vld [vmem:[#allocation55_spill] sm:$0xff]  ;;  %vm15518_vm14 = vcmp.eq.f32.partialorder %v8371_v20, %v6962_v59 }
 0x276   : > { %vm2462_vm10 = vmand %vm8340_vm7, %vm16104_vm4  ;;  %v5860_v52 = vsel %vm2461_vm11, 1.0, %v15949_v21  ;;  %v3548_v48 = vmul.f32 %v8361_v25, %v5859_v11  ;;  %16106 = vst [vmem:[#allocation219_spill] sm:$0xff] %v8381_v4  ;;  %v3141_v12 = vsub.f32 %v16107_v14, %v8312_v62  ;;  %v3279_v53 = vmul.f32 1.442695, %v3121_v47  ;;  %v16110_v25 = vld [vmem:[#allocation37_spill] sm:$0xff]  ;;  %v16123_v14 = vld [vmem:[#allocation148_spill] sm:$0xff] }
 0x277   : > { %v5861_v35 = vsel %vm2462_vm10, 1.0, %v15949_v21  ;;  %v3549_v36 = vmul.f32 %v8381_v4, %v5860_v52  ;;  %6177 = vpow2.f32 %v3265_v23  ;;  %v3142_v11 = vsub.f32 %v16108_v22, %v8312_v62  ;;  %v8389_v58 = vpop.eup %6169  ;;  %vm8405_vm13 = vmxor %vm15518_vm14, %vm16043_vm12  ;;  %v16135_v4 = vld [vmem:[#allocation45_spill] sm:$0xff] }
 0x278   : > { %v3685_v50 = vadd.f32 %v3548_v48, %v3547_v16  ;;  %16109 = vst [vmem:[#allocation220_spill] sm:$0xff] %v8389_v58  ;;  %v3315_v37 = vmul.f32 1.442695, %v3139_v18  ;;  %v3122_v10 = vsub.f32 %v16110_v25, %v8261_v55  ;;  %6179 = vpow2.f32 %v3275_v7 }
 0x279   : > { %vm15472_vm7 = vcmp.eq.f32.partialorder %v8371_v20, %v6973_v0  ;;  %v3550_v47 = vmul.f32 %v8389_v58, %v5861_v35  ;;  %v3317_v23 = vmul.f32 1.442695, %v3140_v28  ;;  %vm15366_vm15 = vcmp.eq.f32.partialorder %v8371_v20, %v7560_v34  ;;  %v16115_v28 = vld [vmem:[#allocation41_spill] sm:$0xff] }
 0x27a   : > { %v3686_v16 = vadd.f32 %v3685_v50, %v3549_v36  ;;  %v1567_v52 = vadd.s32 56, %v16072_v3  ;;  %v3319_v48 = vmul.f32 1.442695, %v3141_v12  ;;  %6181 = vpow2.f32 %v3277_v46  ;;  %vm8415_vm4 = vmxor %vm15472_vm7, %vm16043_vm12 }
 0x27b   : > { %vm15369_vm11 = vcmp.eq.f32.partialorder %v8371_v20, %v7578_v42  ;;  %v3321_v50 = vmul.f32 1.442695, %v3142_v11  ;;  %6183 = vpow2.f32 %v3279_v53  ;;  %v1572_v46 = vadd.s32 96, %v16072_v3  ;;  %vm8434_vm10 = vmxor %vm15366_vm15, %vm16043_vm12  ;;  %v16146_v20 = vld [vmem:[#allocation63_spill] sm:$0xff] }
 0x27c   : > { %v3687_v18 = vadd.f32 %v3686_v16, %v3550_v47  ;;  %6185 = vpow2.f32 %v3315_v37  ;;  %v3281_v35 = vmul.f32 1.442695, %v3122_v10  ;;  %v3127_v36 = vsub.f32 %v16115_v28, %v8345_v54  ;;  %v8422_v47 = vpop.eup %6171  ;;  %v16117_v16 = vld [vmem:[#allocation154_spill] sm:$0xff]  ;;  %vm8453_vm8 = vmxor %vm15369_vm11, %vm16043_vm12 }
 0x27d   : > { %16116 = vst [vmem:[#allocation221_spill] sm:$0xff] %v8422_v47  ;;  %v8425_v11 = vmax.f32 %v16117_v16, 0.0  ;;  %v8428_v53 = vadd.s32 %v16087_v17, %v1570_v39  ;;  %6187 = vpow2.f32 %v3317_v23  ;;  %v16122_v37 = vld [vmem:[#allocation42_spill] sm:$0xff]  ;;  %v8441_v25 = vmax.f32 %v16123_v14, 0.0  ;;  %v16125_v16 = vld [vmem:[#allocation149_spill] sm:$0xff]  ;;  %v8457_v23 = vpop.eup %6173  ;;  %vm2440_vm11 = vmand %vm8415_vm4, %vm15612_vm3 }
 0x27e   : > { %3688 = vadd.xlane.f32.xlu1 %v3687_v18  ;;  %v3128_v10 = vsub.f32 %v16122_v37, %v8345_v54  ;;  %v8444_v58 = vmax.f32 %v16125_v16, 0.0  ;;  %v8447_v39 = vadd.s32 %v16087_v17, %v1567_v52  ;;  %6189 = vpow2.f32 %v3319_v48  ;;  %16130 = vst [vmem:[#allocation224_spill] sm:$0xff] %v8457_v23  ;;  %v16131_v37 = vld [vmem:[#allocation150_spill] sm:$0xff]  ;;  %v16134_v52 = vld [vmem:[#allocation44_spill] sm:$0xff] }
 0x27f   : > { %16118 = vst [vmem:[#allocation154_spill] sm:$0xff] %v8425_v11  ;;  %16119 = vst [vmem:[#allocation222_spill] sm:$0xff] %v8428_v53  ;;  %v8460_v14 = vmax.f32 %v16131_v37, 0.0  ;;  %vm16133_vm2 = vcmp.eq.s32.totalorder %v6965_v60, 1  ;;  %6191 = vpow2.f32 %v3321_v50  ;;  %v3129_v16 = vsub.f32 %v16134_v52, %v8345_v54  ;;  %v8470_v53 = vpop.eup %6175  ;;  %v16139_v52 = vld [vmem:[#allocation62_spill] sm:$0xff] }
 0x280   : > { %16124 = vst [vmem:[#allocation148_spill] sm:$0xff] %v8441_v25  ;;  %16126 = vst [vmem:[#allocation149_spill] sm:$0xff] %v8444_v58  ;;  %v3130_v28 = vsub.f32 %v16135_v4, %v8345_v54  ;;  %v8473_v48 = vadd.s32 %v16087_v17, %v1572_v46  ;;  %6193 = vpow2.f32 %v3281_v35  ;;  %v3291_v50 = vmul.f32 1.442695, %v3127_v36  ;;  %v8495_v36 = vpop.permute.xlu0 %1311 }
 0x281   : > { %16127 = vst [vmem:[#allocation223_spill] sm:$0xff] %v8447_v39  ;;  %16132 = vst [vmem:[#allocation150_spill] sm:$0xff] %v8460_v14  ;;  %v8480_v37 = vpop.eup %6177  ;;  %v5839_v4 = vsel %vm2440_vm11, 1.0, %v15949_v21  ;;  %v3293_v12 = vmul.f32 1.442695, %v3128_v10  ;;  %v8493_v35 = vmax.f32 %v16141_v31, 0.0  ;;  %v3149_v31 = vsub.f32 %v16146_v20, %v8425_v11 }
 0x282   : > { %vm2439_vm15 = vmand %vm8405_vm13, %vm16133_vm2  ;;  %16136 = vst [vmem:[#allocation225_spill] sm:$0xff] %v8470_v53  ;;  %v8490_v39 = vpop.eup %6179  ;;  %v3295_v24 = vmul.f32 1.442695, %v3129_v16  ;;  %v3297_v41 = vmul.f32 1.442695, %v3130_v28  ;;  %v3150_v54 = vsub.f32 %v16148_v33, %v8425_v11  ;;  %6195 = vpow2.f32 %v3291_v50 }
 0x283   : > { %16137 = vst [vmem:[#allocation226_spill] sm:$0xff] %v8473_v48  ;;  %v5838_v7 = vsel %vm2439_vm15, 1.0, %v15949_v21  ;;  %16138 = vst [vmem:[#allocation227_spill] sm:$0xff] %v8480_v37  ;;  %v3147_v48 = vsub.f32 %v16139_v52, %v8425_v11  ;;  %vm16144_vm15 = vcmp.eq.s32.totalorder %v7614_v57, 1  ;;  %6197 = vpow2.f32 %v3293_v12 }
 0x284   : > { %vm2441_vm2 = vmand %vm8434_vm10, %vm15600_vm6  ;;  %v3527_v46 = vmul.f32 %v8422_v47, %v5838_v7  ;;  %16140 = vst [vmem:[#allocation228_spill] sm:$0xff] %v8490_v39  ;;  %v3528_v7 = vmul.f32 %v8457_v23, %v5839_v4  ;;  %v16145_v47 = vld [vmem:[#allocation64_spill] sm:$0xff]  ;;  %v8508_v51 = vpop.eup %6181  ;;  %vm15397_vm11 = vcmp.eq.f32.partialorder %v8495_v36, %v6973_v0  ;;  %vm15393_vm4 = vcmp.eq.f32.partialorder %v8495_v36, %v7560_v34 }
 0x285   : > { %16142 = vst [vmem:[#allocation156_spill] sm:$0xff] %v8493_v35  ;;  %16143 = vst [vmem:[#allocation229_spill] sm:$0xff] %v8495_v36  ;;  %v5840_v22 = vsel %vm2441_vm2, 1.0, %v15949_v21  ;;  %v3148_v52 = vsub.f32 %v16145_v47, %v8425_v11  ;;  %v8513_v4 = vpop.eup %6183  ;;  %v1569_v47 = vadd.s32 72, %v16072_v3  ;;  %v3331_v23 = vmul.f32 1.442695, %v3147_v48 }
 0x286   : > { %vm2442_vm13 = vmand %vm8453_vm8, %vm16144_vm15  ;;  %16147 = vst [vmem:[#allocation230_spill] sm:$0xff] %v8508_v51  ;;  %v3529_v44 = vmul.f32 %v8470_v53, %v5840_v22  ;;  %v3660_v18 = vadd.f32 %v3528_v7, %v3527_v46  ;;  %vm15398_vm8 = vcmp.eq.f32.partialorder %v8495_v36, %v6962_v59  ;;  %v8518_v16 = vpop.eup %6185  ;;  %v1574_v50 = vadd.s32 112, %v16072_v3  ;;  %v16168_v11 = vld [vmem:[#allocation152_spill] sm:$0xff] }
 0x287   : > { %v5841_v10 = vsel %vm2442_vm13, 1.0, %v15949_v21  ;;  %16149 = vst [vmem:[#allocation231_spill] sm:$0xff] %v8513_v4  ;;  %16150 = vst [vmem:[#allocation232_spill] sm:$0xff] %v8518_v16  ;;  %v3333_v22 = vmul.f32 1.442695, %v3148_v52  ;;  %v8523_v7 = vpop.eup %6187  ;;  %6199 = vpow2.f32 %v3295_v24  ;;  %vm15402_vm2 = vcmp.eq.f32.partialorder %v8495_v36, %v7578_v42  ;;  %v16181_v36 = vld [vmem:[#allocation155_spill] sm:$0xff] }
 0x288   : > { %v3530_v28 = vmul.f32 %v8480_v37, %v5841_v10  ;;  %v3661_v46 = vadd.f32 %v3660_v18, %v3529_v44  ;;  %16151 = vst [vmem:[#allocation233_spill] sm:$0xff] %v8523_v7  ;;  %v3335_v33 = vmul.f32 1.442695, %v3149_v31  ;;  %v8528_v48 = vpop.eup %6189  ;;  %vm8534_vm10 = vmxor %vm15398_vm8, %vm16043_vm12  ;;  %v3337_v52 = vmul.f32 1.442695, %v3150_v54  ;;  %v16156_v31 = vld [vmem:[#allocation151_spill] sm:$0xff] }
 0x289   : > { %16152 = vst [vmem:[#allocation234_spill] sm:$0xff] %v8528_v48  ;;  %6201 = vpow2.f32 %v3297_v41  ;;  %v8540_v10 = vpop.eup %6191  ;;  %v8543_v24 = vmax.f32 %v16156_v31, 0.0  ;;  %v16158_v18 = vld [vmem:[#allocation159_spill] sm:$0xff]  ;;  %vm8552_vm15 = vmxor %vm15397_vm11, %vm16043_vm12  ;;  %v8560_v41 = vadd.s32 %v16087_v17, %v1569_v47  ;;  %v16166_v31 = vld [vmem:[#allocation49_spill] sm:$0xff]  ;;  %v8575_v55 = vmax.f32 %v16168_v11, 0.0 }
 0x28a   : > { %v3662_v44 = vadd.f32 %v3661_v46, %v3530_v28  ;;  %16155 = vst [vmem:[#allocation235_spill] sm:$0xff] %v8540_v10  ;;  %v8546_v20 = vmax.f32 %v16158_v18, 0.0  ;;  %v1571_v28 = vadd.s32 88, %v16072_v3  ;;  %6203 = vpow2.f32 %v3331_v23  ;;  %v8557_v54 = vpop.eup %6193  ;;  %vm8566_vm13 = vmxor %vm15393_vm4, %vm16043_vm12  ;;  %v16167_v23 = vld [vmem:[#allocation50_spill] sm:$0xff]  ;;  %v16176_v11 = vld [vmem:[#allocation153_spill] sm:$0xff] }
 0x28b   : > { %16157 = vst [vmem:[#allocation151_spill] sm:$0xff] %v8543_v24  ;;  %16162 = vst [vmem:[#allocation236_spill] sm:$0xff] %v8557_v54  ;;  %6205 = vpow2.f32 %v3333_v22  ;;  %v3135_v18 = vsub.f32 %v16166_v31, %v8441_v25  ;;  %v3136_v53 = vsub.f32 %v16167_v23, %v8441_v25  ;;  %v8578_v47 = vadd.s32 %v16087_v17, %v1574_v50  ;;  %v16173_v22 = vld [vmem:[#allocation52_spill] sm:$0xff]  ;;  %v16179_v50 = vld [vmem:[#allocation53_spill] sm:$0xff] }
 0x28c   : > { %16159 = vst [vmem:[#allocation159_spill] sm:$0xff] %v8546_v20  ;;  %16163 = vst [vmem:[#allocation237_spill] sm:$0xff] %v8560_v41  ;;  %3663 = vadd.xlane.f32.xlu0 %v3662_v44  ;;  %6207 = vpow2.f32 %v3335_v33  ;;  %v3137_v31 = vsub.f32 %v16173_v22, %v8441_v25  ;;  %v16174_v41 = vld [vmem:[#allocation162_spill] sm:$0xff]  ;;  %v8594_v62 = vmax.f32 %v16176_v11, 0.0  ;;  %vm16178_vm11 = vcmp.eq.s32.totalorder %v6965_v60, 1 }
 0x28d   : > { %16169 = vst [vmem:[#allocation152_spill] sm:$0xff] %v8575_v55  ;;  %16170 = vst [vmem:[#allocation238_spill] sm:$0xff] %v8578_v47  ;;  %v8591_v23 = vmax.f32 %v16174_v41, 0.0  ;;  %6209 = vpow2.f32 %v3337_v52  ;;  %v3138_v47 = vsub.f32 %v16179_v50, %v8441_v25  ;;  %v8603_v33 = vmax.f32 %v7727_v19, 0.0  ;;  %v8616_v52 = vpop.eup %6195  ;;  %v16188_v25 = vld [vmem:[#allocation70_spill] sm:$0xff] }
 0x28e   : > { %vm8584_vm4 = vmxor %vm15402_vm2, %vm16043_vm12  ;;  %16177 = vst [vmem:[#allocation153_spill] sm:$0xff] %v8594_v62  ;;  %v8606_v22 = vmax.f32 %v16181_v36, 0.0  ;;  %v8609_v41 = vadd.s32 %v16087_v17, %v1571_v28  ;;  %v3307_v28 = vmul.f32 1.442695, %v3135_v18  ;;  %v3309_v11 = vmul.f32 1.442695, %v3136_v53  ;;  %v8624_v50 = vpop.eup %6197 }
 0x28f   : > { %16175 = vst [vmem:[#allocation162_spill] sm:$0xff] %v8591_v23  ;;  %vm2467_vm8 = vmand %vm8534_vm10, %vm16178_vm11  ;;  %vm16187_vm10 = vcmp.eq.s32.totalorder %v7614_v57, 1  ;;  %v3155_v9 = vsub.f32 %v16188_v25, %v8493_v35  ;;  %v3311_v43 = vmul.f32 1.442695, %v3137_v31  ;;  %v16189_v53 = vld [vmem:[#allocation72_spill] sm:$0xff] }
 0x290   : > { %16180 = vst [vmem:[#allocation239_spill] sm:$0xff] %v8603_v33  ;;  %16182 = vst [vmem:[#allocation155_spill] sm:$0xff] %v8606_v22  ;;  %v5866_v12 = vsel %vm2467_vm8, 1.0, %v15949_v21  ;;  %6211 = vpow2.f32 %v3307_v28  ;;  %v1576_v28 = vadd.s32 128, %v16072_v3 }
 0x291   : > { %16183 = vst [vmem:[#allocation240_spill] sm:$0xff] %v8609_v41  ;;  %vm2468_vm2 = vmand %vm8552_vm15, %vm15612_vm3  ;;  %v3555_v36 = vmul.f32 %v8518_v16, %v5866_v12  ;;  %v8626_v41 = vpop.permute.xlu1 %1286  ;;  %v3156_v12 = vsub.f32 %v16189_v53, %v8493_v35  ;;  %v3313_v16 = vmul.f32 1.442695, %v3138_v47  ;;  %v16195_v53 = vld [vmem:[#allocation71_spill] sm:$0xff]  ;;  %v3347_v2 = vmul.f32 1.442695, %v3155_v9 }
 0x292   : > { %16184 = vst [vmem:[#allocation241_spill] sm:$0xff] %v8616_v52  ;;  %vm2469_vm11 = vmand %vm8566_vm13, %vm15600_vm6  ;;  %v5867_v19 = vsel %vm2468_vm2, 1.0, %v15949_v21  ;;  %vm1641_vm2 = vcmp.ne.s32.totalorder %v7008_v6, %v7954_v8  ;;  %v3157_v47 = vsub.f32 %v16195_v53, %v8493_v35  ;;  %vm15428_vm5 = vcmp.eq.f32.partialorder %v8626_v41, %v7560_v34 }
 0x293   : > { %16185 = vst [vmem:[#allocation242_spill] sm:$0xff] %v8624_v50  ;;  %16186 = vst [vmem:[#allocation243_spill] sm:$0xff] %v8626_v41  ;;  %v5868_v37 = vsel %vm2469_vm11, 1.0, %v15949_v21  ;;  %v3556_v46 = vmul.f32 %v8523_v7, %v5867_v19  ;;  %v8650_v19 = vpop.eup %6199  ;;  %vm1649_vm11 = vcmp.ne.s32.totalorder %v7060_v29, %v7954_v8  ;;  %6213 = vpow2.f32 %v3309_v11 }
 0x294   : > { %vm2470_vm8 = vmand %vm8584_vm4, %vm16187_vm10  ;;  %vm16191_vm4 = vcmp.eq.f32.partialorder %v6998_v5, %v7578_v42  ;;  %16194 = vst [vmem:[#allocation244_spill] sm:$0xff] %v8650_v19  ;;  %v3557_v31 = vmul.f32 %v8528_v48, %v5868_v37  ;;  %v8666_v7 = vpop.eup %6201  ;;  %v8669_v37 = vmax.f32 %v16200_v63, 0.0  ;;  %v3351_v29 = vmul.f32 1.442695, %v3157_v47  ;;  %v16218_v47 = vld [vmem:[#allocation157_spill] sm:$0xff] }
 0x295   : > { %v5869_v18 = vsel %vm2470_vm8, 1.0, %v15949_v21  ;;  %vm16190_vm15 = vmmov %vm16187_vm10  ;;  %v3695_v25 = vadd.f32 %v3556_v46, %v3555_v36  ;;  %vm16196_vm8 = vcmp.eq.f32.partialorder %v7053_v26, %v7578_v42  ;;  %16199 = vst [vmem:[#allocation245_spill] sm:$0xff] %v8666_v7  ;;  %v16202_v36 = vld [vmem:[#allocation75_spill] sm:$0xff]  ;;  %v8675_v53 = vpop.eup %6203  ;;  %6215 = vpow2.f32 %v3311_v43 }
 0x296   : > { %vm8646_vm13 = vmand %vm16191_vm4, %vm16190_vm15  ;;  %16201 = vst [vmem:[#allocation163_spill] sm:$0xff] %v8669_v37  ;;  %vm15429_vm4 = vcmp.eq.f32.partialorder %v8626_v41, %v6962_v59  ;;  %v3158_v46 = vsub.f32 %v16202_v36, %v8493_v35  ;;  %v3558_v26 = vmul.f32 %v8540_v10, %v5869_v18  ;;  %v8689_v36 = vpop.eup %6205  ;;  %v3349_v35 = vmul.f32 1.442695, %v3156_v12  ;;  %v16213_v12 = vld [vmem:[#allocation165_spill] sm:$0xff] }
 0x297   : > { %vm8662_vm15 = vmand %vm16196_vm8, %vm16187_vm10  ;;  %16203 = vst [vmem:[#allocation246_spill] sm:$0xff] %v8675_v53  ;;  %vm15425_vm10 = vcmp.eq.f32.partialorder %v8626_v41, %v6973_v0  ;;  %v3696_v48 = vadd.f32 %v3695_v25, %v3557_v31  ;;  %v8703_v9 = vpop.eup %6207  ;;  %v8718_v44 = vmax.f32 %v16213_v12, 0.0  ;;  %v16215_v31 = vld [vmem:[#allocation121_spill] sm:$0xff]  ;;  %6217 = vpow2.f32 %v3313_v16  ;;  %v16222_v12 = vld [vmem:[#allocation164_spill] sm:$0xff] }
 0x298   : > { %vm8685_vm8 = vmand %vm8646_vm13, %vm1641_vm2  ;;  %16206 = vst [vmem:[#allocation247_spill] sm:$0xff] %v8689_v36  ;;  %vm15431_vm13 = vcmp.eq.f32.partialorder %v8626_v41, %v7578_v42  ;;  %v8715_v18 = vpop.eup %6209  ;;  %v3207_v5 = vsub.f32 %v16215_v31, %v8669_v37  ;;  %v8731_v43 = vmax.f32 %v16218_v47, 0.0  ;;  %v8737_v27 = vmax.f32 %v16222_v12, 0.0  ;;  %v16226_v16 = vld [vmem:[#allocation160_spill] sm:$0xff]  ;;  %v8795_v41 = vpop.permute.xlu0 %1321 }
 0x299   : > { %vm8699_vm0 = vmand %vm8662_vm15, %vm1649_vm11  ;;  %16209 = vst [vmem:[#allocation248_spill] sm:$0xff] %v8703_v9  ;;  %v3697_v11 = vadd.f32 %v3696_v48, %v3558_v26  ;;  %v3353_v48 = vmul.f32 1.442695, %v3158_v46  ;;  %v16220_v26 = vld [vmem:[#allocation167_spill] sm:$0xff]  ;;  %6219 = vpow2.f32 %v3347_v2  ;;  %v8748_v46 = vmax.f32 %v16226_v16, 0.0  ;;  %v16232_v2 = vld [vmem:[#allocation122_spill] sm:$0xff] }
 0x29a   : > { %vm8709_vm2 = vmxor %vm15429_vm4, %vm16043_vm12  ;;  %16212 = vst [vmem:[#allocation249_spill] sm:$0xff] %v8715_v18  ;;  %v8734_v10 = vmax.f32 %v16220_v26, 0.0  ;;  %v8751_v47 = vadd.s32 %v16087_v17, %v1576_v28  ;;  %6221 = vpow2.f32 %v3349_v35  ;;  %v16231_v26 = vld [vmem:[#allocation12_spill] sm:$0xff]  ;;  %v3208_v56 = vsub.f32 %v16232_v2, %v8669_v37  ;;  %v16235_v35 = vld [vmem:[#allocation169_spill] sm:$0xff]  ;;  %v8793_v8 = vpop.eup %6211 }
 0x29b   : > { %16214 = vst [vmem:[#allocation165_spill] sm:$0xff] %v8718_v44  ;;  %vm8726_vm11 = vmxor %vm15425_vm10, %vm16043_vm12  ;;  %3698 = vadd.xlane.f32.xlu1 %v3697_v11  ;;  %v3961_v12 = vadd.f32 %v16231_v26, %v8161_v45  ;;  %v1573_v16 = vadd.s32 104, %v16072_v3  ;;  %6223 = vpow2.f32 %v3351_v29  ;;  %v8773_v28 = vsel %vm8685_vm8, 1.0, %v15949_v21  ;;  %v16238_v2 = vld [vmem:[#allocation129_spill] sm:$0xff] }
 0x29c   : > { %16219 = vst [vmem:[#allocation157_spill] sm:$0xff] %v8731_v43  ;;  %16221 = vst [vmem:[#allocation167_spill] sm:$0xff] %v8734_v10  ;;  %v3451_v45 = vmul.f32 1.442695, %v3207_v5  ;;  %6225 = vpow2.f32 %v3353_v48  ;;  %v3215_v63 = vsub.f32 %v16238_v2, %v8737_v27  ;;  %v8806_v31 = vsel %vm8699_vm0, 1.0, %v15949_v21 }
 0x29d   : > { %16223 = vst [vmem:[#allocation164_spill] sm:$0xff] %v8737_v27  ;;  %vm8743_vm15 = vmxor %vm15428_vm5, %vm16043_vm12  ;;  %vm16233_vm5 = vcmp.eq.s32.totalorder %v6965_v60, 1  ;;  %v3453_v2 = vmul.f32 1.442695, %v3208_v56  ;;  %v8814_v37 = vadd.s32 %v16087_v17, %v1573_v16  ;;  %v8817_v15 = vpop.eup %6213  ;;  %v16249_v56 = vld [vmem:[#allocation172_spill] sm:$0xff]  ;;  %vm15468_vm0 = vcmp.eq.f32.partialorder %v8795_v41, %v6962_v59  ;;  %v16251_v16 = vld [vmem:[#allocation78_spill] sm:$0xff] }
 0x29e   : > { %16227 = vst [vmem:[#allocation160_spill] sm:$0xff] %v8748_v46  ;;  %16228 = vst [vmem:[#allocation250_spill] sm:$0xff] %v8751_v47  ;;  %v8776_v47 = vmax.f32 %v16235_v35, 0.0  ;;  %6227 = vpow2.f32 %v3451_v45  ;;  %v16270_v46 = vld [vmem:[#allocation14_spill] sm:$0xff] }
 0x29f   : > { %vm8757_vm10 = vmxor %vm15431_vm13, %vm16043_vm12  ;;  %16234 = vst [vmem:[#allocation12_spill] sm:$0xff] %v8773_v28  ;;  %6229 = vpow2.f32 %v3453_v2  ;;  %v16259_v2 = vld [vmem:[#allocation79_spill] sm:$0xff] }
 0x2a0   : > { %vm2447_vm4 = vmand %vm8709_vm2, %vm16233_vm5  ;;  %16236 = vst [vmem:[#allocation169_spill] sm:$0xff] %v8776_v47  ;;  %vm15458_vm2 = vcmp.eq.f32.partialorder %v8795_v41, %v7560_v34 }
 0x2a1   : > { %vm2448_vm13 = vmand %vm8726_vm11, %vm15612_vm3  ;;  %v5846_v26 = vsel %vm2447_vm4, 1.0, %v15949_v21  ;;  %16239 = vst [vmem:[#allocation251_spill] sm:$0xff] %v8793_v8  ;;  %vm16241_vm4 = vcmp.eq.s32.totalorder %v7614_v57, 1  ;;  %vm15461_vm11 = vcmp.eq.f32.partialorder %v8795_v41, %v7578_v42 }
 0x2a2   : > { %vm2449_vm5 = vmand %vm8743_vm15, %vm15600_vm6  ;;  %v5847_v5 = vsel %vm2448_vm13, 1.0, %v15949_v21  ;;  %v3535_v35 = vmul.f32 %v8490_v39, %v5846_v26  ;;  %16240 = vst [vmem:[#allocation252_spill] sm:$0xff] %v8795_v41  ;;  %v8809_v26 = vadd.f32 %v3961_v12, %v8165_v38  ;;  %v16244_v39 = vld [vmem:[#allocation130_spill] sm:$0xff]  ;;  %v8822_v38 = vpop.eup %6215  ;;  %v8825_v12 = vmax.f32 %v16249_v56, 0.0  ;;  %v16255_v56 = vld [vmem:[#allocation17_spill] sm:$0xff] }
 0x2a3   : > { %vm2450_vm8 = vmand %vm8757_vm10, %vm16241_vm4  ;;  %v5848_v48 = vsel %vm2449_vm5, 1.0, %v15949_v21  ;;  %v3536_v29 = vmul.f32 %v8508_v51, %v5847_v5  ;;  %16242 = vst [vmem:[#allocation253_spill] sm:$0xff] %v8806_v31  ;;  %v3216_v25 = vsub.f32 %v16244_v39, %v8737_v27  ;;  %v16247_v51 = vld [vmem:[#allocation18_spill] sm:$0xff]  ;;  %v3467_v39 = vmul.f32 1.442695, %v3215_v63  ;;  %v16289_v27 = vld [vmem:[#allocation68_spill] sm:$0xff] }
 0x2a4   : > { %16243 = vst [vmem:[#allocation254_spill] sm:$0xff] %v8809_v26  ;;  %16245 = vst [vmem:[#allocation255_spill] sm:$0xff] %v8814_v37  ;;  %v5849_v11 = vsel %vm2450_vm8, 1.0, %v15949_v21  ;;  %v3537_v5 = vmul.f32 %v8513_v4, %v5848_v48  ;;  %v3838_v49 = vmul.f32 %v8773_v28, %v16247_v51  ;;  %v3163_v26 = vsub.f32 %v16251_v16, %v8546_v20  ;;  %v8831_v37 = vpop.eup %6217 }
 0x2a5   : > { %16246 = vst [vmem:[#allocation256_spill] sm:$0xff] %v8817_v15  ;;  %v3670_v6 = vadd.f32 %v3536_v29, %v3535_v35  ;;  %16248 = vst [vmem:[#allocation18_spill] sm:$0xff] %v8822_v38  ;;  %vm15467_vm10 = vcmp.eq.f32.partialorder %v8795_v41, %v6973_v0  ;;  %v3538_v45 = vmul.f32 %v8557_v54, %v5849_v11  ;;  %v16253_v29 = vld [vmem:[#allocation80_spill] sm:$0xff]  ;;  %v8838_v48 = vpop.eup %6219  ;;  %v3469_v63 = vmul.f32 1.442695, %v3216_v25 }
 0x2a6   : > { %16250 = vst [vmem:[#allocation172_spill] sm:$0xff] %v8825_v12  ;;  %16252 = vst [vmem:[#allocation257_spill] sm:$0xff] %v8831_v37  ;;  %v3164_v35 = vsub.f32 %v16253_v29, %v8546_v20  ;;  %v3966_v16 = vadd.f32 %v16255_v56, %v8181_v30  ;;  %v8844_v4 = vpop.eup %6221  ;;  %v3165_v25 = vsub.f32 %v16259_v2, %v8546_v20  ;;  %6231 = vpow2.f32 %v3467_v39  ;;  %v16265_v2 = vld [vmem:[#allocation58_spill] sm:$0xff]  ;;  %v16269_v12 = vld [vmem:[#allocation13_spill] sm:$0xff] }
 0x2a7   : > { %v3671_v51 = vadd.f32 %v3670_v6, %v3537_v5  ;;  %16254 = vst [vmem:[#allocation258_spill] sm:$0xff] %v8838_v48  ;;  %16256 = vst [vmem:[#allocation17_spill] sm:$0xff] %v8844_v4  ;;  %v16260_v6 = vld [vmem:[#allocation57_spill] sm:$0xff]  ;;  %v8860_v56 = vpop.eup %6223  ;;  %v3363_v54 = vmul.f32 1.442695, %v3163_v26  ;;  %v3144_v28 = vsub.f32 %v16265_v2, %v8444_v58  ;;  %v8886_v47 = vadd.f32 %v16270_v46, %v16269_v12  ;;  %v16271_v26 = vld [vmem:[#allocation7_spill] sm:$0xff] }
 0x2a8   : > { %vm8850_vm13 = vmxor %vm15468_vm0, %vm16043_vm12  ;;  %v3143_v30 = vsub.f32 %v16260_v6, %v8444_v58  ;;  %16261 = vst [vmem:[#allocation259_spill] sm:$0xff] %v8860_v56  ;;  %v8874_v40 = vpop.eup %6225  ;;  %v3365_v6 = vmul.f32 1.442695, %v3164_v35  ;;  %v16273_v2 = vld [vmem:[#allocation20_spill] sm:$0xff]  ;;  %6233 = vpow2.f32 %v3469_v63  ;;  %vm16280_vm8 = vcmp.eq.s32.totalorder %v6965_v60, 1  ;;  %v16281_v37 = vld [vmem:[#allocation61_spill] sm:$0xff] }
 0x2a9   : > { %v3672_v5 = vadd.f32 %v3671_v51, %v3538_v45  ;;  %vm8866_vm15 = vmxor %vm15467_vm10, %vm16043_vm12  ;;  %v16264_v45 = vld [vmem:[#allocation83_spill] sm:$0xff]  ;;  %16266 = vst [vmem:[#allocation260_spill] sm:$0xff] %v8874_v40  ;;  %v16278_v46 = vld [vmem:[#allocation60_spill] sm:$0xff]  ;;  %v3367_v63 = vmul.f32 1.442695, %v3165_v25  ;;  %6235 = vpow2.f32 %v3363_v54 }
 0x2aa   : > { %v3166_v51 = vsub.f32 %v16264_v45, %v8546_v20  ;;  %vm8880_vm5 = vmxor %vm15458_vm2, %vm16043_vm12  ;;  %v16272_v45 = vld [vmem:[#allocation10_spill] sm:$0xff]  ;;  %v3145_v12 = vsub.f32 %v16278_v46, %v8444_v58  ;;  %v3323_v41 = vmul.f32 1.442695, %v3143_v30  ;;  %v3325_v46 = vmul.f32 1.442695, %v3144_v28  ;;  %v16283_v30 = vld [vmem:[#allocation27_spill] sm:$0xff] }
 0x2ab   : > { %3673 = vadd.xlane.f32.xlu0 %v3672_v5  ;;  %v8890_v20 = vadd.f32 %v16272_v45, %v16271_v26  ;;  %v8894_v5 = vadd.f32 %v16274_v13, %v16273_v2  ;;  %vm8902_vm4 = vmxor %vm15461_vm11, %vm16043_vm12  ;;  %v8908_v45 = vadd.f32 %v3966_v16, %v3838_v49  ;;  %v1578_v13 = vadd.s32 144, %v16072_v3  ;;  %v16286_v39 = vld [vmem:[#allocation65_spill] sm:$0xff] }
 0x2ac   : > { %vm2475_vm2 = vmand %vm8850_vm13, %vm16280_vm8  ;;  %v3146_v2 = vsub.f32 %v16281_v37, %v8444_v58  ;;  %v3369_v16 = vmul.f32 1.442695, %v3166_v51  ;;  %6237 = vpow2.f32 %v3365_v6  ;;  %v8932_v29 = vmul.f32 %v8806_v31, %v16283_v30  ;;  %v8934_v37 = vpop.permute.xlu1 %1296 }
 0x2ad   : > { %16279 = vst [vmem:[#allocation261_spill] sm:$0xff] %v8908_v45  ;;  %vm2476_vm11 = vmand %vm8866_vm15, %vm15612_vm3  ;;  %v5874_v49 = vsel %vm2475_vm2, 1.0, %v15949_v21  ;;  %v8922_v45 = vpop.eup %6227  ;;  %vm16285_vm2 = vcmp.eq.s32.totalorder %v7614_v57, 1  ;;  %v3327_v51 = vmul.f32 1.442695, %v3145_v12  ;;  %6239 = vpow2.f32 %v3367_v63  ;;  %v16290_v12 = vld [vmem:[#allocation69_spill] sm:$0xff] }
 0x2ae   : > { %16282 = vst [vmem:[#allocation262_spill] sm:$0xff] %v8922_v45  ;;  %vm2477_vm13 = vmand %vm8880_vm5, %vm15600_vm6  ;;  %v5875_v11 = vsel %vm2476_vm11, 1.0, %v15949_v21  ;;  %v3563_v25 = vmul.f32 %v8675_v53, %v5874_v49  ;;  %v3151_v49 = vsub.f32 %v16286_v39, %v8460_v14  ;;  %v3329_v30 = vmul.f32 1.442695, %v3146_v2  ;;  %v16287_v53 = vld [vmem:[#allocation66_spill] sm:$0xff]  ;;  %v8947_v45 = vpop.eup %6229 }
 0x2af   : > { %16284 = vst [vmem:[#allocation27_spill] sm:$0xff] %v8934_v37  ;;  %vm2478_vm15 = vmand %vm8902_vm4, %vm16285_vm2  ;;  %v5876_v54 = vsel %vm2477_vm13, 1.0, %v15949_v21  ;;  %v3564_v28 = vmul.f32 %v8689_v36, %v5875_v11  ;;  %v3152_v26 = vsub.f32 %v16287_v53, %v8460_v14  ;;  %6241 = vpow2.f32 %v3369_v16 }
 0x2b0   : > { %v5877_v6 = vsel %vm2478_vm15, 1.0, %v15949_v21  ;;  %16288 = vst [vmem:[#allocation263_spill] sm:$0xff] %v8947_v45  ;;  %v3565_v35 = vmul.f32 %v8703_v9, %v5876_v54  ;;  %v3153_v11 = vsub.f32 %v16289_v27, %v8460_v14  ;;  %vm15471_vm11 = vcmp.eq.f32.partialorder %v8934_v37, %v6962_v59  ;;  %v8958_v63 = vpop.eup %6231  ;;  %v16313_v9 = vld [vmem:[#allocation94_spill] sm:$0xff] }
 0x2b1   : > { %v3705_v43 = vadd.f32 %v3564_v28, %v3563_v25  ;;  %vm15470_vm5 = vcmp.eq.f32.partialorder %v8934_v37, %v6973_v0  ;;  %6243 = vpow2.f32 %v3323_v41  ;;  %v3154_v2 = vsub.f32 %v16290_v12, %v8460_v14  ;;  %16291 = vst [vmem:[#allocation264_spill] sm:$0xff] %v8958_v63  ;;  %v16292_v25 = vld [vmem:[#allocation86_spill] sm:$0xff]  ;;  %vm8971_vm8 = vmxor %vm15471_vm11, %vm16043_vm12  ;;  %v16323_v14 = vld [vmem:[#allocation76_spill] sm:$0xff] }
 0x2b2   : > { %v3566_v53 = vmul.f32 %v8715_v18, %v5877_v6  ;;  %6245 = vpow2.f32 %v3325_v46  ;;  %v3339_v16 = vmul.f32 1.442695, %v3151_v49  ;;  %vm15469_vm4 = vcmp.eq.f32.partialorder %v8934_v37, %v7560_v34  ;;  %v8965_v39 = vpop.eup %6233  ;;  %vm8985_vm2 = vmxor %vm15470_vm5, %vm16043_vm12 }
 0x2b3   : > { %v3706_v54 = vadd.f32 %v3705_v43, %v3565_v35  ;;  %6247 = vpow2.f32 %v3327_v51  ;;  %v3171_v28 = vsub.f32 %v16292_v25, %v8591_v23  ;;  %v3341_v27 = vmul.f32 1.442695, %v3152_v26  ;;  %16293 = vst [vmem:[#allocation265_spill] sm:$0xff] %v8965_v39  ;;  %v8975_v43 = vpop.permute.xlu0 %1331  ;;  %v16297_v51 = vld [vmem:[#allocation88_spill] sm:$0xff]  ;;  %v8994_v12 = vpop.eup %6235  ;;  %vm9003_vm15 = vmxor %vm15469_vm4, %vm16043_vm12 }
 0x2b4   : > { %16296 = vst [vmem:[#allocation266_spill] sm:$0xff] %v8975_v43  ;;  %vm15474_vm13 = vcmp.eq.f32.partialorder %v8934_v37, %v7578_v42  ;;  %v3172_v49 = vsub.f32 %v16297_v51, %v8591_v23  ;;  %v3343_v26 = vmul.f32 1.442695, %v3153_v11  ;;  %v8990_v35 = vadd.s32 %v16087_v17, %v1578_v13  ;;  %16302 = vst [vmem:[#allocation268_spill] sm:$0xff] %v8994_v12  ;;  %v16305_v13 = vld [vmem:[#allocation91_spill] sm:$0xff] }
 0x2b5   : > { %v3707_v46 = vadd.f32 %v3706_v54, %v3566_v53  ;;  %6249 = vpow2.f32 %v3329_v30  ;;  %v16301_v53 = vld [vmem:[#allocation87_spill] sm:$0xff]  ;;  %v3345_v25 = vmul.f32 1.442695, %v3154_v2  ;;  %v8997_v11 = vadd.s32 120, %v16072_v3  ;;  %v16306_v2 = vld [vmem:[#allocation26_spill] sm:$0xff]  ;;  %vm9023_vm4 = vmxor %vm15474_vm13, %vm16043_vm12 }
 0x2b6   : > { %16300 = vst [vmem:[#allocation267_spill] sm:$0xff] %v8990_v35  ;;  %v3173_v54 = vsub.f32 %v16301_v53, %v8591_v23  ;;  %v3174_v30 = vsub.f32 %v16305_v13, %v8591_v23  ;;  %6251 = vpow2.f32 %v3339_v16  ;;  %v9011_v53 = vadd.f32 %v16306_v2, %v8185_v32  ;;  %v9013_v35 = vpop.eup %6237  ;;  %v16311_v2 = vld [vmem:[#allocation73_spill] sm:$0xff]  ;;  %vm2456_vm13 = vmand %vm8985_vm2, %vm15612_vm3 }
 0x2b7   : > { %3708 = vadd.xlane.f32.xlu1 %v3707_v46  ;;  %16307 = vst [vmem:[#allocation26_spill] sm:$0xff] %v9013_v35  ;;  %vm15496_vm10 = vcmp.eq.f32.partialorder %v8975_v43, %v6962_v59  ;;  %vm15495_vm0 = vcmp.eq.f32.partialorder %v8975_v43, %v6973_v0  ;;  %v3379_v16 = vmul.f32 1.442695, %v3171_v28  ;;  %6253 = vpow2.f32 %v3341_v27  ;;  %v9035_v18 = vpop.eup %6239 }
 0x2b8   : > { %vm15494_vm5 = vcmp.eq.f32.partialorder %v8975_v43, %v7560_v34  ;;  %vm16310_vm11 = vcmp.eq.s32.totalorder %v6965_v60, 1  ;;  %v3381_v32 = vmul.f32 1.442695, %v3172_v49  ;;  %6255 = vpow2.f32 %v3343_v26  ;;  %16312 = vst [vmem:[#allocation269_spill] sm:$0xff] %v9035_v18  ;;  %vm9105_vm2 = vmxor %vm15495_vm0, %vm16043_vm12 }
 0x2b9   : > { %vm2455_vm7 = vmand %vm8971_vm8, %vm16310_vm11  ;;  %v3159_v13 = vsub.f32 %v16311_v2, %v8543_v24  ;;  %v3383_v28 = vmul.f32 1.442695, %v3173_v54  ;;  %6257 = vpow2.f32 %v3345_v25  ;;  %v3179_v41 = vsub.f32 %v16313_v9, %v8603_v33  ;;  %v9044_v36 = vpop.eup %6241  ;;  %v16315_v2 = vld [vmem:[#allocation96_spill] sm:$0xff]  ;;  %v16318_v9 = vld [vmem:[#allocation95_spill] sm:$0xff] }
 0x2ba   : > { %v5854_v27 = vsel %vm2455_vm7, 1.0, %v15949_v21  ;;  %16314 = vst [vmem:[#allocation270_spill] sm:$0xff] %v9044_v36  ;;  %vm2457_vm11 = vmand %vm9003_vm15, %vm15600_vm6  ;;  %v5855_v49 = vsel %vm2456_vm13, 1.0, %v15949_v21  ;;  %v3385_v6 = vmul.f32 1.442695, %v3174_v30  ;;  %v3180_v39 = vsub.f32 %v16315_v2, %v8603_v33  ;;  %v16320_v2 = vld [vmem:[#allocation99_spill] sm:$0xff] }
 0x2bb   : > { %v3543_v26 = vmul.f32 %v8616_v52, %v5854_v27  ;;  %v9054_v54 = vpop.eup %6243  ;;  %vm16317_vm7 = vcmp.eq.s32.totalorder %v7614_v57, 1  ;;  %v5856_v25 = vsel %vm2457_vm11, 1.0, %v15949_v21  ;;  %v3544_v51 = vmul.f32 %v8624_v50, %v5855_v49  ;;  %vm9127_vm11 = vmxor %vm15494_vm5, %vm16043_vm12 }
 0x2bc   : > { %16316 = vst [vmem:[#allocation271_spill] sm:$0xff] %v9054_v54  ;;  %vm2458_vm8 = vmand %vm9023_vm4, %vm16317_vm7  ;;  %6259 = vpow2.f32 %v3379_v16  ;;  %v3181_v63 = vsub.f32 %v16318_v9, %v8603_v33  ;;  %v9064_v27 = vpop.eup %6245  ;;  %v3182_v52 = vsub.f32 %v16320_v2, %v8603_v33  ;;  %v3355_v45 = vmul.f32 1.442695, %v3159_v13  ;;  %v16322_v16 = vld [vmem:[#allocation74_spill] sm:$0xff] }
 0x2bd   : > { %16319 = vst [vmem:[#allocation272_spill] sm:$0xff] %v9064_v27  ;;  %v5857_v30 = vsel %vm2458_vm8, 1.0, %v15949_v21  ;;  %6261 = vpow2.f32 %v3381_v32  ;;  %v9069_v37 = vpop.eup %6247  ;;  %v3545_v46 = vmul.f32 %v8650_v19, %v5856_v25  ;;  %v3680_v23 = vadd.f32 %v3544_v51, %v3543_v26  ;;  %vm9093_vm4 = vmxor %vm15496_vm10, %vm16043_vm12 }
 0x2be   : > { %16321 = vst [vmem:[#allocation273_spill] sm:$0xff] %v9069_v37  ;;  %v3395_v31 = vmul.f32 1.442695, %v3179_v41  ;;  %v3160_v49 = vsub.f32 %v16322_v16, %v8543_v24  ;;  %v1580_v9 = vadd.s32 160, %v16072_v3  ;;  %6263 = vpow2.f32 %v3383_v28  ;;  %v9082_v41 = vpop.permute.xlu1 %1306  ;;  %v16327_v28 = vld [vmem:[#allocation77_spill] sm:$0xff] }
 0x2bf   : > { %v3397_v50 = vmul.f32 1.442695, %v3180_v39  ;;  %v3161_v32 = vsub.f32 %v16323_v14, %v8543_v24  ;;  %v9077_v58 = vpop.eup %6249  ;;  %v3546_v13 = vmul.f32 %v8666_v7, %v5857_v30  ;;  %v3681_v2 = vadd.f32 %v3680_v23, %v3545_v46  ;;  %16326 = vst [vmem:[#allocation276_spill] sm:$0xff] %v9082_v41  ;;  %v16334_v46 = vld [vmem:[#allocation81_spill] sm:$0xff] }
 0x2c0   : > { %16324 = vst [vmem:[#allocation274_spill] sm:$0xff] %v9077_v58  ;;  %6265 = vpow2.f32 %v3385_v6  ;;  %v3399_v33 = vmul.f32 1.442695, %v3181_v63  ;;  %v9080_v25 = vpop.eup %6251  ;;  %v1577_v26 = vadd.s32 136, %v16072_v3  ;;  %v3401_v51 = vmul.f32 1.442695, %v3182_v52 }
 0x2c1   : > { %16325 = vst [vmem:[#allocation275_spill] sm:$0xff] %v9080_v25  ;;  %v3162_v39 = vsub.f32 %v16327_v28, %v8543_v24  ;;  %6267 = vpow2.f32 %v3355_v45  ;;  %v9087_v16 = vpop.eup %6253  ;;  %v3682_v63 = vadd.f32 %v3681_v2, %v3546_v13  ;;  %vm15497_vm13 = vcmp.eq.f32.partialorder %v8975_v43, %v7578_v42  ;;  %v16348_v28 = vld [vmem:[#allocation85_spill] sm:$0xff] }
 0x2c2   : > { %16328 = vst [vmem:[#allocation277_spill] sm:$0xff] %v9087_v16  ;;  %6269 = vpow2.f32 %v3395_v31  ;;  %v3357_v52 = vmul.f32 1.442695, %v3160_v49  ;;  %v9099_v6 = vpop.eup %6255  ;;  %v3359_v30 = vmul.f32 1.442695, %v3161_v32  ;;  %v3167_v2 = vsub.f32 %v16334_v46, %v8575_v55  ;;  %vm9145_vm8 = vmxor %vm15497_vm13, %vm16043_vm12 }
 0x2c3   : > { %16331 = vst [vmem:[#allocation278_spill] sm:$0xff] %v9099_v6  ;;  %6271 = vpow2.f32 %v3397_v50  ;;  %v9113_v13 = vadd.f32 %v9011_v53, %v8932_v29  ;;  %v9115_v31 = vpop.eup %6257  ;;  %vm15517_vm15 = vcmp.eq.f32.partialorder %v9082_v41, %v6962_v59  ;;  %v9121_v49 = vadd.s32 %v16087_v17, %v8997_v11  ;;  %3683 = vadd.xlane.f32.xlu0 %v3682_v63  ;;  %v16340_v29 = vld [vmem:[#allocation82_spill] sm:$0xff]  ;;  %vm2484_vm13 = vmand %vm9105_vm2, %vm15612_vm3 }
 0x2c4   : > { %16336 = vst [vmem:[#allocation280_spill] sm:$0xff] %v9115_v31  ;;  %6273 = vpow2.f32 %v3399_v33  ;;  %v3168_v53 = vsub.f32 %v16340_v29, %v8575_v55  ;;  %vm15515_vm7 = vcmp.eq.f32.partialorder %v9082_v41, %v6973_v0  ;;  %v9136_v32 = vadd.s32 %v16087_v17, %v1580_v9  ;;  %v16353_v50 = vld [vmem:[#allocation90_spill] sm:$0xff] }
 0x2c5   : > { %16335 = vst [vmem:[#allocation279_spill] sm:$0xff] %v9113_v13  ;;  %16337 = vst [vmem:[#allocation281_spill] sm:$0xff] %v9121_v49  ;;  %v9139_v11 = vadd.s32 %v16087_v17, %v1577_v26  ;;  %6275 = vpow2.f32 %v3401_v51  ;;  %v3361_v33 = vmul.f32 1.442695, %v3162_v39  ;;  %vm15513_vm5 = vcmp.eq.f32.partialorder %v9082_v41, %v7560_v34  ;;  %v16347_v26 = vld [vmem:[#allocation84_spill] sm:$0xff] }
 0x2c6   : > { %16341 = vst [vmem:[#allocation282_spill] sm:$0xff] %v9136_v32  ;;  %v9149_v29 = vpop.eup %6259  ;;  %v1582_v9 = vadd.s32 176, %v16072_v3  ;;  %vm16346_vm0 = vcmp.eq.s32.totalorder %v6965_v60, 1  ;;  %6277 = vpow2.f32 %v3357_v52  ;;  %v3169_v46 = vsub.f32 %v16347_v26, %v8575_v55  ;;  %v16350_v26 = vld [vmem:[#allocation89_spill] sm:$0xff] }
 0x2c7   : > { %16342 = vst [vmem:[#allocation283_spill] sm:$0xff] %v9139_v11  ;;  %16345 = vst [vmem:[#allocation284_spill] sm:$0xff] %v9149_v29  ;;  %v3170_v51 = vsub.f32 %v16348_v28, %v8575_v55  ;;  %v9162_v39 = vpop.eup %6261  ;;  %v1579_v32 = vadd.s32 152, %v16072_v3  ;;  %6279 = vpow2.f32 %v3359_v30  ;;  %v3371_v23 = vmul.f32 1.442695, %v3167_v2 }
 0x2c8   : > { %vm2483_vm10 = vmand %vm9093_vm4, %vm16346_vm0  ;;  %16349 = vst [vmem:[#allocation285_spill] sm:$0xff] %v9162_v39  ;;  %vm15514_vm0 = vcmp.eq.f32.partialorder %v9082_v41, %v7578_v42  ;;  %v5883_v52 = vsel %vm2484_vm13, 1.0, %v15949_v21  ;;  %v3373_v45 = vmul.f32 1.442695, %v3168_v53  ;;  %v3175_v11 = vsub.f32 %v16350_v26, %v8594_v62  ;;  %v9180_v43 = vpop.eup %6263  ;;  %v16394_v41 = vld [vmem:[#allocation110_spill] sm:$0xff] }
 0x2c9   : > { %v5882_v14 = vsel %vm2483_vm10, 1.0, %v15949_v21  ;;  %vm2485_vm4 = vmand %vm9127_vm11, %vm15600_vm6  ;;  %16351 = vst [vmem:[#allocation286_spill] sm:$0xff] %v9180_v43  ;;  %vm16352_vm10 = vcmp.eq.s32.totalorder %v7614_v57, 1  ;;  %v3572_v2 = vmul.f32 %v8844_v4, %v5883_v52  ;;  %6281 = vpow2.f32 %v3361_v33  ;;  %v16357_v33 = vld [vmem:[#allocation93_spill] sm:$0xff] }
 0x2ca   : > { %v3571_v28 = vmul.f32 %v8838_v48, %v5882_v14  ;;  %vm2486_vm2 = vmand %vm9145_vm8, %vm16352_vm10  ;;  %v5884_v30 = vsel %vm2485_vm4, 1.0, %v15949_v21  ;;  %v3176_v49 = vsub.f32 %v16353_v50, %v8594_v62  ;;  %v9190_v14 = vpop.eup %6265  ;;  %v3375_v26 = vmul.f32 1.442695, %v3169_v46  ;;  %v16355_v48 = vld [vmem:[#allocation92_spill] sm:$0xff]  ;;  %v16359_v46 = vld [vmem:[#allocation102_spill] sm:$0xff] }
 0x2cb   : > { %16354 = vst [vmem:[#allocation287_spill] sm:$0xff] %v9190_v14  ;;  %v5885_v53 = vsel %vm2486_vm2, 1.0, %v15949_v21  ;;  %v3377_v13 = vmul.f32 1.442695, %v3170_v51  ;;  %v3177_v7 = vsub.f32 %v16355_v48, %v8594_v62  ;;  %v9195_v19 = vpop.eup %6267  ;;  %v3573_v63 = vmul.f32 %v8860_v56, %v5884_v30  ;;  %vm9222_vm13 = vmxor %vm15517_vm15, %vm16043_vm12 }
 0x2cc   : > { %16356 = vst [vmem:[#allocation288_spill] sm:$0xff] %v9195_v19  ;;  %v3715_v31 = vadd.f32 %v3572_v2, %v3571_v28  ;;  %6283 = vpow2.f32 %v3371_v23  ;;  %v3178_v52 = vsub.f32 %v16357_v33, %v8594_v62  ;;  %v9200_v4 = vpop.eup %6269  ;;  %v1583_v50 = vadd.s32 184, %v16072_v3  ;;  %v16361_v28 = vld [vmem:[#allocation104_spill] sm:$0xff]  ;;  %v9212_v33 = vpop.permute.xlu0 %1341  ;;  %vm9234_vm11 = vmxor %vm15515_vm7, %vm16043_vm12 }
 0x2cd   : > { %16358 = vst [vmem:[#allocation289_spill] sm:$0xff] %v9200_v4  ;;  %6285 = vpow2.f32 %v3373_v45  ;;  %v3387_v6 = vmul.f32 1.442695, %v3175_v11  ;;  %v3187_v51 = vsub.f32 %v16359_v46, %v8718_v44  ;;  %v9205_v16 = vpop.eup %6271  ;;  %v3574_v48 = vmul.f32 %v8874_v40, %v5885_v53  ;;  %16363 = vst [vmem:[#allocation292_spill] sm:$0xff] %v9212_v33 }
 0x2ce   : > { %16360 = vst [vmem:[#allocation290_spill] sm:$0xff] %v9205_v16  ;;  %v3716_v19 = vadd.f32 %v3715_v31, %v3573_v63  ;;  %v3389_v30 = vmul.f32 1.442695, %v3176_v49  ;;  %v3188_v23 = vsub.f32 %v16361_v28, %v8718_v44  ;;  %v9210_v2 = vpop.eup %6273  ;;  %v1581_v56 = vadd.s32 168, %v16072_v3  ;;  %v16367_v63 = vld [vmem:[#allocation103_spill] sm:$0xff]  ;;  %vm9254_vm4 = vmxor %vm15513_vm5, %vm16043_vm12 }
 0x2cf   : > { %16362 = vst [vmem:[#allocation291_spill] sm:$0xff] %v9210_v2  ;;  %v1585_v11 = vadd.s32 200, %v16072_v3  ;;  %6287 = vpow2.f32 %v3375_v26  ;;  %v3391_v45 = vmul.f32 1.442695, %v3177_v7  ;;  %v9216_v46 = vpop.eup %6275  ;;  %v3393_v53 = vmul.f32 1.442695, %v3178_v52  ;;  %vm9267_vm2 = vmxor %vm15514_vm0, %vm16043_vm12 }
 0x2d0   : > { %16364 = vst [vmem:[#allocation293_spill] sm:$0xff] %v9216_v46  ;;  %v3717_v49 = vadd.f32 %v3716_v19, %v3574_v48  ;;  %6289 = vpow2.f32 %v3377_v13  ;;  %v3189_v28 = vsub.f32 %v16367_v63, %v8718_v44  ;;  %v9228_v40 = vpop.eup %6277  ;;  %v9239_v26 = vadd.s32 %v16087_v17, %v1582_v9  ;;  %v16372_v19 = vld [vmem:[#allocation107_spill] sm:$0xff]  ;;  %vm2464_vm15 = vmand %vm9234_vm11, %vm15612_vm3 }
 0x2d1   : > { %16368 = vst [vmem:[#allocation294_spill] sm:$0xff] %v9228_v40  ;;  %6291 = vpow2.f32 %v3387_v6  ;;  %v3190_v48 = vsub.f32 %v16372_v19, %v8718_v44  ;;  %v3411_v13 = vmul.f32 1.442695, %v3187_v51  ;;  %v9243_v52 = vpop.eup %6279  ;;  %vm15543_vm8 = vcmp.eq.f32.partialorder %v9212_v33, %v6962_v59 }
 0x2d2   : > { %16371 = vst [vmem:[#allocation295_spill] sm:$0xff] %v9239_v26  ;;  %16373 = vst [vmem:[#allocation296_spill] sm:$0xff] %v9243_v52  ;;  %3718 = vadd.xlane.f32.xlu1 %v3717_v49  ;;  %v9248_v63 = vadd.s32 %v16087_v17, %v1579_v32  ;;  %v9259_v6 = vadd.s32 %v16087_v17, %v1583_v50  ;;  %6293 = vpow2.f32 %v3389_v30  ;;  %v3413_v51 = vmul.f32 1.442695, %v3188_v23  ;;  %v16382_v50 = vld [vmem:[#allocation97_spill] sm:$0xff] }
 0x2d3   : > { %vm15538_vm10 = vcmp.eq.f32.partialorder %v9212_v33, %v6973_v0  ;;  %v9272_v49 = vadd.s32 %v16087_v17, %v1581_v56  ;;  %v9275_v19 = vadd.s32 %v16087_v17, %v1585_v11  ;;  %6295 = vpow2.f32 %v3391_v45  ;;  %v9279_v23 = vpop.eup %6281  ;;  %v16385_v45 = vld [vmem:[#allocation98_spill] sm:$0xff] }
 0x2d4   : > { %16374 = vst [vmem:[#allocation297_spill] sm:$0xff] %v9248_v63  ;;  %16377 = vst [vmem:[#allocation298_spill] sm:$0xff] %v9259_v6  ;;  %v3183_v30 = vsub.f32 %v16382_v50, %v8606_v22  ;;  %vm15537_vm5 = vcmp.eq.f32.partialorder %v9212_v33, %v7560_v34  ;;  %vm16384_vm0 = vcmp.eq.s32.totalorder %v6965_v60, 1  ;;  %v9288_v56 = vadd.s32 192, %v16072_v3  ;;  %v16386_v6 = vld [vmem:[#allocation100_spill] sm:$0xff]  ;;  %v16391_v63 = vld [vmem:[#allocation138_spill] sm:$0xff] }
 0x2d5   : > { %16380 = vst [vmem:[#allocation299_spill] sm:$0xff] %v9272_v49  ;;  %16381 = vst [vmem:[#allocation300_spill] sm:$0xff] %v9275_v19  ;;  %6297 = vpow2.f32 %v3393_v53  ;;  %v3415_v11 = vmul.f32 1.442695, %v3189_v28  ;;  %v3184_v19 = vsub.f32 %v16385_v45, %v8606_v22  ;;  %vm15542_vm14 = vcmp.eq.f32.partialorder %v9212_v33, %v7578_v42  ;;  %v16388_v45 = vld [vmem:[#allocation101_spill] sm:$0xff] }
 0x2d6   : > { %16383 = vst [vmem:[#allocation301_spill] sm:$0xff] %v9279_v23  ;;  %vm2463_vm7 = vmand %vm9222_vm13, %vm16384_vm0  ;;  %6299 = vpow2.f32 %v3411_v13  ;;  %v3417_v31 = vmul.f32 1.442695, %v3190_v48  ;;  %v3185_v49 = vsub.f32 %v16386_v6, %v8606_v22  ;;  %v9301_v53 = vpop.eup %6283  ;;  %v5863_v28 = vsel %vm2464_vm15, 1.0, %v15949_v21  ;;  %v16424_v33 = vld [vmem:[#allocation109_spill] sm:$0xff] }
 0x2d7   : > { %v5862_v50 = vsel %vm2463_vm7, 1.0, %v15949_v21  ;;  %16387 = vst [vmem:[#allocation302_spill] sm:$0xff] %v9301_v53  ;;  %vm2465_vm0 = vmand %vm9254_vm4, %vm15600_vm6  ;;  %6301 = vpow2.f32 %v3413_v51  ;;  %v3186_v26 = vsub.f32 %v16388_v45, %v8606_v22  ;;  %v9311_v13 = vpop.eup %6285  ;;  %vm16390_vm7 = vcmp.eq.s32.totalorder %v7614_v57, 1 }
 0x2d8   : > { %v3551_v7 = vmul.f32 %v8793_v8, %v5862_v50  ;;  %16389 = vst [vmem:[#allocation303_spill] sm:$0xff] %v9311_v13  ;;  %vm2466_vm13 = vmand %vm9267_vm2, %vm16390_vm7  ;;  %v5864_v48 = vsel %vm2465_vm0, 1.0, %v15949_v21  ;;  %v3552_v9 = vmul.f32 %v8817_v15, %v5863_v28  ;;  %v3403_v6 = vmul.f32 1.442695, %v3183_v30  ;;  %v16392_v8 = vld [vmem:[#allocation161_spill] sm:$0xff] }
 0x2d9   : > { %v2996_v53 = vsub.f32 0.0, %v16391_v63  ;;  %v5865_v50 = vsel %vm2466_vm13, 1.0, %v15949_v21  ;;  %6303 = vpow2.f32 %v3415_v11  ;;  %v3405_v51 = vmul.f32 1.442695, %v3184_v19  ;;  %v9322_v23 = vpop.eup %6287  ;;  %v16396_v11 = vld [vmem:[#allocation112_spill] sm:$0xff]  ;;  %vm9348_vm15 = vmxor %vm15543_vm8, %vm16043_vm12 }
 0x2da   : > { %v2995_v45 = vsub.f32 0.0, %v16392_v8  ;;  %16393 = vst [vmem:[#allocation304_spill] sm:$0xff] %v9322_v23  ;;  %v3553_v13 = vmul.f32 %v8822_v38, %v5864_v48  ;;  %v3690_v52 = vadd.f32 %v3552_v9, %v3551_v7  ;;  %v3407_v32 = vmul.f32 1.442695, %v3185_v49  ;;  %v9327_v46 = vpop.eup %6289  ;;  %v16398_v8 = vld [vmem:[#allocation257_spill] sm:$0xff]  ;;  %v9337_v48 = vpop.permute.xlu1 %1316  ;;  %v16401_v9 = vld [vmem:[#allocation111_spill] sm:$0xff]  ;;  %vm9360_vm11 = vmxor %vm15538_vm10, %vm16043_vm12 }
 0x2db   : > { %v3195_v40 = vsub.f32 %v16394_v41, %v8734_v10  ;;  %16395 = vst [vmem:[#allocation305_spill] sm:$0xff] %v9327_v46  ;;  %v1586_v30 = vadd.s32 208, %v16072_v3  ;;  %6305 = vpow2.f32 %v3417_v31  ;;  %v3409_v28 = vmul.f32 1.442695, %v3186_v26  ;;  %v9332_v63 = vpop.eup %6291  ;;  %16400 = vst [vmem:[#allocation308_spill] sm:$0xff] %v9337_v48  ;;  %v16402_v26 = vld [vmem:[#allocation158_spill] sm:$0xff] }
 0x2dc   : > { %v3196_v19 = vsub.f32 %v16396_v11, %v8734_v10  ;;  %16397 = vst [vmem:[#allocation306_spill] sm:$0xff] %v9332_v63  ;;  %v3554_v15 = vmul.f32 %v16398_v8, %v5865_v50  ;;  %v3691_v23 = vadd.f32 %v3690_v52, %v3553_v13  ;;  %6307 = vpow2.f32 %v3403_v6  ;;  %v9335_v49 = vpop.eup %6293  ;;  %v16410_v11 = vld [vmem:[#allocation157_spill] sm:$0xff]  ;;  %vm9376_vm2 = vmxor %vm15537_vm5, %vm16043_vm12 }
 0x2dd   : > { %v3029_v7 = vmul.f32 1.442695, %v2996_v53  ;;  %16399 = vst [vmem:[#allocation307_spill] sm:$0xff] %v9335_v49  ;;  %6309 = vpow2.f32 %v3405_v51  ;;  %v3197_v41 = vsub.f32 %v16401_v9, %v8734_v10  ;;  %v3027_v31 = vmul.f32 1.442695, %v2995_v45  ;;  %v9342_v46 = vpop.eup %6295  ;;  %v16406_v53 = vld [vmem:[#allocation115_spill] sm:$0xff]  ;;  %vm9397_vm7 = vmxor %vm15542_vm14, %vm16043_vm12 }
 0x2de   : > { %v2997_v38 = vsub.f32 0.0, %v16402_v26  ;;  %16403 = vst [vmem:[#allocation309_spill] sm:$0xff] %v9342_v46  ;;  %v3692_v6 = vadd.f32 %v3691_v23, %v3554_v15  ;;  %6311 = vpow2.f32 %v3407_v32  ;;  %v3198_v13 = vsub.f32 %v16406_v53, %v8734_v10  ;;  %v16411_v26 = vld [vmem:[#allocation105_spill] sm:$0xff]  ;;  %v16412_v23 = vld [vmem:[#allocation106_spill] sm:$0xff]  ;;  %vm2492_vm14 = vmand %vm9360_vm11, %vm15612_vm3 }
 0x2df   : > { %v3427_v50 = vmul.f32 1.442695, %v3195_v40  ;;  %v9354_v51 = vpop.eup %6297  ;;  %6313 = vpow2.f32 %v3409_v28  ;;  %v3429_v9 = vmul.f32 1.442695, %v3196_v19  ;;  %v3191_v15 = vsub.f32 %v16411_v26, %v16410_v11  ;;  %v16426_v45 = vld [vmem:[#allocation169_spill] sm:$0xff] }
 0x2e0   : > { %16407 = vst [vmem:[#allocation310_spill] sm:$0xff] %v9354_v51  ;;  %v3192_v32 = vsub.f32 %v16412_v23, %v16410_v11  ;;  %v9368_v53 = vpop.eup %6299  ;;  %vm15587_vm4 = vcmp.eq.f32.partialorder %v9337_v48, %v6962_v59  ;;  %3693 = vadd.xlane.f32.xlu0 %v3692_v6  ;;  %v9382_v28 = vadd.s32 %v16087_v17, %v9288_v56  ;;  %v16418_v23 = vld [vmem:[#allocation108_spill] sm:$0xff]  ;;  %6315 = vpow2.f32 %v3029_v7  ;;  %v16437_v49 = vld [vmem:[#allocation113_spill] sm:$0xff] }
 0x2e1   : > { %16413 = vst [vmem:[#allocation311_spill] sm:$0xff] %v9368_v53  ;;  %v9385_v19 = vadd.s32 %v16087_v17, %v1586_v30  ;;  %v3193_v26 = vsub.f32 %v16418_v23, %v16410_v11  ;;  %v9389_v6 = vpop.eup %6301  ;;  %vm15563_vm0 = vcmp.eq.f32.partialorder %v9337_v48, %v6973_v0  ;;  %v3431_v56 = vmul.f32 1.442695, %v3197_v41 }
 0x2e2   : > { %16416 = vst [vmem:[#allocation312_spill] sm:$0xff] %v9382_v28  ;;  %16419 = vst [vmem:[#allocation314_spill] sm:$0xff] %v9389_v6  ;;  %6317 = vpow2.f32 %v3027_v31  ;;  %v9401_v30 = vmul.f32 1.442695, %v2997_v38  ;;  %vm15559_vm13 = vcmp.eq.f32.partialorder %v9337_v48, %v7560_v34  ;;  %vm16423_vm5 = vcmp.eq.s32.totalorder %v6965_v60, 1 }
 0x2e3   : > { %16417 = vst [vmem:[#allocation313_spill] sm:$0xff] %v9385_v19  ;;  %v16422_v19 = vld [vmem:[#allocation188_spill] sm:$0xff]  ;;  %vm2491_vm10 = vmand %vm9348_vm15, %vm16423_vm5  ;;  %v1589_v7 = vadd.s32 232, %v16072_v3  ;;  %6319 = vpow2.f32 %v3427_v50  ;;  %v3433_v28 = vmul.f32 1.442695, %v3198_v13  ;;  %v3194_v41 = vsub.f32 %v16424_v33, %v16410_v11  ;;  %v9413_v31 = vpop.eup %6303 }
 0x2e4   : > { %v2998_v23 = vsub.f32 0.0, %v16422_v19  ;;  %16425 = vst [vmem:[#allocation315_spill] sm:$0xff] %v9413_v31  ;;  %v5890_v38 = vsel %vm2491_vm10, 1.0, %v15949_v21  ;;  %vm15560_vm8 = vcmp.eq.f32.partialorder %v9337_v48, %v7578_v42  ;;  %6321 = vpow2.f32 %v3429_v9  ;;  %vm2493_vm5 = vmand %vm9376_vm2, %vm15600_vm6  ;;  %v16427_v31 = vld [vmem:[#allocation118_spill] sm:$0xff]  ;;  %v16463_v48 = vld [vmem:[#allocation200_spill] sm:$0xff] }
 0x2e5   : > { %v3419_v52 = vmul.f32 1.442695, %v3191_v15  ;;  %v3421_v19 = vmul.f32 1.442695, %v3192_v32  ;;  %v5891_v13 = vsel %vm2492_vm14, 1.0, %v15949_v21  ;;  %v3579_v50 = vmul.f32 %v8994_v12, %v5890_v38  ;;  %v9430_v53 = vpop.eup %6305  ;;  %v16430_v32 = vld [vmem:[#allocation120_spill] sm:$0xff]  ;;  %vm9470_vm14 = vmxor %vm15587_vm4, %vm16043_vm12 }
 0x2e6   : > { %v3423_v33 = vmul.f32 1.442695, %v3193_v26  ;;  %v3203_v6 = vsub.f32 %v16427_v31, %v16426_v45  ;;  %16428 = vst [vmem:[#allocation316_spill] sm:$0xff] %v9430_v53  ;;  %vm16429_vm10 = vcmp.eq.s32.totalorder %v7614_v57, 1  ;;  %v5892_v9 = vsel %vm2493_vm5, 1.0, %v15949_v21  ;;  %v9440_v38 = vpop.eup %6307  ;;  %v16432_v12 = vld [vmem:[#allocation119_spill] sm:$0xff]  ;;  %vm9482_vm11 = vmxor %vm15563_vm0, %vm16043_vm12 }
 0x2e7   : > { %vm2494_vm15 = vmand %vm9397_vm7, %vm16429_vm10  ;;  %v3580_v15 = vmul.f32 %v9013_v35, %v5891_v13  ;;  %6323 = vpow2.f32 %v3431_v56  ;;  %v3204_v40 = vsub.f32 %v16430_v32, %v16426_v45  ;;  %16431 = vst [vmem:[#allocation317_spill] sm:$0xff] %v9440_v38  ;;  %v3425_v31 = vmul.f32 1.442695, %v3194_v41  ;;  %v9445_v51 = vpop.eup %6309  ;;  %v16434_v56 = vld [vmem:[#allocation123_spill] sm:$0xff]  ;;  %v16436_v38 = vld [vmem:[#allocation160_spill] sm:$0xff] }
 0x2e8   : > { %v5893_v26 = vsel %vm2494_vm15, 1.0, %v15949_v21  ;;  %6325 = vpow2.f32 %v3433_v28  ;;  %v3205_v53 = vsub.f32 %v16432_v12, %v16426_v45  ;;  %16433 = vst [vmem:[#allocation318_spill] sm:$0xff] %v9445_v51  ;;  %v3581_v8 = vmul.f32 %v9035_v18, %v5892_v9  ;;  %v9450_v35 = vpop.eup %6311  ;;  %v16438_v41 = vld [vmem:[#allocation139_spill] sm:$0xff]  ;;  %vm9498_vm7 = vmxor %vm15559_vm13, %vm16043_vm12 }
 0x2e9   : > { %v3725_v46 = vadd.f32 %v3580_v15, %v3579_v50  ;;  %6327 = vpow2.f32 %v3419_v52  ;;  %v3206_v13 = vsub.f32 %v16434_v56, %v16426_v45  ;;  %16435 = vst [vmem:[#allocation319_spill] sm:$0xff] %v9450_v35  ;;  %v3443_v32 = vmul.f32 1.442695, %v3203_v6  ;;  %v9455_v2 = vpop.eup %6313  ;;  %v16440_v52 = vld [vmem:[#allocation114_spill] sm:$0xff]  ;;  %v9460_v56 = vpop.permute.xlu0 %1351  ;;  %v16442_v6 = vld [vmem:[#allocation116_spill] sm:$0xff]  ;;  %vm9510_vm10 = vmxor %vm15560_vm8, %vm16043_vm12 }
 0x2ea   : > { %6329 = vpow2.f32 %v3421_v19  ;;  %v3199_v28 = vsub.f32 %v16437_v49, %v16436_v38  ;;  %v2999_v63 = vsub.f32 0.0, %v16438_v41  ;;  %16439 = vst [vmem:[#allocation320_spill] sm:$0xff] %v9455_v2  ;;  %v3582_v12 = vmul.f32 %v9044_v36, %v5893_v26  ;;  %v6316_v15 = vpop.eup %6315  ;;  %16441 = vst [vmem:[#allocation321_spill] sm:$0xff] %v9460_v56 }
 0x2eb   : > { %v3726_v51 = vadd.f32 %v3725_v46, %v3581_v8  ;;  %v3445_v9 = vmul.f32 1.442695, %v3204_v40  ;;  %v3200_v50 = vsub.f32 %v16440_v52, %v16436_v38  ;;  %6331 = vpow2.f32 %v3423_v33  ;;  %v16445_v33 = vld [vmem:[#allocation117_spill] sm:$0xff]  ;;  %v16457_v52 = vld [vmem:[#allocation172_spill] sm:$0xff]  ;;  %vm2472_vm0 = vmand %vm9482_vm11, %vm15612_vm3 }
 0x2ec   : > { %v3447_v19 = vmul.f32 1.442695, %v3205_v53  ;;  %v3201_v18 = vsub.f32 %v16442_v6, %v16436_v38  ;;  %v9464_v49 = vmul.f32 1.442695, %v2998_v23  ;;  %v6318_v41 = vpop.eup %6317  ;;  %6333 = vpow2.f32 %v3425_v31  ;;  %v16465_v46 = vld [vmem:[#allocation127_spill] sm:$0xff] }
 0x2ed   : > { %v3727_v40 = vadd.f32 %v3726_v51, %v3582_v12  ;;  %v3449_v26 = vmul.f32 1.442695, %v3206_v13  ;;  %v3202_v53 = vsub.f32 %v16445_v33, %v16436_v38  ;;  %v9476_v8 = vpop.eup %6319  ;;  %v9487_v6 = vadd.s32 %v16087_v17, %v1589_v7  ;;  %v16450_v51 = vld [vmem:[#allocation168_spill] sm:$0xff] }
 0x2ee   : > { %16446 = vst [vmem:[#allocation322_spill] sm:$0xff] %v9476_v8  ;;  %6335 = vpow2.f32 %v3443_v32  ;;  %v3435_v12 = vmul.f32 1.442695, %v3199_v28  ;;  %v3001_v31 = vsub.f32 0.0, %v16450_v51  ;;  %v9490_v13 = vpop.eup %6321  ;;  %vm15586_vm2 = vcmp.eq.f32.partialorder %v9460_v56, %v6962_v59 }
 0x2ef   : > { %16449 = vst [vmem:[#allocation323_spill] sm:$0xff] %v9487_v6  ;;  %16451 = vst [vmem:[#allocation324_spill] sm:$0xff] %v9490_v13  ;;  %3728 = vadd.xlane.f32.xlu1 %v3727_v40  ;;  %6337 = vpow2.f32 %v3445_v9  ;;  %v3437_v7 = vmul.f32 1.442695, %v3200_v50  ;;  %v9502_v32 = vmul.f32 0.0, %v6316_v15  ;;  %vm15582_vm5 = vcmp.eq.f32.partialorder %v9460_v56, %v6973_v0  ;;  %v16458_v6 = vld [vmem:[#allocation126_spill] sm:$0xff] }
 0x2f0   : > { %v3035_v28 = vmul.f32 1.442695, %v2999_v63  ;;  %6339 = vpow2.f32 %v3447_v19  ;;  %v3439_v51 = vmul.f32 1.442695, %v3201_v18  ;;  %v3211_v9 = vsub.f32 %v16458_v6, %v16457_v52  ;;  %v16462_v19 = vld [vmem:[#allocation128_spill] sm:$0xff] }
 0x2f1   : > { %16454 = vst [vmem:[#allocation325_spill] sm:$0xff] %v9502_v32  ;;  %v9516_v50 = vmul.f32 0.0, %v6318_v41  ;;  %v9518_v15 = vpop.eup %6323  ;;  %vm15581_vm15 = vcmp.eq.f32.partialorder %v9460_v56, %v7560_v34  ;;  %vm16461_vm13 = vcmp.eq.s32.totalorder %v6965_v60, 1  ;;  %6341 = vpow2.f32 %v3449_v26 }
 0x2f2   : > { %16460 = vst [vmem:[#allocation327_spill] sm:$0xff] %v9518_v15  ;;  %vm2471_vm8 = vmand %vm9470_vm14, %vm16461_vm13  ;;  %v3441_v63 = vmul.f32 1.442695, %v3202_v53  ;;  %v3212_v18 = vsub.f32 %v16462_v19, %v16457_v52  ;;  %v4158_v6 = vadd.f32 %v16463_v48, %v8886_v47  ;;  %v9530_v41 = vpop.eup %6325  ;;  %vm15588_vm13 = vcmp.eq.f32.partialorder %v9460_v56, %v7578_v42  ;;  %v16467_v48 = vld [vmem:[#allocation131_spill] sm:$0xff] }
 0x2f3   : > { %16459 = vst [vmem:[#allocation326_spill] sm:$0xff] %v9516_v50  ;;  %16464 = vst [vmem:[#allocation328_spill] sm:$0xff] %v9530_v41  ;;  %v5870_v36 = vsel %vm2471_vm8, 1.0, %v15949_v21  ;;  %6343 = vpow2.f32 %v3435_v12  ;;  %v3213_v26 = vsub.f32 %v16465_v46, %v16457_v52  ;;  %v3039_v53 = vmul.f32 1.442695, %v3001_v31  ;;  %v9541_v19 = vpop.eup %6327 }
 0x2f4   : > { %16466 = vst [vmem:[#allocation329_spill] sm:$0xff] %v9541_v19  ;;  %vm2473_vm14 = vmand %vm9498_vm7, %vm15600_vm6  ;;  %v5871_v47 = vsel %vm2472_vm0, 1.0, %v15949_v21  ;;  %v3559_v23 = vmul.f32 %v9054_v54, %v5870_v36  ;;  %6345 = vpow2.f32 %v3437_v7  ;;  %v3214_v41 = vsub.f32 %v16467_v48, %v16457_v52  ;;  %v9551_v12 = vpop.eup %6329  ;;  %v9559_v19 = vpop.permute.xlu1 %1326  ;;  %v16471_v48 = vld [vmem:[#allocation180_spill] sm:$0xff] }
 0x2f5   : > { %16468 = vst [vmem:[#allocation330_spill] sm:$0xff] %v9551_v12  ;;  %vm16469_vm8 = vcmp.eq.s32.totalorder %v7614_v57, 1  ;;  %v5872_v31 = vsel %vm2473_vm14, 1.0, %v15949_v21  ;;  %v3560_v33 = vmul.f32 %v9064_v27, %v5871_v47  ;;  %6347 = vpow2.f32 %v3439_v51  ;;  %16470 = vst [vmem:[#allocation331_spill] sm:$0xff] %v9559_v19  ;;  %v9563_v12 = vpop.eup %6331  ;;  %v16474_v51 = vld [vmem:[#allocation198_spill] sm:$0xff]  ;;  %v16475_v27 = vld [vmem:[#allocation195_spill] sm:$0xff] }
 0x2f6   : > { %vm2474_vm11 = vmand %vm9510_vm10, %vm16469_vm8  ;;  %v3459_v46 = vmul.f32 1.442695, %v3211_v9  ;;  %6349 = vpow2.f32 %v3441_v63  ;;  %v3461_v7 = vmul.f32 1.442695, %v3212_v18  ;;  %v3003_v54 = vsub.f32 0.0, %v16471_v48  ;;  %16472 = vst [vmem:[#allocation332_spill] sm:$0xff] %v9563_v12  ;;  %v9566_v8 = vpop.eup %6333 }
 0x2f7   : > { %v5873_v36 = vsel %vm2474_vm11, 1.0, %v15949_v21  ;;  %v3561_v15 = vmul.f32 %v9069_v37, %v5872_v31  ;;  %v3700_v40 = vadd.f32 %v3560_v33, %v3559_v23  ;;  %v3463_v13 = vmul.f32 1.442695, %v3213_v26  ;;  %16473 = vst [vmem:[#allocation333_spill] sm:$0xff] %v9566_v8  ;;  %v16477_v23 = vld [vmem:[#allocation201_spill] sm:$0xff]  ;;  %v16484_v8 = vld [vmem:[#allocation212_spill] sm:$0xff]  ;;  %vm9604_vm8 = vmxor %vm15586_vm2, %vm16043_vm12 }
 0x2f8   : > { %6351 = vpow2.f32 %v3035_v28  ;;  %v3465_v47 = vmul.f32 1.442695, %v3214_v41  ;;  %v9570_v9 = vadd.f32 %v16474_v51, %v8890_v20  ;;  %v3005_v63 = vsub.f32 0.0, %v16475_v27  ;;  %v9573_v18 = vpop.eup %6335  ;;  %v16479_v41 = vld [vmem:[#allocation163_spill] sm:$0xff]  ;;  %v16480_v31 = vld [vmem:[#allocation125_spill] sm:$0xff] }
 0x2f9   : > { %6353 = vpow2.f32 %v3039_v53  ;;  %16476 = vst [vmem:[#allocation334_spill] sm:$0xff] %v9573_v18  ;;  %v3562_v48 = vmul.f32 %v9077_v58, %v5873_v36  ;;  %v3701_v12 = vadd.f32 %v3700_v40, %v3561_v15  ;;  %v9578_v26 = vadd.f32 %v16477_v23, %v8894_v5  ;;  %v9580_v28 = vpop.eup %6337  ;;  %v16481_v53 = vld [vmem:[#allocation207_spill] sm:$0xff]  ;;  %v16483_v18 = vld [vmem:[#allocation4_spill] sm:$0xff]  ;;  %v16485_v15 = vld [vmem:[#allocation5_spill] sm:$0xff] }
 0x2fa   : > { %6355 = vpow2.f32 %v3459_v46  ;;  %16478 = vst [vmem:[#allocation335_spill] sm:$0xff] %v9580_v28  ;;  %v3210_v20 = vsub.f32 %v16480_v31, %v16479_v41  ;;  %v3043_v33 = vmul.f32 1.442695, %v3003_v54  ;;  %v3000_v37 = vsub.f32 0.0, %v16481_v53  ;;  %v9585_v27 = vpop.eup %6339  ;;  %v16493_v31 = vld [vmem:[#allocation2_spill] sm:$0xff]  ;;  %v16498_v28 = vld [vmem:[#allocation12_spill] sm:$0xff] }
 0x2fb   : > { %6357 = vpow2.f32 %v3461_v7  ;;  %16482 = vst [vmem:[#allocation336_spill] sm:$0xff] %v9585_v27  ;;  %vm1642_vm0 = vcmp.ne.s32.totalorder %v16484_v8, %v16483_v18  ;;  %vm1643_vm7 = vcmp.ne.s32.totalorder %v16484_v8, %v16485_v15  ;;  %vm16486_vm10 = vcmp.eq.s32.totalorder %v6965_v60, 1  ;;  %v16492_v7 = vld [vmem:[#allocation211_spill] sm:$0xff]  ;;  %v9610_v23 = vpop.eup %6341  ;;  %v9620_v27 = vpop.permute.xlu1 %1336  ;;  %v16518_v58 = vld [vmem:[#allocation176_spill] sm:$0xff] }
 0x2fc   : > { %vm9596_vm14 = vmand %vm1442_vm1, %vm16486_vm10  ;;  %v3702_v36 = vadd.f32 %v3701_v12, %v3562_v48  ;;  %6359 = vpow2.f32 %v3463_v13  ;;  %v3007_v40 = vsub.f32 0.0, %v16492_v7  ;;  %v3002_v53 = vsub.f32 0.0, %v16493_v31  ;;  %16494 = vst [vmem:[#allocation4_spill] sm:$0xff] %v9610_v23  ;;  %v16500_v12 = vld [vmem:[#allocation215_spill] sm:$0xff] }
 0x2fd   : > { %vm9616_vm1 = vmxor %vm15582_vm5, %vm16043_vm12  ;;  %16497 = vst [vmem:[#allocation5_spill] sm:$0xff] %v9620_v27  ;;  %6361 = vpow2.f32 %v3465_v47  ;;  %v9623_v48 = vadd.f32 %v16498_v28, %v4158_v6  ;;  %v3047_v13 = vmul.f32 1.442695, %v3005_v63  ;;  %v3004_v7 = vsub.f32 0.0, %v16500_v12  ;;  %v9626_v31 = vpop.eup %6343  ;;  %v16504_v63 = vld [vmem:[#allocation124_spill] sm:$0xff] }
 0x2fe   : > { %16501 = vst [vmem:[#allocation338_spill] sm:$0xff] %v9626_v31  ;;  %3703 = vadd.xlane.f32.xlu0 %v3702_v36  ;;  %vm9634_vm10 = vmxor %vm15581_vm15, %vm16043_vm12  ;;  %v9639_v6 = vadd.s32 216, %v16072_v3  ;;  %v9642_v47 = vadd.s32 248, %v16072_v3  ;;  %v16505_v12 = vsub.f32 %v16504_v63, %v16479_v41  ;;  %6363 = vpow2.f32 %v9401_v30  ;;  %v9648_v36 = vpop.eup %6345  ;;  %v16509_v63 = vld [vmem:[#allocation154_spill] sm:$0xff] }
 0x2ff   : > { %16499 = vst [vmem:[#allocation337_spill] sm:$0xff] %v9623_v48  ;;  %16506 = vst [vmem:[#allocation339_spill] sm:$0xff] %v9648_v36  ;;  %v3457_v31 = vmul.f32 1.442695, %v3210_v20  ;;  %6365 = vpow2.f32 %v3043_v33  ;;  %v3037_v2 = vmul.f32 1.442695, %v3000_v37  ;;  %v9661_v35 = vpop.eup %6347  ;;  %v9709_v50 = vpop.permute.xlu1 %1346 }
 0x300   : > { %v3455_v48 = vmul.f32 1.442695, %v16505_v12  ;;  %vm9656_vm5 = vmxor %vm15588_vm13, %vm16043_vm12  ;;  %v3009_v12 = vsub.f32 0.0, %v16509_v63  ;;  %16510 = vst [vmem:[#allocation340_spill] sm:$0xff] %v9661_v35  ;;  %v16511_v30 = vld [vmem:[#allocation214_spill] sm:$0xff]  ;;  %vm16512_vm13 = vcmp.eq.s32.totalorder %v6965_v60, 1  ;;  %6367 = vpow2.f32 %v9464_v49  ;;  %v9675_v56 = vpop.eup %6349 }
 0x301   : > { %vm2499_vm11 = vmand %vm9604_vm8, %vm16512_vm13  ;;  %v3051_v37 = vmul.f32 1.442695, %v3007_v40  ;;  %v3041_v20 = vmul.f32 1.442695, %v3002_v53  ;;  %v16513_v33 = vld [vmem:[#allocation148_spill] sm:$0xff]  ;;  %16514 = vst [vmem:[#allocation341_spill] sm:$0xff] %v9675_v56  ;;  %6369 = vpow2.f32 %v3047_v13 }
 0x302   : > { %v3006_v63 = vsub.f32 0.0, %v16513_v33  ;;  %vm2500_vm4 = vmand %vm9616_vm1, %vm15612_vm3  ;;  %v5898_v35 = vsel %vm2499_vm11, 1.0, %v15949_v21  ;;  %v3045_v54 = vmul.f32 1.442695, %v3004_v7  ;;  %v16515_v36 = vld [vmem:[#allocation149_spill] sm:$0xff]  ;;  %v9685_v40 = vpop.eup %6351  ;;  %v16516_v53 = vld [vmem:[#allocation3_spill] sm:$0xff]  ;;  %vm16519_vm1 = vcmp.eq.f32.partialorder %v16518_v58, %v6962_v59 }
 0x303   : > { %v3008_v49 = vsub.f32 0.0, %v16515_v36  ;;  %vm16517_vm2 = vmmov %vm16512_vm13  ;;  %v5899_v7 = vsel %vm2500_vm4, 1.0, %v15949_v21  ;;  %v3587_v13 = vmul.f32 %v9149_v29, %v5898_v35  ;;  %6371 = vpow2.f32 %v3455_v48  ;;  %v16522_v36 = vld [vmem:[#allocation156_spill] sm:$0xff]  ;;  %v9707_v51 = vpop.eup %6353  ;;  %16523 = vst [vmem:[#allocation342_spill] sm:$0xff] %v9709_v50 }
 0x304   : > { %vm9696_vm11 = vmand %vm16519_vm1, %vm16517_vm2  ;;  %v3011_v56 = vsub.f32 0.0, %v16522_v36  ;;  %vm16524_vm2 = vcmp.eq.s32.totalorder %v7614_v57, 1  ;;  %v3588_v23 = vmul.f32 %v9162_v39, %v5899_v7  ;;  %6373 = vpow2.f32 %v3457_v31  ;;  %v9717_v41 = vpop.eup %6355  ;;  %v16528_v36 = vld [vmem:[#allocation150_spill] sm:$0xff] }
 0x305   : > { %vm2501_vm15 = vmand %vm9634_vm10, %vm15600_vm6  ;;  %v3055_v52 = vmul.f32 1.442695, %v3009_v12  ;;  %16525 = vst [vmem:[#allocation343_spill] sm:$0xff] %v9717_v41  ;;  %6375 = vpow2.f32 %v3037_v2  ;;  %v3049_v48 = vmul.f32 1.442695, %v3006_v63  ;;  %v3010_v29 = vsub.f32 0.0, %v16528_v36  ;;  %v9730_v7 = vpop.eup %6357 }
 0x306   : > { %vm2502_vm1 = vmand %vm9656_vm5, %vm16524_vm2  ;;  %v5900_v32 = vsel %vm2501_vm15, 1.0, %v15949_v21  ;;  %16529 = vst [vmem:[#allocation344_spill] sm:$0xff] %v9730_v7  ;;  %vm16530_vm5 = vcmp.eq.f32.partialorder %v16518_v58, %v6973_v0  ;;  %v3735_v39 = vadd.f32 %v3588_v23, %v3587_v13  ;;  %6377 = vpow2.f32 %v3051_v37  ;;  %v9743_v63 = vpop.eup %6359  ;;  %v16534_v36 = vld [vmem:[#allocation213_spill] sm:$0xff]  ;;  %v16536_v58 = vld [vmem:[#allocation187_spill] sm:$0xff]  ;;  %v9808_v7 = vpop.permute.xlu0 %1361 }
 0x307   : > { %vm9724_vm4 = vmand %vm1443_vm9, %vm15612_vm3  ;;  %v5901_v28 = vsel %vm2502_vm1, 1.0, %v15949_v21  ;;  %v3589_v12 = vmul.f32 %v9180_v43, %v5900_v32  ;;  %v3012_v2 = vsub.f32 0.0, %v8543_v24  ;;  %16533 = vst [vmem:[#allocation345_spill] sm:$0xff] %v9743_v63  ;;  %vm16537_vm1 = vcmp.eq.f32.partialorder %v16536_v58, %v6962_v59  ;;  %v16543_v23 = vld [vmem:[#allocation159_spill] sm:$0xff]  ;;  %v9769_v43 = vpop.eup %6361 }
 0x308   : > { %vm9737_vm15 = vmand %vm16530_vm5, %vm15612_vm3  ;;  %vm16540_vm6 = vcmp.eq.f32.partialorder %v16536_v58, %v6973_v0  ;;  %v1588_v37 = vadd.s32 224, %v16072_v3  ;;  %6379 = vpow2.f32 %v3041_v20  ;;  %v3059_v13 = vmul.f32 1.442695, %v3011_v56  ;;  %16544 = vst [vmem:[#allocation346_spill] sm:$0xff] %v9769_v43  ;;  %v16550_v20 = vld [vmem:[#allocation218_spill] sm:$0xff]  ;;  %v6364_v43 = vpop.eup %6363 }
 0x309   : > { %vm16535_vm2 = vmmov %vm16512_vm13  ;;  %v3013_v24 = vsub.f32 0.0, %v16543_v23  ;;  %vm16551_vm10 = vcmp.eq.f32.partialorder %v16550_v20, %v6962_v59  ;;  %v3590_v23 = vmul.f32 %v9190_v14, %v5901_v28  ;;  %v3736_v58 = vadd.f32 %v3735_v39, %v3589_v12  ;;  %16557 = vst [vmem:[#allocation347_spill] sm:$0xff] %v9808_v7  ;;  %v9826_v12 = vpop.permute.xlu1 %1356 }
 0x30a   : > { %vm9754_vm5 = vmand %vm16537_vm1, %vm16535_vm2  ;;  %6381 = vpow2.f32 %v3055_v52  ;;  %v3053_v8 = vmul.f32 1.442695, %v3008_v49  ;;  %v9812_v41 = vadd.s32 %v16087_v17, %v9639_v6  ;;  %v9816_v39 = vadd.s32 %v16087_v17, %v9642_v47  ;;  %v6366_v49 = vpop.eup %6365  ;;  %16563 = vst [vmem:[#allocation350_spill] sm:$0xff] %v9826_v12  ;;  %v16564_v6 = vld [vmem:[#allocation199_spill] sm:$0xff] }
 0x30b   : > { %vm9763_vm8 = vmand %vm16540_vm6, %vm15612_vm3  ;;  %6383 = vpow2.f32 %v3045_v54  ;;  %v3057_v52 = vmul.f32 1.442695, %v3010_v29  ;;  %v3737_v14 = vadd.f32 %v3736_v58, %v3590_v23  ;;  %v3061_v47 = vmul.f32 1.442695, %v3012_v2  ;;  %v6368_v54 = vpop.eup %6367  ;;  %v16570_v58 = vld [vmem:[#allocation253_spill] sm:$0xff] }
 0x30c   : > { %vm9776_vm2 = vmand %vm9596_vm14, %vm1642_vm0  ;;  %vm16554_vm0 = vcmp.eq.f32.partialorder %v16550_v20, %v6973_v0  ;;  %16558 = vst [vmem:[#allocation348_spill] sm:$0xff] %v9812_v41  ;;  %vm16560_vm14 = vcmp.eq.f32.partialorder %v9559_v19, %v6962_v59  ;;  %v9830_v41 = vadd.f32 %v16564_v6, %v9570_v9  ;;  %6385 = vpow2.f32 %v3049_v48  ;;  %v6370_v48 = vpop.eup %6369 }
 0x30d   : > { %vm9785_vm6 = vmand %vm9724_vm4, %vm1643_vm7  ;;  %16559 = vst [vmem:[#allocation349_spill] sm:$0xff] %v9816_v39  ;;  %v9841_v39 = vadd.s32 %v16087_v17, %v1588_v37  ;;  %v9845_v23 = vadd.f32 %v16570_v58, %v9578_v26  ;;  %6387 = vpow2.f32 %v3059_v13  ;;  %v3063_v9 = vmul.f32 1.442695, %v3013_v24  ;;  %3738 = vadd.xlane.f32.xlu1 %v3737_v14  ;;  %v9883_v35 = vpop.eup %6371  ;;  %v16583_v14 = vld [vmem:[#allocation223_spill] sm:$0xff] }
 0x30e   : > { %vm16549_vm1 = vmmov %vm16512_vm13  ;;  %16565 = vst [vmem:[#allocation351_spill] sm:$0xff] %v9830_v41  ;;  %v16573_v2 = vmov 0  ;;  %v16576_v26 = vmov 0  ;;  %v9877_v37 = vadd.s32 %v16087_v17, %v16072_v3  ;;  %v9880_v13 = vmul.f32 0.0, %v9685_v40 }
 0x30f   : > { %vm9794_vm9 = vmand %vm16551_vm10, %vm16549_vm1  ;;  %vm16566_vm10 = vcmp.eq.f32.partialorder %v9559_v19, %v6973_v0  ;;  %16569 = vst [vmem:[#allocation352_spill] sm:$0xff] %v9841_v39  ;;  %6389 = vpow2.f32 %v3053_v8  ;;  %v3014_v46 = vsub.f32 0.0, %v8575_v55  ;;  %vm16584_vm13 = vcmp.eq.f32.partialorder %v9559_v19, %v7578_v42  ;;  %v16587_v39 = vld [vmem:[#allocation162_spill] sm:$0xff] }
 0x310   : > { %vm9804_vm7 = vmand %vm16554_vm0, %vm15612_vm3  ;;  %16571 = vst [vmem:[#allocation353_spill] sm:$0xff] %v9845_v23  ;;  %vm16572_vm0 = vcmp.ne.s32.totalorder %v16511_v30, %v16483_v18  ;;  %v9900_v8 = vmul.f32 0.0, %v9707_v51  ;;  %v9902_v55 = vmul.f32 0.0, %v6364_v43  ;;  %v3015_v58 = vsub.f32 0.0, %v16587_v39  ;;  %v9905_v23 = vpop.eup %6373  ;;  %v16598_v39 = vld [vmem:[#allocation222_spill] sm:$0xff] }
 0x311   : > { %vm9822_vm4 = vmxor %vm16560_vm14, %vm16043_vm12  ;;  %16581 = vst [vmem:[#allocation354_spill] sm:$0xff] %v9877_v37  ;;  %6391 = vpow2.f32 %v3057_v52  ;;  %v9931_v51 = vmul.f32 0.0, %v6366_v49  ;;  %v9933_v33 = vmul.f32 0.0, %v6368_v54  ;;  %v3016_v52 = vsub.f32 0.0, %v8594_v62  ;;  %v6376_v31 = vpop.eup %6375  ;;  %v9950_v62 = vpop.permute.xlu1 %1371 }
 0x312   : > { %vm9836_vm1 = vmxor %vm16566_vm10, %vm16043_vm12  ;;  %vm16575_vm10 = vcmp.ne.s32.totalorder %v16511_v30, %v16485_v15  ;;  %16582 = vst [vmem:[#allocation355_spill] sm:$0xff] %v9883_v35  ;;  %6393 = vpow2.f32 %v3061_v47  ;;  %v1590_v28 = vadd.s32 240, %v16072_v3  ;;  %v9948_v47 = vmul.f32 0.0, %v6370_v48  ;;  %v6378_v54 = vpop.eup %6377 }
 0x313   : > { %vm9852_vm14 = vmand %vm9794_vm9, %vm16572_vm0  ;;  %vm16578_vm9 = vcmp.eq.f32.partialorder %v9559_v19, %v7560_v34  ;;  %16588 = vst [vmem:[#allocation356_spill] sm:$0xff] %v9905_v23  ;;  %6395 = vpow2.f32 %v3063_v9  ;;  %v3065_v23 = vmul.f32 1.442695, %v3014_v46  ;;  %v6380_v20 = vpop.eup %6379  ;;  %v16605_v9 = vld [vmem:[#allocation277_spill] sm:$0xff]  ;;  %v3067_v35 = vmul.f32 1.442695, %v3015_v58 }
 0x314   : > { %v16574_v2 = vsel %vm9852_vm14, 4294967295, %v16573_v2  ;;  %vm9861_vm3 = vmand %vm9804_vm7, %vm16575_vm10  ;;  %16596 = vst [vmem:[#allocation357_spill] sm:$0xff] %v9931_v51  ;;  %v3018_v24 = vsub.f32 0.0, %v8606_v22  ;;  %v6382_v37 = vpop.eup %6381  ;;  %v16613_v58 = vld [vmem:[#allocation136_spill] sm:$0xff]  ;;  %v3019_v22 = vsub.f32 0.0, %v8718_v44  ;;  %v3020_v32 = vsub.f32 0.0, %v16410_v11 }
 0x315   : > { %v16577_v26 = vsel %vm9861_vm3, 4294967295, %v16576_v26  ;;  %vm9871_vm0 = vmxor %vm16578_vm9, %vm16043_vm12  ;;  %vm16589_vm9 = vcmp.ne.s32.totalorder %v16516_v53, %v16483_v18  ;;  %16597 = vst [vmem:[#allocation358_spill] sm:$0xff] %v9933_v33  ;;  %v10014_v11 = vsel %vm9785_vm6, 1.0, %v15949_v21  ;;  %v10028_v63 = vadd.s32 %v16087_v17, %v1590_v28 }
 0x316   : > { %vm9895_vm3 = vmxor %vm16584_vm13, %vm16043_vm12  ;;  %vm16592_vm13 = vcmp.ne.s32.totalorder %v16516_v53, %v16485_v15  ;;  %vm16595_vm12 = vcmp.eq.s32.totalorder %v6965_v60, 1  ;;  %16600 = vst [vmem:[#allocation359_spill] sm:$0xff] %v9948_v47  ;;  %v16603_v53 = vld [vmem:[#allocation239_spill] sm:$0xff]  ;;  %6397 = vpow2.f32 %v3065_v23  ;;  %v3073_v28 = vmul.f32 1.442695, %v3018_v24  ;;  %v16694_v24 = vld [vmem:[#allocation133_spill] sm:$0xff] }
 0x317   : > { %vm9912_vm10 = vmand %vm9696_vm11, %vm16589_vm9  ;;  %16601 = vst [vmem:[#allocation360_spill] sm:$0xff] %v9950_v62  ;;  %v3017_v30 = vsub.f32 0.0, %v16603_v53  ;;  %v6384_v53 = vpop.eup %6383  ;;  %6399 = vpow2.f32 %v3067_v35  ;;  %v16641_v23 = vmov 0  ;;  %v10057_v6 = vmul.f32 0.0, %v6376_v31 }
 0x318   : > { %vm9921_vm7 = vmand %vm9737_vm15, %vm16592_vm13  ;;  %vm16599_vm13 = vcmp.eq.s32.totalorder %v6976_v1, 1  ;;  %16623 = vst [vmem:[#allocation362_spill] sm:$0xff] %v10014_v11  ;;  %v6386_v44 = vpop.eup %6385  ;;  %v3075_v35 = vmul.f32 1.442695, %v3019_v22  ;;  %v16674_v19 = vmov 0 }
 0x319   : > { %vm2479_vm11 = vmand %vm9822_vm4, %vm16595_vm12  ;;  %vm16602_vm4 = vcmp.eq.s32.totalorder %v7583_v61, 1  ;;  %16630 = vst [vmem:[#allocation364_spill] sm:$0xff] %v10028_v63 }
 0x31a   : > { %vm2480_vm14 = vmand %vm9836_vm1, %vm16599_vm13  ;;  %v5878_v49 = vsel %vm2479_vm11, 1.0, %v15949_v21  ;;  %vm16604_vm1 = vcmp.eq.s32.totalorder %v7614_v57, 1 }
 0x31b   : > { %vm2481_vm9 = vmand %vm9871_vm0, %vm16602_vm4  ;;  %v5879_v29 = vsel %vm2480_vm14, 1.0, %v15949_v21  ;;  %v3567_v41 = vmul.f32 %v9080_v25, %v5878_v49  ;;  %vm16606_vm14 = vcmp.ne.s32.totalorder %v16534_v36, %v16483_v18  ;;  %vm16614_vm4 = vcmp.eq.f32.partialorder %v16613_v58, %v6962_v59  ;;  %v16621_v25 = vld [vmem:[#allocation278_spill] sm:$0xff] }
 0x31c   : > { %vm2482_vm11 = vmand %vm9895_vm3, %vm16604_vm1  ;;  %v5880_v3 = vsel %vm2481_vm9, 1.0, %v15949_v21  ;;  %v3568_v48 = vmul.f32 %v16605_v9, %v5879_v29  ;;  %vm16609_vm3 = vcmp.ne.s32.totalorder %v16534_v36, %v16485_v15  ;;  %v3069_v29 = vmul.f32 1.442695, %v3016_v52 }
 0x31d   : > { %vm9971_vm0 = vmand %vm9754_vm5, %vm16606_vm14  ;;  %v5881_v49 = vsel %vm2482_vm11, 1.0, %v15949_v21  ;;  %vm16618_vm5 = vcmp.eq.f32.partialorder %v16613_v58, %v6973_v0  ;;  %v3569_v36 = vmul.f32 %v16621_v25, %v5880_v3  ;;  %v10009_v52 = vsel %vm9776_vm2, 1.0, %v15949_v21  ;;  %v16625_v58 = vld [vmem:[#allocation243_spill] sm:$0xff] }
 0x31e   : > { %vm9980_vm9 = vmand %vm9763_vm8, %vm16609_vm3  ;;  %vm16617_vm8 = vcmp.eq.s32.totalorder %v6976_v1, 1  ;;  %v3710_v47 = vadd.f32 %v3568_v48, %v3567_v41  ;;  %16622 = vst [vmem:[#allocation361_spill] sm:$0xff] %v10009_v52  ;;  %vm16626_vm3 = vcmp.eq.f32.partialorder %v16625_v58, %v6962_v59  ;;  %v10025_v41 = vpop.permute.xlu0 %1366  ;;  %v10032_v56 = vadd.f32 %v10014_v11, %v10009_v52  ;;  %v6388_v48 = vpop.eup %6387 }
 0x31f   : > { %vm16612_vm13 = vmmov %vm16595_vm12  ;;  %16629 = vst [vmem:[#allocation363_spill] sm:$0xff] %v10025_v41  ;;  %v3071_v3 = vmul.f32 1.442695, %v3017_v30  ;;  %vm16633_vm6 = vcmp.eq.f32.partialorder %v16625_v58, %v6973_v0  ;;  %v16636_v41 = vld [vmem:[#allocation280_spill] sm:$0xff]  ;;  %v6390_v63 = vpop.eup %6389  ;;  %v16639_v30 = vld [vmem:[#allocation27_spill] sm:$0xff]  ;;  %v10055_v58 = vpop.permute.xlu1 %1396  ;;  %6401 = vpow2.f32 %v3069_v29  ;;  %v10115_v25 = vmul.f32 0.0, %v6380_v20 }
 0x320   : > { %vm9989_vm1 = vmand %vm16614_vm4, %vm16612_vm13  ;;  %16631 = vst [vmem:[#allocation365_spill] sm:$0xff] %v10032_v56  ;;  %v3570_v51 = vmul.f32 %v16636_v41, %v5881_v49  ;;  %v3711_v17 = vadd.f32 %v3710_v47, %v3569_v36  ;;  %v16637_v56 = vld [vmem:[#allocation237_spill] sm:$0xff]  ;;  %v10059_v36 = vmul.f32 0.0, %v6378_v54  ;;  %v6392_v47 = vpop.eup %6391  ;;  %v3077_v54 = vmul.f32 1.442695, %v3020_v32 }
 0x321   : > { %vm10001_vm14 = vmand %vm16618_vm5, %vm16617_vm8  ;;  %16643 = vst [vmem:[#allocation366_spill] sm:$0xff] %v10055_v58  ;;  %v10081_v29 = vpop.eup %6393  ;;  %v10117_v32 = vmul.f32 0.0, %v6382_v37  ;;  %6403 = vpow2.f32 %v3071_v3  ;;  %v10134_v20 = vsel %vm9912_vm10, 1.0, %v15949_v21  ;;  %v10139_v37 = vsel %vm9921_vm7, 1.0, %v15949_v21 }
 0x322   : > { %vm16624_vm11 = vmmov %vm16595_vm12  ;;  %v3712_v49 = vadd.f32 %v3711_v17, %v3570_v51  ;;  %vm16650_vm12 = vnez %v16577_v26  ;;  %16662 = vst [vmem:[#allocation370_spill] sm:$0xff] %v10115_v25  ;;  %v10119_v17 = vpop.eup %6395  ;;  %v10141_v3 = vmul.f32 0.0, %v6384_v53  ;;  %6405 = vpow2.f32 %v3073_v28  ;;  %v10161_v53 = vpop.permute.xlu0 %1376 }
 0x323   : > { %vm10021_vm13 = vmand %vm16626_vm3, %vm16624_vm11  ;;  %v10079_v22 = vsel %vm16650_vm12, 1.0, %v15949_v21  ;;  %16663 = vst [vmem:[#allocation371_spill] sm:$0xff] %v10117_v32  ;;  %vm16673_vm10 = vcmp.ne.s32.totalorder %v16598_v39, %v16485_v15  ;;  %vm16677_vm7 = vcmp.eq.f32.partialorder %v9808_v7, %v7578_v42  ;;  %v10175_v9 = vadd.f32 %v10139_v37, %v10134_v20  ;;  %v16721_v32 = vld [vmem:[#allocation293_spill] sm:$0xff] }
 0x324   : > { %vm16632_vm2 = vmmov %vm16617_vm8  ;;  %vm16645_vm8 = vcmp.eq.f32.partialorder %v9808_v7, %v6962_v59  ;;  %16651 = vst [vmem:[#allocation368_spill] sm:$0xff] %v10079_v22  ;;  %3713 = vadd.xlane.f32.xlu0 %v3712_v49  ;;  %v16671_v49 = vmov 0  ;;  %v10177_v5 = vmul.f32 0.0, %v6388_v48  ;;  %v10179_v28 = vmul.f32 0.0, %v6386_v44  ;;  %v16686_v48 = vld [vmem:[#allocation226_spill] sm:$0xff]  ;;  %v16688_v44 = vld [vmem:[#allocation229_spill] sm:$0xff] }
 0x325   : > { %vm10039_vm4 = vmand %vm16633_vm6, %vm16632_vm2  ;;  %vm16644_vm6 = vmmov 1   ;;  %16667 = vst [vmem:[#allocation372_spill] sm:$0xff] %v10134_v20  ;;  %6407 = vpow2.f32 %v3075_v35 }
 0x326   : > { %vm16638_vm5 = vmmov %vm16624_vm11  ;;  %vm16640_vm11 = vcmp.eq.f32.partialorder %v16639_v30, %v6962_v59  ;;  %16668 = vst [vmem:[#allocation373_spill] sm:$0xff] %v10139_v37  ;;  %6409 = vpow2.f32 %v3077_v54 }
 0x327   : > { %vm10051_vm3 = vmand %vm16640_vm11, %vm16638_vm5  ;;  %vm16648_vm11 = vnez %v16574_v2  ;;  %16669 = vst [vmem:[#allocation374_spill] sm:$0xff] %v10141_v3 }
 0x328   : > { %v16642_v23 = vsel %vm10051_vm3, 4294967295, %v16641_v23  ;;  %vm10067_vm5 = vmxor %vm16645_vm8, %vm16644_vm6  ;;  %v10074_v31 = vsel %vm16648_vm11, 1.0, %v15949_v21  ;;  %vm16652_vm8 = vcmp.ne.s32.totalorder %v16583_v14, %v16483_v18  ;;  %vm16655_vm11 = vcmp.ne.s32.totalorder %v16583_v14, %v16485_v15  ;;  %16676 = vst [vmem:[#allocation375_spill] sm:$0xff] %v10161_v53 }
 0x329   : > { %16649 = vst [vmem:[#allocation367_spill] sm:$0xff] %v10074_v31  ;;  %vm10088_vm2 = vmand %vm10021_vm13, %vm16652_vm8  ;;  %vm16658_vm3 = vcmp.eq.f32.partialorder %v9808_v7, %v6973_v0  ;;  %v10113_v33 = vadd.f32 %v10079_v22, %v10074_v31 }
 0x32a   : > { %vm10097_vm15 = vmand %vm10039_vm4, %vm16655_vm11  ;;  %vm16664_vm4 = vcmp.eq.f32.partialorder %v9808_v7, %v7560_v34  ;;  %vm16670_vm11 = vcmp.ne.s32.totalorder %v16598_v39, %v16483_v18  ;;  %16680 = vst [vmem:[#allocation376_spill] sm:$0xff] %v10175_v9  ;;  %v10187_v7 = vmul.f32 0.0, %v6390_v63  ;;  %v10189_v39 = vmul.f32 0.0, %v6392_v47  ;;  %v16693_v47 = vld [vmem:[#allocation164_spill] sm:$0xff] }
 0x32b   : > { %vm10107_vm13 = vmxor %vm16658_vm3, %vm16644_vm6  ;;  %16661 = vst [vmem:[#allocation369_spill] sm:$0xff] %v10113_v33  ;;  %v3021_v33 = vsub.f32 0.0, %v8734_v10  ;;  %v3218_v54 = vsub.f32 %v16694_v24, %v16693_v47  ;;  %v16695_v10 = vld [vmem:[#allocation15_spill] sm:$0xff]  ;;  %v16696_v9 = vld [vmem:[#allocation16_spill] sm:$0xff]  ;;  %v3026_v2 = vsub.f32 0.0, %v16693_v47 }
 0x32c   : > { %vm10125_vm3 = vmxor %vm16664_vm4, %vm16644_vm6  ;;  %16681 = vst [vmem:[#allocation377_spill] sm:$0xff] %v10177_v5  ;;  %v3840_v14 = vmul.f32 %v10014_v11, %v16696_v9  ;;  %v10232_v9 = vpop.eup %6397  ;;  %v10277_v11 = vpop.permute.xlu0 %1381 }
 0x32d   : > { %vm10148_vm4 = vmand %vm9989_vm1, %vm16670_vm11  ;;  %16682 = vst [vmem:[#allocation378_spill] sm:$0xff] %v10179_v28  ;;  %vm16683_vm11 = vcmp.eq.s32.totalorder %v6965_v60, 1  ;;  %vm1679_vm1 = vcmp.ne.s32.totalorder %v16686_v48, %v16485_v15  ;;  %v10225_v28 = vsel %vm9971_vm0, 1.0, %v15949_v21  ;;  %v10248_v24 = vpop.eup %6399  ;;  %v3473_v25 = vmul.f32 1.442695, %v3218_v54  ;;  %v16728_v54 = vld [vmem:[#allocation32_spill] sm:$0xff] }
 0x32e   : > { %v16672_v49 = vsel %vm10148_vm4, 4294967295, %v16671_v49  ;;  %vm10157_vm8 = vmand %vm10001_vm14, %vm16673_vm10  ;;  %16684 = vst [vmem:[#allocation379_spill] sm:$0xff] %v10187_v7 }
 0x32f   : > { %v16675_v19 = vsel %vm10157_vm8, 4294967295, %v16674_v19  ;;  %vm10167_vm12 = vmxor %vm16677_vm7, %vm16644_vm6  ;;  %16685 = vst [vmem:[#allocation380_spill] sm:$0xff] %v10189_v39  ;;  %vm1678_vm7 = vcmp.ne.s32.totalorder %v16686_v48, %v16483_v18  ;;  %vm16689_vm8 = vcmp.eq.f32.partialorder %v16688_v44, %v6962_v59  ;;  %v3839_v39 = vmul.f32 %v10009_v52, %v16695_v10  ;;  %v16714_v52 = vld [vmem:[#allocation291_spill] sm:$0xff]  ;;  %v16877_v48 = vld [vmem:[#allocation304_spill] sm:$0xff] }
 0x330   : > { %vm2507_vm10 = vmand %vm10067_vm5, %vm16683_vm11  ;;  %vm16692_vm5 = vcmp.eq.s32.totalorder %v6976_v1, 1  ;;  %16698 = vst [vmem:[#allocation15_spill] sm:$0xff] %v10225_v28  ;;  %v10230_v10 = vsel %vm9980_vm9, 1.0, %v15949_v21  ;;  %vm16704_vm9 = vcmp.eq.f32.partialorder %v16639_v30, %v6973_v0 }
 0x331   : > { %vm16687_vm14 = vmmov %vm16683_vm11  ;;  %v5906_v63 = vsel %vm2507_vm10, 1.0, %v15949_v21  ;;  %16699 = vst [vmem:[#allocation16_spill] sm:$0xff] %v10230_v10  ;;  %v10246_v40 = vadd.f32 %v10230_v10, %v10225_v28 }
 0x332   : > { %vm10201_vm4 = vmand %vm16689_vm8, %vm16687_vm14  ;;  %vm16697_vm8 = vcmp.eq.s32.totalorder %v7583_v61, 1  ;;  %v3595_v26 = vmul.f32 %v9200_v4, %v5906_v63  ;;  %v10242_v63 = vadd.f32 %v3840_v14, %v3839_v39  ;;  %16713 = vst [vmem:[#allocation383_spill] sm:$0xff] %v10277_v11 }
 0x333   : > { %vm2508_vm11 = vmand %vm10107_vm13, %vm16692_vm5  ;;  %vm15701_vm13 = vcmp.eq.f32.partialorder %v9620_v27, %v7560_v34  ;;  %16702 = vst [vmem:[#allocation382_spill] sm:$0xff] %v10246_v40  ;;  %v3022_v40 = vsub.f32 0.0, %v16436_v38  ;;  %v16716_v38 = vld [vmem:[#allocation25_spill] sm:$0xff] }
 0x334   : > { %vm2509_vm14 = vmand %vm10125_vm3, %vm16697_vm8  ;;  %v5907_v7 = vsel %vm2508_vm11, 1.0, %v15949_v21  ;;  %vm16700_vm3 = vcmp.eq.s32.totalorder %v7614_v57, 1  ;;  %16701 = vst [vmem:[#allocation381_spill] sm:$0xff] %v10242_v63  ;;  %v10266_v63 = vpop.eup %6401  ;;  %vm16710_vm8 = vcmp.eq.f32.partialorder %v16688_v44, %v6973_v0  ;;  %v3848_v3 = vmul.f32 %v10079_v22, %v16716_v38  ;;  %v16727_v22 = vld [vmem:[#allocation30_spill] sm:$0xff]  ;;  %v16767_v38 = vld [vmem:[#allocation33_spill] sm:$0xff] }
 0x335   : > { %vm2510_vm10 = vmand %vm10167_vm12, %vm16700_vm3  ;;  %v5908_v41 = vsel %vm2509_vm14, 1.0, %v15949_v21  ;;  %v3596_v46 = vmul.f32 %v9205_v16, %v5907_v7  ;;  %v16707_v7 = vld [vmem:[#allocation132_spill] sm:$0xff]  ;;  %v3079_v16 = vmul.f32 1.442695, %v3021_v33  ;;  %vm16717_vm3 = vcmp.ne.s32.totalorder %v16637_v56, %v16483_v18 }
 0x336   : > { %vm16703_vm0 = vmmov %vm16692_vm5  ;;  %v5909_v4 = vsel %vm2510_vm10, 1.0, %v15949_v21  ;;  %v16708_v39 = vsub.f32 %v16707_v7, %v16693_v47  ;;  %v3597_v5 = vmul.f32 %v16714_v52, %v5908_v41  ;;  %vm16718_vm10 = vnez %v16642_v23  ;;  %v16722_v41 = vld [vmem:[#allocation163_spill] sm:$0xff]  ;;  %v16788_v47 = vld [vmem:[#allocation140_spill] sm:$0xff] }
 0x337   : > { %vm10255_vm5 = vmand %vm16704_vm9, %vm16703_vm0  ;;  %v3745_v7 = vadd.f32 %v3596_v46, %v3595_v26  ;;  %v3598_v53 = vmul.f32 %v16721_v32, %v5909_v4  ;;  %v3023_v26 = vsub.f32 0.0, %v16426_v45  ;;  %v3024_v46 = vsub.f32 0.0, %v16722_v41 }
 0x338   : > { %v3471_v14 = vmul.f32 1.442695, %v16708_v39  ;;  %vm16709_vm11 = vmmov %vm16703_vm0  ;;  %v16715_v39 = vld [vmem:[#allocation24_spill] sm:$0xff]  ;;  %vm16723_vm9 = vcmp.ne.s32.totalorder %v16637_v56, %v16485_v15  ;;  %v3851_v4 = vmul.f32 %v10134_v20, %v16727_v22  ;;  %v3852_v45 = vmul.f32 %v10139_v37, %v16728_v54  ;;  %v16878_v56 = vld [vmem:[#allocation357_spill] sm:$0xff] }
 0x339   : > { %vm10273_vm14 = vmand %vm16710_vm8, %vm16709_vm11  ;;  %v3847_v33 = vmul.f32 %v10074_v31, %v16715_v39  ;;  %v6404_v39 = vpop.eup %6403  ;;  %v3746_v23 = vadd.f32 %v3745_v7, %v3597_v5  ;;  %vm16729_vm8 = vcmp.eq.f32.partialorder %v9620_v27, %v6962_v59  ;;  %v10327_v22 = vsel %vm10097_vm15, 1.0, %v15949_v21  ;;  %v16734_v7 = vld [vmem:[#allocation172_spill] sm:$0xff] }
 0x33a   : > { %vm10289_vm0 = vmand %vm16718_vm10, %vm16717_vm3  ;;  %v6406_v41 = vpop.eup %6405  ;;  %16733 = vst [vmem:[#allocation30_spill] sm:$0xff] %v10327_v22  ;;  %v3081_v5 = vmul.f32 1.442695, %v3022_v40  ;;  %6411 = vpow2.f32 %v3079_v16  ;;  %vm16739_vm15 = vcmp.eq.f32.partialorder %v10055_v58, %v6973_v0  ;;  %v10377_v20 = vadd.f32 %v3852_v45, %v3851_v4  ;;  %v16757_v45 = vld [vmem:[#allocation240_spill] sm:$0xff] }
 0x33b   : > { %vm10301_vm11 = vmand %vm10255_vm5, %vm16723_vm9  ;;  %v10305_v52 = vadd.f32 %v3848_v3, %v3847_v33  ;;  %v10322_v3 = vsel %vm10088_vm2, 1.0, %v15949_v21  ;;  %v3025_v33 = vsub.f32 0.0, %v16734_v7  ;;  %v6408_v54 = vpop.eup %6407  ;;  %v3747_v32 = vadd.f32 %v3746_v23, %v3598_v53  ;;  %v16792_v53 = vld [vmem:[#allocation144_spill] sm:$0xff] }
 0x33c   : > { %vm10315_vm3 = vmxor %vm16729_vm8, %vm16644_vm6  ;;  %16732 = vst [vmem:[#allocation25_spill] sm:$0xff] %v10322_v3  ;;  %vm16735_vm5 = vcmp.eq.f32.partialorder %v10055_v58, %v6962_v59  ;;  %v10340_v51 = vadd.f32 %v10327_v22, %v10322_v3  ;;  %v6410_v40 = vpop.eup %6409  ;;  %6413 = vpow2.f32 %v3471_v14  ;;  %vm16742_vm9 = vnez %v16672_v49  ;;  %v10369_v14 = vpop.permute.xlu0 %1386 }
 0x33d   : > { %16726 = vst [vmem:[#allocation24_spill] sm:$0xff] %v10305_v52  ;;  %vm10334_vm10 = vmxor %vm16735_vm5, %vm16644_vm6  ;;  %v10354_v23 = vsel %vm16742_vm9, 1.0, %v15949_v21  ;;  %vm16744_vm8 = vnez %v16675_v19  ;;  %v3083_v7 = vmul.f32 1.442695, %v3023_v26  ;;  %vm16746_vm5 = vcmp.eq.f32.partialorder %v9620_v27, %v6973_v0  ;;  %3748 = vadd.xlane.f32.xlu1 %v3747_v32  ;;  %v10371_v49 = vpop.permute.xlu1 %1406 }
 0x33e   : > { %16738 = vst [vmem:[#allocation32_spill] sm:$0xff] %v10340_v51  ;;  %vm10347_vm2 = vmxor %vm16739_vm15, %vm16644_vm6  ;;  %v10359_v16 = vsel %vm16744_vm8, 1.0, %v15949_v21  ;;  %6415 = vpow2.f32 %v3473_v25  ;;  %v3085_v26 = vmul.f32 1.442695, %v3024_v46  ;;  %vm16758_vm12 = vcmp.eq.s32.totalorder %v6965_v60, 1  ;;  %v16815_v51 = vld [vmem:[#allocation142_spill] sm:$0xff] }
 0x33f   : > { %16743 = vst [vmem:[#allocation384_spill] sm:$0xff] %v10354_v23  ;;  %16745 = vst [vmem:[#allocation385_spill] sm:$0xff] %v10359_v16  ;;  %v10375_v19 = vadd.f32 %v10359_v16, %v10354_v23  ;;  %v10410_v35 = vsel %vm10289_vm0, 1.0, %v15949_v21  ;;  %v10415_v30 = vsel %vm10301_vm11, 1.0, %v15949_v21  ;;  %6417 = vpow2.f32 %v3081_v5  ;;  %v16768_v5 = vld [vmem:[#allocation34_spill] sm:$0xff] }
 0x340   : > { %vm10365_vm15 = vmxor %vm16746_vm5, %vm16644_vm6  ;;  %16749 = vst [vmem:[#allocation386_spill] sm:$0xff] %v10369_v14  ;;  %vm1674_vm5 = vcmp.ne.s32.totalorder %v16757_v45, %v16483_v18  ;;  %v3087_v46 = vmul.f32 1.442695, %v3025_v33  ;;  %v10429_v44 = vadd.f32 %v10415_v30, %v10410_v35  ;;  %v3855_v4 = vmul.f32 %v10322_v3, %v16767_v38  ;;  %v16806_v3 = vld [vmem:[#allocation301_spill] sm:$0xff] }
 0x341   : > { %16750 = vst [vmem:[#allocation387_spill] sm:$0xff] %v10371_v49  ;;  %16751 = vst [vmem:[#allocation388_spill] sm:$0xff] %v10375_v19  ;;  %v3856_v33 = vmul.f32 %v10327_v22, %v16768_v5  ;;  %v3089_v16 = vmul.f32 1.442695, %v3026_v2  ;;  %v10444_v23 = vmul.f32 0.0, %v10119_v17  ;;  %v10450_v38 = vmul.f32 0.0, %v10232_v9  ;;  %v3644_v5 = vpop.xlane.xlu1 %3643 }
 0x342   : > { %16752 = vst [vmem:[#allocation389_spill] sm:$0xff] %v10377_v20  ;;  %vm10384_vm9 = vmand %vm10201_vm4, %vm1678_vm7  ;;  %vm16763_vm7 = vcmp.eq.s32.totalorder %v6976_v1, 1  ;;  %v10447_v20 = vmul.f32 0.0, %v10081_v29  ;;  %6419 = vpow2.f32 %v3083_v7  ;;  %vm16773_vm0 = vcmp.eq.f32.partialorder %v9620_v27, %v7578_v42  ;;  %v16780_v9 = vld [vmem:[#allocation325_spill] sm:$0xff] }
 0x343   : > { %vm10393_vm8 = vmand %vm10273_vm14, %vm1679_vm1  ;;  %16761 = vst [vmem:[#allocation390_spill] sm:$0xff] %v10410_v35  ;;  %vm1675_vm1 = vcmp.ne.s32.totalorder %v16757_v45, %v16485_v15  ;;  %v10461_v22 = vmul.f32 0.0, %v10248_v24  ;;  %v10464_v17 = vmul.f32 0.0, %v10266_v63  ;;  %v10466_v29 = vadd.f32 %v3856_v33, %v3855_v4  ;;  %v10482_v63 = vpop.permute.xlu0 %1391  ;;  %v16789_v33 = vld [vmem:[#allocation141_spill] sm:$0xff]  ;;  %v16819_v45 = vld [vmem:[#allocation146_spill] sm:$0xff] }
 0x344   : > { %vm10403_vm4 = vmand %vm10334_vm10, %vm16758_vm12  ;;  %16762 = vst [vmem:[#allocation391_spill] sm:$0xff] %v10415_v30  ;;  %6421 = vpow2.f32 %v3085_v26  ;;  %vm16779_vm10 = vcmp.eq.s32.totalorder %v6965_v60, 1  ;;  %v3796_v7 = vadd.f32 %v3644_v5, %v16780_v9  ;;  %v10475_v27 = vmul.f32 0.0, %v6406_v41  ;;  %v6412_v9 = vpop.eup %6411 }
 0x345   : > { %vm10423_vm12 = vmand %vm10347_vm2, %vm16763_vm7  ;;  %16766 = vst [vmem:[#allocation392_spill] sm:$0xff] %v10429_v44  ;;  %6423 = vpow2.f32 %v3087_v46  ;;  %v10484_v26 = vmul.f32 0.0, %v6408_v54  ;;  %v10486_v43 = vmul.f32 0.0, %v6410_v40  ;;  %v16791_v40 = vld [vmem:[#allocation294_spill] sm:$0xff]  ;;  %v10563_v37 = vsel %vm10393_vm8, 1.0, %v15949_v21 }
 0x346   : > { %vm10439_vm14 = vmxor %vm15701_vm13, %vm16644_vm6  ;;  %16771 = vst [vmem:[#allocation33_spill] sm:$0xff] %v10447_v20  ;;  %6425 = vpow2.f32 %v3089_v16  ;;  %v4343_v4 = vadd.f32 %v16788_v47, %v3796_v7  ;;  %v4344_v5 = vadd.f32 %v16789_v33, %v3796_v7  ;;  %v16796_v47 = vld [vmem:[#allocation276_spill] sm:$0xff]  ;;  %v5935_v19 = vsel %vm10423_vm12, 1.0, %v15949_v21  ;;  %v16816_v33 = vld [vmem:[#allocation143_spill] sm:$0xff] }
 0x347   : > { %16772 = vst [vmem:[#allocation34_spill] sm:$0xff] %v10450_v38  ;;  %vm10456_vm11 = vmxor %vm16773_vm0, %vm16644_vm6  ;;  %v10473_v38 = vmul.f32 0.0, %v6404_v39  ;;  %v16787_v39 = vld [vmem:[#allocation288_spill] sm:$0xff]  ;;  %vm15675_vm8 = vcmp.eq.f32.partialorder %v9709_v50, %v7578_v42 }
 0x348   : > { %16776 = vst [vmem:[#allocation393_spill] sm:$0xff] %v10461_v22  ;;  %16777 = vst [vmem:[#allocation394_spill] sm:$0xff] %v10464_v17  ;;  %v3659_v17 = vpop.xlane.xlu1 %3658 }
 0x349   : > { %16778 = vst [vmem:[#allocation395_spill] sm:$0xff] %v10466_v29  ;;  %vm2487_vm2 = vmand %vm10315_vm3, %vm16779_vm10  ;;  %vm16786_vm3 = vcmp.eq.s32.totalorder %v7583_v61, 1  ;;  %v3799_v44 = vadd.f32 %v3659_v17, %v9880_v13  ;;  %v10558_v13 = vsel %vm10384_vm9, 1.0, %v15949_v21  ;;  %vm15674_vm9 = vcmp.eq.f32.partialorder %v9709_v50, %v7560_v34 }
 0x34a   : > { %16781 = vst [vmem:[#allocation325_spill] sm:$0xff] %v10473_v38  ;;  %16782 = vst [vmem:[#allocation396_spill] sm:$0xff] %v10475_v27  ;;  %v5886_v24 = vsel %vm2487_vm2, 1.0, %v15949_v21  ;;  %v16793_v27 = vld [vmem:[#allocation145_spill] sm:$0xff] }
 0x34b   : > { %vm2488_vm0 = vmand %vm10365_vm15, %vm16763_vm7  ;;  %16783 = vst [vmem:[#allocation397_spill] sm:$0xff] %v10482_v63  ;;  %v3575_v46 = vmul.f32 %v16787_v39, %v5886_v24  ;;  %vm16790_vm15 = vcmp.eq.s32.totalorder %v7614_v57, 1  ;;  %v10504_v24 = vpop.eup %6413  ;;  %vm16797_vm7 = vcmp.eq.f32.partialorder %v16796_v47, %v6962_v59  ;;  %v16805_v39 = vld [vmem:[#allocation296_spill] sm:$0xff] }
 0x34c   : > { %16784 = vst [vmem:[#allocation398_spill] sm:$0xff] %v10484_v26  ;;  %16785 = vst [vmem:[#allocation399_spill] sm:$0xff] %v10486_v43  ;;  %v5887_v41 = vsel %vm2488_vm0, 1.0, %v15949_v21  ;;  %v4345_v43 = vadd.f32 %v16792_v53, %v3796_v7  ;;  %v4346_v26 = vadd.f32 %v16793_v27, %v3796_v7  ;;  %v5934_v27 = vsel %vm10403_vm4, 1.0, %v15949_v21  ;;  %v10521_v53 = vpop.eup %6415 }
 0x34d   : > { %vm2489_vm10 = vmand %vm10439_vm14, %vm16786_vm3  ;;  %v3576_v16 = vmul.f32 %v16791_v40, %v5887_v41  ;;  %16794 = vst [vmem:[#allocation140_spill] sm:$0xff] %v10504_v24  ;;  %vm16795_vm14 = vcmp.eq.s32.totalorder %v6965_v60, 1  ;;  %v4471_v7 = vadd.f32 1e-06, %v4343_v4  ;;  %v4472_v41 = vadd.f32 1e-06, %v4344_v5  ;;  %v6418_v5 = vpop.eup %6417 }
 0x34e   : > { %vm2490_vm2 = vmand %vm10456_vm11, %vm16790_vm15  ;;  %v5888_v54 = vsel %vm2489_vm10, 1.0, %v15949_v21  ;;  %vm15677_vm11 = vcmp.eq.f32.partialorder %v9709_v50, %v6962_v59  ;;  %16800 = vst [vmem:[#allocation141_spill] sm:$0xff] %v10521_v53  ;;  %vm16801_vm3 = vcmp.eq.s32.totalorder %v6976_v1, 1  ;;  %vm16802_vm10 = vcmp.eq.f32.partialorder %v16796_v47, %v6973_v0  ;;  %v6420_v17 = vpop.eup %6419  ;;  %v16945_v53 = vld [vmem:[#allocation230_spill] sm:$0xff] }
 0x34f   : > { %vm10511_vm0 = vmand %vm16797_vm7, %vm16795_vm14  ;;  %v5889_v2 = vsel %vm2490_vm2, 1.0, %v15949_v21  ;;  %v3577_v20 = vmul.f32 %v16805_v39, %v5888_v54  ;;  %v3720_v38 = vadd.f32 %v3576_v16, %v3575_v46  ;;  %vm15673_vm2 = vcmp.eq.f32.partialorder %v10371_v49, %v6962_v59  ;;  %v10553_v46 = vpop.permute.xlu0 %1401  ;;  %16810 = vst [vmem:[#allocation145_spill] sm:$0xff] %v10558_v13  ;;  %v6422_v25 = vpop.eup %6421 }
 0x350   : > { %vm10528_vm15 = vmand %vm16802_vm10, %vm16801_vm3  ;;  %v4473_v32 = vadd.f32 1e-06, %v4345_v43  ;;  %v4474_v4 = vadd.f32 1e-06, %v4346_v26  ;;  %v3578_v29 = vmul.f32 %v16806_v3, %v5889_v2  ;;  %vm15672_vm4 = vcmp.eq.f32.partialorder %v10371_v49, %v6973_v0  ;;  %16809 = vst [vmem:[#allocation144_spill] sm:$0xff] %v10553_v46  ;;  %v6424_v40 = vpop.eup %6423 }
 0x351   : > { %6427 = vlog2.f32 %v4471_v7  ;;  %vm10547_vm14 = vmand %vm10511_vm0, %vm1674_vm5  ;;  %vm15676_vm7 = vcmp.eq.f32.partialorder %v9709_v50, %v6973_v0  ;;  %v3721_v43 = vadd.f32 %v3720_v38, %v3577_v20  ;;  %16811 = vst [vmem:[#allocation400_spill] sm:$0xff] %v10563_v37  ;;  %v16814_v38 = vld [vmem:[#allocation262_spill] sm:$0xff]  ;;  %v4355_v16 = vadd.f32 %v16815_v51, %v3799_v44  ;;  %v16830_v20 = vld [vmem:[#allocation40_spill] sm:$0xff] }
 0x352   : > { %6429 = vlog2.f32 %v4472_v41  ;;  %vm10570_vm5 = vmand %vm10528_vm15, %vm1675_vm1  ;;  %v3623_v54 = vmul.f32 %v16814_v38, %v5934_v27  ;;  %v4356_v2 = vadd.f32 %v16816_v33, %v3799_v44  ;;  %v16817_v41 = vld [vmem:[#allocation263_spill] sm:$0xff]  ;;  %v10580_v39 = vadd.f32 %v10563_v37, %v10558_v13  ;;  %v6426_v33 = vpop.eup %6425 }
 0x353   : > { %6431 = vlog2.f32 %v4473_v32  ;;  %v3722_v7 = vadd.f32 %v3721_v43, %v3578_v29  ;;  %v3624_v3 = vmul.f32 %v16817_v41, %v5935_v19  ;;  %v4357_v27 = vadd.f32 %v16819_v45, %v3799_v44  ;;  %v16822_v19 = vld [vmem:[#allocation147_spill] sm:$0xff]  ;;  %v3639_v43 = vpop.xlane.xlu0 %3638  ;;  %v3669_v41 = vpop.xlane.xlu1 %3668  ;;  %vm10628_vm1 = vmxor %vm15677_vm11, %vm16644_vm6 }
 0x354   : > { %6433 = vlog2.f32 %v4474_v4  ;;  %16818 = vst [vmem:[#allocation142_spill] sm:$0xff] %v10580_v39  ;;  %v4483_v32 = vadd.f32 1e-06, %v4355_v16  ;;  %v10585_v38 = vmul.f32 0.0, %v6412_v9  ;;  %v10587_v51 = vmul.f32 0.0, %v6418_v5  ;;  %v16825_v9 = vld [vmem:[#allocation326_spill] sm:$0xff]  ;;  %vm10641_vm12 = vmxor %vm15673_vm2, %vm16644_vm6 }
 0x355   : > { %3723 = vadd.xlane.f32.xlu0 %v3722_v7  ;;  %v4358_v29 = vadd.f32 %v16822_v19, %v3799_v44  ;;  %v4484_v4 = vadd.f32 1e-06, %v4356_v2  ;;  %v10595_v37 = vsel %vm10547_vm14, 1.0, %v15949_v21  ;;  %v10600_v45 = vsel %vm10570_vm5, 1.0, %v15949_v21  ;;  %v16829_v19 = vld [vmem:[#allocation38_spill] sm:$0xff]  ;;  %vm10657_vm0 = vmxor %vm15672_vm4, %vm16644_vm6 }
 0x356   : > { %16820 = vst [vmem:[#allocation143_spill] sm:$0xff] %v10585_v38  ;;  %16821 = vst [vmem:[#allocation146_spill] sm:$0xff] %v10587_v51  ;;  %v3795_v5 = vadd.f32 %v3639_v43, %v16825_v9  ;;  %v3801_v16 = vadd.f32 %v3669_v41, %v9900_v8  ;;  %v10604_v7 = vmul.f32 0.0, %v6420_v17  ;;  %v10608_v44 = vadd.f32 %v10600_v45, %v10595_v37  ;;  %v16831_v8 = vld [vmem:[#allocation173_spill] sm:$0xff]  ;;  %v16832_v41 = vld [vmem:[#allocation174_spill] sm:$0xff] }
 0x357   : > { %16823 = vst [vmem:[#allocation147_spill] sm:$0xff] %v10595_v37  ;;  %16824 = vst [vmem:[#allocation401_spill] sm:$0xff] %v10600_v45  ;;  %v10610_v2 = vadd.f32 %v3624_v3, %v3623_v54  ;;  %v10612_v26 = vmul.f32 0.0, %v6422_v25  ;;  %v10616_v51 = vmul.f32 %v10225_v28, %v16829_v19  ;;  %v10620_v38 = vmul.f32 %v10230_v10, %v16830_v20  ;;  %v16836_v25 = vld [vmem:[#allocation177_spill] sm:$0xff]  ;;  %v16847_v37 = vld [vmem:[#allocation183_spill] sm:$0xff] }
 0x358   : > { %16826 = vst [vmem:[#allocation326_spill] sm:$0xff] %v10604_v7  ;;  %16827 = vst [vmem:[#allocation402_spill] sm:$0xff] %v10608_v44  ;;  %v4485_v43 = vadd.f32 1e-06, %v4357_v27  ;;  %6435 = vlog2.f32 %v4483_v32  ;;  %v4339_v17 = vadd.f32 %v16831_v8, %v3795_v5  ;;  %v4340_v9 = vadd.f32 %v16832_v41, %v3795_v5  ;;  %v16840_v8 = vld [vmem:[#allocation178_spill] sm:$0xff]  ;;  %v3679_v32 = vpop.xlane.xlu1 %3678 }
 0x359   : > { %16828 = vst [vmem:[#allocation403_spill] sm:$0xff] %v10612_v26  ;;  %v10632_v54 = vadd.f32 1e-06, %v4358_v29  ;;  %6437 = vlog2.f32 %v4484_v4  ;;  %v4341_v19 = vadd.f32 %v16836_v25, %v3795_v5  ;;  %v10635_v20 = vmul.f32 0.0, %v6424_v40  ;;  %v16841_v26 = vld [vmem:[#allocation181_spill] sm:$0xff]  ;;  %v3649_v29 = vpop.xlane.xlu0 %3648  ;;  %vm10667_vm3 = vmxor %vm15676_vm7, %vm16644_vm6 }
 0x35a   : > { %v4342_v41 = vadd.f32 %v16840_v8, %v3795_v5  ;;  %v4363_v7 = vadd.f32 %v16841_v26, %v3801_v16  ;;  %v10647_v13 = vmul.f32 0.0, %v6426_v33  ;;  %v16843_v4 = vld [vmem:[#allocation41_spill] sm:$0xff]  ;;  %v4467_v5 = vadd.f32 1e-06, %v4339_v17  ;;  %v16846_v8 = vld [vmem:[#allocation182_spill] sm:$0xff]  ;;  %v16852_v17 = vld [vmem:[#allocation7_spill] sm:$0xff] }
 0x35b   : > { %16835 = vst [vmem:[#allocation38_spill] sm:$0xff] %v10632_v54  ;;  %16837 = vst [vmem:[#allocation40_spill] sm:$0xff] %v10635_v20  ;;  %v6428_v27 = vpop.eup %6427  ;;  %v10651_v40 = vmul.f32 %v10410_v35, %v16843_v4  ;;  %v4364_v26 = vadd.f32 %v16846_v8, %v3801_v16  ;;  %v4365_v33 = vadd.f32 %v16847_v37, %v3801_v16  ;;  %6439 = vlog2.f32 %v4485_v43  ;;  %v16850_v35 = vld [vmem:[#allocation184_spill] sm:$0xff] }
 0x35c   : > { %16842 = vst [vmem:[#allocation173_spill] sm:$0xff] %v10647_v13  ;;  %v6430_v25 = vpop.eup %6429  ;;  %v4604_v45 = vmul.f32 0.6931472, %v6428_v27  ;;  %v4468_v28 = vadd.f32 1e-06, %v4340_v9  ;;  %v4366_v44 = vadd.f32 %v16850_v35, %v3801_v16  ;;  %vm15694_vm10 = vcmp.eq.f32.partialorder %v9826_v12, %v6962_v59  ;;  %v16854_v16 = vld [vmem:[#allocation10_spill] sm:$0xff]  ;;  %v3689_v50 = vpop.xlane.xlu1 %3688 }
 0x35d   : > { %v6432_v13 = vpop.eup %6431  ;;  %v4606_v10 = vmul.f32 0.6931472, %v6430_v25  ;;  %vm16851_vm15 = vcmp.eq.s32.totalorder %v6965_v60, 1  ;;  %v4469_v39 = vadd.f32 1e-06, %v4341_v19  ;;  %v3797_v54 = vadd.f32 %v3649_v29, %v9902_v55  ;;  %v16861_v25 = vld [vmem:[#allocation264_spill] sm:$0xff]  ;;  %v3654_v55 = vpop.xlane.xlu0 %3653 }
 0x35e   : > { %v6434_v27 = vpop.eup %6433  ;;  %vm2543_vm14 = vmand %vm10641_vm12, %vm16851_vm15  ;;  %v4608_v37 = vmul.f32 0.6931472, %v6432_v13  ;;  %v4855_v8 = vmul.f32 %v16852_v17, %v4604_v45  ;;  %vm15689_vm5 = vcmp.eq.f32.partialorder %v9826_v12, %v6973_v0  ;;  %vm16853_vm4 = vcmp.eq.s32.totalorder %v6976_v1, 1  ;;  %v16863_v17 = vld [vmem:[#allocation170_spill] sm:$0xff] }
 0x35f   : > { %vm2544_vm2 = vmand %vm10657_vm0, %vm16853_vm4  ;;  %v5942_v35 = vsel %vm2543_vm14, 1.0, %v15949_v21  ;;  %v4856_v43 = vmul.f32 %v16854_v16, %v4606_v10  ;;  %v10688_v9 = vadd.f32 1e-06, %v4342_v41  ;;  %v4491_v13 = vadd.f32 1e-06, %v4363_v7 }
 0x360   : > { %vm15684_vm12 = vcmp.eq.f32.partialorder %v9950_v62, %v6962_v59  ;;  %vm10696_vm15 = vmxor %vm15674_vm9, %vm16644_vm6  ;;  %v5943_v45 = vsel %vm2544_vm2, 1.0, %v15949_v21  ;;  %6441 = vlog2.f32 %v4467_v5  ;;  %v4492_v19 = vadd.f32 1e-06, %v4364_v26  ;;  %v16862_v26 = vld [vmem:[#allocation198_spill] sm:$0xff] }
 0x361   : > { %v4493_v10 = vadd.f32 1e-06, %v4365_v33  ;;  %vm15683_vm4 = vcmp.eq.f32.partialorder %v9950_v62, %v6973_v0  ;;  %vm10707_vm0 = vmxor %vm15675_vm8, %vm16644_vm6  ;;  %v4610_v20 = vmul.f32 0.6931472, %v6434_v27  ;;  %v4984_v41 = vadd.f32 %v4856_v43, %v4855_v8  ;;  %v16867_v8 = vld [vmem:[#allocation171_spill] sm:$0xff] }
 0x362   : > { %6443 = vlog2.f32 %v4468_v28  ;;  %v10711_v29 = vadd.f32 1e-06, %v4366_v44  ;;  %vm15688_vm2 = vcmp.eq.f32.partialorder %v9826_v12, %v7560_v34  ;;  %vm16860_vm14 = vcmp.eq.s32.totalorder %v6965_v60, 1  ;;  %v10722_v27 = vpop.eup %6435  ;;  %v16866_v44 = vld [vmem:[#allocation265_spill] sm:$0xff] }
 0x363   : > { %vm2495_vm9 = vmand %vm10628_vm1, %vm16860_vm14  ;;  %v3631_v5 = vmul.f32 %v16861_v25, %v5942_v35  ;;  %v4857_v33 = vmul.f32 %v16862_v26, %v4608_v37  ;;  %6445 = vlog2.f32 %v4469_v39  ;;  %v4347_v16 = vadd.f32 %v16863_v17, %v3797_v54  ;;  %16864 = vst [vmem:[#allocation177_spill] sm:$0xff] %v10722_v27  ;;  %v10733_v39 = vpop.eup %6437  ;;  %v16870_v35 = vld [vmem:[#allocation302_spill] sm:$0xff]  ;;  %v16871_v26 = vld [vmem:[#allocation175_spill] sm:$0xff] }
 0x364   : > { %16859 = vst [vmem:[#allocation174_spill] sm:$0xff] %v10711_v29  ;;  %vm16865_vm8 = vcmp.eq.s32.totalorder %v6976_v1, 1  ;;  %v5894_v28 = vsel %vm2495_vm9, 1.0, %v15949_v21  ;;  %vm15687_vm11 = vcmp.eq.f32.partialorder %v9826_v12, %v7578_v42  ;;  %v3632_v3 = vmul.f32 %v16866_v44, %v5943_v45  ;;  %16868 = vst [vmem:[#allocation178_spill] sm:$0xff] %v10733_v39  ;;  %v16873_v45 = vld [vmem:[#allocation303_spill] sm:$0xff] }
 0x365   : > { %vm2496_vm7 = vmand %vm10667_vm3, %vm16865_vm8  ;;  %6447 = vlog2.f32 %v4491_v13  ;;  %v4348_v37 = vadd.f32 %v16867_v8, %v3797_v54  ;;  %vm16869_vm1 = vcmp.eq.s32.totalorder %v7583_v61, 1  ;;  %v3583_v43 = vmul.f32 %v16870_v35, %v5894_v28  ;;  %v16874_v44 = vld [vmem:[#allocation199_spill] sm:$0xff]  ;;  %v10751_v47 = vpop.eup %6439 }
 0x366   : > { %vm2497_vm14 = vmand %vm10696_vm15, %vm16869_vm1  ;;  %v5895_v4 = vsel %vm2496_vm7, 1.0, %v15949_v21  ;;  %6449 = vlog2.f32 %v4492_v19  ;;  %v4349_v17 = vadd.f32 %v16871_v26, %v3797_v54  ;;  %vm16872_vm9 = vcmp.eq.s32.totalorder %v7614_v57, 1  ;;  %v16875_v19 = vld [vmem:[#allocation179_spill] sm:$0xff]  ;;  %16876 = vst [vmem:[#allocation181_spill] sm:$0xff] %v10751_v47 }
 0x367   : > { %vm2498_vm8 = vmand %vm10707_vm0, %vm16872_vm9  ;;  %v5896_v13 = vsel %vm2497_vm14, 1.0, %v15949_v21  ;;  %v3584_v8 = vmul.f32 %v16873_v45, %v5895_v4  ;;  %v4858_v25 = vmul.f32 %v16874_v44, %v4610_v20  ;;  %6451 = vlog2.f32 %v4493_v10  ;;  %v16879_v10 = vld [vmem:[#allocation305_spill] sm:$0xff]  ;;  %v16880_v4 = vld [vmem:[#allocation358_spill] sm:$0xff] }
 0x368   : > { %v5897_v29 = vsel %vm2498_vm8, 1.0, %v15949_v21  ;;  %v4985_v28 = vadd.f32 %v4984_v41, %v4857_v33  ;;  %v4350_v35 = vadd.f32 %v16875_v19, %v3797_v54  ;;  %v4475_v26 = vadd.f32 1e-06, %v4347_v16  ;;  %v16881_v41 = vld [vmem:[#allocation359_spill] sm:$0xff]  ;;  %vm10764_vm3 = vmxor %vm15694_vm10, %vm16644_vm6  ;;  %v16891_v19 = vld [vmem:[#allocation134_spill] sm:$0xff] }
 0x369   : > { %v3585_v7 = vmul.f32 %v16877_v48, %v5896_v13  ;;  %v3730_v52 = vadd.f32 %v3584_v8, %v3583_v43  ;;  %v4476_v22 = vadd.f32 1e-06, %v4348_v37  ;;  %v3803_v39 = vadd.f32 %v3679_v32, %v16878_v56  ;;  %v16884_v56 = vld [vmem:[#allocation189_spill] sm:$0xff]  ;;  %v16886_v43 = vld [vmem:[#allocation192_spill] sm:$0xff]  ;;  %vm10779_vm0 = vmxor %vm15689_vm5, %vm16644_vm6 }
 0x36a   : > { %vm15693_vm7 = vcmp.eq.f32.partialorder %v9950_v62, %v7560_v34  ;;  %v3586_v20 = vmul.f32 %v16879_v10, %v5897_v29  ;;  %v4477_v44 = vadd.f32 1e-06, %v4349_v17  ;;  %v3798_v45 = vadd.f32 %v3654_v55, %v16880_v4  ;;  %v16885_v29 = vld [vmem:[#allocation190_spill] sm:$0xff]  ;;  %v10773_v13 = vpop.eup %6441  ;;  %v16890_v8 = vld [vmem:[#allocation196_spill] sm:$0xff]  ;;  %vm10793_vm1 = vmxor %vm15684_vm12, %vm16644_vm6  ;;  %v3664_v10 = vpop.xlane.xlu0 %3663 }
 0x36b   : > { %v3805_v33 = vadd.f32 %v3689_v50, %v16881_v41  ;;  %v3731_v16 = vadd.f32 %v3730_v52, %v3585_v7  ;;  %vm15692_vm15 = vcmp.eq.f32.partialorder %v9950_v62, %v7578_v42  ;;  %v4371_v32 = vadd.f32 %v16884_v56, %v3803_v39  ;;  %vm10805_vm14 = vmxor %vm15683_vm4, %vm16644_vm6  ;;  %v16914_v54 = vld [vmem:[#allocation363_spill] sm:$0xff]  ;;  %v16916_v50 = vld [vmem:[#allocation306_spill] sm:$0xff] }
 0x36c   : > { %v4372_v37 = vadd.f32 %v16885_v29, %v3803_v39  ;;  %v4373_v17 = vadd.f32 %v16886_v43, %v3803_v39  ;;  %v10783_v52 = vadd.f32 %v3632_v3, %v3631_v5  ;;  %6453 = vlog2.f32 %v4475_v26  ;;  %v10787_v4 = vpop.eup %6443  ;;  %v16894_v43 = vld [vmem:[#allocation204_spill] sm:$0xff]  ;;  %vm10818_vm9 = vmxor %vm15688_vm2, %vm16644_vm6 }
 0x36d   : > { %v4374_v55 = vadd.f32 %v16890_v8, %v3803_v39  ;;  %v4351_v7 = vadd.f32 %v16891_v19, %v3798_v45  ;;  %v3732_v56 = vadd.f32 %v3731_v16, %v3586_v20  ;;  %v4499_v29 = vadd.f32 1e-06, %v4371_v32  ;;  %v16895_v3 = vld [vmem:[#allocation208_spill] sm:$0xff]  ;;  %v10799_v39 = vpop.eup %6445  ;;  %v16899_v16 = vld [vmem:[#allocation137_spill] sm:$0xff]  ;;  %vm10831_vm8 = vmxor %vm15687_vm11, %vm16644_vm6 }
 0x36e   : > { %16889 = vst [vmem:[#allocation41_spill] sm:$0xff] %v10783_v52  ;;  %v4352_v5 = vadd.f32 %v16894_v43, %v3798_v45  ;;  %v4353_v26 = vadd.f32 %v16895_v3, %v3798_v45  ;;  %v10809_v19 = vadd.f32 %v4985_v28, %v4858_v25  ;;  %6455 = vlog2.f32 %v4476_v22  ;;  %v16903_v28 = vld [vmem:[#allocation216_spill] sm:$0xff] }
 0x36f   : > { %v4500_v20 = vadd.f32 1e-06, %v4372_v37  ;;  %v4354_v32 = vadd.f32 %v16899_v16, %v3798_v45  ;;  %v10812_v43 = vpop.eup %6447  ;;  %3733 = vadd.xlane.f32.xlu0 %v3732_v56  ;;  %v10822_v48 = vadd.f32 1e-06, %v4350_v35  ;;  %6457 = vlog2.f32 %v4477_v44 }
 0x370   : > { %16898 = vst [vmem:[#allocation182_spill] sm:$0xff] %v10809_v19  ;;  %16900 = vst [vmem:[#allocation183_spill] sm:$0xff] %v10812_v43  ;;  %v4501_v25 = vadd.f32 1e-06, %v4373_v17  ;;  %v4379_v22 = vadd.f32 %v16903_v28, %v3805_v33  ;;  %v10825_v37 = vpop.eup %6449  ;;  %v10835_v56 = vadd.f32 1e-06, %v4374_v55  ;;  %v3800_v44 = vadd.f32 %v3664_v10, %v10057_v6 }
 0x371   : > { %16904 = vst [vmem:[#allocation184_spill] sm:$0xff] %v10825_v37  ;;  %v4479_v16 = vadd.f32 1e-06, %v4351_v7  ;;  %v16908_v19 = vld [vmem:[#allocation217_spill] sm:$0xff]  ;;  %v10839_v17 = vpop.eup %6451  ;;  %vm16910_vm4 = vcmp.eq.s32.totalorder %v6965_v60, 1  ;;  %6459 = vlog2.f32 %v4499_v29  ;;  %v16911_v37 = vld [vmem:[#allocation219_spill] sm:$0xff]  ;;  %vm15704_vm10 = vcmp.eq.f32.partialorder %v16914_v54, %v7578_v42 }
 0x372   : > { %16907 = vst [vmem:[#allocation7_spill] sm:$0xff] %v10835_v56  ;;  %v4380_v35 = vadd.f32 %v16908_v19, %v3805_v33  ;;  %16909 = vst [vmem:[#allocation10_spill] sm:$0xff] %v10839_v17  ;;  %v4480_v28 = vadd.f32 1e-06, %v4352_v5  ;;  %v4481_v12 = vadd.f32 1e-06, %v4353_v26  ;;  %v4381_v43 = vadd.f32 %v16911_v37, %v3805_v33 }
 0x373   : > { %vm2503_vm12 = vmand %vm10764_vm3, %vm16910_vm4  ;;  %vm16912_vm11 = vcmp.eq.s32.totalorder %v6976_v1, 1  ;;  %6461 = vlog2.f32 %v4500_v20  ;;  %v10851_v6 = vadd.f32 1e-06, %v4354_v32  ;;  %v16913_v10 = vld [vmem:[#allocation220_spill] sm:$0xff]  ;;  %vm15700_vm4 = vcmp.eq.f32.partialorder %v16914_v54, %v6962_v59  ;;  %v16918_v19 = vld [vmem:[#allocation307_spill] sm:$0xff] }
 0x374   : > { %vm2504_vm2 = vmand %vm10779_vm0, %vm16912_vm11  ;;  %v5902_v55 = vsel %vm2503_vm12, 1.0, %v15949_v21  ;;  %v10854_v7 = vadd.f32 %v16913_v10, %v3805_v33  ;;  %vm16915_vm3 = vcmp.eq.s32.totalorder %v7583_v61, 1  ;;  %6463 = vlog2.f32 %v4501_v25  ;;  %v16921_v37 = vld [vmem:[#allocation221_spill] sm:$0xff]  ;;  %v16936_v25 = vld [vmem:[#allocation314_spill] sm:$0xff] }
 0x375   : > { %vm2505_vm5 = vmand %vm10818_vm9, %vm16915_vm3  ;;  %v5903_v29 = vsel %vm2504_vm2, 1.0, %v15949_v21  ;;  %v3591_v5 = vmul.f32 %v16916_v50, %v5902_v55  ;;  %v4507_v26 = vadd.f32 1e-06, %v4379_v22  ;;  %vm15697_vm11 = vcmp.eq.f32.partialorder %v16914_v54, %v6973_v0  ;;  %v3699_v55 = vpop.xlane.xlu1 %3698  ;;  %v16926_v50 = vld [vmem:[#allocation310_spill] sm:$0xff] }
 0x376   : > { %vm16917_vm12 = vcmp.eq.s32.totalorder %v7614_v57, 1  ;;  %v5904_v33 = vsel %vm2505_vm5, 1.0, %v15949_v21  ;;  %v3592_v20 = vmul.f32 %v16918_v19, %v5903_v29  ;;  %6465 = vlog2.f32 %v4479_v16  ;;  %vm10879_vm9 = vmxor %vm15693_vm7, %vm16644_vm6  ;;  %v10884_v16 = vpop.eup %6453  ;;  %v16941_v19 = vld [vmem:[#allocation315_spill] sm:$0xff] }
 0x377   : > { %vm2506_vm0 = vmand %vm10831_vm8, %vm16917_vm12  ;;  %v4508_v32 = vadd.f32 1e-06, %v4380_v35  ;;  %vm15698_vm2 = vcmp.eq.f32.partialorder %v10277_v11, %v6962_v59  ;;  %6467 = vlog2.f32 %v4480_v28  ;;  %v4509_v22 = vadd.f32 1e-06, %v4381_v43  ;;  %v16922_v35 = vld [vmem:[#allocation309_spill] sm:$0xff]  ;;  %v16925_v43 = vld [vmem:[#allocation224_spill] sm:$0xff] }
 0x378   : > { %v5905_v3 = vsel %vm2506_vm0, 1.0, %v15949_v21  ;;  %v4359_v45 = vadd.f32 %v16921_v37, %v3800_v44  ;;  %vm15699_vm5 = vcmp.eq.f32.partialorder %v10277_v11, %v6973_v0  ;;  %v3593_v10 = vmul.f32 %v16922_v35, %v5904_v33  ;;  %vm10893_vm8 = vmxor %vm15692_vm15, %vm16644_vm6  ;;  %v3674_v37 = vpop.xlane.xlu0 %3673 }
 0x379   : > { %v3740_v29 = vadd.f32 %v3592_v20, %v3591_v5  ;;  %6469 = vlog2.f32 %v4481_v12  ;;  %v4360_v28 = vadd.f32 %v16925_v43, %v3800_v44  ;;  %vm15702_vm3 = vcmp.eq.f32.partialorder %v16914_v54, %v7560_v34  ;;  %v16928_v5 = vld [vmem:[#allocation225_spill] sm:$0xff]  ;;  %v16929_v20 = vld [vmem:[#allocation227_spill] sm:$0xff]  ;;  %v10909_v12 = vpop.eup %6455  ;;  %v3709_v24 = vpop.xlane.xlu1 %3708  ;;  %vm11027_vm13 = vmxor %vm15704_vm10, %vm16644_vm6 }
 0x37a   : > { %v3594_v56 = vmul.f32 %v16926_v50, %v5905_v3  ;;  %vm16927_vm12 = vcmp.eq.s32.totalorder %v6965_v60, 1  ;;  %6471 = vlog2.f32 %v4507_v26  ;;  %v4361_v33 = vadd.f32 %v16928_v5, %v3800_v44  ;;  %v10919_v26 = vpop.eup %6457  ;;  %v16933_v5 = vld [vmem:[#allocation370_spill] sm:$0xff]  ;;  %v16934_v50 = vld [vmem:[#allocation375_spill] sm:$0xff] }
 0x37b   : > { %vm2515_vm0 = vmand %vm10793_vm1, %vm16927_vm12  ;;  %v10907_v62 = vadd.f32 %v16929_v20, %v3800_v44  ;;  %v3741_v43 = vadd.f32 %v3740_v29, %v3593_v10  ;;  %vm16930_vm15 = vcmp.eq.s32.totalorder %v6976_v1, 1  ;;  %6473 = vlog2.f32 %v4508_v32  ;;  %v16932_v10 = vld [vmem:[#allocation311_spill] sm:$0xff]  ;;  %v10936_v17 = vpop.eup %6459 }
 0x37c   : > { %vm2516_vm7 = vmand %vm10805_vm14, %vm16930_vm15  ;;  %v5914_v3 = vsel %vm2515_vm0, 1.0, %v15949_v21  ;;  %v3807_v41 = vadd.f32 %v3699_v55, %v10059_v36  ;;  %vm16931_vm1 = vcmp.eq.s32.totalorder %v7583_v61, 1  ;;  %v4487_v29 = vadd.f32 1e-06, %v4359_v45  ;;  %16937 = vst [vmem:[#allocation198_spill] sm:$0xff] %v10936_v17  ;;  %v16944_v17 = vld [vmem:[#allocation228_spill] sm:$0xff] }
 0x37d   : > { %vm2517_vm12 = vmand %vm10879_vm9, %vm16931_vm1  ;;  %v5915_v44 = vsel %vm2516_vm7, 1.0, %v15949_v21  ;;  %v3603_v8 = vmul.f32 %v16932_v10, %v5914_v3  ;;  %v3802_v20 = vadd.f32 %v3674_v37, %v16933_v5  ;;  %vm15705_vm15 = vcmp.eq.f32.partialorder %v16934_v50, %v6962_v59  ;;  %v16938_v3 = vld [vmem:[#allocation232_spill] sm:$0xff]  ;;  %v10943_v10 = vpop.eup %6461 }
 0x37e   : > { %v3742_v32 = vadd.f32 %v3741_v43, %v3594_v56  ;;  %vm16935_vm14 = vcmp.eq.s32.totalorder %v7614_v57, 1  ;;  %v5916_v36 = vsel %vm2517_vm12, 1.0, %v15949_v21  ;;  %v3604_v55 = vmul.f32 %v16936_v25, %v5915_v44  ;;  %v16939_v43 = vld [vmem:[#allocation233_spill] sm:$0xff]  ;;  %16940 = vst [vmem:[#allocation170_spill] sm:$0xff] %v10943_v10  ;;  %v10947_v25 = vpop.eup %6463  ;;  %vm10972_vm12 = vmxor %vm15697_vm11, %vm16644_vm6 }
 0x37f   : > { %vm2518_vm0 = vmand %vm10893_vm8, %vm16935_vm14  ;;  %v4488_v35 = vadd.f32 1e-06, %v4360_v28  ;;  %vm15706_vm7 = vcmp.eq.f32.partialorder %v16934_v50, %v6973_v0  ;;  %v4489_v37 = vadd.f32 1e-06, %v4361_v33  ;;  %v4387_v56 = vadd.f32 %v16938_v3, %v3807_v41  ;;  %v16942_v28 = vld [vmem:[#allocation234_spill] sm:$0xff]  ;;  %16943 = vst [vmem:[#allocation171_spill] sm:$0xff] %v10947_v25 }
 0x380   : > { %v5917_v45 = vsel %vm2518_vm0, 1.0, %v15949_v21  ;;  %v4388_v5 = vadd.f32 %v16939_v43, %v3807_v41  ;;  %3743 = vadd.xlane.f32.xlu0 %v3742_v32  ;;  %v3605_v47 = vmul.f32 %v16941_v19, %v5916_v36  ;;  %v3755_v52 = vadd.f32 %v3604_v55, %v3603_v8  ;;  %v10953_v10 = vpop.eup %6465  ;;  %vm10959_vm8 = vmxor %vm15700_vm4, %vm16644_vm6  ;;  %v16948_v8 = vld [vmem:[#allocation316_spill] sm:$0xff]  ;;  %v17007_v25 = vld [vmem:[#allocation322_spill] sm:$0xff] }
 0x381   : > { %6475 = vlog2.f32 %v4509_v22  ;;  %v4389_v44 = vadd.f32 %v16942_v28, %v3807_v41  ;;  %vm15709_vm9 = vcmp.eq.f32.partialorder %v10277_v11, %v7560_v34  ;;  %v4515_v33 = vadd.f32 1e-06, %v4387_v56  ;;  %v16951_v56 = vld [vmem:[#allocation235_spill] sm:$0xff]  ;;  %vm10984_vm14 = vmxor %vm15698_vm2, %vm16644_vm6 }
 0x382   : > { %6477 = vlog2.f32 %v4487_v29  ;;  %v4367_v3 = vadd.f32 %v16944_v17, %v3802_v20  ;;  %v4368_v43 = vadd.f32 %v16945_v53, %v3802_v20  ;;  %v3606_v32 = vmul.f32 %v16948_v8, %v5917_v45  ;;  %v3684_v53 = vpop.xlane.xlu0 %3683  ;;  %v10966_v29 = vpop.eup %6467  ;;  %vm10998_vm11 = vmxor %vm15699_vm5, %vm16644_vm6 }
 0x383   : > { %v3756_v36 = vadd.f32 %v3755_v52, %v3605_v47  ;;  %vm15708_vm1 = vcmp.eq.f32.partialorder %v10277_v11, %v7578_v42  ;;  %6479 = vlog2.f32 %v4488_v35  ;;  %v4516_v17 = vadd.f32 1e-06, %v4388_v5  ;;  %v16952_v52 = vld [vmem:[#allocation231_spill] sm:$0xff]  ;;  %v10978_v8 = vpop.eup %6469  ;;  %vm11014_vm5 = vmxor %vm15702_vm3, %vm16644_vm6  ;;  %v17000_v35 = vld [vmem:[#allocation320_spill] sm:$0xff] }
 0x384   : > { %6481 = vlog2.f32 %v4489_v37  ;;  %v4390_v45 = vadd.f32 %v16951_v56, %v3807_v41  ;;  %v4517_v47 = vadd.f32 1e-06, %v4389_v44  ;;  %v4369_v28 = vadd.f32 %v16952_v52, %v3802_v20  ;;  %v16955_v37 = vld [vmem:[#allocation236_spill] sm:$0xff]  ;;  %v16956_v44 = vld [vmem:[#allocation371_spill] sm:$0xff]  ;;  %v10992_v52 = vpop.eup %6471  ;;  %vm11049_vm10 = vmxor %vm15705_vm15, %vm16644_vm6 }
 0x385   : > { %v3757_v5 = vadd.f32 %v3756_v36, %v3606_v32  ;;  %v4370_v19 = vadd.f32 %v16955_v37, %v3802_v20  ;;  %v4495_v41 = vadd.f32 1e-06, %v4367_v3  ;;  %v3809_v56 = vadd.f32 %v3709_v24, %v16956_v44  ;;  %16957 = vst [vmem:[#allocation175_spill] sm:$0xff] %v10992_v52  ;;  %v16961_v3 = vld [vmem:[#allocation374_spill] sm:$0xff]  ;;  %v11008_v36 = vpop.eup %6473 }
 0x386   : > { %v11005_v32 = vadd.f32 1e-06, %v10854_v7  ;;  %6483 = vlog2.f32 %v4515_v33  ;;  %v4496_v20 = vadd.f32 1e-06, %v4368_v43  ;;  %v3804_v24 = vadd.f32 %v3684_v53, %v16961_v3  ;;  %16962 = vst [vmem:[#allocation179_spill] sm:$0xff] %v11008_v36  ;;  %v16965_v44 = vld [vmem:[#allocation246_spill] sm:$0xff] }
 0x387   : > { %3758 = vadd.xlane.f32.xlu1 %v3757_v5  ;;  %6485 = vlog2.f32 %v4516_v17  ;;  %v4395_v52 = vadd.f32 %v16965_v44, %v3809_v56  ;;  %v16966_v7 = vld [vmem:[#allocation247_spill] sm:$0xff]  ;;  %v16967_v33 = vld [vmem:[#allocation248_spill] sm:$0xff]  ;;  %v11032_v5 = vadd.f32 1e-06, %v10907_v62  ;;  %v4497_v17 = vadd.f32 1e-06, %v4369_v28 }
 0x388   : > { %16960 = vst [vmem:[#allocation199_spill] sm:$0xff] %v11005_v32  ;;  %v4396_v32 = vadd.f32 %v16966_v7, %v3809_v56  ;;  %v4397_v43 = vadd.f32 %v16967_v33, %v3809_v56  ;;  %6487 = vlog2.f32 %v4517_v47  ;;  %v16971_v3 = vld [vmem:[#allocation241_spill] sm:$0xff]  ;;  %vm16972_vm3 = vcmp.eq.s32.totalorder %v6965_v60, 1 }
 0x389   : > { %16970 = vst [vmem:[#allocation357_spill] sm:$0xff] %v11032_v5  ;;  %v4375_v44 = vadd.f32 %v16971_v3, %v3804_v24  ;;  %vm2511_vm4 = vmand %vm10959_vm8, %vm16972_vm3  ;;  %vm15712_vm2 = vcmp.eq.f32.partialorder %v16934_v50, %v7578_v42  ;;  %v11041_v7 = vadd.f32 1e-06, %v4390_v45  ;;  %v11043_v33 = vadd.f32 1e-06, %v4370_v19  ;;  %v16978_v45 = vld [vmem:[#allocation242_spill] sm:$0xff] }
 0x38a   : > { %6489 = vlog2.f32 %v4495_v41  ;;  %v4523_v54 = vadd.f32 1e-06, %v4395_v52  ;;  %vm16977_vm0 = vcmp.eq.s32.totalorder %v6976_v1, 1  ;;  %v5910_v22 = vsel %vm2511_vm4, 1.0, %v15949_v21  ;;  %vm11065_vm8 = vmxor %vm15706_vm7, %vm16644_vm6  ;;  %v16983_v52 = vld [vmem:[#allocation317_spill] sm:$0xff]  ;;  %v16984_v3 = vld [vmem:[#allocation244_spill] sm:$0xff] }
 0x38b   : > { %16973 = vst [vmem:[#allocation358_spill] sm:$0xff] %v11041_v7  ;;  %16974 = vst [vmem:[#allocation359_spill] sm:$0xff] %v11043_v33  ;;  %6491 = vlog2.f32 %v4496_v20  ;;  %v4524_v19 = vadd.f32 1e-06, %v4396_v32  ;;  %v4376_v47 = vadd.f32 %v16978_v45, %v3804_v24  ;;  %v11059_v28 = vpop.eup %6475  ;;  %v3599_v32 = vmul.f32 %v16983_v52, %v5910_v22  ;;  %v3719_v22 = vpop.xlane.xlu1 %3718  ;;  %v16989_v53 = vld [vmem:[#allocation249_spill] sm:$0xff] }
 0x38c   : > { %vm2512_vm3 = vmand %vm10972_vm12, %vm16977_vm0  ;;  %16979 = vst [vmem:[#allocation189_spill] sm:$0xff] %v11059_v28  ;;  %vm16982_vm12 = vcmp.eq.s32.totalorder %v7583_v61, 1  ;;  %v4525_v20 = vadd.f32 1e-06, %v4397_v43  ;;  %v4377_v45 = vadd.f32 %v16984_v3, %v3804_v24  ;;  %v11078_v7 = vpop.eup %6477  ;;  %vm15714_vm0 = vcmp.eq.f32.partialorder %v10369_v14, %v6973_v0  ;;  %v16986_v28 = vld [vmem:[#allocation318_spill] sm:$0xff]  ;;  %v17041_v41 = vld [vmem:[#allocation329_spill] sm:$0xff] }
 0x38d   : > { %vm2513_vm4 = vmand %vm11014_vm5, %vm16982_vm12  ;;  %v5911_v55 = vsel %vm2512_vm3, 1.0, %v15949_v21  ;;  %vm16985_vm7 = vcmp.eq.s32.totalorder %v7614_v57, 1  ;;  %6493 = vlog2.f32 %v4497_v17  ;;  %v4503_v33 = vadd.f32 1e-06, %v4375_v44  ;;  %v11088_v43 = vpop.eup %6479  ;;  %v16990_v44 = vld [vmem:[#allocation319_spill] sm:$0xff]  ;;  %v17095_v62 = vld [vmem:[#allocation361_spill] sm:$0xff] }
 0x38e   : > { %vm2514_vm15 = vmand %vm11027_vm13, %vm16985_vm7  ;;  %v5912_v37 = vsel %vm2513_vm4, 1.0, %v15949_v21  ;;  %v3600_v36 = vmul.f32 %v16986_v28, %v5911_v55  ;;  %v4398_v27 = vadd.f32 %v16989_v53, %v3809_v56  ;;  %6495 = vlog2.f32 %v4523_v54  ;;  %v11103_v17 = vpop.eup %6481  ;;  %v16993_v54 = vld [vmem:[#allocation245_spill] sm:$0xff] }
 0x38f   : > { %v5913_v3 = vsel %vm2514_vm15, 1.0, %v15949_v21  ;;  %vm11095_vm5 = vmxor %vm15709_vm9, %vm16644_vm6  ;;  %v11101_v55 = vmul.f32 0.6931472, %v10773_v13  ;;  %v3601_v28 = vmul.f32 %v16990_v44, %v5912_v37  ;;  %6497 = vlog2.f32 %v4524_v19 }
 0x390   : > { %v3750_v31 = vadd.f32 %v3600_v36, %v3599_v32  ;;  %vm11112_vm15 = vmxor %vm15708_vm1, %vm16644_vm6  ;;  %v4378_v13 = vadd.f32 %v16993_v54, %v3804_v24  ;;  %vm16994_vm7 = vcmp.eq.s32.totalorder %v6965_v60, 1  ;;  %6499 = vlog2.f32 %v4525_v20  ;;  %v16995_v32 = vld [vmem:[#allocation377_spill] sm:$0xff]  ;;  %v11126_v53 = vpop.eup %6483 }
 0x391   : > { %vm2523_vm3 = vmand %vm10984_vm14, %vm16994_vm7  ;;  %v4504_v56 = vadd.f32 1e-06, %v4376_v47  ;;  %v4505_v36 = vadd.f32 1e-06, %v4377_v45  ;;  %v11124_v37 = vadd.f32 %v3719_v22, %v16995_v32  ;;  %16996 = vst [vmem:[#allocation190_spill] sm:$0xff] %v11126_v53  ;;  %vm16997_vm4 = vcmp.eq.f32.partialorder %v10482_v63, %v6962_v59  ;;  %v11142_v20 = vpop.eup %6485 }
 0x392   : > { %vm11132_vm1 = vmxor %vm16997_vm4, %vm16644_vm6  ;;  %v3602_v19 = vmul.f32 %v17000_v35, %v5913_v3  ;;  %v3751_v54 = vadd.f32 %v3750_v31, %v3601_v28  ;;  %vm17001_vm14 = vcmp.eq.s32.totalorder %v6976_v1, 1  ;;  %v5922_v47 = vsel %vm2523_vm3, 1.0, %v15949_v21  ;;  %17002 = vst [vmem:[#allocation192_spill] sm:$0xff] %v11142_v20  ;;  %v17008_v28 = vld [vmem:[#allocation258_spill] sm:$0xff]  ;;  %v17009_v3 = vld [vmem:[#allocation17_spill] sm:$0xff]  ;;  %v11164_v11 = vpop.eup %6487 }
 0x393   : > { %vm2524_vm7 = vmand %vm10998_vm11, %vm17001_vm14  ;;  %6501 = vlog2.f32 %v4503_v33  ;;  %vm17003_vm4 = vcmp.eq.f32.partialorder %v10482_v63, %v6973_v0  ;;  %vm15715_vm12 = vcmp.eq.f32.partialorder %v10553_v46, %v6962_v59  ;;  %vm17006_vm13 = vcmp.eq.s32.totalorder %v7583_v61, 1  ;;  %17010 = vst [vmem:[#allocation196_spill] sm:$0xff] %v11164_v11 }
 0x394   : > { %vm11148_vm9 = vmxor %vm17003_vm4, %vm16644_vm6  ;;  %v5923_v31 = vsel %vm2524_vm7, 1.0, %v15949_v21  ;;  %v3611_v33 = vmul.f32 %v17007_v25, %v5922_v47  ;;  %v4403_v22 = vadd.f32 %v17008_v28, %v11124_v37  ;;  %v4404_v32 = vadd.f32 %v17009_v3, %v11124_v37  ;;  %v17012_v47 = vld [vmem:[#allocation324_spill] sm:$0xff]  ;;  %v11175_v44 = vpop.eup %6489 }
 0x395   : > { %vm2525_vm11 = vmand %vm11095_vm5, %vm17006_vm13  ;;  %v3752_v35 = vadd.f32 %v3751_v54, %v3602_v19  ;;  %vm17011_vm14 = vcmp.eq.s32.totalorder %v7614_v57, 1  ;;  %v3612_v25 = vmul.f32 %v17012_v47, %v5923_v31  ;;  %v4612_v28 = vmul.f32 0.6931472, %v10884_v16  ;;  %17013 = vst [vmem:[#allocation134_spill] sm:$0xff] %v11175_v44  ;;  %v11190_v31 = vpop.eup %6491  ;;  %v17020_v16 = vld [vmem:[#allocation327_spill] sm:$0xff] }
 0x396   : > { %vm2526_vm5 = vmand %vm11112_vm15, %vm17011_vm14  ;;  %v5924_v52 = vsel %vm2525_vm11, 1.0, %v15949_v21  ;;  %vm17014_vm13 = vcmp.eq.f32.partialorder %v16934_v50, %v7560_v34  ;;  %v11186_v5 = vadd.f32 1e-06, %v4398_v27  ;;  %v11188_v54 = vadd.f32 1e-06, %v4378_v13  ;;  %17019 = vst [vmem:[#allocation137_spill] sm:$0xff] %v11190_v31 }
 0x397   : > { %v5925_v3 = vsel %vm2526_vm5, 1.0, %v15949_v21  ;;  %vm11182_vm7 = vmxor %vm17014_vm13, %vm16644_vm6  ;;  %6503 = vlog2.f32 %v4504_v56  ;;  %3753 = vadd.xlane.f32.xlu0 %v3752_v35  ;;  %v3613_v47 = vmul.f32 %v17020_v16, %v5924_v52  ;;  %v3765_v11 = vadd.f32 %v3612_v25, %v3611_v33  ;;  %v11216_v33 = vpop.eup %6493  ;;  %v17036_v50 = vld [vmem:[#allocation13_spill] sm:$0xff] }
 0x398   : > { %17017 = vst [vmem:[#allocation204_spill] sm:$0xff] %v11186_v5  ;;  %17018 = vst [vmem:[#allocation208_spill] sm:$0xff] %v11188_v54  ;;  %v4531_v27 = vadd.f32 1e-06, %v4403_v22  ;;  %v11204_v13 = vmul.f32 0.6931472, %v10787_v4  ;;  %6505 = vlog2.f32 %v4505_v36  ;;  %vm17031_vm15 = vcmp.eq.f32.partialorder %v10369_v14, %v6962_v59  ;;  %v11246_v5 = vpop.eup %6495 }
 0x399   : > { %vm11199_vm4 = vmxor %vm15712_vm2, %vm16644_vm6  ;;  %vm17023_vm11 = vcmp.eq.s32.totalorder %v6965_v60, 1  ;;  %v4532_v56 = vadd.f32 1e-06, %v4404_v32  ;;  %v11213_v35 = vmul.f32 0.6931472, %v10799_v39  ;;  %17024 = vst [vmem:[#allocation216_spill] sm:$0xff] %v11216_v33  ;;  %v3766_v32 = vadd.f32 %v3765_v11, %v3613_v47 }
 0x39a   : > { %vm2519_vm14 = vmand %vm11049_vm10, %vm17023_vm11  ;;  %v4614_v25 = vmul.f32 0.6931472, %v10909_v12  ;;  %v17025_v4 = vld [vmem:[#allocation238_spill] sm:$0xff]  ;;  %v17027_v22 = vld [vmem:[#allocation252_spill] sm:$0xff]  ;;  %vm17035_vm13 = vcmp.eq.s32.totalorder %v6976_v1, 1  ;;  %v4859_v16 = vmul.f32 %v17036_v50, %v4612_v28  ;;  %17037 = vst [vmem:[#allocation217_spill] sm:$0xff] %v11246_v5  ;;  %v11265_v5 = vpop.eup %6497  ;;  %6507 = vlog2.f32 %v4531_v27 }
 0x39b   : > { %vm17026_vm2 = vmmov %vm17023_vm11  ;;  %vm17028_vm10 = vcmp.eq.f32.partialorder %v17027_v22, %v6962_v59  ;;  %v17034_v12 = vld [vmem:[#allocation328_spill] sm:$0xff]  ;;  %v5918_v52 = vsel %vm2519_vm14, 1.0, %v15949_v21  ;;  %v17042_v50 = vld [vmem:[#allocation259_spill] sm:$0xff]  ;;  %17044 = vst [vmem:[#allocation219_spill] sm:$0xff] %v11265_v5  ;;  %v11273_v44 = vpop.eup %6499  ;;  %6509 = vlog2.f32 %v4532_v56 }
 0x39c   : > { %vm11225_vm11 = vmand %vm17028_vm10, %vm17026_vm2  ;;  %v3614_v36 = vmul.f32 %v17034_v12, %v5925_v3  ;;  %vm17040_vm10 = vcmp.eq.s32.totalorder %v7583_v61, 1  ;;  %v3607_v47 = vmul.f32 %v17041_v41, %v5918_v52  ;;  %v4405_v28 = vadd.f32 %v17042_v50, %v11124_v37  ;;  %v17043_v3 = vld [vmem:[#allocation14_spill] sm:$0xff]  ;;  %17047 = vst [vmem:[#allocation220_spill] sm:$0xff] %v11273_v44  ;;  %v17055_v52 = vld [vmem:[#allocation260_spill] sm:$0xff]  ;;  %v3694_v50 = vpop.xlane.xlu0 %3693 }
 0x39d   : > { %vm11235_vm3 = vmxor %vm17031_vm15, %vm16644_vm6  ;;  %v4860_v12 = vmul.f32 %v17043_v3, %v4614_v25  ;;  %v17046_v33 = vld [vmem:[#allocation330_spill] sm:$0xff]  ;;  %v11298_v3 = vpop.eup %6501  ;;  %6511 = vlog2.f32 %v10822_v48  ;;  %v17061_v56 = vld [vmem:[#allocation333_spill] sm:$0xff] }
 0x39e   : > { %vm2520_vm2 = vmand %vm11065_vm8, %vm17035_vm13  ;;  %v3767_v54 = vadd.f32 %v3766_v32, %v3614_v36  ;;  %vm17045_vm8 = vcmp.eq.s32.totalorder %v7614_v57, 1  ;;  %v17051_v36 = vld [vmem:[#allocation332_spill] sm:$0xff]  ;;  %17056 = vst [vmem:[#allocation221_spill] sm:$0xff] %v11298_v3  ;;  %6513 = vlog2.f32 %v10688_v9  ;;  %v4620_v9 = vmul.f32 0.6931472, %v10953_v10  ;;  %v17071_v10 = vld [vmem:[#allocation334_spill] sm:$0xff] }
 0x39f   : > { %vm11252_vm15 = vmxor %vm15714_vm0, %vm16644_vm6  ;;  %v5919_v11 = vsel %vm2520_vm2, 1.0, %v15949_v21  ;;  %vm17048_vm2 = vcmp.eq.f32.partialorder %v17027_v22, %v6973_v0  ;;  %vm17070_vm0 = vcmp.eq.s32.totalorder %v7583_v61, 1  ;;  %6515 = vlog2.f32 %v10851_v6  ;;  %v17100_v39 = vld [vmem:[#allocation42_spill] sm:$0xff]  ;;  %v17222_v3 = vld [vmem:[#allocation365_spill] sm:$0xff] }
 0x3a0   : > { %vm2521_vm5 = vmand %vm11182_vm7, %vm17040_vm10  ;;  %v3608_v31 = vmul.f32 %v17046_v33, %v5919_v11  ;;  %vm1687_vm7 = vcmp.ne.s32.totalorder %v17025_v4, %v16485_v15  ;;  %v4406_v11 = vadd.f32 %v17055_v52, %v11124_v37  ;;  %3768 = vadd.xlane.f32.xlu1 %v3767_v54  ;;  %v17060_v33 = vld [vmem:[#allocation378_spill] sm:$0xff]  ;;  %v11312_v37 = vadd.f32 %v4860_v12, %v4859_v16  ;;  %v17134_v12 = vld [vmem:[#allocation343_spill] sm:$0xff] }
 0x3a1   : > { %vm2522_vm14 = vmand %vm11199_vm4, %vm17045_vm8  ;;  %v5920_v19 = vsel %vm2521_vm5, 1.0, %v15949_v21  ;;  %vm17052_vm4 = vcmp.eq.f32.partialorder %v10482_v63, %v7560_v34  ;;  %v3806_v41 = vadd.f32 %v3694_v50, %v17060_v33  ;;  %v4533_v54 = vadd.f32 1e-06, %v4405_v28  ;;  %v11338_v33 = vpop.eup %6503  ;;  %v17109_v25 = vld [vmem:[#allocation166_spill] sm:$0xff] }
 0x3a2   : > { %vm11282_vm10 = vmand %vm17048_vm2, %vm17035_vm13  ;;  %v5921_v20 = vsel %vm2522_vm14, 1.0, %v15949_v21  ;;  %v3609_v32 = vmul.f32 %v17051_v36, %v5920_v19  ;;  %v3760_v19 = vadd.f32 %v3608_v31, %v3607_v47  ;;  %vm17057_vm14 = vcmp.eq.f32.partialorder %v10482_v63, %v7578_v42  ;;  %17066 = vst [vmem:[#allocation224_spill] sm:$0xff] %v11338_v33  ;;  %v17075_v63 = vld [vmem:[#allocation335_spill] sm:$0xff]  ;;  %v11363_v27 = vpop.eup %6505 }
 0x3a3   : > { %vm11292_vm5 = vmxor %vm17052_vm4, %vm16644_vm6  ;;  %v3610_v52 = vmul.f32 %v17061_v56, %v5921_v20  ;;  %vm17062_vm2 = vcmp.eq.s32.totalorder %v6965_v60, 1  ;;  %v4616_v31 = vmul.f32 0.6931472, %v10919_v26  ;;  %vm17065_vm8 = vcmp.eq.s32.totalorder %v6976_v1, 1  ;;  %v17073_v20 = vld [vmem:[#allocation256_spill] sm:$0xff]  ;;  %17076 = vst [vmem:[#allocation225_spill] sm:$0xff] %v11363_v27 }
 0x3a4   : > { %vm11306_vm13 = vmxor %vm17057_vm14, %vm16644_vm6  ;;  %v3761_v16 = vadd.f32 %v3760_v19, %v3609_v32  ;;  %v4622_v26 = vmul.f32 0.6931472, %v10966_v29  ;;  %v17072_v29 = vld [vmem:[#allocation251_spill] sm:$0xff]  ;;  %v4384_v32 = vadd.f32 %v17073_v20, %v3806_v41  ;;  %6517 = vlog2.f32 %v4533_v54  ;;  %v17087_v54 = vld [vmem:[#allocation200_spill] sm:$0xff] }
 0x3a5   : > { %vm2531_vm4 = vmand %vm11132_vm1, %vm17062_vm2  ;;  %vm17067_vm2 = vcmp.eq.f32.partialorder %v10553_v46, %v6973_v0  ;;  %v4383_v28 = vadd.f32 %v17072_v29, %v3806_v41  ;;  %v17107_v36 = vld [vmem:[#allocation339_spill] sm:$0xff] }
 0x3a6   : > { %vm11327_vm14 = vmxor %vm15715_vm12, %vm16644_vm6  ;;  %v5930_v24 = vsel %vm2531_vm4, 1.0, %v15949_v21  ;;  %v3762_v50 = vadd.f32 %v3761_v16, %v3610_v52  ;;  %v11376_v52 = vadd.f32 1e-06, %v4406_v11  ;;  %v17081_v16 = vld [vmem:[#allocation18_spill] sm:$0xff]  ;;  %v17086_v11 = vld [vmem:[#allocation257_spill] sm:$0xff] }
 0x3a7   : > { %vm2532_vm1 = vmand %vm11148_vm9, %vm17065_vm8  ;;  %v3619_v47 = vmul.f32 %v17071_v10, %v5930_v24  ;;  %vm17074_vm8 = vcmp.eq.s32.totalorder %v7614_v57, 1  ;;  %v4385_v6 = vadd.f32 %v17081_v16, %v3806_v41  ;;  %v4386_v10 = vadd.f32 %v17086_v11, %v3806_v41  ;;  %v11415_v11 = vpop.eup %6507 }
 0x3a8   : > { %vm11344_vm12 = vmxor %vm17067_vm2, %vm16644_vm6  ;;  %v5931_v45 = vsel %vm2532_vm1, 1.0, %v15949_v21  ;;  %17080 = vst [vmem:[#allocation227_spill] sm:$0xff] %v11376_v52  ;;  %3763 = vadd.xlane.f32.xlu0 %v3762_v50  ;;  %vm17083_vm2 = vcmp.eq.f32.partialorder %v10369_v14, %v7578_v42  ;;  %v4861_v52 = vmul.f32 %v17087_v54, %v4616_v31  ;;  %v4511_v41 = vadd.f32 1e-06, %v4383_v28  ;;  %v17098_v54 = vld [vmem:[#allocation4_spill] sm:$0xff] }
 0x3a9   : > { %vm2533_vm9 = vmand %vm11292_vm5, %vm17070_vm0  ;;  %v3620_v56 = vmul.f32 %v17075_v63, %v5931_v45  ;;  %vm17077_vm5 = vcmp.eq.f32.partialorder %v10369_v14, %v7560_v34  ;;  %v17082_v45 = vld [vmem:[#allocation336_spill] sm:$0xff]  ;;  %v4512_v31 = vadd.f32 1e-06, %v4384_v32  ;;  %17097 = vst [vmem:[#allocation370_spill] sm:$0xff] %v11415_v11  ;;  %v3864_v28 = vmul.f32 %v10415_v30, %v17100_v39  ;;  %v11425_v32 = vpop.eup %6509 }
 0x3aa   : > { %vm2534_vm4 = vmand %vm11306_vm13, %vm17074_vm8  ;;  %v5932_v19 = vsel %vm2533_vm9, 1.0, %v15949_v21  ;;  %vm17088_vm8 = vcmp.ne.s32.totalorder %v17025_v4, %v16483_v18  ;;  %vm17094_vm13 = vcmp.eq.s32.totalorder %v6965_v60, 1  ;;  %17101 = vst [vmem:[#allocation232_spill] sm:$0xff] %v11425_v32  ;;  %v6512_v53 = vpop.eup %6511  ;;  %6519 = vlog2.f32 %v4511_v41  ;;  %v17155_v50 = vld [vmem:[#allocation212_spill] sm:$0xff] }
 0x3ab   : > { %v5933_v24 = vsel %vm2534_vm4, 1.0, %v15949_v21  ;;  %vm11372_vm1 = vmxor %vm17077_vm5, %vm16644_vm6  ;;  %v3621_v29 = vmul.f32 %v17082_v45, %v5932_v19  ;;  %v3775_v20 = vadd.f32 %v3620_v56, %v3619_v47  ;;  %vm17091_vm5 = vcmp.eq.f32.partialorder %v10055_v58, %v7560_v34  ;;  %v17096_v19 = vld [vmem:[#allocation362_spill] sm:$0xff] }
 0x3ac   : > { %vm11386_vm9 = vmxor %vm17083_vm2, %vm16644_vm6  ;;  %v4863_v47 = vmul.f32 %v17095_v62, %v4620_v9  ;;  %v4864_v16 = vmul.f32 %v17096_v19, %v4622_v26  ;;  %v3622_v14 = vmul.f32 %v17098_v54, %v5933_v24  ;;  %v17103_v26 = vld [vmem:[#allocation338_spill] sm:$0xff]  ;;  %v11474_v39 = vadd.f32 %v3864_v28, %v10651_v40  ;;  %v3729_v40 = vpop.xlane.xlu1 %3728  ;;  %v17128_v28 = vld [vmem:[#allocation185_spill] sm:$0xff] }
 0x3ad   : > { %vm11397_vm4 = vmand %vm11225_vm11, %vm17088_vm8  ;;  %v3776_v45 = vadd.f32 %v3775_v20, %v3621_v29  ;;  %vm17099_vm11 = vcmp.eq.s32.totalorder %v6976_v1, 1  ;;  %v4513_v29 = vadd.f32 1e-06, %v4385_v6  ;;  %6521 = vlog2.f32 %v4512_v31  ;;  %v17131_v31 = vld [vmem:[#allocation186_spill] sm:$0xff] }
 0x3ae   : > { %vm11405_vm2 = vmxor %vm17091_vm5, %vm16644_vm6  ;;  %v11433_v20 = vadd.f32 %v4864_v16, %v4863_v47  ;;  %v11451_v47 = vmul.f32 0.6931472, %v10978_v8  ;;  %v6514_v16 = vpop.eup %6513  ;;  %vm17108_vm5 = vcmp.eq.s32.totalorder %v6965_v60, 1  ;;  %v17116_v8 = vld [vmem:[#allocation354_spill] sm:$0xff] }
 0x3af   : > { %vm2527_vm0 = vmand %vm11235_vm3, %vm17094_vm13  ;;  %vm17102_vm3 = vcmp.eq.s32.totalorder %v7583_v61, 1  ;;  %v3777_v19 = vadd.f32 %v3776_v45, %v3622_v14  ;;  %6523 = vlog2.f32 %v4513_v29  ;;  %v11518_v29 = vmul.f32 0.6931472, %v6514_v16  ;;  %v17174_v62 = vld [vmem:[#allocation214_spill] sm:$0xff] }
 0x3b0   : > { %vm2528_vm8 = vmand %vm11252_vm15, %vm17099_vm11  ;;  %v5926_v44 = vsel %vm2527_vm0, 1.0, %v15949_v21  ;;  %vm17106_vm0 = vcmp.eq.s32.totalorder %v7614_v57, 1 }
 0x3b1   : > { %vm2529_vm13 = vmand %vm11372_vm1, %vm17102_vm3  ;;  %v5927_v9 = vsel %vm2528_vm8, 1.0, %v15949_v21  ;;  %v3615_v24 = vmul.f32 %v17103_v26, %v5926_v44  ;;  %vm17118_vm3 = vcmp.eq.s32.totalorder %v6976_v1, 1  ;;  %3778 = vadd.xlane.f32.xlu1 %v3777_v19  ;;  %v17122_v26 = vld [vmem:[#allocation340_spill] sm:$0xff]  ;;  %v4618_v19 = vmul.f32 0.6931472, %v6512_v53 }
 0x3b2   : > { %vm11440_vm15 = vmand %vm11282_vm10, %vm1687_vm7  ;;  %v5928_v44 = vsel %vm2529_vm13, 1.0, %v15949_v21  ;;  %v3616_v6 = vmul.f32 %v17107_v36, %v5927_v9  ;;  %vm17110_vm7 = vcmp.eq.f32.partialorder %v17109_v25, %v6962_v59  ;;  %v11478_v9 = vadd.f32 %v10620_v38, %v10616_v51  ;;  %v17145_v38 = vld [vmem:[#allocation345_spill] sm:$0xff] }
 0x3b3   : > { %vm2530_vm1 = vmand %vm11386_vm9, %vm17106_vm0  ;;  %vm17113_vm9 = vcmp.eq.f32.partialorder %v10553_v46, %v7560_v34  ;;  %vm17119_vm13 = vcmp.eq.f32.partialorder %v17109_v25, %v6973_v0  ;;  %v3617_v54 = vmul.f32 %v17122_v26, %v5928_v44  ;;  %v11500_v51 = vadd.f32 1e-06, %v4386_v10 }
 0x3b4   : > { %vm11458_vm10 = vmand %vm17110_vm7, %vm17108_vm5  ;;  %v5929_v63 = vsel %vm2530_vm1, 1.0, %v15949_v21  ;;  %17117 = vst [vmem:[#allocation233_spill] sm:$0xff] %v11478_v9  ;;  %v3770_v41 = vadd.f32 %v3616_v6, %v3615_v24  ;;  %vm17123_vm1 = vcmp.eq.f32.partialorder %v10553_v46, %v7578_v42  ;;  %v3813_v24 = vadd.f32 %v3729_v40, %v10444_v23  ;;  %v6516_v6 = vpop.eup %6515  ;;  %v17129_v46 = vld [vmem:[#allocation341_spill] sm:$0xff] }
 0x3b5   : > { %vm11467_vm11 = vmxor %vm17113_vm9, %vm16644_vm6  ;;  %17126 = vst [vmem:[#allocation234_spill] sm:$0xff] %v11500_v51  ;;  %vm17127_vm9 = vcmp.eq.s32.totalorder %v6965_v60, 1  ;;  %v4990_v44 = vadd.f32 %v11312_v37, %v4861_v52  ;;  %v3618_v10 = vmul.f32 %v17129_v46, %v5929_v63  ;;  %v11520_v23 = vpop.eup %6517  ;;  %v17136_v63 = vld [vmem:[#allocation26_spill] sm:$0xff]  ;;  %v11553_v32 = vmul.f32 0.6931472, %v6516_v6  ;;  %v17218_v6 = vld [vmem:[#allocation41_spill] sm:$0xff] }
 0x3b6   : > { %vm11485_vm0 = vmand %vm17119_vm13, %vm17118_vm3  ;;  %v3771_v26 = vadd.f32 %v3770_v41, %v3617_v54  ;;  %17132 = vst [vmem:[#allocation228_spill] sm:$0xff] %v11520_v23  ;;  %vm17133_vm13 = vcmp.eq.s32.totalorder %v7583_v61, 1  ;;  %v17135_v54 = vld [vmem:[#allocation268_spill] sm:$0xff]  ;;  %v4412_v41 = vadd.f32 %v17136_v63, %v3813_v24 }
 0x3b7   : > { %vm11494_vm5 = vmxor %vm17123_vm1, %vm16644_vm6  ;;  %vm17130_vm1 = vcmp.eq.s32.totalorder %v6976_v1, 1  ;;  %v4411_v53 = vadd.f32 %v17135_v54, %v3813_v24 }
 0x3b8   : > { %vm2539_vm3 = vmand %vm11327_vm14, %vm17127_vm9  ;;  %vm1633_vm14 = vcmp.ne.s32.totalorder %v17116_v8, %v17131_v31  ;;  %vm15726_vm9 = vcmp.eq.f32.partialorder %v10371_v49, %v7578_v42  ;;  %v3772_v40 = vadd.f32 %v3771_v26, %v3618_v10  ;;  %v17144_v26 = vld [vmem:[#allocation12_spill] sm:$0xff] }
 0x3b9   : > { %vm2540_vm7 = vmand %vm11344_vm12, %vm17130_vm1  ;;  %v5938_v48 = vsel %vm2539_vm3, 1.0, %v15949_v21  ;;  %vm17137_vm12 = vcmp.eq.f32.partialorder %v10371_v49, %v7560_v34  ;;  %vm17140_vm1 = vcmp.eq.s32.totalorder %v7614_v57, 1  ;;  %v4539_v23 = vadd.f32 1e-06, %v4411_v53 }
 0x3ba   : > { %vm2541_vm8 = vmand %vm11467_vm11, %vm17133_vm13  ;;  %v5939_v37 = vsel %vm2540_vm7, 1.0, %v15949_v21  ;;  %v3627_v52 = vmul.f32 %v17134_v12, %v5938_v48  ;;  %v17141_v48 = vld [vmem:[#allocation344_spill] sm:$0xff]  ;;  %v17142_v12 = vld [vmem:[#allocation269_spill] sm:$0xff]  ;;  %vm17143_vm7 = vcmp.eq.f32.partialorder %v10055_v58, %v7578_v42  ;;  %v4862_v10 = vmul.f32 %v17144_v26, %v4618_v19  ;;  %3773 = vadd.xlane.f32.xlu0 %v3772_v40 }
 0x3bb   : > { %vm11536_vm3 = vmxor %vm17137_vm12, %vm16644_vm6  ;;  %v5940_v45 = vsel %vm2541_vm8, 1.0, %v15949_v21  ;;  %v3628_v54 = vmul.f32 %v17141_v48, %v5939_v37  ;;  %v4413_v63 = vadd.f32 %v17142_v12, %v3813_v24  ;;  %vm17146_vm8 = vcmp.eq.s32.totalorder %v7583_v61, 1  ;;  %v17149_v19 = vld [vmem:[#allocation191_spill] sm:$0xff] }
 0x3bc   : > { %vm2542_vm11 = vmand %vm11494_vm5, %vm17140_vm1  ;;  %v3629_v11 = vmul.f32 %v17145_v38, %v5940_v45  ;;  %v4540_v37 = vadd.f32 1e-06, %v4412_v41  ;;  %v11563_v12 = vsel %vm11397_vm4, 1.0, %v15949_v21  ;;  %vm17150_vm1 = vcmp.eq.f32.partialorder %v17149_v19, %v7560_v34  ;;  %v17156_v41 = vld [vmem:[#allocation270_spill] sm:$0xff]  ;;  %v17157_v58 = vld [vmem:[#allocation355_spill] sm:$0xff] }
 0x3bd   : > { %v5941_v46 = vsel %vm2542_vm11, 1.0, %v15949_v21  ;;  %vm2410_vm13 = vmxor %vm17143_vm7, %vm16644_vm6  ;;  %v3785_v5 = vadd.f32 %v3628_v54, %v3627_v52  ;;  %17147 = vst [vmem:[#allocation230_spill] sm:$0xff] %v11563_v12  ;;  %v17153_v52 = vld [vmem:[#allocation346_spill] sm:$0xff]  ;;  %vm17154_vm7 = vcmp.eq.s32.totalorder %v7614_v57, 1  ;;  %v4414_v40 = vadd.f32 %v17156_v41, %v3813_v24  ;;  %v11594_v24 = vpop.eup %6519 }
 0x3be   : > { %vm2537_vm5 = vmand %vm11405_vm2, %vm17146_vm8  ;;  %v3630_v53 = vmul.f32 %v17153_v52, %v5941_v46  ;;  %v4541_v45 = vadd.f32 1e-06, %v4413_v63  ;;  %6525 = vlog2.f32 %v4539_v23  ;;  %17161 = vst [vmem:[#allocation235_spill] sm:$0xff] %v11594_v24  ;;  %v4636_v63 = vmul.f32 0.6931472, %v11078_v7  ;;  %v17168_v41 = vld [vmem:[#allocation218_spill] sm:$0xff] }
 0x3bf   : > { %vm17148_vm12 = vmmov %vm17146_vm8  ;;  %v5936_v56 = vsel %vm2537_vm5, 1.0, %v15949_v21  ;;  %v3786_v54 = vadd.f32 %v3785_v5, %v3629_v11  ;;  %6527 = vlog2.f32 %v4540_v37  ;;  %v11605_v11 = vadd.f32 %v4990_v44, %v4862_v10  ;;  %v17172_v10 = vld [vmem:[#allocation356_spill] sm:$0xff] }
 0x3c0   : > { %vm11570_vm11 = vmand %vm17150_vm1, %vm17148_vm12  ;;  %v3625_v38 = vmul.f32 %v17157_v58, %v5936_v56  ;;  %vm17158_vm12 = vcmp.eq.f32.partialorder %v17109_v25, %v7560_v34  ;;  %v11611_v23 = vsel %vm11440_vm15, 1.0, %v15949_v21  ;;  %v11613_v56 = vpop.eup %6521  ;;  %vm17173_vm15 = vcmp.ne.s32.totalorder %v17116_v8, %v16483_v18 }
 0x3c1   : > { %vm2538_vm2 = vmand %vm2410_vm13, %vm17154_vm7  ;;  %17166 = vst [vmem:[#allocation231_spill] sm:$0xff] %v11611_v23  ;;  %v3787_v44 = vadd.f32 %v3786_v54, %v3630_v53  ;;  %vm1652_vm13 = vcmp.ne.s32.totalorder %v17174_v62, %v17128_v28  ;;  %v4638_v52 = vmul.f32 0.6931472, %v11088_v43  ;;  %v11634_v58 = vpop.eup %6523  ;;  %vm1653_vm4 = vcmp.ne.s32.totalorder %v17174_v62, %v17131_v31  ;;  %v17179_v53 = vld [vmem:[#allocation6_spill] sm:$0xff]  ;;  %v17238_v62 = vld [vmem:[#allocation23_spill] sm:$0xff] }
 0x3c2   : > { %v5937_v26 = vsel %vm2538_vm2, 1.0, %v15949_v21  ;;  %vm11588_vm1 = vmand %vm17158_vm12, %vm17146_vm8  ;;  %17167 = vst [vmem:[#allocation236_spill] sm:$0xff] %v11613_v56  ;;  %vm17169_vm12 = vcmp.eq.f32.partialorder %v17168_v41, %v7560_v34  ;;  %v3781_v7 = vadd.f32 %v10610_v2, %v3625_v38  ;;  %v11644_v14 = vadd.f32 1e-06, %v4414_v40  ;;  %v17182_v40 = vld [vmem:[#allocation176_spill] sm:$0xff] }
 0x3c3   : > { %vm17162_vm5 = vmmov %vm17154_vm7  ;;  %vm17163_vm7 = vcmp.eq.f32.partialorder %v17109_v25, %v7578_v42  ;;  %v3626_v37 = vmul.f32 %v17172_v10, %v5937_v26  ;;  %17175 = vst [vmem:[#allocation371_spill] sm:$0xff] %v11634_v58  ;;  %6529 = vlog2.f32 %v4541_v45  ;;  %v11647_v38 = vmul.f32 0.6931472, %v11103_v17  ;;  %3788 = vadd.xlane.f32.xlu1 %v3787_v44  ;;  %v17180_v26 = vld [vmem:[#allocation357_spill] sm:$0xff]  ;;  %v17190_v10 = vld [vmem:[#allocation368_spill] sm:$0xff] }
 0x3c4   : > { %vm11601_vm2 = vmand %vm17163_vm7, %vm17162_vm5  ;;  %17177 = vst [vmem:[#allocation374_spill] sm:$0xff] %v11644_v14  ;;  %6531 = vlog2.f32 %v17180_v26  ;;  %v17186_v44 = vld [vmem:[#allocation9_spill] sm:$0xff]  ;;  %v17188_v26 = vld [vmem:[#allocation367_spill] sm:$0xff]  ;;  %v11687_v48 = vmul.f32 %v17190_v10, %v4638_v52 }
 0x3c5   : > { %vm11620_vm5 = vmand %vm17169_vm12, %vm17146_vm8  ;;  %vm17176_vm8 = vcmp.ne.s32.totalorder %v17116_v8, %v16485_v15  ;;  %v3782_v43 = vadd.f32 %v3781_v7, %v3626_v37  ;;  %v17187_v7 = vld [vmem:[#allocation3_spill] sm:$0xff]  ;;  %v11676_v14 = vmul.f32 %v17188_v26, %v4636_v63  ;;  %v17191_v58 = vld [vmem:[#allocation177_spill] sm:$0xff] }
 0x3c6   : > { %vm1907_vm7 = vmand %vm11458_vm10, %vm17173_vm15  ;;  %vm17178_vm10 = vcmp.ne.s32.totalorder %v17116_v8, %v17128_v28  ;;  %v17189_v8 = vld [vmem:[#allocation379_spill] sm:$0xff]  ;;  %v11690_v51 = vmul.f32 0.6931472, %v17191_v58  ;;  %v17199_v10 = vld [vmem:[#allocation8_spill] sm:$0xff] }
 0x3c7   : > { %vm1908_vm12 = vmand %vm11485_vm0, %vm17176_vm8  ;;  %v5690_v2 = vsel %vm1907_vm7, 1.0, %v15949_v21  ;;  %vm17181_vm0 = vcmp.eq.s32.totalorder %v7583_v61, 1  ;;  %vm17183_vm7 = vcmp.eq.f32.partialorder %v17182_v40, %v7560_v34  ;;  %3783 = vadd.xlane.f32.xlu0 %v3782_v43  ;;  %v17232_v25 = vld [vmem:[#allocation381_spill] sm:$0xff] }
 0x3c8   : > { %vm1909_vm15 = vmand %vm11588_vm1, %vm17178_vm10  ;;  %v5691_v36 = vsel %vm1908_vm12, 1.0, %v15949_v21  ;;  %v3827_v54 = vmul.f32 %v5690_v2, %v17179_v53  ;;  %vm1656_vm12 = vcmp.ne.s32.totalorder %v17187_v7, %v17128_v28  ;;  %v3704_v53 = vpop.xlane.xlu0 %3703  ;;  %v11725_v27 = vpop.eup %6525 }
 0x3c9   : > { %vm11662_vm8 = vmand %vm17183_vm7, %vm17181_vm0  ;;  %v5692_v45 = vsel %vm1909_vm15, 1.0, %v15949_v21  ;;  %v4147_v46 = vadd.f32 %v5691_v36, %v5690_v2  ;;  %v3828_v37 = vmul.f32 %v5691_v36, %v17186_v44  ;;  %v3808_v5 = vadd.f32 %v3704_v53, %v17189_v8  ;;  %v17203_v8 = vld [vmem:[#allocation140_spill] sm:$0xff]  ;;  %17207 = vst [vmem:[#allocation246_spill] sm:$0xff] %v11725_v27  ;;  %v11737_v33 = vpop.eup %6527 }
 0x3ca   : > { %vm1910_vm1 = vmand %vm11601_vm2, %vm1633_vm14  ;;  %vm1657_vm14 = vcmp.ne.s32.totalorder %v17187_v7, %v17131_v31  ;;  %v4851_v44 = vmul.f32 %v5690_v2, %v11101_v55  ;;  %v4852_v49 = vmul.f32 %v5691_v36, %v11204_v13  ;;  %v17194_v55 = vld [vmem:[#allocation187_spill] sm:$0xff]  ;;  %v3829_v16 = vmul.f32 %v5692_v45, %v17199_v10  ;;  %v17200_v2 = vld [vmem:[#allocation213_spill] sm:$0xff]  ;;  %17212 = vst [vmem:[#allocation247_spill] sm:$0xff] %v11737_v33  ;;  %v3739_v7 = vpop.xlane.xlu1 %3738 }
 0x3cb   : > { %vm2418_vm10 = vmxor %vm15726_vm9, %vm16644_vm6  ;;  %v5693_v63 = vsel %vm1910_vm1, 1.0, %v15949_v21  ;;  %v4148_v43 = vadd.f32 %v5692_v45, %v4147_v46  ;;  %v3955_v26 = vadd.f32 %v3828_v37, %v3827_v54  ;;  %vm17198_vm1 = vcmp.eq.s32.totalorder %v7614_v57, 1  ;;  %v17201_v13 = vld [vmem:[#allocation271_spill] sm:$0xff]  ;;  %v17202_v54 = vld [vmem:[#allocation272_spill] sm:$0xff] }
 0x3cc   : > { %vm17192_vm2 = vmmov %vm17181_vm0  ;;  %v4391_v36 = vadd.f32 %v17201_v13, %v3808_v5  ;;  %v4392_v46 = vadd.f32 %v17202_v54, %v3808_v5  ;;  %v17206_v10 = vld [vmem:[#allocation273_spill] sm:$0xff]  ;;  %v17221_v33 = vld [vmem:[#allocation223_spill] sm:$0xff] }
 0x3cd   : > { %vm2545_vm6 = vmand %vm11536_vm3, %vm17192_vm2  ;;  %v4149_v37 = vadd.f32 %v5693_v63, %v4148_v43  ;;  %v4393_v24 = vadd.f32 %v17206_v10, %v3808_v5  ;;  %v17208_v13 = vld [vmem:[#allocation141_spill] sm:$0xff]  ;;  %v17210_v43 = vld [vmem:[#allocation11_spill] sm:$0xff] }
 0x3ce   : > { %vm17193_vm15 = vmmov %vm17181_vm0  ;;  %vm17195_vm0 = vcmp.eq.f32.partialorder %v17194_v55, %v7560_v34  ;;  %v5944_v58 = vsel %vm2545_vm6, 1.0, %v15949_v21  ;;  %v17214_v10 = vld [vmem:[#allocation243_spill] sm:$0xff] }
 0x3cf   : > { %vm11703_vm7 = vmand %vm17195_vm0, %vm17193_vm15  ;;  %v3633_v56 = vmul.f32 %v17203_v8, %v5944_v58  ;;  %v3830_v58 = vmul.f32 %v5693_v63, %v17210_v43  ;;  %v3956_v8 = vadd.f32 %v3955_v26, %v3829_v16  ;;  %4150 = vadd.xlane.f32.xlu1 %v4149_v37  ;;  %v17220_v16 = vld [vmem:[#allocation274_spill] sm:$0xff]  ;;  %v4520_v37 = vadd.f32 1e-06, %v4392_v46  ;;  %v17228_v46 = vld [vmem:[#allocation27_spill] sm:$0xff] }
 0x3d0   : > { %vm2546_vm9 = vmand %vm2418_vm10, %vm17198_vm1  ;;  %vm17205_vm10 = vcmp.eq.f32.partialorder %v17149_v19, %v7578_v42  ;;  %v17211_v19 = vld [vmem:[#allocation178_spill] sm:$0xff]  ;;  %v4394_v43 = vadd.f32 %v17220_v16, %v3808_v5  ;;  %v11766_v5 = vpop.eup %6529 }
 0x3d1   : > { %v5945_v53 = vsel %vm2546_vm9, 1.0, %v15949_v21  ;;  %vm17204_vm2 = vmmov %vm17198_vm1  ;;  %vm17209_vm9 = vcmp.ne.s32.totalorder %v17155_v50, %v17128_v28  ;;  %v11735_v30 = vmul.f32 0.6931472, %v17211_v19  ;;  %v3791_v27 = vadd.f32 %v17218_v6, %v3633_v56  ;;  %17226 = vst [vmem:[#allocation248_spill] sm:$0xff] %v11766_v5  ;;  %v6532_v16 = vpop.eup %6531 }
 0x3d2   : > { %vm1794_vm6 = vmand %vm17205_vm10, %vm17204_vm2  ;;  %v3634_v54 = vmul.f32 %v17208_v13, %v5945_v53  ;;  %vm17215_vm2 = vcmp.eq.f32.partialorder %v17214_v10, %v7560_v34  ;;  %v4519_v19 = vadd.f32 1e-06, %v4391_v36  ;;  %v4853_v6 = vmul.f32 %v5692_v45, %v11213_v35  ;;  %v17233_v45 = vld [vmem:[#allocation237_spill] sm:$0xff] }
 0x3d3   : > { %vm1921_vm0 = vmand %vm11570_vm11, %vm17209_vm9  ;;  %vm17219_vm11 = vcmp.ne.s32.totalorder %v17155_v50, %v17131_v31  ;;  %v17225_v50 = vld [vmem:[#allocation19_spill] sm:$0xff] }
 0x3d4   : > { %vm17213_vm1 = vmmov %vm17193_vm15  ;;  %v5704_v26 = vsel %vm1921_vm0, 1.0, %v15949_v21  ;;  %vm1660_vm15 = vcmp.ne.s32.totalorder %v17221_v33, %v17128_v28  ;;  %v3792_v36 = vadd.f32 %v3791_v27, %v3634_v54  ;;  %v3957_v27 = vadd.f32 %v3956_v8, %v3830_v58  ;;  %v17235_v54 = vld [vmem:[#allocation369_spill] sm:$0xff] }
 0x3d5   : > { %vm11744_vm10 = vmand %vm17215_vm2, %vm17213_vm1  ;;  %v4163_v9 = vadd.f32 %v5704_v26, %v17222_v3  ;;  %vm17223_vm1 = vcmp.eq.s32.totalorder %v7614_v57, 1  ;;  %vm17224_vm2 = vcmp.eq.f32.partialorder %v17168_v41, %v7578_v42  ;;  %v3841_v56 = vmul.f32 %v5704_v26, %v17225_v50  ;;  %v17290_v50 = vld [vmem:[#allocation21_spill] sm:$0xff] }
 0x3d6   : > { %vm1922_vm9 = vmand %vm1794_vm6, %vm17219_vm11  ;;  %vm1661_vm6 = vcmp.ne.s32.totalorder %v17221_v33, %v17131_v31  ;;  %v4521_v3 = vadd.f32 1e-06, %v4393_v24  ;;  %v4979_v41 = vadd.f32 %v4852_v49, %v4851_v44  ;;  %vm17227_vm11 = vcmp.eq.s32.totalorder %v7583_v61, 1  ;;  %3793 = vadd.xlane.f32.xlu0 %v3792_v36  ;;  %v17234_v44 = vld [vmem:[#allocation337_spill] sm:$0xff] }
 0x3d7   : > { %v5705_v13 = vsel %vm1922_vm9, 1.0, %v15949_v21  ;;  %vm1802_vm3 = vmand %vm17224_vm2, %vm17223_vm1  ;;  %vm17229_vm9 = vcmp.eq.f32.partialorder %v17228_v46, %v7560_v34  ;;  %v3971_v35 = vadd.f32 %v17232_v25, %v3841_v56  ;;  %v4854_v49 = vmul.f32 %v5693_v63, %v11518_v29  ;;  %4160 = vadd.xlane.f32.xlu1 %v17234_v44 }
 0x3d8   : > { %vm1929_vm0 = vmand %vm11620_vm5, %vm1652_vm13  ;;  %vm1668_vm13 = vcmp.ne.s32.totalorder %v17233_v45, %v17128_v28  ;;  %vm17236_vm5 = vcmp.eq.s32.totalorder %v7614_v57, 1  ;;  %v3842_v8 = vmul.f32 %v5705_v13, %v17238_v62  ;;  %6533 = vlog2.f32 %v4519_v19 }
 0x3d9   : > { %vm11779_vm1 = vmand %vm17229_vm9, %vm17227_vm11  ;;  %v5712_v24 = vsel %vm1929_vm0, 1.0, %v15949_v21  ;;  %vm17237_vm11 = vcmp.eq.f32.partialorder %v17182_v40, %v7578_v42  ;;  %v4980_v58 = vadd.f32 %v4979_v41, %v4853_v6  ;;  %v4164_v29 = vadd.f32 %v5705_v13, %v4163_v9  ;;  %v17241_v40 = vld [vmem:[#allocation136_spill] sm:$0xff] }
 0x3da   : > { %vm1930_vm2 = vmand %vm1802_vm3, %vm1653_vm4  ;;  %v4173_v5 = vadd.f32 %v5712_v24, %v17235_v54  ;;  %vm1669_vm3 = vcmp.ne.s32.totalorder %v17233_v45, %v17131_v31  ;;  %v11807_v56 = vadd.f32 1e-06, %v4394_v43  ;;  %6535 = vlog2.f32 %v4520_v37  ;;  %v17245_v37 = vld [vmem:[#allocation222_spill] sm:$0xff]  ;;  %v17246_v6 = vld [vmem:[#allocation376_spill] sm:$0xff] }
 0x3db   : > { %vm1806_vm4 = vmand %vm17237_vm11, %vm17236_vm5  ;;  %v5713_v63 = vsel %vm1930_vm2, 1.0, %v15949_v21  ;;  %vm17240_vm9 = vcmp.eq.s32.totalorder %v7583_v61, 1  ;;  %vm17242_vm5 = vcmp.eq.f32.partialorder %v17241_v40, %v7560_v34  ;;  %v11824_v17 = vadd.f32 %v3971_v35, %v3842_v8  ;;  %v17249_v35 = vld [vmem:[#allocation28_spill] sm:$0xff]  ;;  %v17255_v54 = vld [vmem:[#allocation229_spill] sm:$0xff] }
 0x3dc   : > { %vm1933_vm0 = vmand %vm11662_vm8, %vm1656_vm12  ;;  %17239 = vst [vmem:[#allocation241_spill] sm:$0xff] %v11807_v56  ;;  %6537 = vlog2.f32 %v4521_v3  ;;  %v4865_v43 = vmul.f32 %v5704_v26, %v11451_v47  ;;  %vm1672_vm8 = vcmp.ne.s32.totalorder %v17245_v37, %v17128_v28  ;;  %v4174_v36 = vadd.f32 %v5713_v63, %v4173_v5  ;;  %v17250_v47 = vld [vmem:[#allocation351_spill] sm:$0xff]  ;;  %v17251_v26 = vld [vmem:[#allocation353_spill] sm:$0xff] }
 0x3dd   : > { %vm11814_vm11 = vmand %vm17242_vm5, %vm17240_vm9  ;;  %v11822_v9 = vsel %vm1933_vm0, 1.0, %v15949_v21  ;;  %vm17247_vm12 = vcmp.eq.s32.totalorder %v7614_v57, 1  ;;  %v4866_v25 = vmul.f32 %v5705_v13, %v11553_v32  ;;  %v3849_v3 = vmul.f32 %v5712_v24, %v17249_v35  ;;  %4155 = vadd.xlane.f32.xlu0 %v17250_v47  ;;  %4170 = vadd.xlane.f32.xlu1 %v17251_v26  ;;  %v17253_v32 = vld [vmem:[#allocation393_spill] sm:$0xff]  ;;  %v17265_v47 = vld [vmem:[#allocation284_spill] sm:$0xff] }
 0x3de   : > { %vm1934_vm2 = vmand %vm1806_vm4, %vm1657_vm14  ;;  %v4178_v41 = vadd.f32 %v11822_v9, %v17246_v6  ;;  %vm17248_vm14 = vcmp.eq.f32.partialorder %v17194_v55, %v7578_v42  ;;  %vm17252_vm9 = vcmp.ne.s32.totalorder %v17200_v2, %v17128_v28  ;;  %v11850_v55 = vadd.f32 %v4980_v58, %v4854_v49  ;;  %v17263_v6 = vld [vmem:[#allocation226_spill] sm:$0xff]  ;;  %v17266_v26 = vld [vmem:[#allocation285_spill] sm:$0xff] }
 0x3df   : > { %vm1814_vm4 = vmand %vm17248_vm14, %vm17247_vm12  ;;  %v11843_v5 = vsel %vm1934_vm2, 1.0, %v15949_v21  ;;  %v3815_v13 = vadd.f32 %v3739_v7, %v17253_v32  ;;  %v5004_v44 = vadd.f32 %v11687_v48, %v11676_v14  ;;  %vm17254_vm12 = vcmp.eq.s32.totalorder %v7583_v61, 1  ;;  %v17262_v14 = vld [vmem:[#allocation24_spill] sm:$0xff]  ;;  %v17264_v7 = vld [vmem:[#allocation382_spill] sm:$0xff] }
 0x3e0   : > { %vm1941_vm5 = vmand %vm11703_vm7, %vm17252_vm9  ;;  %vm17256_vm14 = vcmp.eq.f32.partialorder %v17255_v54, %v7560_v34  ;;  %vm17259_vm0 = vcmp.ne.s32.totalorder %v17200_v2, %v17131_v31  ;;  %v4995_v48 = vadd.f32 %v11433_v20, %v4865_v43  ;;  %v3981_v8 = vadd.f32 %v17262_v14, %v3849_v3  ;;  %v17269_v43 = vld [vmem:[#allocation286_spill] sm:$0xff]  ;;  %v17270_v14 = vld [vmem:[#allocation287_spill] sm:$0xff] }
 0x3e1   : > { %vm11860_vm2 = vmand %vm17256_vm14, %vm17254_vm12  ;;  %v11872_v49 = vsel %vm1941_vm5, 1.0, %v15949_v21  ;;  %v4642_v58 = vmul.f32 0.6931472, %v6532_v16  ;;  %v4419_v2 = vadd.f32 %v17265_v47, %v3815_v13  ;;  %v4420_v32 = vadd.f32 %v17266_v26, %v3815_v13  ;;  %v17271_v47 = vld [vmem:[#allocation29_spill] sm:$0xff]  ;;  %4165 = vadd.xlane.f32.xlu0 %v4164_v29  ;;  %3958 = vadd.xlane.f32.xlu1 %v3957_v27  ;;  %v17280_v29 = vld [vmem:[#allocation32_spill] sm:$0xff] }
 0x3e2   : > { %vm11867_vm7 = vmand %vm1814_vm4, %vm17259_vm0  ;;  %v4188_v35 = vadd.f32 %v11872_v49, %v17264_v7  ;;  %vm17267_vm4 = vcmp.eq.s32.totalorder %v7614_v57, 1  ;;  %vm17268_vm0 = vcmp.eq.f32.partialorder %v17214_v10, %v7578_v42  ;;  %v4873_v20 = vmul.f32 %v5712_v24, %v11647_v38  ;;  %v17273_v38 = vld [vmem:[#allocation276_spill] sm:$0xff]  ;;  %v17337_v24 = vld [vmem:[#allocation30_spill] sm:$0xff] }
 0x3e3   : > { %vm1810_vm5 = vmand %vm17268_vm0, %vm17267_vm4  ;;  %v4179_v16 = vadd.f32 %v11843_v5, %v4178_v41  ;;  %v4421_v3 = vadd.f32 %v17269_v43, %v3815_v13  ;;  %v4422_v7 = vadd.f32 %v17270_v14, %v3815_v13  ;;  %v3850_v10 = vmul.f32 %v5713_v63, %v17271_v47  ;;  %v17279_v14 = vld [vmem:[#allocation240_spill] sm:$0xff] }
 0x3e4   : > { %vm1937_vm14 = vmand %vm11744_vm10, %vm1660_vm15  ;;  %vm17274_vm0 = vcmp.eq.f32.partialorder %v17273_v38, %v7560_v34  ;;  %v4547_v41 = vadd.f32 1e-06, %v4419_v2  ;;  %v4548_v13 = vadd.f32 1e-06, %v4420_v32  ;;  %v5005_v43 = vadd.f32 %v5004_v44, %v4873_v20  ;;  %v11936_v44 = vpop.eup %6533 }
 0x3e5   : > { %vm17272_vm4 = vmmov %vm17254_vm12  ;;  %v11916_v26 = vsel %vm1937_vm14, 1.0, %v15949_v21  ;;  %vm1676_vm15 = vcmp.ne.s32.totalorder %v17279_v14, %v17128_v28  ;;  %v11923_v27 = vsel %vm11867_vm7, 1.0, %v15949_v21  ;;  %v11927_v33 = vadd.f32 %v4995_v48, %v4866_v25  ;;  %17283 = vst [vmem:[#allocation242_spill] sm:$0xff] %v11936_v44  ;;  %v17284_v48 = vld [vmem:[#allocation20_spill] sm:$0xff]  ;;  %v11948_v47 = vpop.eup %6535  ;;  %4175 = vadd.xlane.f32.xlu0 %v4174_v36  ;;  %4180 = vadd.xlane.f32.xlu1 %v4179_v16  ;;  %v17294_v36 = vld [vmem:[#allocation255_spill] sm:$0xff] }
 0x3e6   : > { %vm11904_vm12 = vmand %vm17274_vm0, %vm17272_vm4  ;;  %v4183_v2 = vadd.f32 %v11916_v26, %v17280_v29  ;;  %v11929_v32 = vadd.f32 %v3981_v8, %v3850_v10  ;;  %vm17281_vm10 = vcmp.eq.s32.totalorder %v7614_v57, 1  ;;  %v11939_v20 = vadd.f32 %v11923_v27, %v4188_v35  ;;  %17285 = vst [vmem:[#allocation244_spill] sm:$0xff] %v11948_v47  ;;  %v17300_v29 = vld [vmem:[#allocation36_spill] sm:$0xff]  ;;  %v3714_v35 = vpop.xlane.xlu0 %3713 }
 0x3e7   : > { %vm11911_vm9 = vmand %vm1810_vm5, %vm1661_vm6  ;;  %vm17282_vm6 = vcmp.eq.f32.partialorder %v17228_v46, %v7578_v42  ;;  %v4549_v52 = vadd.f32 1e-06, %v4421_v3  ;;  %v4874_v25 = vmul.f32 %v5713_v63, %v4642_v58  ;;  %v4867_v8 = vmul.f32 %v17284_v48, %v11690_v51  ;;  %v17289_v3 = vld [vmem:[#allocation181_spill] sm:$0xff]  ;;  %v11964_v51 = vpop.eup %6537 }
 0x3e8   : > { %vm1818_vm5 = vmand %vm17282_vm6, %vm17281_vm10  ;;  %v11950_v46 = vadd.f32 1e-06, %v4422_v7  ;;  %6539 = vlog2.f32 %v4547_v41  ;;  %v4632_v10 = vmul.f32 0.6931472, %v17289_v3  ;;  %v4868_v63 = vmul.f32 %v17290_v50, %v11735_v30  ;;  %17291 = vst [vmem:[#allocation245_spill] sm:$0xff] %v11964_v51  ;;  %v17295_v7 = vld [vmem:[#allocation392_spill] sm:$0xff] }
 0x3e9   : > { %vm1945_vm7 = vmand %vm11779_vm1, %vm1668_vm13  ;;  %vm1677_vm1 = vcmp.ne.s32.totalorder %v17279_v14, %v17131_v31  ;;  %6541 = vlog2.f32 %v4548_v13  ;;  %v11969_v45 = vsel %vm11911_vm9, 1.0, %v15949_v21  ;;  %v11979_v30 = vadd.f32 %v5005_v43, %v4874_v25  ;;  %v17296_v13 = vld [vmem:[#allocation38_spill] sm:$0xff]  ;;  %v17301_v25 = vld [vmem:[#allocation31_spill] sm:$0xff]  ;;  %4982 = vadd.xlane.f32.xlu1 %v11850_v55 }
 0x3ea   : > { %17286 = vst [vmem:[#allocation249_spill] sm:$0xff] %v11950_v46  ;;  %vm11955_vm14 = vmand %vm1818_vm5, %vm1669_vm3  ;;  %v11972_v58 = vsel %vm1945_vm7, 1.0, %v15949_v21  ;;  %vm17293_vm3 = vcmp.eq.f32.partialorder %v17241_v40, %v7578_v42  ;;  %vm1682_vm0 = vcmp.ne.s32.totalorder %v17294_v36, %v16483_v18  ;;  %v4184_v16 = vadd.f32 %v11969_v45, %v4183_v2  ;;  %v17304_v50 = vld [vmem:[#allocation37_spill] sm:$0xff] }
 0x3eb   : > { %vm17292_vm13 = vmmov %vm17281_vm10  ;;  %v4193_v41 = vadd.f32 %v11972_v58, %v17295_v7  ;;  %6543 = vlog2.f32 %v17296_v13  ;;  %v4999_v40 = vadd.f32 %v4868_v63, %v4867_v8  ;;  %vm17297_vm10 = vcmp.ne.s32.totalorder %v17245_v37, %v17131_v31  ;;  %v17303_v8 = vld [vmem:[#allocation201_spill] sm:$0xff]  ;;  %v17307_v7 = vld [vmem:[#allocation254_spill] sm:$0xff] }
 0x3ec   : > { %vm1822_vm4 = vmand %vm17293_vm3, %vm17292_vm13  ;;  %6545 = vlog2.f32 %v4549_v52  ;;  %v3857_v2 = vmul.f32 %v11916_v26, %v17300_v29  ;;  %v3853_v19 = vmul.f32 %v11822_v9, %v17301_v25  ;;  %v12011_v37 = vsel %vm11955_vm14, 1.0, %v15949_v21  ;;  %v17302_v52 = vld [vmem:[#allocation388_spill] sm:$0xff]  ;;  %3963 = vadd.xlane.f32.xlu0 %v17307_v7  ;;  %v17308_v13 = vld [vmem:[#allocation395_spill] sm:$0xff] }
 0x3ed   : > { %vm1949_vm9 = vmand %vm11814_vm11, %vm1672_vm8  ;;  %vm1683_vm11 = vcmp.ne.s32.totalorder %v17294_v36, %v16485_v15  ;;  %v4869_v3 = vmul.f32 %v17303_v8, %v4632_v10  ;;  %v3858_v63 = vmul.f32 %v11969_v45, %v17304_v50  ;;  %vm17306_vm5 = vcmp.eq.f32.partialorder %v17255_v54, %v7578_v42  ;;  %v17309_v25 = vld [vmem:[#allocation389_spill] sm:$0xff]  ;;  %v17311_v10 = vld [vmem:[#allocation134_spill] sm:$0xff]  ;;  %4185 = vadd.xlane.f32.xlu1 %v4184_v16 }
 0x3ee   : > { %vm11995_vm6 = vmand %vm1822_vm4, %vm17297_vm10  ;;  %v12000_v43 = vsel %vm1949_vm9, 1.0, %v15949_v21  ;;  %v3991_v29 = vadd.f32 %v17308_v13, %v3857_v2  ;;  %vm17310_vm14 = vcmp.ne.s32.totalorder %v17263_v6, %v17128_v28  ;;  %v4652_v8 = vmul.f32 0.6931472, %v17311_v10  ;;  %v17312_v50 = vld [vmem:[#allocation137_spill] sm:$0xff]  ;;  %v17313_v7 = vld [vmem:[#allocation380_spill] sm:$0xff] }
 0x3ef   : > { %v4198_v48 = vadd.f32 %v12000_v43, %v17302_v52  ;;  %vm17305_vm8 = vmmov %vm17292_vm13  ;;  %v3986_v52 = vadd.f32 %v17309_v25, %v3853_v19  ;;  %v4654_v54 = vmul.f32 0.6931472, %v17312_v50  ;;  %vm1688_vm3 = vcmp.ne.s32.totalorder %v17025_v4, %v17128_v28  ;;  %v17315_v19 = vld [vmem:[#allocation35_spill] sm:$0xff] }
 0x3f0   : > { %vm1830_vm7 = vmand %vm17306_vm5, %vm17305_vm8  ;;  %v3810_v55 = vadd.f32 %v3714_v35, %v17313_v7  ;;  %v12038_v46 = vadd.f32 %v12011_v37, %v4193_v41  ;;  %v12043_v2 = vsel %vm11995_vm6, 1.0, %v15949_v21  ;;  %v3854_v62 = vmul.f32 %v11843_v5, %v17315_v19  ;;  %v17324_v25 = vld [vmem:[#allocation359_spill] sm:$0xff]  ;;  %v17328_v19 = vld [vmem:[#allocation142_spill] sm:$0xff] }
 0x3f1   : > { %vm1957_vm13 = vmand %vm11860_vm2, %vm17310_vm14  ;;  %17314 = vst [vmem:[#allocation377_spill] sm:$0xff] %v12043_v2  ;;  %vm17316_vm2 = vcmp.ne.s32.totalorder %v17263_v6, %v17131_v31  ;;  %vm1689_vm9 = vcmp.ne.s32.totalorder %v17025_v4, %v17131_v31  ;;  %v12057_v41 = vadd.f32 %v12043_v2, %v4198_v48  ;;  %v12059_v35 = vadd.f32 %v4999_v40, %v4869_v3  ;;  %v17325_v10 = vld [vmem:[#allocation275_spill] sm:$0xff]  ;;  %v17326_v48 = vld [vmem:[#allocation277_spill] sm:$0xff] }
 0x3f2   : > { %vm12050_vm4 = vmand %vm1830_vm7, %vm17316_vm2  ;;  %v12062_v53 = vsel %vm1957_vm13, 1.0, %v15949_v21  ;;  %vm17321_vm6 = vcmp.eq.f32.partialorder %v17273_v38, %v7578_v42  ;;  %6547 = vlog2.f32 %v17324_v25  ;;  %v4399_v50 = vadd.f32 %v17325_v10, %v3810_v55  ;;  %v17327_v40 = vld [vmem:[#allocation278_spill] sm:$0xff]  ;;  %v17333_v25 = vld [vmem:[#allocation261_spill] sm:$0xff]  ;;  %v12099_v44 = vpop.eup %6539  ;;  %4992 = vadd.xlane.f32.xlu1 %v11605_v11 }
 0x3f3   : > { %17319 = vst [vmem:[#allocation258_spill] sm:$0xff] %v12062_v53  ;;  %vm17320_vm10 = vmmov %vm17305_vm8  ;;  %v4400_v7 = vadd.f32 %v17326_v48, %v3810_v55  ;;  %v4401_v3 = vadd.f32 %v17327_v40, %v3810_v55  ;;  %v4208_v51 = vadd.f32 %v12062_v53, %v17328_v19  ;;  %vm17329_vm7 = vcmp.eq.s32.totalorder %v7583_v61, 1  ;;  %3968 = vadd.xlane.f32.xlu0 %v17333_v25  ;;  %v17335_v48 = vld [vmem:[#allocation216_spill] sm:$0xff]  ;;  %v17336_v19 = vld [vmem:[#allocation25_spill] sm:$0xff] }
 0x3f4   : > { %vm12069_vm8 = vmand %vm17321_vm6, %vm17320_vm10  ;;  %vm17330_vm14 = vcmp.eq.f32.partialorder %v17027_v22, %v7560_v34  ;;  %v12094_v10 = vadd.f32 %v3991_v29, %v3858_v63  ;;  %v4656_v40 = vmul.f32 0.6931472, %v17335_v48  ;;  %v4879_v56 = vmul.f32 %v17336_v19, %v4652_v8  ;;  %17338 = vst [vmem:[#allocation238_spill] sm:$0xff] %v12099_v44  ;;  %v17340_v53 = vld [vmem:[#allocation308_spill] sm:$0xff]  ;;  %v12115_v8 = vpop.eup %6541  ;;  %v17355_v6 = vld [vmem:[#allocation183_spill] sm:$0xff] }
 0x3f5   : > { %vm1953_vm5 = vmand %vm11904_vm12, %vm1676_vm15  ;;  %v4880_v47 = vmul.f32 %v17337_v24, %v4654_v54  ;;  %vm17339_vm12 = vcmp.eq.s32.totalorder %v6965_v60, 1  ;;  %vm17341_vm15 = vcmp.eq.f32.partialorder %v17340_v53, %v6962_v59  ;;  %v4527_v16 = vadd.f32 1e-06, %v4399_v50  ;;  %17344 = vst [vmem:[#allocation252_spill] sm:$0xff] %v12115_v8  ;;  %v17345_v54 = vld [vmem:[#allocation280_spill] sm:$0xff]  ;;  %v6544_v24 = vpop.eup %6543  ;;  %v17386_v11 = vld [vmem:[#allocation325_spill] sm:$0xff] }
 0x3f6   : > { %vm12089_vm13 = vmand %vm17330_vm14, %vm17329_vm7  ;;  %17334 = vst [vmem:[#allocation17_spill] sm:$0xff] %v12094_v10  ;;  %v4528_v63 = vadd.f32 1e-06, %v4400_v7  ;;  %v12110_v29 = vadd.f32 %v3986_v52, %v3854_v62  ;;  %v12113_v25 = vsel %vm1953_vm5, 1.0, %v15949_v21  ;;  %v4402_v48 = vadd.f32 %v17345_v54, %v3810_v55  ;;  %v17349_v62 = vld [vmem:[#allocation402_spill] sm:$0xff]  ;;  %v17356_v8 = vld [vmem:[#allocation184_spill] sm:$0xff] }
 0x3f7   : > { %vm12106_vm2 = vmand %vm17341_vm15, %vm17339_vm12  ;;  %v12121_v19 = vsel %vm12050_vm4, 1.0, %v15949_v21  ;;  %v4203_v50 = vadd.f32 %v12113_v25, %v17349_v62  ;;  %v5014_v7 = vadd.f32 %v4880_v47, %v4879_v56  ;;  %vm17350_vm6 = vcmp.eq.s32.totalorder %v6976_v1, 1  ;;  %v12148_v62 = vpop.eup %6545  ;;  %v17360_v47 = vld [vmem:[#allocation182_spill] sm:$0xff]  ;;  %v17363_v2 = vld [vmem:[#allocation372_spill] sm:$0xff] }
 0x3f8   : > { %17346 = vst [vmem:[#allocation13_spill] sm:$0xff] %v12121_v19  ;;  %vm12128_vm10 = vmand %vm12069_vm8, %vm1677_vm1  ;;  %vm17351_vm4 = vcmp.eq.f32.partialorder %v17340_v53, %v6973_v0  ;;  %v4529_v14 = vadd.f32 1e-06, %v4401_v3  ;;  %v12144_v13 = vadd.f32 %v12121_v19, %v4208_v51  ;;  %v4644_v54 = vmul.f32 0.6931472, %v17355_v6  ;;  %4987 = vadd.xlane.f32.xlu0 %v17360_v47 }
 0x3f9   : > { %vm12139_vm5 = vmand %vm17351_vm4, %vm17350_vm6  ;;  %v4646_v44 = vmul.f32 0.6931472, %v17356_v8  ;;  %17357 = vst [vmem:[#allocation14_spill] sm:$0xff] %v12148_v62  ;;  %6549 = vlog2.f32 %v4527_v16  ;;  %v4634_v51 = vmul.f32 0.6931472, %v6544_v24  ;;  %v4881_v3 = vmul.f32 %v11916_v26, %v4656_v40  ;;  %v17361_v8 = vld [vmem:[#allocation10_spill] sm:$0xff] }
 0x3fa   : > { %17354 = vst [vmem:[#allocation259_spill] sm:$0xff] %v12144_v13  ;;  %vm12155_vm1 = vmand %vm12106_vm2, %vm1682_vm0  ;;  %v4648_v6 = vmul.f32 0.6931472, %v17361_v8  ;;  %6551 = vlog2.f32 %v4528_v63  ;;  %v12166_v62 = vsel %vm12128_vm10, 1.0, %v15949_v21  ;;  %v4875_v19 = vmul.f32 %v17363_v2, %v4644_v54  ;;  %v17364_v13 = vld [vmem:[#allocation373_spill] sm:$0xff]  ;;  %v17373_v63 = vld [vmem:[#allocation250_spill] sm:$0xff]  ;;  %v3749_v8 = vpop.xlane.xlu1 %3748 }
 0x3fb   : > { %17362 = vst [vmem:[#allocation260_spill] sm:$0xff] %v12166_v62  ;;  %v4876_v10 = vmul.f32 %v17364_v13, %v4646_v44  ;;  %vm17365_vm0 = vcmp.eq.s32.totalorder %v7614_v57, 1  ;;  %vm17366_vm8 = vcmp.eq.f32.partialorder %v17027_v22, %v7578_v42  ;;  %vm12184_vm14 = vmand %vm12139_vm5, %vm1683_vm11  ;;  %v12188_v40 = vadd.f32 1e-06, %v4402_v48  ;;  %v17372_v22 = vld [vmem:[#allocation174_spill] sm:$0xff]  ;;  %v17374_v13 = vld [vmem:[#allocation44_spill] sm:$0xff] }
 0x3fc   : > { %vm12175_vm7 = vmand %vm17366_vm8, %vm17365_vm0  ;;  %v12191_v44 = vadd.f32 %v12166_v62, %v4203_v50  ;;  %v5015_v16 = vadd.f32 %v5014_v7, %v4881_v3  ;;  %6553 = vlog2.f32 %v17372_v22  ;;  %vm1694_vm12 = vcmp.ne.s32.totalorder %v17373_v63, %v16483_v18  ;;  %v17375_v54 = vld [vmem:[#allocation39_spill] sm:$0xff]  ;;  %v6548_v50 = vpop.eup %6547  ;;  %3973 = vadd.xlane.f32.xlu0 %v11824_v17  ;;  %v17380_v7 = vld [vmem:[#allocation45_spill] sm:$0xff] }
 0x3fd   : > { %17371 = vst [vmem:[#allocation378_spill] sm:$0xff] %v12188_v40  ;;  %v4877_v52 = vmul.f32 %v11822_v9, %v4648_v6  ;;  %v5009_v24 = vadd.f32 %v4876_v10, %v4875_v19  ;;  %v3865_v55 = vmul.f32 %v11972_v58, %v17374_v13  ;;  %v3861_v47 = vmul.f32 %v11872_v49, %v17375_v54  ;;  %vm12206_vm11 = vmand %vm12089_vm13, %vm1688_vm3  ;;  %v17378_v9 = vld [vmem:[#allocation279_spill] sm:$0xff]  ;;  %v17379_v10 = vld [vmem:[#allocation253_spill] sm:$0xff] }
 0x3fe   : > { %vm1695_vm15 = vcmp.ne.s32.totalorder %v17373_v63, %v16485_v15  ;;  %6555 = vlog2.f32 %v4529_v14  ;;  %3978 = vadd.xlane.f32.xlu1 %v17378_v9  ;;  %v4870_v19 = vmul.f32 %v17379_v10, %v4634_v51  ;;  %v3866_v3 = vmul.f32 %v12011_v37, %v17380_v7  ;;  %vm1966_vm3 = vmand %vm12175_vm7, %vm1689_vm9  ;;  %v17381_v2 = vld [vmem:[#allocation233_spill] sm:$0xff]  ;;  %v17387_v54 = vld [vmem:[#allocation43_spill] sm:$0xff] }
 0x3ff   : > { %v4217_v38 = vadd.f32 %v11611_v23, %v11563_v12  ;;  %v4658_v6 = vmul.f32 0.6931472, %v6548_v50  ;;  %v12224_v17 = vadd.f32 %v5009_v24, %v4877_v52  ;;  %v4001_v14 = vadd.f32 %v11474_v39, %v3865_v55  ;;  %v17391_v48 = vld [vmem:[#allocation289_spill] sm:$0xff]  ;;  %v17392_v9 = vld [vmem:[#allocation290_spill] sm:$0xff]  ;;  %vm17394_vm5 = vmmov %vm17365_vm0 }
 0x400   : > { %v3996_v51 = vadd.f32 %v17381_v2, %v3861_v47  ;;  %vm17382_vm13 = vcmp.eq.s32.totalorder %v7583_v61, 1  ;;  %vm17383_vm2 = vcmp.eq.f32.partialorder %v17340_v53, %v7560_v34  ;;  %v3817_v22 = vadd.f32 %v3749_v8, %v17386_v11  ;;  %v17390_v47 = vld [vmem:[#allocation281_spill] sm:$0xff]  ;;  %4190 = vadd.xlane.f32.xlu0 %v11939_v20  ;;  %v17439_v40 = vld [vmem:[#allocation15_spill] sm:$0xff]  ;;  %v17446_v12 = vld [vmem:[#allocation292_spill] sm:$0xff] }
 0x401   : > { %vm12233_vm10 = vmand %vm17383_vm2, %vm17382_vm13  ;;  %v5001_v13 = vadd.f32 %v12059_v35, %v4870_v19  ;;  %v3862_v52 = vmul.f32 %v11923_v27, %v17387_v54  ;;  %vm1684_vm9 = vcmp.ne.s32.totalorder %v17294_v36, %v17128_v28  ;;  %v12246_v39 = vsel %vm12206_vm11, 1.0, %v15949_v21  ;;  %v17393_v19 = vld [vmem:[#allocation291_spill] sm:$0xff] }
 0x402   : > { %17388 = vst [vmem:[#allocation251_spill] sm:$0xff] %v12246_v39  ;;  %v12249_v24 = vsel %vm1966_vm3, 1.0, %v15949_v21  ;;  %v12254_v55 = vsel %vm12155_vm1, 1.0, %v15949_v21  ;;  %v12259_v35 = vsel %vm12184_vm14, 1.0, %v15949_v21  ;;  %vm1690_vm6 = vcmp.ne.s32.totalorder %v17390_v47, %v16483_v18  ;;  %4195 = vadd.xlane.f32.xlu1 %v12038_v46  ;;  %vm12290_vm8 = vmand %vm12233_vm10, %vm1684_vm9  ;;  %v17402_v46 = vld [vmem:[#allocation266_spill] sm:$0xff] }
 0x403   : > { %17389 = vst [vmem:[#allocation256_spill] sm:$0xff] %v12249_v24  ;;  %v4427_v50 = vadd.f32 %v17391_v48, %v3817_v22  ;;  %v4428_v10 = vadd.f32 %v17392_v9, %v3817_v22  ;;  %v4429_v7 = vadd.f32 %v17393_v19, %v3817_v22  ;;  %vm1685_vm4 = vcmp.ne.s32.totalorder %v17294_v36, %v17131_v31  ;;  %v12294_v11 = vpop.eup %6549 }
 0x404   : > { %vm17395_vm1 = vcmp.eq.f32.partialorder %v17340_v53, %v7578_v42  ;;  %v4882_v20 = vmul.f32 %v11969_v45, %v4658_v6  ;;  %v12280_v26 = vadd.f32 %v4001_v14, %v3866_v3  ;;  %v12282_v8 = vadd.f32 %v3996_v51, %v3862_v52  ;;  %17400 = vst [vmem:[#allocation18_spill] sm:$0xff] %v12294_v11  ;;  %v17406_v3 = vld [vmem:[#allocation293_spill] sm:$0xff]  ;;  %v12308_v4 = vpop.eup %6551  ;;  %v17423_v53 = vld [vmem:[#allocation391_spill] sm:$0xff]  ;;  %v17555_v45 = vld [vmem:[#allocation258_spill] sm:$0xff] }
 0x405   : > { %vm12274_vm0 = vmand %vm17395_vm1, %vm17394_vm5  ;;  %v4218_v2 = vadd.f32 %v12246_v39, %v4217_v38  ;;  %vm17401_vm7 = vcmp.eq.s32.totalorder %v6965_v60, 1  ;;  %vm17403_vm14 = vcmp.eq.f32.partialorder %v17402_v46, %v6962_v59  ;;  %v4430_v38 = vadd.f32 %v17406_v3, %v3817_v22  ;;  %17407 = vst [vmem:[#allocation257_spill] sm:$0xff] %v12308_v4  ;;  %v17410_v22 = vld [vmem:[#allocation221_spill] sm:$0xff]  ;;  %4997 = vadd.xlane.f32.xlu0 %v11927_v33  ;;  %v17433_v52 = vld [vmem:[#allocation171_spill] sm:$0xff] }
 0x406   : > { %vm12301_vm11 = vmand %vm17403_vm14, %vm17401_vm7  ;;  %v4555_v6 = vadd.f32 1e-06, %v4427_v50  ;;  %v4556_v14 = vadd.f32 1e-06, %v4428_v10  ;;  %v4212_v51 = vadd.f32 %v12259_v35, %v12254_v55  ;;  %vm1691_vm3 = vcmp.ne.s32.totalorder %v17390_v47, %v16485_v15  ;;  %v17411_v50 = vld [vmem:[#allocation224_spill] sm:$0xff]  ;;  %v6554_v19 = vpop.eup %6553  ;;  %5002 = vadd.xlane.f32.xlu1 %v5001_v13  ;;  %v17443_v39 = vld [vmem:[#allocation50_spill] sm:$0xff] }
 0x407   : > { %v12312_v54 = vadd.f32 %v5015_v16, %v4882_v20  ;;  %vm12319_vm13 = vmand %vm12274_vm0, %vm1685_vm4  ;;  %v4668_v48 = vmul.f32 0.6931472, %v17410_v22  ;;  %v4670_v9 = vmul.f32 0.6931472, %v17411_v50  ;;  %v17412_v10 = vld [vmem:[#allocation208_spill] sm:$0xff]  ;;  %vm17413_vm2 = vcmp.eq.s32.totalorder %v6976_v1, 1 }
 0x408   : > { %6557 = vlog2.f32 %v17412_v10  ;;  %vm17414_vm10 = vcmp.eq.f32.partialorder %v17402_v46, %v6973_v0  ;;  %v4557_v16 = vadd.f32 1e-06, %v4429_v7  ;;  %v12339_v56 = vsel %vm12290_vm8, 1.0, %v15949_v21  ;;  %v17417_v20 = vld [vmem:[#allocation198_spill] sm:$0xff]  ;;  %v12354_v4 = vpop.eup %6555  ;;  %vm12361_vm0 = vmand %vm12301_vm11, %vm1694_vm12 }
 0x409   : > { %vm12331_vm9 = vmand %vm17414_vm10, %vm17413_vm2  ;;  %6559 = vlog2.f32 %v4555_v6  ;;  %v4660_v3 = vmul.f32 0.6931472, %v17417_v20  ;;  %vm17418_vm4 = vcmp.eq.s32.totalorder %v7583_v61, 1  ;;  %vm17419_vm5 = vcmp.eq.f32.partialorder %v17402_v46, %v7560_v34  ;;  %v17422_v6 = vld [vmem:[#allocation390_spill] sm:$0xff]  ;;  %17424 = vst [vmem:[#allocation200_spill] sm:$0xff] %v12354_v4  ;;  %v17434_v4 = vld [vmem:[#allocation7_spill] sm:$0xff]  ;;  %3983 = vadd.xlane.f32.xlu0 %v11929_v32 }
 0x40a   : > { %vm12347_vm1 = vmand %vm17419_vm5, %vm17418_vm4  ;;  %v4650_v7 = vmul.f32 0.6931472, %v6554_v19  ;;  %v4213_v33 = vadd.f32 %v12339_v56, %v4212_v51  ;;  %v4887_v50 = vmul.f32 %v17422_v6, %v4668_v48  ;;  %v4888_v10 = vmul.f32 %v17423_v53, %v4670_v9  ;;  %v17428_v48 = vld [vmem:[#allocation170_spill] sm:$0xff]  ;;  %3988 = vadd.xlane.f32.xlu1 %v12110_v29 }
 0x40b   : > { %6561 = vlog2.f32 %v4556_v14  ;;  %v12366_v13 = vadd.f32 %v12249_v24, %v4218_v2  ;;  %v12371_v51 = vsel %vm12319_vm13, 1.0, %v15949_v21  ;;  %v4662_v9 = vmul.f32 0.6931472, %v17428_v48  ;;  %vm12379_vm12 = vmand %vm12331_vm9, %vm1695_vm15  ;;  %v17431_v14 = vld [vmem:[#allocation267_spill] sm:$0xff]  ;;  %v17432_v2 = vld [vmem:[#allocation225_spill] sm:$0xff] }
 0x40c   : > { %vm1702_vm8 = vcmp.ne.s32.totalorder %v17431_v14, %v16483_v18  ;;  %v4672_v19 = vmul.f32 0.6931472, %v17432_v2  ;;  %v12386_v6 = vadd.f32 %v4888_v10, %v4887_v50  ;;  %v4664_v53 = vmul.f32 0.6931472, %v17433_v52  ;;  %v17435_v48 = vld [vmem:[#allocation331_spill] sm:$0xff]  ;;  %v17440_v2 = vld [vmem:[#allocation16_spill] sm:$0xff]  ;;  %vm17445_vm11 = vmmov %vm17401_vm7 }
 0x40d   : > { %17427 = vst [vmem:[#allocation361_spill] sm:$0xff] %v12366_v13  ;;  %6563 = vlog2.f32 %v17434_v4  ;;  %vm17436_vm14 = vcmp.eq.f32.partialorder %v17435_v48, %v6962_v59  ;;  %v4883_v11 = vmul.f32 %v17439_v40, %v4660_v3  ;;  %v4884_v50 = vmul.f32 %v17440_v2, %v4662_v9  ;;  %v17441_v10 = vld [vmem:[#allocation49_spill] sm:$0xff]  ;;  %v17442_v24 = vld [vmem:[#allocation147_spill] sm:$0xff]  ;;  %4200 = vadd.xlane.f32.xlu0 %v12057_v41  ;;  %v17586_v9 = vld [vmem:[#allocation302_spill] sm:$0xff] }
 0x40e   : > { %vm12395_vm15 = vmand %vm17436_vm14, %vm17401_vm7  ;;  %v3871_v52 = vmul.f32 %v17442_v24, %v17441_v10  ;;  %v17444_v4 = vld [vmem:[#allocation401_spill] sm:$0xff]  ;;  %vm17447_vm13 = vcmp.eq.f32.partialorder %v17446_v12, %v6962_v59  ;;  %v12415_v32 = vadd.f32 1e-06, %v4430_v38  ;;  %6565 = vlog2.f32 %v4557_v16  ;;  %4205 = vadd.xlane.f32.xlu1 %v12191_v44  ;;  %v17463_v41 = vld [vmem:[#allocation47_spill] sm:$0xff] }
 0x40f   : > { %v3872_v23 = vmul.f32 %v17444_v4, %v17443_v39  ;;  %vm12411_vm2 = vmand %vm17447_vm13, %vm17445_vm11  ;;  %v4878_v40 = vmul.f32 %v11843_v5, %v4650_v7  ;;  %v12420_v3 = vadd.f32 %v12371_v51, %v4213_v33  ;;  %vm1703_vm10 = vcmp.ne.s32.totalorder %v17431_v14, %v16485_v15  ;;  %v17455_v5 = vld [vmem:[#allocation46_spill] sm:$0xff]  ;;  %v17456_v7 = vld [vmem:[#allocation384_spill] sm:$0xff] }
 0x410   : > { %17450 = vst [vmem:[#allocation362_spill] sm:$0xff] %v12415_v32  ;;  %vm17451_vm9 = vcmp.eq.s32.totalorder %v6976_v1, 1  ;;  %vm17452_vm4 = vcmp.eq.f32.partialorder %v17435_v48, %v6973_v0  ;;  %v4885_v38 = vmul.f32 %v11872_v49, %v4664_v53  ;;  %v5019_v29 = vadd.f32 %v4884_v50, %v4883_v11  ;;  %vm12441_vm7 = vmand %vm12395_vm15, %vm1690_vm6  ;;  %v17459_v32 = vld [vmem:[#allocation48_spill] sm:$0xff]  ;;  %v17460_v49 = vld [vmem:[#allocation385_spill] sm:$0xff] }
 0x411   : > { %vm12429_vm5 = vmand %vm17452_vm4, %vm17451_vm9  ;;  %v4010_v16 = vadd.f32 %v3872_v23, %v3871_v52  ;;  %v3867_v33 = vmul.f32 %v17456_v7, %v17455_v5  ;;  %v5011_v2 = vadd.f32 %v12224_v17, %v4878_v40  ;;  %v4889_v10 = vmul.f32 %v11972_v58, %v4672_v19  ;;  %v17461_v53 = vld [vmem:[#allocation52_spill] sm:$0xff]  ;;  %v17462_v50 = vld [vmem:[#allocation53_spill] sm:$0xff]  ;;  %v3724_v19 = vpop.xlane.xlu0 %3723  ;;  %5007 = vadd.xlane.f32.xlu0 %v11979_v30 }
 0x412   : > { %v3868_v11 = vmul.f32 %v17460_v49, %v17459_v32  ;;  %vm1696_vm14 = vcmp.ne.s32.totalorder %v17373_v63, %v17128_v28  ;;  %v12452_v23 = vadd.f32 %v5019_v29, %v4885_v38  ;;  %v3873_v36 = vmul.f32 %v12113_v25, %v17461_v53  ;;  %v6558_v17 = vpop.eup %6557  ;;  %v17478_v39 = vld [vmem:[#allocation283_spill] sm:$0xff] }
 0x413   : > { %v3874_v52 = vmul.f32 %v12166_v62, %v17462_v50  ;;  %vm1973_vm6 = vmand %vm12347_vm1, %vm1696_vm14  ;;  %v12463_v58 = vsel %vm12361_vm0, 1.0, %v15949_v21  ;;  %v3869_v32 = vmul.f32 %v12000_v43, %v17463_v41  ;;  %vm1697_vm15 = vcmp.ne.s32.totalorder %v17373_v63, %v17131_v31  ;;  %v12484_v20 = vpop.eup %6559  ;;  %v17482_v62 = vld [vmem:[#allocation296_spill] sm:$0xff]  ;;  %5012 = vadd.xlane.f32.xlu1 %v5011_v2  ;;  %v17490_v63 = vld [vmem:[#allocation51_spill] sm:$0xff] }
 0x414   : > { %v4005_v40 = vadd.f32 %v3868_v11, %v3867_v33  ;;  %vm17464_vm11 = vcmp.eq.s32.totalorder %v7614_v57, 1  ;;  %vm17465_vm1 = vcmp.eq.f32.partialorder %v17402_v46, %v7578_v42  ;;  %v12482_v44 = vsel %vm12379_vm12, 1.0, %v15949_v21  ;;  %17469 = vst [vmem:[#allocation166_spill] sm:$0xff] %v12484_v20  ;;  %vm12491_vm0 = vmand %vm12429_vm5, %vm1691_vm3  ;;  %v17472_v46 = vld [vmem:[#allocation33_spill] sm:$0xff] }
 0x415   : > { %vm12475_vm13 = vmand %vm17465_vm1, %vm17464_vm11  ;;  %17468 = vst [vmem:[#allocation42_spill] sm:$0xff] %v12482_v44  ;;  %v3812_v29 = vadd.f32 %v3724_v19, %v17472_v46  ;;  %v4011_v5 = vadd.f32 %v4010_v16, %v3873_v36  ;;  %v12497_v33 = vsel %vm1973_vm6, 1.0, %v15949_v21  ;;  %vm1692_vm12 = vcmp.ne.s32.totalorder %v17390_v47, %v17128_v28  ;;  %v12519_v50 = vpop.eup %6561  ;;  %v17480_v19 = vld [vmem:[#allocation288_spill] sm:$0xff]  ;;  %v17481_v46 = vld [vmem:[#allocation294_spill] sm:$0xff] }
 0x416   : > { %17473 = vst [vmem:[#allocation354_spill] sm:$0xff] %v12497_v33  ;;  %vm17474_vm9 = vcmp.eq.s32.totalorder %v7583_v61, 1  ;;  %vm17475_vm4 = vcmp.eq.f32.partialorder %v17435_v48, %v7560_v34  ;;  %vm1698_vm3 = vcmp.ne.s32.totalorder %v17478_v39, %v16483_v18  ;;  %v4674_v11 = vmul.f32 0.6931472, %v6558_v17  ;;  %17479 = vst [vmem:[#allocation185_spill] sm:$0xff] %v12519_v50 }
 0x417   : > { %vm12506_vm14 = vmand %vm17475_vm4, %vm17474_vm9  ;;  %v4006_v16 = vadd.f32 %v4005_v40, %v3869_v32  ;;  %v4227_v53 = vadd.f32 %v12482_v44, %v12463_v58  ;;  %v12517_v36 = vsel %vm12441_vm7, 1.0, %v15949_v21  ;;  %vm1699_vm5 = vcmp.ne.s32.totalorder %v17478_v39, %v16485_v15  ;;  %v17483_v32 = vld [vmem:[#allocation301_spill] sm:$0xff]  ;;  %v6564_v50 = vpop.eup %6563  ;;  %3998 = vadd.xlane.f32.xlu1 %v12282_v8 }
 0x418   : > { %v4407_v41 = vadd.f32 %v17480_v19, %v3812_v29  ;;  %v4408_v20 = vadd.f32 %v17481_v46, %v3812_v29  ;;  %v4409_v17 = vadd.f32 %v17482_v62, %v3812_v29  ;;  %v4410_v40 = vadd.f32 %v17483_v32, %v3812_v29  ;;  %vm12533_vm7 = vmand %vm12475_vm13, %vm1697_vm15  ;;  %v17491_v29 = vld [vmem:[#allocation377_spill] sm:$0xff] }
 0x419   : > { %vm17486_vm6 = vcmp.eq.s32.totalorder %v6976_v1, 1  ;;  %vm17487_vm11 = vcmp.eq.f32.partialorder %v17446_v12, %v6973_v0  ;;  %v5025_v30 = vadd.f32 %v12386_v6, %v4889_v10  ;;  %v3870_v22 = vmul.f32 %v17491_v29, %v17490_v63  ;;  %vm17492_vm15 = vmmov %vm17474_vm9  ;;  %v12577_v63 = vpop.eup %6565  ;;  %v17573_v32 = vld [vmem:[#allocation245_spill] sm:$0xff] }
 0x41a   : > { %vm12542_vm1 = vmand %vm17487_vm11, %vm17486_vm6  ;;  %v4228_v19 = vadd.f32 %v12497_v33, %v4227_v53  ;;  %v12553_v46 = vsel %vm12491_vm0, 1.0, %v15949_v21  ;;  %vm17493_vm13 = vcmp.eq.f32.partialorder %v17446_v12, %v7560_v34  ;;  %v4535_v2 = vadd.f32 1e-06, %v4407_v41  ;;  %17498 = vst [vmem:[#allocation186_spill] sm:$0xff] %v12577_v63  ;;  %v17539_v63 = vld [vmem:[#allocation60_spill] sm:$0xff] }
 0x41b   : > { %vm12560_vm9 = vmand %vm17493_vm13, %vm17492_vm15  ;;  %v4536_v10 = vadd.f32 1e-06, %v4408_v20  ;;  %v12573_v38 = vadd.f32 %v4011_v5, %v3874_v52  ;;  %v4222_v53 = vadd.f32 %v12553_v46, %v12517_v36  ;;  %v4890_v33 = vmul.f32 %v12011_v37, %v4674_v11  ;;  %v17500_v5 = vld [vmem:[#allocation17_spill] sm:$0xff]  ;;  %v17503_v11 = vld [vmem:[#allocation235_spill] sm:$0xff]  ;;  %4215 = vadd.xlane.f32.xlu1 %v12420_v3 }
 0x41c   : > { %vm12569_vm4 = vmand %vm12411_vm2, %vm1702_vm8  ;;  %v4666_v44 = vmul.f32 0.6931472, %v6564_v50  ;;  %v12583_v13 = vsel %vm12533_vm7, 1.0, %v15949_v21  ;;  %vm1693_vm8 = vcmp.ne.s32.totalorder %v17390_v47, %v17131_v31  ;;  %v4537_v52 = vadd.f32 1e-06, %v4409_v17  ;;  %3993 = vadd.xlane.f32.xlu0 %v17500_v5  ;;  %v17515_v5 = vld [vmem:[#allocation234_spill] sm:$0xff] }
 0x41d   : > { %vm1969_vm2 = vmand %vm12506_vm14, %vm1692_vm12  ;;  %v12592_v20 = vadd.f32 1e-06, %v4410_v40  ;;  %v12595_v37 = vadd.f32 %v4006_v16, %v3870_v22  ;;  %vm17501_vm0 = vcmp.eq.s32.totalorder %v7614_v57, 1  ;;  %vm17502_vm7 = vcmp.eq.f32.partialorder %v17435_v48, %v7578_v42  ;;  %v17506_v48 = vld [vmem:[#allocation236_spill] sm:$0xff]  ;;  %v17508_v40 = vld [vmem:[#allocation5_spill] sm:$0xff] }
 0x41e   : > { %vm1842_vm6 = vmand %vm17502_vm7, %vm17501_vm0  ;;  %v4684_v50 = vmul.f32 0.6931472, %v17503_v11  ;;  %6567 = vlog2.f32 %v4535_v2  ;;  %v12613_v16 = vadd.f32 %v5025_v30, %v4890_v33  ;;  %v12616_v41 = vadd.f32 %v12583_v13, %v4228_v19  ;;  %v17512_v33 = vld [vmem:[#allocation175_spill] sm:$0xff]  ;;  %v17537_v19 = vld [vmem:[#allocation56_spill] sm:$0xff] }
 0x41f   : > { %17499 = vst [vmem:[#allocation268_spill] sm:$0xff] %v12592_v20  ;;  %vm12608_vm12 = vmand %vm12542_vm1, %vm1703_vm10  ;;  %v4686_v17 = vmul.f32 0.6931472, %v17506_v48  ;;  %vm17507_vm14 = vcmp.eq.s32.totalorder %v6965_v60, 1  ;;  %vm17509_vm11 = vcmp.eq.f32.partialorder %v17508_v40, %v6962_v59  ;;  %6569 = vlog2.f32 %v4536_v10  ;;  %v17521_v47 = vld [vmem:[#allocation371_spill] sm:$0xff] }
 0x420   : > { %vm12624_vm15 = vmand %vm17509_vm11, %vm17507_vm14  ;;  %v12629_v62 = vsel %vm1969_vm2, 1.0, %v15949_v21  ;;  %v4895_v8 = vmul.f32 %v17442_v24, %v4684_v50  ;;  %v4676_v30 = vmul.f32 0.6931472, %v17512_v33  ;;  %v4886_v22 = vmul.f32 %v11923_v27, %v4666_v44  ;;  %v17520_v24 = vld [vmem:[#allocation259_spill] sm:$0xff] }
 0x421   : > { %vm12637_vm10 = vmand %vm1842_vm6, %vm1693_vm8  ;;  %v4223_v2 = vadd.f32 %v12629_v62, %v4222_v53  ;;  %6571 = vlog2.f32 %v17515_v5  ;;  %v4896_v10 = vmul.f32 %v17444_v4, %v4686_v17  ;;  %vm17516_vm1 = vcmp.eq.s32.totalorder %v6976_v1, 1  ;;  %4210 = vadd.xlane.f32.xlu0 %v17520_v24  ;;  %v17522_v11 = vld [vmem:[#allocation179_spill] sm:$0xff]  ;;  %v17523_v53 = vld [vmem:[#allocation189_spill] sm:$0xff] }
 0x422   : > { %vm17517_vm13 = vcmp.eq.f32.partialorder %v17508_v40, %v6973_v0  ;;  %v4688_v44 = vmul.f32 0.6931472, %v17521_v47  ;;  %v4678_v50 = vmul.f32 0.6931472, %v17522_v11  ;;  %v4680_v48 = vmul.f32 0.6931472, %v17523_v53  ;;  %vm12678_vm6 = vmand %vm12624_vm15, %vm1698_vm3 }
 0x423   : > { %vm12649_vm2 = vmand %vm17517_vm13, %vm17516_vm1  ;;  %v17524_v33 = vld [vmem:[#allocation199_spill] sm:$0xff]  ;;  %vm17525_vm8 = vcmp.eq.s32.totalorder %v7583_v61, 1  ;;  %vm17526_vm0 = vcmp.eq.f32.partialorder %v17508_v40, %v7560_v34  ;;  %v5034_v17 = vadd.f32 %v4896_v10, %v4895_v8  ;;  %v4891_v5 = vmul.f32 %v17456_v7, %v4676_v30  ;;  %v17529_v24 = vld [vmem:[#allocation57_spill] sm:$0xff] }
 0x424   : > { %6573 = vlog2.f32 %v17524_v33  ;;  %vm12663_vm7 = vmand %vm17526_vm0, %vm17525_vm8  ;;  %v3879_v47 = vmul.f32 %v12254_v55, %v17529_v24  ;;  %v17530_v11 = vld [vmem:[#allocation58_spill] sm:$0xff]  ;;  %v5021_v3 = vadd.f32 %v12452_v23, %v4886_v22  ;;  %v12686_v7 = vsel %vm12637_vm10, 1.0, %v15949_v21  ;;  %v17536_v22 = vld [vmem:[#allocation145_spill] sm:$0xff] }
 0x425   : > { %v3880_v53 = vmul.f32 %v12259_v35, %v17530_v11  ;;  %6575 = vlog2.f32 %v4537_v52  ;;  %v4892_v8 = vmul.f32 %v17460_v49, %v4678_v50  ;;  %vm12694_vm14 = vmand %vm12649_vm2, %vm1699_vm5  ;;  %v4224_v52 = vadd.f32 %v12686_v7, %v4223_v2  ;;  %v17535_v23 = vld [vmem:[#allocation54_spill] sm:$0xff]  ;;  %v17538_v24 = vld [vmem:[#allocation400_spill] sm:$0xff]  ;;  %5017 = vadd.xlane.f32.xlu0 %v12312_v54 }
 0x426   : > { %v3875_v10 = vmul.f32 %v17536_v22, %v17535_v23  ;;  %v3876_v11 = vmul.f32 %v17538_v24, %v17537_v19  ;;  %v4897_v49 = vmul.f32 %v12113_v25, %v4688_v44  ;;  %v3881_v27 = vmul.f32 %v12339_v56, %v17539_v63  ;;  %5022 = vadd.xlane.f32.xlu1 %v5021_v3  ;;  %v17547_v44 = vld [vmem:[#allocation282_spill] sm:$0xff]  ;;  %v17565_v33 = vld [vmem:[#allocation297_spill] sm:$0xff] }
 0x427   : > { %v4020_v30 = vadd.f32 %v3880_v53, %v3879_v47  ;;  %v5029_v50 = vadd.f32 %v4892_v8, %v4891_v5  ;;  %vm1704_vm3 = vcmp.ne.s32.totalorder %v17431_v14, %v17128_v28  ;;  %vm17540_vm5 = vcmp.eq.s32.totalorder %v7614_v57, 1  ;;  %v17548_v5 = vld [vmem:[#allocation61_spill] sm:$0xff]  ;;  %v17554_v53 = vld [vmem:[#allocation55_spill] sm:$0xff]  ;;  %v17564_v63 = vld [vmem:[#allocation242_spill] sm:$0xff] }
 0x428   : > { %vm17541_vm11 = vcmp.eq.f32.partialorder %v17446_v12, %v7578_v42  ;;  %v4893_v54 = vmul.f32 %v12000_v43, %v4680_v48  ;;  %v4015_v25 = vadd.f32 %v3876_v11, %v3875_v10  ;;  %vm1705_vm10 = vcmp.ne.s32.totalorder %v17431_v14, %v17131_v31  ;;  %vm12723_vm1 = vmand %vm12560_vm9, %vm1704_vm3  ;;  %v12752_v6 = vpop.eup %6567  ;;  %v17556_v8 = vld [vmem:[#allocation59_spill] sm:$0xff] }
 0x429   : > { %vm12714_vm15 = vmand %vm17541_vm11, %vm17540_vm5  ;;  %v12730_v12 = vsel %vm12569_vm4, 1.0, %v15949_v21  ;;  %vm1710_vm13 = vcmp.ne.s32.totalorder %v17547_v44, %v16483_v18  ;;  %v3882_v43 = vmul.f32 %v12371_v51, %v17548_v5  ;;  %v4021_v48 = vadd.f32 %v4020_v30, %v3881_v27  ;;  %v17557_v30 = vld [vmem:[#allocation13_spill] sm:$0xff]  ;;  %v12768_v19 = vpop.eup %6569  ;;  %4003 = vadd.xlane.f32.xlu0 %v12280_v26 }
 0x42a   : > { %17546 = vst [vmem:[#allocation26_spill] sm:$0xff] %v12730_v12  ;;  %v12739_v14 = vsel %vm12608_vm12, 1.0, %v15949_v21  ;;  %vm1700_vm9 = vcmp.ne.s32.totalorder %v17478_v39, %v17128_v28  ;;  %vm17550_vm2 = vmmov %vm17540_vm5  ;;  %vm17551_vm4 = vcmp.eq.f32.partialorder %v17508_v40, %v7578_v42  ;;  %v12754_v47 = vadd.f32 %v5034_v17, %v4897_v49  ;;  %4008 = vadd.xlane.f32.xlu1 %v12595_v37  ;;  %v17568_v37 = vld [vmem:[#allocation244_spill] sm:$0xff] }
 0x42b   : > { %17549 = vst [vmem:[#allocation269_spill] sm:$0xff] %v12739_v14  ;;  %vm12748_vm8 = vmand %vm17551_vm4, %vm17550_vm2  ;;  %v3877_v3 = vmul.f32 %v17555_v45, %v17554_v53  ;;  %v3878_v23 = vmul.f32 %v17557_v30, %v17556_v8  ;;  %v4237_v40 = vadd.f32 %v12739_v14, %v12730_v12  ;;  %vm1711_vm0 = vcmp.ne.s32.totalorder %v17547_v44, %v16485_v15  ;;  %v6572_v27 = vpop.eup %6571  ;;  %v17575_v12 = vld [vmem:[#allocation34_spill] sm:$0xff] }
 0x42c   : > { %vm12762_vm12 = vmand %vm12714_vm15, %vm1705_vm10  ;;  %17560 = vst [vmem:[#allocation12_spill] sm:$0xff] %v12768_v19  ;;  %v12776_v17 = vsel %vm12723_vm1, 1.0, %v15949_v21  ;;  %vm1701_vm3 = vcmp.ne.s32.totalorder %v17478_v39, %v17131_v31  ;;  %v12789_v49 = vsel %vm12678_vm6, 1.0, %v15949_v21  ;;  %v12794_v26 = vsel %vm12694_vm14, 1.0, %v15949_v21 }
 0x42d   : > { %17561 = vst [vmem:[#allocation191_spill] sm:$0xff] %v12776_v17  ;;  %vm12782_vm5 = vmand %vm12663_vm7, %vm1700_vm9  ;;  %v4016_v39 = vadd.f32 %v4015_v25, %v3877_v3  ;;  %v4238_v4 = vadd.f32 %v12776_v17, %v4237_v40  ;;  %v4232_v2 = vadd.f32 %v12794_v26, %v12789_v49  ;;  %v4700_v5 = vmul.f32 0.6931472, %v17564_v63  ;;  %v17569_v3 = vld [vmem:[#allocation241_spill] sm:$0xff] }
 0x42e   : > { %v6574_v53 = vpop.eup %6573  ;;  %vm1706_vm7 = vcmp.ne.s32.totalorder %v17565_v33, %v16483_v18  ;;  %v5030_v8 = vadd.f32 %v5029_v50, %v4893_v54  ;;  %v12803_v14 = vadd.f32 %v4021_v48, %v3882_v43  ;;  %vm12807_vm6 = vmand %vm12748_vm8, %vm1701_vm3  ;;  %v4702_v25 = vmul.f32 0.6931472, %v17568_v37  ;;  %v3734_v43 = vpop.xlane.xlu0 %3733  ;;  %v17572_v48 = vld [vmem:[#allocation361_spill] sm:$0xff]  ;;  %4225 = vadd.xlane.f32.xlu1 %v4224_v52 }
 0x42f   : > { %6577 = vlog2.f32 %v17569_v3  ;;  %v4690_v40 = vmul.f32 0.6931472, %v6572_v27  ;;  %v4682_v17 = vmul.f32 0.6931472, %v6574_v53  ;;  %v12816_v63 = vsel %vm12762_vm12, 1.0, %v15949_v21  ;;  %v12823_v54 = vpop.eup %6575  ;;  %4220 = vadd.xlane.f32.xlu0 %v17572_v48  ;;  %v17574_v3 = vld [vmem:[#allocation190_spill] sm:$0xff] }
 0x430   : > { %17570 = vst [vmem:[#allocation212_spill] sm:$0xff] %v12816_v63  ;;  %v12821_v50 = vsel %vm12782_vm5, 1.0, %v15949_v21  ;;  %17571 = vst [vmem:[#allocation270_spill] sm:$0xff] %v12823_v54  ;;  %v4704_v37 = vmul.f32 0.6931472, %v17573_v32  ;;  %v4903_v27 = vmul.f32 %v12254_v55, %v4700_v5  ;;  %v4904_v53 = vmul.f32 %v12259_v35, %v4702_v25  ;;  %v17577_v55 = vld [vmem:[#allocation321_spill] sm:$0xff] }
 0x431   : > { %v4692_v10 = vmul.f32 0.6931472, %v17574_v3  ;;  %vm1707_vm14 = vcmp.ne.s32.totalorder %v17565_v33, %v16485_v15  ;;  %v3814_v11 = vadd.f32 %v3734_v43, %v17575_v12  ;;  %v4017_v20 = vadd.f32 %v4016_v39, %v3878_v23  ;;  %v17581_v39 = vld [vmem:[#allocation192_spill] sm:$0xff]  ;;  %v17587_v43 = vld [vmem:[#allocation303_spill] sm:$0xff] }
 0x432   : > { %v12834_v54 = vadd.f32 %v12816_v63, %v4238_v4  ;;  %v12839_v48 = vsel %vm12807_vm6, 1.0, %v15949_v21  ;;  %vm17576_vm11 = vcmp.eq.s32.totalorder %v6965_v60, 1  ;;  %vm17578_vm15 = vcmp.eq.f32.partialorder %v17577_v55, %v6962_v59  ;;  %v17588_v3 = vld [vmem:[#allocation304_spill] sm:$0xff] }
 0x433   : > { %vm12846_vm10 = vmand %vm17578_vm15, %vm17576_vm11  ;;  %v4894_v52 = vmul.f32 %v17491_v29, %v4682_v17  ;;  %v4233_v12 = vadd.f32 %v12821_v50, %v4232_v2  ;;  %v5044_v23 = vadd.f32 %v4904_v53, %v4903_v27  ;;  %v4694_v4 = vmul.f32 0.6931472, %v17581_v39  ;;  %v17589_v17 = vld [vmem:[#allocation260_spill] sm:$0xff]  ;;  %5027 = vadd.xlane.f32.xlu0 %v12613_v16 }
 0x434   : > { %vm17582_vm1 = vcmp.eq.s32.totalorder %v6976_v1, 1  ;;  %vm17583_vm9 = vcmp.eq.f32.partialorder %v17577_v55, %v6973_v0  ;;  %v4415_v25 = vadd.f32 %v17586_v9, %v3814_v11  ;;  %v4416_v32 = vadd.f32 %v17587_v43, %v3814_v11  ;;  %v17594_v9 = vld [vmem:[#allocation358_spill] sm:$0xff]  ;;  %vm12884_vm3 = vmand %vm12846_vm10, %vm1710_vm13  ;;  %v17598_v16 = vld [vmem:[#allocation196_spill] sm:$0xff] }
 0x435   : > { %vm12858_vm2 = vmand %vm17583_vm9, %vm17582_vm1  ;;  %v4417_v29 = vadd.f32 %v17588_v3, %v3814_v11  ;;  %v4898_v2 = vmul.f32 %v17589_v17, %v4690_v40  ;;  %vm17590_vm4 = vcmp.eq.s32.totalorder %v7583_v61, 1  ;;  %vm17591_vm8 = vcmp.eq.f32.partialorder %v17577_v55, %v7560_v34  ;;  %v17597_v3 = vld [vmem:[#allocation305_spill] sm:$0xff]  ;;  %v17612_v5 = vld [vmem:[#allocation68_spill] sm:$0xff] }
 0x436   : > { %vm12871_vm12 = vmand %vm17591_vm8, %vm17590_vm4  ;;  %v5031_v53 = vadd.f32 %v5030_v8, %v4894_v52  ;;  %v4905_v39 = vmul.f32 %v12339_v56, %v4704_v37  ;;  %6579 = vlog2.f32 %v17594_v9  ;;  %v4899_v43 = vmul.f32 %v17536_v22, %v4692_v10  ;;  %v17600_v37 = vld [vmem:[#allocation342_spill] sm:$0xff]  ;;  %v17630_v40 = vld [vmem:[#allocation63_spill] sm:$0xff] }
 0x437   : > { %v4418_v17 = vadd.f32 %v17597_v3, %v3814_v11  ;;  %v4543_v63 = vadd.f32 1e-06, %v4415_v25  ;;  %v4696_v8 = vmul.f32 0.6931472, %v17598_v16  ;;  %v4900_v56 = vmul.f32 %v17538_v24, %v4694_v4  ;;  %vm17599_vm5 = vmmov %vm17576_vm11  ;;  %v17604_v11 = vld [vmem:[#allocation65_spill] sm:$0xff]  ;;  %v17605_v25 = vld [vmem:[#allocation66_spill] sm:$0xff]  ;;  %4013 = vadd.xlane.f32.xlu0 %v12573_v38 }
 0x438   : > { %vm17601_vm6 = vcmp.eq.f32.partialorder %v17600_v37, %v6962_v59  ;;  %v5036_v10 = vadd.f32 %v12754_v47, %v4898_v2  ;;  %5032 = vadd.xlane.f32.xlu1 %v5031_v53  ;;  %v4234_v35 = vadd.f32 %v12839_v48, %v4233_v12  ;;  %v3887_v52 = vmul.f32 %v12517_v36, %v17604_v11  ;;  %vm12911_vm13 = vmand %vm12858_vm2, %vm1711_vm0  ;;  %v17637_v3 = vld [vmem:[#allocation256_spill] sm:$0xff] }
 0x439   : > { %vm12896_vm11 = vmand %vm17601_vm6, %vm17599_vm5  ;;  %v3888_v24 = vmul.f32 %v12553_v46, %v17605_v25  ;;  %v4544_v9 = vadd.f32 1e-06, %v4416_v32  ;;  %v4545_v47 = vadd.f32 1e-06, %v4417_v29  ;;  %v5045_v2 = vadd.f32 %v5044_v23, %v4905_v39  ;;  %v6578_v12 = vpop.eup %6577  ;;  %v17613_v32 = vld [vmem:[#allocation62_spill] sm:$0xff]  ;;  %v17615_v39 = vld [vmem:[#allocation64_spill] sm:$0xff] }
 0x43a   : > { %v5039_v53 = vadd.f32 %v4900_v56, %v4899_v43  ;;  %vm17608_vm15 = vmmov %vm17582_vm1  ;;  %vm17609_vm10 = vcmp.eq.f32.partialorder %v17600_v37, %v6973_v0  ;;  %v3889_v16 = vmul.f32 %v12629_v62, %v17612_v5  ;;  %v17614_v29 = vld [vmem:[#allocation230_spill] sm:$0xff]  ;;  %v17616_v43 = vld [vmem:[#allocation231_spill] sm:$0xff]  ;;  %v12940_v38 = vadd.f32 1e-06, %v4418_v17 }
 0x43b   : > { %vm12920_vm1 = vmand %vm17609_vm10, %vm17608_vm15  ;;  %v4030_v11 = vadd.f32 %v3888_v24, %v3887_v52  ;;  %v3883_v23 = vmul.f32 %v17614_v29, %v17613_v32  ;;  %v3884_v56 = vmul.f32 %v17616_v43, %v17615_v39  ;;  %6581 = vlog2.f32 %v4543_v63  ;;  %v17619_v24 = vld [vmem:[#allocation69_spill] sm:$0xff]  ;;  %4230 = vadd.xlane.f32.xlu0 %v12616_v41 }
 0x43c   : > { %vm12936_vm0 = vmand %vm12896_vm11, %vm1706_vm7  ;;  %v4706_v5 = vmul.f32 0.6931472, %v6578_v12  ;;  %v4901_v52 = vmul.f32 %v17555_v45, %v4696_v8  ;;  %4018 = vadd.xlane.f32.xlu1 %v4017_v20  ;;  %v3890_v32 = vmul.f32 %v12686_v7, %v17619_v24  ;;  %vm1712_vm9 = vcmp.ne.s32.totalorder %v17547_v44, %v17128_v28  ;;  %v17631_v8 = vld [vmem:[#allocation251_spill] sm:$0xff]  ;;  %v3744_v12 = vpop.xlane.xlu0 %3743  ;;  %v17643_v25 = vld [vmem:[#allocation309_spill] sm:$0xff] }
 0x43d   : > { %v4031_v39 = vadd.f32 %v4030_v11, %v3889_v16  ;;  %v4025_v19 = vadd.f32 %v3884_v56, %v3883_v23  ;;  %vm17620_vm7 = vcmp.eq.s32.totalorder %v7614_v57, 1  ;;  %vm17621_vm2 = vcmp.eq.f32.partialorder %v17577_v55, %v7578_v42  ;;  %vm12960_vm5 = vmand %vm12871_vm12, %vm1712_vm9  ;;  %v17638_v23 = vld [vmem:[#allocation295_spill] sm:$0xff]  ;;  %v17639_v56 = vld [vmem:[#allocation394_spill] sm:$0xff] }
 0x43e   : > { %vm12952_vm4 = vmand %vm17621_vm2, %vm17620_vm7  ;;  %6583 = vlog2.f32 %v4544_v9  ;;  %vm1713_vm8 = vcmp.ne.s32.totalorder %v17547_v44, %v17131_v31  ;;  %v12967_v45 = vsel %vm12884_vm3, 1.0, %v15949_v21  ;;  %v12972_v63 = vsel %vm12911_vm13, 1.0, %v15949_v21  ;;  %v17642_v20 = vld [vmem:[#allocation307_spill] sm:$0xff]  ;;  %v17646_v55 = vld [vmem:[#allocation18_spill] sm:$0xff] }
 0x43f   : > { %17626 = vst [vmem:[#allocation218_spill] sm:$0xff] %v12967_v45  ;;  %17627 = vst [vmem:[#allocation214_spill] sm:$0xff] %v12972_v63  ;;  %6585 = vlog2.f32 %v4545_v47  ;;  %v5040_v27 = vadd.f32 %v5039_v53, %v4901_v52  ;;  %v3885_v22 = vmul.f32 %v17631_v8, %v17630_v40  ;;  %v4247_v4 = vadd.f32 %v12972_v63, %v12967_v45  ;;  %v17636_v53 = vld [vmem:[#allocation67_spill] sm:$0xff] }
 0x440   : > { %vm12979_vm6 = vmand %vm12920_vm1, %vm1707_vm14  ;;  %vm17632_vm12 = vcmp.eq.s32.totalorder %v7583_v61, 1  ;;  %vm17633_vm3 = vcmp.eq.f32.partialorder %v17600_v37, %v7560_v34  ;;  %v4906_v47 = vmul.f32 %v12371_v51, %v4706_v5  ;;  %v12998_v41 = vadd.f32 %v4031_v39, %v3890_v32  ;;  %v6580_v11 = vpop.eup %6579  ;;  %4235 = vadd.xlane.f32.xlu1 %v4234_v35  ;;  %v17641_v39 = vld [vmem:[#allocation306_spill] sm:$0xff]  ;;  %5037 = vadd.xlane.f32.xlu0 %v5036_v10 }
 0x441   : > { %vm12993_vm11 = vmand %vm17633_vm3, %vm17632_vm12  ;;  %v3886_v16 = vmul.f32 %v17637_v3, %v17636_v53  ;;  %vm1708_vm14 = vcmp.ne.s32.totalorder %v17565_v33, %v17128_v28  ;;  %vm1718_vm13 = vcmp.ne.s32.totalorder %v17638_v23, %v16483_v18  ;;  %v3816_v52 = vadd.f32 %v3744_v12, %v17639_v56  ;;  %v17648_v53 = vld [vmem:[#allocation299_spill] sm:$0xff] }
 0x442   : > { %v4026_v24 = vadd.f32 %v4025_v19, %v3885_v22  ;;  %vm1990_vm15 = vmand %vm12952_vm4, %vm1713_vm8  ;;  %v13015_v51 = vsel %vm12960_vm5, 1.0, %v15949_v21  ;;  %v13020_v5 = vsel %vm12936_vm0, 1.0, %v15949_v21  ;;  %v13022_v32 = vadd.f32 %v5045_v2, %v4906_v47 }
 0x443   : > { %17640 = vst [vmem:[#allocation6_spill] sm:$0xff] %v13015_v51  ;;  %v4698_v35 = vmul.f32 0.6931472, %v6580_v11  ;;  %v4248_v19 = vadd.f32 %v13015_v51, %v4247_v4  ;;  %v13028_v44 = vsel %vm12979_vm6, 1.0, %v15949_v21  ;;  %vm1719_vm10 = vcmp.ne.s32.totalorder %v17638_v23, %v16485_v15  ;;  %vm13040_vm1 = vmand %vm12993_vm11, %vm1708_vm14 }
 0x444   : > { %v4423_v17 = vadd.f32 %v17641_v39, %v3816_v52  ;;  %v4424_v40 = vadd.f32 %v17642_v20, %v3816_v52  ;;  %v4425_v22 = vadd.f32 %v17643_v25, %v3816_v52  ;;  %v4716_v4 = vmul.f32 0.6931472, %v17646_v55  ;;  %v17653_v20 = vld [vmem:[#allocation310_spill] sm:$0xff]  ;;  %v3759_v55 = vpop.xlane.xlu1 %3758  ;;  %4023 = vadd.xlane.f32.xlu0 %v12803_v14 }
 0x445   : > { %v4902_v12 = vmul.f32 %v17557_v30, %v4698_v35  ;;  %v13047_v47 = vsel %vm1990_vm15, 1.0, %v15949_v21  ;;  %vm1709_vm0 = vcmp.ne.s32.totalorder %v17565_v33, %v17131_v31  ;;  %v4242_v10 = vadd.f32 %v13028_v44, %v13020_v5  ;;  %v17652_v35 = vld [vmem:[#allocation378_spill] sm:$0xff]  ;;  %v13065_v39 = vpop.eup %6581  ;;  %v17687_v33 = vld [vmem:[#allocation220_spill] sm:$0xff] }
 0x446   : > { %17647 = vst [vmem:[#allocation357_spill] sm:$0xff] %v13047_v47  ;;  %vm1714_vm9 = vcmp.ne.s32.totalorder %v17648_v53, %v16483_v18  ;;  %v4551_v9 = vadd.f32 1e-06, %v4423_v17  ;;  %v4552_v11 = vadd.f32 1e-06, %v4424_v40  ;;  %v4027_v56 = vadd.f32 %v4026_v24, %v3886_v16  ;;  %v17654_v24 = vld [vmem:[#allocation257_spill] sm:$0xff] }
 0x447   : > { %vm17649_vm2 = vcmp.eq.f32.partialorder %v17600_v37, %v7578_v42  ;;  %6587 = vlog2.f32 %v17652_v35  ;;  %v4426_v25 = vadd.f32 %v17653_v20, %v3816_v52  ;;  %v5041_v51 = vadd.f32 %v5040_v27, %v4902_v12  ;;  %v17655_v40 = vld [vmem:[#allocation398_spill] sm:$0xff] }
 0x448   : > { %vm13060_vm4 = vmand %vm17649_vm2, %vm17620_vm7  ;;  %v13071_v16 = vsel %vm13040_vm1, 1.0, %v15949_v21  ;;  %v4718_v17 = vmul.f32 0.6931472, %v17654_v24  ;;  %v4553_v37 = vadd.f32 1e-06, %v4425_v22  ;;  %v3819_v63 = vadd.f32 %v3759_v55, %v17655_v40  ;;  %v13080_v52 = vpop.eup %6583  ;;  %v17658_v22 = vld [vmem:[#allocation217_spill] sm:$0xff]  ;;  %4240 = vadd.xlane.f32.xlu0 %v12834_v54 }
 0x449   : > { %v13077_v35 = vadd.f32 %v13047_v47, %v4248_v19  ;;  %v4911_v45 = vmul.f32 %v12517_v36, %v4716_v4  ;;  %6589 = vlog2.f32 %v4551_v9  ;;  %5042 = vadd.xlane.f32.xlu1 %v5041_v51  ;;  %vm13087_vm8 = vmand %vm13060_vm4, %vm1709_vm0  ;;  %v4243_v14 = vadd.f32 %v13071_v16, %v4242_v10  ;;  %v13094_v36 = vpop.eup %6585  ;;  %v17660_v51 = vld [vmem:[#allocation347_spill] sm:$0xff]  ;;  %v17666_v9 = vld [vmem:[#allocation200_spill] sm:$0xff] }
 0x44a   : > { %v4912_v19 = vmul.f32 %v12553_v46, %v4718_v17  ;;  %v4708_v2 = vmul.f32 0.6931472, %v17658_v22  ;;  %vm17659_vm5 = vcmp.eq.s32.totalorder %v6965_v60, 1  ;;  %vm17661_vm6 = vcmp.eq.f32.partialorder %v17660_v51, %v6962_v59  ;;  %v17664_v4 = vld [vmem:[#allocation311_spill] sm:$0xff]  ;;  %v17665_v46 = vld [vmem:[#allocation314_spill] sm:$0xff]  ;;  %v17672_v17 = vld [vmem:[#allocation316_spill] sm:$0xff] }
 0x44b   : > { %vm13101_vm12 = vmand %vm17661_vm6, %vm17659_vm5  ;;  %vm1715_vm3 = vcmp.ne.s32.totalorder %v17648_v53, %v16485_v15  ;;  %6591 = vlog2.f32 %v4552_v11  ;;  %v4435_v12 = vadd.f32 %v17664_v4, %v3819_v63  ;;  %v4436_v10 = vadd.f32 %v17665_v46, %v3819_v63  ;;  %v17671_v55 = vld [vmem:[#allocation315_spill] sm:$0xff] }
 0x44c   : > { %v4720_v30 = vmul.f32 0.6931472, %v17666_v9  ;;  %vm17667_vm11 = vcmp.eq.s32.totalorder %v6976_v1, 1  ;;  %vm17668_vm14 = vcmp.eq.f32.partialorder %v17660_v51, %v6973_v0  ;;  %v4437_v24 = vadd.f32 %v17671_v55, %v3819_v63  ;;  %v17673_v22 = vld [vmem:[#allocation219_spill] sm:$0xff]  ;;  %vm13145_vm2 = vmand %vm13101_vm12, %vm1718_vm13  ;;  %5047 = vadd.xlane.f32.xlu0 %v13022_v32 }
 0x44d   : > { %vm13115_vm15 = vmand %vm17668_vm14, %vm17667_vm11  ;;  %v4438_v40 = vadd.f32 %v17672_v17, %v3819_v63  ;;  %v5054_v11 = vadd.f32 %v4912_v19, %v4911_v45  ;;  %v4710_v4 = vmul.f32 0.6931472, %v17673_v22  ;;  %vm17674_vm1 = vcmp.eq.s32.totalorder %v7583_v61, 1  ;;  %v17679_v63 = vld [vmem:[#allocation204_spill] sm:$0xff]  ;;  %4028 = vadd.xlane.f32.xlu1 %v4027_v56  ;;  %v3754_v19 = vpop.xlane.xlu0 %3753 }
 0x44e   : > { %vm17675_vm0 = vcmp.eq.f32.partialorder %v17660_v51, %v7560_v34  ;;  %v13131_v9 = vadd.f32 1e-06, %v4426_v25  ;;  %v4563_v47 = vadd.f32 1e-06, %v4435_v12  ;;  %v13137_v45 = vsel %vm13087_vm8, 1.0, %v15949_v21  ;;  %vm17682_vm4 = vmmov %vm17659_vm5  ;;  %v17683_v12 = vld [vmem:[#allocation350_spill] sm:$0xff] }
 0x44f   : > { %vm13127_vm7 = vmand %vm17675_vm0, %vm17674_vm1  ;;  %6593 = vlog2.f32 %v17679_v63  ;;  %v4564_v25 = vadd.f32 1e-06, %v4436_v10  ;;  %v4244_v54 = vadd.f32 %v13137_v45, %v4243_v14  ;;  %v4907_v27 = vmul.f32 %v17614_v29, %v4708_v2  ;;  %v17689_v10 = vld [vmem:[#allocation74_spill] sm:$0xff] }
 0x450   : > { %17678 = vst [vmem:[#allocation176_spill] sm:$0xff] %v13131_v9  ;;  %6595 = vlog2.f32 %v4553_v37  ;;  %vm17684_vm8 = vcmp.eq.f32.partialorder %v17683_v12, %v6962_v59  ;;  %v4712_v17 = vmul.f32 0.6931472, %v17687_v33  ;;  %v4908_v22 = vmul.f32 %v17616_v43, %v4710_v4  ;;  %v17688_v37 = vld [vmem:[#allocation73_spill] sm:$0xff]  ;;  %vm13171_vm13 = vmand %vm13115_vm15, %vm1719_vm10  ;;  %4033 = vadd.xlane.f32.xlu0 %v12998_v41 }
 0x451   : > { %vm13156_vm5 = vmand %vm17684_vm8, %vm17682_vm4  ;;  %v3895_v56 = vmul.f32 %v12789_v49, %v17688_v37  ;;  %v3896_v14 = vmul.f32 %v12794_v26, %v17689_v10  ;;  %v4565_v2 = vadd.f32 1e-06, %v4437_v24  ;;  %v13175_v63 = vadd.f32 1e-06, %v4438_v40  ;;  %v6588_v4 = vpop.eup %6587  ;;  %v17697_v37 = vld [vmem:[#allocation76_spill] sm:$0xff]  ;;  %4245 = vadd.xlane.f32.xlu1 %v4244_v54  ;;  %v17702_v10 = vld [vmem:[#allocation42_spill] sm:$0xff] }
 0x452   : > { %6597 = vlog2.f32 %v4563_v47  ;;  %v4913_v43 = vmul.f32 %v12629_v62, %v4720_v30  ;;  %vm17693_vm6 = vmmov %vm17667_vm11  ;;  %vm17694_vm12 = vcmp.eq.f32.partialorder %v17683_v12, %v6973_v0  ;;  %v5049_v20 = vadd.f32 %v4908_v22, %v4907_v27  ;;  %v17698_v47 = vld [vmem:[#allocation70_spill] sm:$0xff]  ;;  %v17701_v22 = vld [vmem:[#allocation72_spill] sm:$0xff] }
 0x453   : > { %17692 = vst [vmem:[#allocation9_spill] sm:$0xff] %v13175_v63  ;;  %vm13183_vm11 = vmand %vm17694_vm12, %vm17693_vm6  ;;  %v3897_v24 = vmul.f32 %v12821_v50, %v17697_v37  ;;  %v4040_v40 = vadd.f32 %v3896_v14, %v3895_v56  ;;  %v3891_v62 = vmul.f32 %v12463_v58, %v17698_v47  ;;  %6599 = vlog2.f32 %v4564_v25  ;;  %v17703_v14 = vld [vmem:[#allocation77_spill] sm:$0xff] }
 0x454   : > { %vm13197_vm10 = vmand %vm13156_vm5, %vm1714_vm9  ;;  %v4722_v32 = vmul.f32 0.6931472, %v6588_v4  ;;  %v5055_v27 = vadd.f32 %v5054_v11, %v4913_v43  ;;  %v3892_v37 = vmul.f32 %v17702_v10, %v17701_v22  ;;  %v4909_v56 = vmul.f32 %v17631_v8, %v4712_v17  ;;  %v13217_v11 = vpop.eup %6589  ;;  %v17715_v17 = vld [vmem:[#allocation71_spill] sm:$0xff]  ;;  %v17716_v43 = vld [vmem:[#allocation354_spill] sm:$0xff]  ;;  %4250 = vadd.xlane.f32.xlu0 %v13077_v35 }
 0x455   : > { %v3898_v47 = vmul.f32 %v12839_v48, %v17703_v14  ;;  %v4041_v63 = vadd.f32 %v4040_v40, %v3897_v24  ;;  %vm1720_vm14 = vcmp.ne.s32.totalorder %v17638_v23, %v17128_v28  ;;  %vm17704_vm9 = vcmp.eq.s32.totalorder %v7614_v57, 1  ;;  %v13233_v55 = vpop.eup %6591  ;;  %v17717_v4 = vld [vmem:[#allocation75_spill] sm:$0xff] }
 0x456   : > { %vm17705_vm15 = vcmp.eq.f32.partialorder %v17660_v51, %v7578_v42  ;;  %v4035_v54 = vadd.f32 %v3892_v37, %v3891_v62  ;;  %vm1721_vm0 = vcmp.ne.s32.totalorder %v17638_v23, %v17131_v31  ;;  %vm1997_vm4 = vmand %vm13127_vm7, %vm1720_vm14  ;;  %v13226_v8 = vsel %vm13145_vm2, 1.0, %v15949_v21  ;;  %17710 = vst [vmem:[#allocation379_spill] sm:$0xff] %v13233_v55 }
 0x457   : > { %vm13213_vm1 = vmand %vm17705_vm15, %vm17704_vm9  ;;  %17708 = vst [vmem:[#allocation3_spill] sm:$0xff] %v13226_v8  ;;  %v13231_v51 = vsel %vm13171_vm13, 1.0, %v15949_v21  ;;  %vm17711_vm8 = vcmp.eq.s32.totalorder %v7583_v61, 1  ;;  %vm17712_vm5 = vcmp.eq.f32.partialorder %v17683_v12, %v7560_v34  ;;  %6601 = vlog2.f32 %v4565_v2  ;;  %v17720_v2 = vld [vmem:[#allocation396_spill] sm:$0xff] }
 0x458   : > { %17709 = vst [vmem:[#allocation367_spill] sm:$0xff] %v13231_v51  ;;  %vm13240_vm6 = vmand %vm17712_vm5, %vm17711_vm8  ;;  %v3893_v29 = vmul.f32 %v17716_v43, %v17715_v17  ;;  %v3894_v24 = vmul.f32 %v12583_v13, %v17717_v4  ;;  %v4257_v40 = vadd.f32 %v13231_v51, %v13226_v8  ;;  %v3818_v41 = vadd.f32 %v3754_v19, %v17720_v2 }
 0x459   : > { %vm13256_vm7 = vmand %vm13183_vm11, %vm1715_vm3  ;;  %v4914_v22 = vmul.f32 %v12686_v7, %v4722_v32  ;;  %v5050_v37 = vadd.f32 %v5049_v20, %v4909_v56  ;;  %v13263_v14 = vsel %vm1997_vm4, 1.0, %v15949_v21  ;;  %v6594_v17 = vpop.eup %6593  ;;  %vm1716_vm3 = vcmp.ne.s32.totalorder %v17648_v53, %v17128_v28  ;;  %v17725_v32 = vld [vmem:[#allocation317_spill] sm:$0xff]  ;;  %v17726_v56 = vld [vmem:[#allocation318_spill] sm:$0xff] }
 0x45a   : > { %17721 = vst [vmem:[#allocation368_spill] sm:$0xff] %v13263_v14  ;;  %v4036_v4 = vadd.f32 %v4035_v54, %v3893_v29  ;;  %vm13270_vm2 = vmand %vm13213_vm1, %vm1721_vm0  ;;  %v4258_v51 = vadd.f32 %v13263_v14, %v4257_v40  ;;  %v13280_v7 = vsel %vm13197_vm10, 1.0, %v15949_v21  ;;  %v13282_v20 = vpop.eup %6595  ;;  %v4431_v23 = vadd.f32 %v17725_v32, %v3818_v41  ;;  %v17727_v54 = vld [vmem:[#allocation319_spill] sm:$0xff] }
 0x45b   : > { %17724 = vst [vmem:[#allocation177_spill] sm:$0xff] %v13282_v20  ;;  %v4432_v25 = vadd.f32 %v17726_v56, %v3818_v41  ;;  %v4433_v19 = vadd.f32 %v17727_v54, %v3818_v41  ;;  %v4042_v29 = vadd.f32 %v4041_v63, %v3898_v47  ;;  %vm17728_vm13 = vmmov %vm17704_vm9  ;;  %vm17729_vm12 = vcmp.eq.f32.partialorder %v17683_v12, %v7578_v42  ;;  %v3769_v56 = vpop.xlane.xlu1 %3768 }
 0x45c   : > { %vm13292_vm11 = vmand %vm17729_vm12, %vm17728_vm13  ;;  %v5056_v30 = vadd.f32 %v5055_v27, %v4914_v22  ;;  %v4714_v2 = vmul.f32 0.6931472, %v6594_v17  ;;  %vm1717_vm10 = vcmp.ne.s32.totalorder %v17648_v53, %v17131_v31  ;;  %v13308_v12 = vsel %vm13256_vm7, 1.0, %v15949_v21  ;;  %v13310_v47 = vpop.eup %6597  ;;  %v17736_v22 = vld [vmem:[#allocation320_spill] sm:$0xff] }
 0x45d   : > { %vm13301_vm14 = vmand %vm13240_vm6, %vm1716_vm3  ;;  %17734 = vst [vmem:[#allocation187_spill] sm:$0xff] %v13310_v47  ;;  %v4559_v32 = vadd.f32 1e-06, %v4431_v23  ;;  %v4560_v35 = vadd.f32 1e-06, %v4432_v25  ;;  %v13315_v27 = vsel %vm13270_vm2, 1.0, %v15949_v21  ;;  %v4252_v46 = vadd.f32 %v13308_v12, %v13280_v7  ;;  %v13322_v8 = vpop.eup %6599 }
 0x45e   : > { %17735 = vst [vmem:[#allocation8_spill] sm:$0xff] %v13315_v27  ;;  %v4434_v17 = vadd.f32 %v17736_v22, %v3818_v41  ;;  %v4910_v54 = vmul.f32 %v17637_v3, %v4714_v2  ;;  %v4037_v62 = vadd.f32 %v4036_v4, %v3894_v24  ;;  %v4259_v14 = vadd.f32 %v13315_v27, %v4258_v51  ;;  %v17738_v25 = vld [vmem:[#allocation143_spill] sm:$0xff]  ;;  %vm1994_vm9 = vmand %vm13292_vm11, %vm1717_vm10  ;;  %v17739_v4 = vld [vmem:[#allocation12_spill] sm:$0xff] }
 0x45f   : > { %17737 = vst [vmem:[#allocation213_spill] sm:$0xff] %v13322_v8  ;;  %v4561_v23 = vadd.f32 1e-06, %v4433_v19  ;;  %v3821_v47 = vadd.f32 %v3769_v56, %v17738_v25  ;;  %v13333_v41 = vsel %vm13301_vm14, 1.0, %v15949_v21  ;;  %v4732_v3 = vmul.f32 0.6931472, %v12752_v6  ;;  %5057 = vadd.xlane.f32.xlu0 %v5056_v30 }
 0x460   : > { %6603 = vlog2.f32 %v4559_v32  ;;  %v5051_v51 = vadd.f32 %v5050_v37, %v4910_v54  ;;  %v4253_v24 = vadd.f32 %v13333_v41, %v4252_v46  ;;  %v4734_v33 = vmul.f32 0.6931472, %v17739_v4  ;;  %v17740_v19 = vld [vmem:[#allocation322_spill] sm:$0xff]  ;;  %v17741_v2 = vld [vmem:[#allocation324_spill] sm:$0xff]  ;;  %v17742_v22 = vld [vmem:[#allocation327_spill] sm:$0xff] }
 0x461   : > { %6605 = vlog2.f32 %v4560_v35  ;;  %v4443_v53 = vadd.f32 %v17740_v19, %v3821_v47  ;;  %v4444_v40 = vadd.f32 %v17741_v2, %v3821_v47  ;;  %v4445_v56 = vadd.f32 %v17742_v22, %v3821_v47  ;;  %v13341_v25 = vpop.eup %6601  ;;  %v17745_v37 = vld [vmem:[#allocation268_spill] sm:$0xff]  ;;  %v17747_v54 = vld [vmem:[#allocation270_spill] sm:$0xff]  ;;  %v3764_v2 = vpop.xlane.xlu0 %3763  ;;  %v17751_v8 = vld [vmem:[#allocation399_spill] sm:$0xff] }
 0x462   : > { %17743 = vst [vmem:[#allocation271_spill] sm:$0xff] %v13341_v25  ;;  %v13343_v63 = vadd.f32 1e-06, %v4434_v17  ;;  %5052 = vadd.xlane.f32.xlu1 %v5051_v51  ;;  %v13346_v6 = vsel %vm1994_vm9, 1.0, %v15949_v21  ;;  %6607 = vlog2.f32 %v17745_v37  ;;  %v4919_v30 = vmul.f32 %v12789_v49, %v4732_v3  ;;  %v17746_v32 = vld [vmem:[#allocation312_spill] sm:$0xff]  ;;  %v17749_v22 = vld [vmem:[#allocation370_spill] sm:$0xff] }
 0x463   : > { %vm1726_vm15 = vcmp.ne.s32.totalorder %v17746_v32, %v16483_v18  ;;  %v4571_v35 = vadd.f32 1e-06, %v4443_v53  ;;  %v4572_v46 = vadd.f32 1e-06, %v4444_v40  ;;  %v4736_v4 = vmul.f32 0.6931472, %v17747_v54  ;;  %4043 = vadd.xlane.f32.xlu0 %v4042_v29 }
 0x464   : > { %17744 = vst [vmem:[#allocation272_spill] sm:$0xff] %v13343_v63  ;;  %v4920_v19 = vmul.f32 %v12794_v26, %v4734_v33  ;;  %vm1727_vm1 = vcmp.ne.s32.totalorder %v17746_v32, %v16485_v15  ;;  %6609 = vlog2.f32 %v4561_v23  ;;  %v17748_v17 = vld [vmem:[#allocation328_spill] sm:$0xff]  ;;  %v4724_v37 = vmul.f32 0.6931472, %v17749_v22  ;;  %v17753_v29 = vld [vmem:[#allocation298_spill] sm:$0xff]  ;;  %v17796_v27 = vld [vmem:[#allocation79_spill] sm:$0xff] }
 0x465   : > { %v4446_v51 = vadd.f32 %v17748_v17, %v3821_v47  ;;  %v17750_v49 = vld [vmem:[#allocation232_spill] sm:$0xff]  ;;  %v4573_v25 = vadd.f32 1e-06, %v4445_v56  ;;  %v3820_v53 = vadd.f32 %v3764_v2, %v17751_v8  ;;  %v4254_v40 = vadd.f32 %v13346_v6, %v4253_v24  ;;  %v17754_v17 = vld [vmem:[#allocation329_spill] sm:$0xff]  ;;  %v17755_v56 = vld [vmem:[#allocation330_spill] sm:$0xff] }
 0x466   : > { %v4726_v3 = vmul.f32 0.6931472, %v17750_v49  ;;  %v5064_v54 = vadd.f32 %v4920_v19, %v4919_v30  ;;  %6611 = vlog2.f32 %v4571_v35  ;;  %4038 = vadd.xlane.f32.xlu1 %v4037_v62  ;;  %v17752_v26 = vld [vmem:[#allocation228_spill] sm:$0xff]  ;;  %v4915_v23 = vmul.f32 %v12463_v58, %v4724_v37  ;;  %v17757_v24 = vld [vmem:[#allocation333_spill] sm:$0xff]  ;;  %v17758_v35 = vld [vmem:[#allocation227_spill] sm:$0xff] }
 0x467   : > { %v4728_v33 = vmul.f32 0.6931472, %v17752_v26  ;;  %vm1722_vm0 = vcmp.ne.s32.totalorder %v17753_v29, %v16483_v18  ;;  %6613 = vlog2.f32 %v4572_v46  ;;  %v4439_v22 = vadd.f32 %v17754_v17, %v3820_v53  ;;  %v17756_v8 = vld [vmem:[#allocation332_spill] sm:$0xff]  ;;  %4260 = vadd.xlane.f32.xlu0 %v4259_v14  ;;  %v17759_v58 = vld [vmem:[#allocation81_spill] sm:$0xff]  ;;  %v17763_v14 = vld [vmem:[#allocation363_spill] sm:$0xff] }
 0x468   : > { %v4916_v47 = vmul.f32 %v17702_v10, %v4726_v3  ;;  %v4440_v49 = vadd.f32 %v17755_v56, %v3820_v53  ;;  %v4441_v2 = vadd.f32 %v17756_v8, %v3820_v53  ;;  %v4442_v30 = vadd.f32 %v17757_v24, %v3820_v53  ;;  %v17767_v26 = vld [vmem:[#allocation82_spill] sm:$0xff]  ;;  %v17770_v17 = vld [vmem:[#allocation360_spill] sm:$0xff] }
 0x469   : > { %v4921_v62 = vmul.f32 %v12821_v50, %v4736_v4  ;;  %6615 = vlog2.f32 %v17758_v35  ;;  %v3903_v10 = vmul.f32 %v13020_v5, %v17759_v58  ;;  %v13374_v19 = vadd.f32 1e-06, %v4446_v51  ;;  %v3779_v51 = vpop.xlane.xlu1 %3778  ;;  %v17782_v35 = vld [vmem:[#allocation78_spill] sm:$0xff] }
 0x46a   : > { %6617 = vlog2.f32 %v4573_v25  ;;  %v4567_v46 = vadd.f32 1e-06, %v4439_v22  ;;  %v5059_v37 = vadd.f32 %v4916_v47, %v4915_v23  ;;  %v13376_v3 = vpop.eup %6603  ;;  %vm1723_vm4 = vcmp.ne.s32.totalorder %v17753_v29, %v16485_v15  ;;  %4255 = vadd.xlane.f32.xlu1 %v4254_v40  ;;  %v17775_v40 = vld [vmem:[#allocation326_spill] sm:$0xff] }
 0x46b   : > { %17760 = vst [vmem:[#allocation273_spill] sm:$0xff] %v13374_v19  ;;  %17761 = vst [vmem:[#allocation11_spill] sm:$0xff] %v13376_v3  ;;  %vm17762_vm8 = vcmp.eq.s32.totalorder %v6965_v60, 1  ;;  %vm17764_vm5 = vcmp.eq.f32.partialorder %v17763_v14, %v6962_v59  ;;  %v4568_v4 = vadd.f32 1e-06, %v4440_v49  ;;  %v5065_v25 = vadd.f32 %v5064_v54, %v4921_v62  ;;  %v13392_v47 = vpop.eup %6605  ;;  %v17781_v62 = vld [vmem:[#allocation85_spill] sm:$0xff] }
 0x46c   : > { %vm13385_vm6 = vmand %vm17764_vm5, %vm17762_vm8  ;;  %v4917_v53 = vmul.f32 %v17716_v43, %v4728_v33  ;;  %v3904_v23 = vmul.f32 %v13028_v44, %v17767_v26  ;;  %17768 = vst [vmem:[#allocation178_spill] sm:$0xff] %v13392_v47  ;;  %vm17771_vm2 = vcmp.eq.f32.partialorder %v17770_v17, %v6962_v59  ;;  %v4569_v56 = vadd.f32 1e-06, %v4441_v2  ;;  %v17776_v43 = vld [vmem:[#allocation84_spill] sm:$0xff]  ;;  %v6608_v8 = vpop.eup %6607  ;;  %v17783_v58 = vld [vmem:[#allocation26_spill] sm:$0xff] }
 0x46d   : > { %vm17769_vm7 = vmmov %vm17762_vm8  ;;  %v13403_v49 = vadd.f32 1e-06, %v4442_v30  ;;  %v3823_v54 = vadd.f32 %v3779_v51, %v17775_v40  ;;  %v3905_v33 = vmul.f32 %v13071_v16, %v17776_v43  ;;  %vm17777_vm13 = vcmp.eq.s32.totalorder %v6976_v1, 1  ;;  %v17784_v26 = vld [vmem:[#allocation80_spill] sm:$0xff]  ;;  %v17785_v40 = vld [vmem:[#allocation269_spill] sm:$0xff] }
 0x46e   : > { %vm13399_vm3 = vmand %vm17771_vm2, %vm17769_vm7  ;;  %vm17778_vm12 = vcmp.eq.f32.partialorder %v17770_v17, %v6973_v0  ;;  %v3906_v2 = vmul.f32 %v13137_v45, %v17781_v62  ;;  %v4050_v30 = vadd.f32 %v3904_v23, %v3903_v10  ;;  %v3899_v51 = vmul.f32 %v17783_v58, %v17782_v35  ;;  %v17791_v62 = vld [vmem:[#allocation335_spill] sm:$0xff]  ;;  %v17792_v23 = vld [vmem:[#allocation336_spill] sm:$0xff]  ;;  %v13435_v35 = vpop.eup %6609 }
 0x46f   : > { %17774 = vst [vmem:[#allocation243_spill] sm:$0xff] %v13403_v49  ;;  %vm13413_vm11 = vmand %vm17778_vm12, %vm17777_vm13  ;;  %v3900_v43 = vmul.f32 %v17785_v40, %v17784_v26  ;;  %vm17787_vm14 = vcmp.eq.f32.partialorder %v17763_v14, %v6973_v0  ;;  %6619 = vlog2.f32 %v4567_v46  ;;  %v17790_v49 = vld [vmem:[#allocation334_spill] sm:$0xff]  ;;  %v4452_v10 = vadd.f32 %v17791_v62, %v3823_v54 }
 0x470   : > { %vm17786_vm10 = vmmov %vm17777_vm13  ;;  %v4451_v63 = vadd.f32 %v17790_v49, %v3823_v54  ;;  %v4453_v47 = vadd.f32 %v17792_v23, %v3823_v54  ;;  %17793 = vst [vmem:[#allocation41_spill] sm:$0xff] %v13435_v35  ;;  %6621 = vlog2.f32 %v4568_v4  ;;  %v4738_v3 = vmul.f32 0.6931472, %v6608_v8  ;;  %v17797_v49 = vld [vmem:[#allocation191_spill] sm:$0xff]  ;;  %v13457_v9 = vpop.eup %6611  ;;  %v3774_v4 = vpop.xlane.xlu0 %3773  ;;  %v17807_v24 = vld [vmem:[#allocation146_spill] sm:$0xff] }
 0x471   : > { %vm13428_vm9 = vmand %vm17787_vm14, %vm17786_vm10  ;;  %v5060_v46 = vadd.f32 %v5059_v37, %v4917_v53  ;;  %v3901_v20 = vmul.f32 %v17797_v49, %v17796_v27  ;;  %6623 = vlog2.f32 %v4569_v56  ;;  %v4580_v23 = vadd.f32 1e-06, %v4452_v10  ;;  %17800 = vst [vmem:[#allocation274_spill] sm:$0xff] %v13457_v9  ;;  %v17806_v56 = vld [vmem:[#allocation4_spill] sm:$0xff]  ;;  %v17808_v10 = vld [vmem:[#allocation83_spill] sm:$0xff] }
 0x472   : > { %vm13442_vm8 = vmand %vm13399_vm3, %vm1726_vm15  ;;  %v4579_v22 = vadd.f32 1e-06, %v4451_v63  ;;  %v4051_v35 = vadd.f32 %v4050_v30, %v3905_v33  ;;  %vm17801_vm15 = vcmp.eq.s32.totalorder %v7583_v61, 1  ;;  %vm17802_vm7 = vcmp.eq.f32.partialorder %v17770_v17, %v7560_v34  ;;  %v13471_v63 = vpop.eup %6613  ;;  %v17809_v9 = vld [vmem:[#allocation212_spill] sm:$0xff]  ;;  %v17817_v50 = vld [vmem:[#allocation338_spill] sm:$0xff] }
 0x473   : > { %vm13453_vm5 = vmand %vm13413_vm11, %vm1727_vm1  ;;  %v4581_v37 = vadd.f32 1e-06, %v4453_v47  ;;  %v4922_v53 = vmul.f32 %v12839_v48, %v4738_v3  ;;  %v4045_v8 = vadd.f32 %v3900_v43, %v3899_v51  ;;  %vm1728_vm1 = vcmp.ne.s32.totalorder %v17746_v32, %v17128_v28  ;;  %17805 = vst [vmem:[#allocation223_spill] sm:$0xff] %v13471_v63  ;;  %v6616_v3 = vpop.eup %6615  ;;  %v17844_v27 = vld [vmem:[#allocation403_spill] sm:$0xff]  ;;  %v17855_v47 = vld [vmem:[#allocation300_spill] sm:$0xff] }
 0x474   : > { %vm13464_vm2 = vmand %vm17802_vm7, %vm17801_vm15  ;;  %v13474_v33 = vadd.f32 %v17806_v56, %v3823_v54  ;;  %v3822_v30 = vadd.f32 %v3774_v4, %v17807_v24  ;;  %v3902_v55 = vmul.f32 %v17809_v9, %v17808_v10  ;;  %vm1729_vm3 = vcmp.ne.s32.totalorder %v17746_v32, %v17131_v31  ;;  %v13509_v43 = vpop.eup %6617  ;;  %v17818_v56 = vld [vmem:[#allocation339_spill] sm:$0xff]  ;;  %v17819_v10 = vld [vmem:[#allocation340_spill] sm:$0xff] }
 0x475   : > { %vm17810_vm13 = vcmp.eq.s32.totalorder %v7614_v57, 1  ;;  %vm17811_vm12 = vcmp.eq.f32.partialorder %v17770_v17, %v7578_v42  ;;  %vm13495_vm10 = vmand %vm13385_vm6, %vm1722_vm0  ;;  %6625 = vlog2.f32 %v4579_v22  ;;  %v5066_v54 = vadd.f32 %v5065_v25, %v4922_v53  ;;  %17816 = vst [vmem:[#allocation365_spill] sm:$0xff] %v13509_v43  ;;  %v17846_v32 = vld [vmem:[#allocation262_spill] sm:$0xff] }
 0x476   : > { %vm13486_vm11 = vmand %vm17811_vm12, %vm17810_vm13  ;;  %v13502_v17 = vsel %vm13442_vm8, 1.0, %v15949_v21  ;;  %v13507_v51 = vsel %vm13453_vm5, 1.0, %v15949_v21  ;;  %6627 = vlog2.f32 %v4580_v23  ;;  %v4447_v4 = vadd.f32 %v17817_v50, %v3822_v30 }
 0x477   : > { %v4448_v24 = vadd.f32 %v17818_v56, %v3822_v30  ;;  %v4449_v22 = vadd.f32 %v17819_v10, %v3822_v30  ;;  %vm13519_vm0 = vmand %vm13464_vm2, %vm1728_vm1  ;;  %6629 = vlog2.f32 %v4581_v37  ;;  %5067 = vadd.xlane.f32.xlu0 %v5066_v54  ;;  %v4730_v26 = vmul.f32 0.6931472, %v6616_v3  ;;  %v17824_v37 = vld [vmem:[#allocation341_spill] sm:$0xff]  ;;  %v17831_v54 = vld [vmem:[#allocation40_spill] sm:$0xff] }
 0x478   : > { %v4052_v62 = vadd.f32 %v4051_v35, %v3906_v2  ;;  %v4046_v23 = vadd.f32 %v4045_v8, %v3901_v20  ;;  %vm2006_vm6 = vmand %vm13486_vm11, %vm1729_vm3  ;;  %v4450_v53 = vadd.f32 %v17824_v37, %v3822_v30  ;;  %v4575_v3 = vadd.f32 1e-06, %v4447_v4  ;;  %v3789_v35 = vpop.xlane.xlu1 %3788 }
 0x479   : > { %vm13533_vm14 = vmand %vm13428_vm9, %vm1723_vm4  ;;  %v4576_v2 = vadd.f32 1e-06, %v4448_v24  ;;  %v4267_v20 = vadd.f32 %v13507_v51, %v13502_v17  ;;  %vm17826_vm5 = vcmp.eq.f32.partialorder %v17763_v14, %v7560_v34  ;;  %v4577_v19 = vadd.f32 1e-06, %v4449_v22  ;;  %v13557_v48 = vpop.eup %6619 }
 0x47a   : > { %vm17825_vm8 = vmmov %vm17801_vm15  ;;  %v4918_v8 = vmul.f32 %v12583_v13, %v4730_v26  ;;  %v13553_v30 = vsel %vm13519_vm0, 1.0, %v15949_v21  ;;  %vm1724_vm4 = vcmp.ne.s32.totalorder %v17753_v29, %v17128_v28  ;;  %17830 = vst [vmem:[#allocation27_spill] sm:$0xff] %v13557_v48  ;;  %6631 = vlog2.f32 %v4575_v3  ;;  %v13564_v24 = vpop.eup %6621  ;;  %v3784_v13 = vpop.xlane.xlu0 %3783 }
 0x47b   : > { %vm13545_vm15 = vmand %vm17826_vm5, %vm17825_vm8  ;;  %17829 = vst [vmem:[#allocation19_spill] sm:$0xff] %v13553_v30  ;;  %v3825_v50 = vadd.f32 %v3789_v35, %v17831_v54  ;;  %v13561_v4 = vsel %vm2006_vm6, 1.0, %v15949_v21  ;;  %v4268_v56 = vadd.f32 %v13553_v30, %v4267_v20  ;;  %4053 = vadd.xlane.f32.xlu0 %v4052_v62  ;;  %vm1725_vm9 = vcmp.ne.s32.totalorder %v17753_v29, %v17131_v31  ;;  %v13587_v26 = vpop.eup %6623  ;;  %v17839_v62 = vld [vmem:[#allocation343_spill] sm:$0xff]  ;;  %v17841_v20 = vld [vmem:[#allocation345_spill] sm:$0xff] }
 0x47c   : > { %17832 = vst [vmem:[#allocation381_spill] sm:$0xff] %v13561_v4  ;;  %17833 = vst [vmem:[#allocation237_spill] sm:$0xff] %v13564_v24  ;;  %v5061_v10 = vadd.f32 %v5060_v46, %v4918_v8  ;;  %vm17835_vm2 = vcmp.eq.f32.partialorder %v17763_v14, %v7578_v42  ;;  %v13580_v25 = vsel %vm13495_vm10, 1.0, %v15949_v21  ;;  %v13585_v46 = vsel %vm13533_vm14, 1.0, %v15949_v21  ;;  %v17840_v14 = vld [vmem:[#allocation344_spill] sm:$0xff]  ;;  %v17847_v24 = vld [vmem:[#allocation263_spill] sm:$0xff]  ;;  %v4151_v29 = vpop.xlane.xlu1 %4150 }
 0x47d   : > { %vm17834_vm7 = vmmov %vm17810_vm13  ;;  %17838 = vst [vmem:[#allocation337_spill] sm:$0xff] %v13587_v26  ;;  %6633 = vlog2.f32 %v4576_v2  ;;  %v4459_v37 = vadd.f32 %v17839_v62, %v3825_v50  ;;  %v4460_v3 = vadd.f32 %v17840_v14, %v3825_v50  ;;  %v4461_v35 = vadd.f32 %v17841_v20, %v3825_v50  ;;  %v17848_v30 = vld [vmem:[#allocation355_spill] sm:$0xff] }
 0x47e   : > { %vm13573_vm1 = vmand %vm17835_vm2, %vm17834_vm7  ;;  %6635 = vlog2.f32 %v4577_v19  ;;  %v3824_v8 = vadd.f32 %v3784_v13, %v17844_v27  ;;  %5062 = vadd.xlane.f32.xlu1 %v5061_v10  ;;  %v4047_v2 = vadd.f32 %v4046_v23, %v3902_v55  ;;  %v4269_v54 = vadd.f32 %v13561_v4, %v4268_v56 }
 0x47f   : > { %vm13597_vm3 = vmand %vm13545_vm15, %vm1724_vm4  ;;  %v4587_v62 = vadd.f32 1e-06, %v4459_v37  ;;  %v4588_v14 = vadd.f32 1e-06, %v4460_v3  ;;  %v4589_v43 = vadd.f32 1e-06, %v4461_v35  ;;  %v4262_v20 = vadd.f32 %v13585_v46, %v13580_v25  ;;  %v13605_v63 = vpop.eup %6625 }
 0x480   : > { %17845 = vst [vmem:[#allocation369_spill] sm:$0xff] %v13605_v63  ;;  %v4455_v26 = vadd.f32 %v17846_v32, %v3824_v8  ;;  %v4456_v48 = vadd.f32 %v17847_v24, %v3824_v8  ;;  %v4457_v19 = vadd.f32 %v17848_v30, %v3824_v8  ;;  %4270 = vadd.xlane.f32.xlu0 %v4269_v54  ;;  %vm13615_vm13 = vmand %vm13573_vm1, %vm1725_vm9  ;;  %v13622_v23 = vsel %vm13597_vm3, 1.0, %v15949_v21  ;;  %v13624_v56 = vpop.eup %6627  ;;  %v17853_v30 = vld [vmem:[#allocation346_spill] sm:$0xff]  ;;  %v17860_v32 = vld [vmem:[#allocation173_spill] sm:$0xff] }
 0x481   : > { %17851 = vst [vmem:[#allocation23_spill] sm:$0xff] %v13624_v56  ;;  %v13627_v24 = vadd.f32 1e-06, %v13474_v33  ;;  %v4462_v13 = vadd.f32 %v17853_v30, %v3825_v50  ;;  %6637 = vlog2.f32 %v4587_v62  ;;  %v4263_v10 = vadd.f32 %v13622_v23, %v4262_v20  ;;  %v13631_v22 = vpop.eup %6629  ;;  %v17859_v62 = vld [vmem:[#allocation356_spill] sm:$0xff]  ;;  %v17920_v63 = vld [vmem:[#allocation218_spill] sm:$0xff] }
 0x482   : > { %17854 = vst [vmem:[#allocation222_spill] sm:$0xff] %v13631_v22  ;;  %6639 = vlog2.f32 %v4588_v14  ;;  %v4583_v37 = vadd.f32 1e-06, %v4455_v26  ;;  %v4584_v3 = vadd.f32 1e-06, %v4456_v48  ;;  %4048 = vadd.xlane.f32.xlu1 %v4047_v2  ;;  %vm1730_vm12 = vcmp.ne.s32.totalorder %v17855_v47, %v16483_v18  ;;  %v4161_v14 = vpop.xlane.xlu1 %4160 }
 0x483   : > { %17852 = vst [vmem:[#allocation136_spill] sm:$0xff] %v13627_v24  ;;  %v4585_v35 = vadd.f32 1e-06, %v4457_v19  ;;  %v13635_v27 = vadd.f32 1e-06, %v4450_v53  ;;  %6641 = vlog2.f32 %v4589_v43  ;;  %vm5171_vm11 = vcmp.gt.f32.partialorder %v4151_v29, 0.0  ;;  %v3794_v43 = vpop.xlane.xlu0 %3793 }
 0x484   : > { %v13640_v33 = vsel %vm13615_vm13, 1.0, %v15949_v21  ;;  %6643 = vlog2.f32 %v4583_v37  ;;  %v5203_v50 = vsel %vm5171_vm11, %v4151_v29, 1.0  ;;  %v4748_v48 = vmul.f32 0.6931472, %v13065_v39  ;;  %v13644_v26 = vpop.eup %6631  ;;  %v17862_v39 = vld [vmem:[#allocation313_spill] sm:$0xff] }
 0x485   : > { %17856 = vst [vmem:[#allocation376_spill] sm:$0xff] %v13635_v27  ;;  %v4264_v54 = vadd.f32 %v13640_v33, %v4263_v10  ;;  %17857 = vst [vmem:[#allocation28_spill] sm:$0xff] %v13644_v26  ;;  %v13646_v2 = vadd.f32 1e-06, %v4462_v13  ;;  %v4458_v53 = vadd.f32 %v17859_v62, %v3824_v8  ;;  %6645 = vlog2.f32 %v4584_v3 }
 0x486   : > { %v4750_v20 = vmul.f32 0.6931472, %v13080_v52  ;;  %6647 = vlog2.f32 %v4585_v35  ;;  %v3826_v19 = vadd.f32 %v3794_v43, %v17860_v32  ;;  %vm5173_vm10 = vcmp.gt.f32.partialorder %v4161_v14, 0.0  ;;  %v17864_v52 = vld [vmem:[#allocation264_spill] sm:$0xff]  ;;  %v17865_v35 = vld [vmem:[#allocation265_spill] sm:$0xff] }
 0x487   : > { %17858 = vst [vmem:[#allocation351_spill] sm:$0xff] %v13646_v2  ;;  %4265 = vadd.xlane.f32.xlu1 %v4264_v54  ;;  %v4752_v55 = vmul.f32 0.6931472, %v13094_v36  ;;  %v13652_v30 = vpop.eup %6633  ;;  %vm1734_vm0 = vcmp.ne.s32.totalorder %v17862_v39, %v16483_v18  ;;  %6649 = vrcp.f32 %v5203_v50  ;;  %v5205_v13 = vsel %vm5173_vm10, %v4161_v14, 1.0  ;;  %v17866_v54 = vld [vmem:[#allocation140_spill] sm:$0xff]  ;;  %v17867_v43 = vld [vmem:[#allocation141_spill] sm:$0xff]  ;;  %v4156_v50 = vpop.xlane.xlu0 %4155 }
 0x488   : > { %17861 = vst [vmem:[#allocation353_spill] sm:$0xff] %v13652_v30  ;;  %v4927_v8 = vmul.f32 %v13020_v5, %v4748_v48  ;;  %v4928_v10 = vmul.f32 %v13028_v44, %v4750_v20  ;;  %v13658_v37 = vpop.eup %6635  ;;  %vm1735_vm6 = vcmp.ne.s32.totalorder %v17862_v39, %v16485_v15  ;;  %v4463_v3 = vadd.f32 %v17864_v52, %v3826_v19  ;;  %v13666_v2 = vpop.xlane.xlu1 %4170  ;;  %v17869_v48 = vld [vmem:[#allocation246_spill] sm:$0xff]  ;;  %v17870_v20 = vld [vmem:[#allocation247_spill] sm:$0xff]  ;;  %v17929_v30 = vld [vmem:[#allocation88_spill] sm:$0xff] }
 0x489   : > { %17863 = vst [vmem:[#allocation393_spill] sm:$0xff] %v13658_v37  ;;  %v4464_v36 = vadd.f32 %v17865_v35, %v3826_v19  ;;  %v4465_v62 = vadd.f32 %v17866_v54, %v3826_v19  ;;  %v4466_v32 = vadd.f32 %v17867_v43, %v3826_v19  ;;  %6651 = vrcp.f32 %v5205_v13  ;;  %17868 = vst [vmem:[#allocation229_spill] sm:$0xff] %v13666_v2  ;;  %v17873_v19 = vld [vmem:[#allocation375_spill] sm:$0xff]  ;;  %v17901_v13 = vld [vmem:[#allocation138_spill] sm:$0xff] }
 0x48a   : > { %v5074_v5 = vadd.f32 %v4928_v10, %v4927_v8  ;;  %v4740_v44 = vmul.f32 0.6931472, %v17869_v48  ;;  %v4742_v24 = vmul.f32 0.6931472, %v17870_v20  ;;  %vm1731_vm14 = vcmp.ne.s32.totalorder %v17855_v47, %v16485_v15 }
 0x48b   : > { %v4591_v22 = vadd.f32 1e-06, %v4463_v3  ;;  %v4592_v52 = vadd.f32 1e-06, %v4464_v36  ;;  %v4593_v56 = vadd.f32 1e-06, %v4465_v62  ;;  %v4929_v35 = vmul.f32 %v13071_v16, %v4752_v55  ;;  %v13673_v54 = vpop.eup %6637 }
 0x48c   : > { %17871 = vst [vmem:[#allocation24_spill] sm:$0xff] %v13673_v54  ;;  %vm17872_vm8 = vcmp.eq.s32.totalorder %v6965_v60, 1  ;;  %vm17874_vm5 = vcmp.eq.f32.partialorder %v17873_v19, %v6962_v59  ;;  %v13684_v8 = vadd.f32 1e-06, %v4458_v53  ;;  %v4594_v10 = vadd.f32 1e-06, %v4466_v32  ;;  %v13687_v3 = vpop.eup %6639  ;;  %v13715_v43 = vpop.xlane.xlu1 %3958 }
 0x48d   : > { %vm13680_vm15 = vmand %vm17874_vm5, %vm17872_vm8  ;;  %vm5172_vm4 = vcmp.gt.f32.partialorder %v4156_v50, 0.0  ;;  %6653 = vlog2.f32 %v12940_v38  ;;  %17878 = vst [vmem:[#allocation382_spill] sm:$0xff] %v13687_v3  ;;  %vm17879_vm9 = vcmp.eq.s32.totalorder %v6976_v1, 1  ;;  %vm17880_vm7 = vcmp.eq.f32.partialorder %v17873_v19, %v6973_v0  ;;  %v17883_v53 = vld [vmem:[#allocation161_spill] sm:$0xff]  ;;  %v13704_v38 = vpop.eup %6641  ;;  %v17891_v32 = vld [vmem:[#allocation248_spill] sm:$0xff] }
 0x48e   : > { %17877 = vst [vmem:[#allocation226_spill] sm:$0xff] %v13684_v8  ;;  %vm13694_vm2 = vmand %vm17880_vm7, %vm17879_vm9  ;;  %6655 = vlog2.f32 %v4591_v22  ;;  %vm5175_vm1 = vcmp.gt.f32.partialorder %v13666_v2, 0.0  ;;  %v13700_v55 = vmul.f32 %v4151_v29, %v17883_v53  ;;  %v13702_v36 = vadd.f32 %v5074_v5, %v4929_v35  ;;  %v4166_v22 = vpop.xlane.xlu0 %4165  ;;  %v13720_v20 = vpop.eup %6643  ;;  %v17909_v8 = vld [vmem:[#allocation89_spill] sm:$0xff] }
 0x48f   : > { %17885 = vst [vmem:[#allocation285_spill] sm:$0xff] %v13704_v38  ;;  %vm17886_vm3 = vcmp.eq.s32.totalorder %v7583_v61, 1  ;;  %vm17887_vm13 = vcmp.eq.f32.partialorder %v17873_v19, %v7560_v34  ;;  %6657 = vlog2.f32 %v4592_v52  ;;  %17890 = vst [vmem:[#allocation286_spill] sm:$0xff] %v13715_v43  ;;  %v4744_v29 = vmul.f32 0.6931472, %v17891_v32  ;;  %v17902_v32 = vld [vmem:[#allocation158_spill] sm:$0xff] }
 0x490   : > { %17884 = vst [vmem:[#allocation284_spill] sm:$0xff] %v13700_v55  ;;  %vm13711_vm11 = vmand %vm17887_vm13, %vm17886_vm3  ;;  %v4923_v5 = vmul.f32 %v17783_v58, %v4740_v44  ;;  %v4924_v48 = vmul.f32 %v17785_v40, %v4742_v24  ;;  %6659 = vlog2.f32 %v4593_v56  ;;  %v5204_v52 = vsel %vm5172_vm4, %v4156_v50, 1.0  ;;  %v13734_v44 = vpop.eup %6645  ;;  %v17897_v40 = vld [vmem:[#allocation383_spill] sm:$0xff]  ;;  %v17926_v24 = vld [vmem:[#allocation188_spill] sm:$0xff] }
 0x491   : > { %17892 = vst [vmem:[#allocation287_spill] sm:$0xff] %v13720_v20  ;;  %vm13727_vm10 = vmand %vm13680_vm15, %vm1730_vm12  ;;  %vm5174_vm8 = vcmp.gt.f32.partialorder %v4166_v22, 0.0  ;;  %vm17896_vm5 = vcmp.eq.s32.totalorder %v6965_v60, 1  ;;  %vm17898_vm9 = vcmp.eq.f32.partialorder %v17897_v40, %v6962_v59  ;;  %6661 = vlog2.f32 %v4594_v10  ;;  %v13754_v38 = vpop.eup %6647  ;;  %v17919_v20 = vld [vmem:[#allocation86_spill] sm:$0xff]  ;;  %v17984_v55 = vld [vmem:[#allocation397_spill] sm:$0xff] }
 0x492   : > { %17895 = vst [vmem:[#allocation29_spill] sm:$0xff] %v13734_v44  ;;  %vm13741_vm7 = vmand %vm17898_vm9, %vm17896_vm5  ;;  %v5207_v56 = vsel %vm5175_vm1, %v13666_v2, 1.0  ;;  %v13749_v53 = vmul.f32 %v4156_v50, %v17901_v13  ;;  %v13752_v58 = vmul.f32 %v4161_v14, %v17902_v32  ;;  %vm17905_vm12 = vcmp.eq.s32.totalorder %v6976_v1, 1  ;;  %v17910_v13 = vld [vmem:[#allocation90_spill] sm:$0xff]  ;;  %v13769_v32 = vpop.eup %6649  ;;  %v13780_v44 = vpop.xlane.xlu0 %4175  ;;  %v17931_v2 = vld [vmem:[#allocation93_spill] sm:$0xff] }
 0x493   : > { %17904 = vst [vmem:[#allocation240_spill] sm:$0xff] %v13754_v38  ;;  %vm17906_vm15 = vcmp.eq.f32.partialorder %v17897_v40, %v6973_v0  ;;  %v5206_v10 = vsel %vm5174_vm8, %v4166_v22, 1.0  ;;  %v5069_v54 = vadd.f32 %v4924_v48, %v4923_v5  ;;  %v3911_v50 = vmul.f32 %v13280_v7, %v17909_v8  ;;  %17911 = vst [vmem:[#allocation32_spill] sm:$0xff] %v13769_v32  ;;  %v13782_v5 = vpop.xlane.xlu1 %4180  ;;  %v17918_v48 = vld [vmem:[#allocation92_spill] sm:$0xff] }
 0x494   : > { %17903 = vst [vmem:[#allocation276_spill] sm:$0xff] %v13752_v58  ;;  %vm13761_vm4 = vmand %vm17906_vm15, %vm17905_vm12  ;;  %v3912_v14 = vmul.f32 %v13308_v12, %v17910_v13  ;;  %6663 = vrcp.f32 %v5204_v52  ;;  %v4925_v8 = vmul.f32 %v17797_v49, %v4744_v29  ;;  %v3913_v13 = vmul.f32 %v13333_v41, %v17918_v48  ;;  %v13800_v29 = vpop.eup %6651  ;;  %v17928_v48 = vld [vmem:[#allocation374_spill] sm:$0xff] }
 0x495   : > { %vm17912_vm1 = vmmov %vm17886_vm3  ;;  %vm17913_vm3 = vcmp.eq.f32.partialorder %v17897_v40, %v7560_v34  ;;  %17916 = vst [vmem:[#allocation20_spill] sm:$0xff] %v13780_v44  ;;  %v3907_v27 = vmul.f32 %v17920_v63, %v17919_v20  ;;  %6665 = vrcp.f32 %v5207_v56  ;;  %vm5176_vm5 = vcmp.gt.f32.partialorder %v13780_v44, 0.0 }
 0x496   : > { %vm13776_vm13 = vmand %vm17913_vm3, %vm17912_vm1  ;;  %17917 = vst [vmem:[#allocation181_spill] sm:$0xff] %v13782_v5  ;;  %vm5177_vm9 = vcmp.gt.f32.partialorder %v13782_v5, 0.0  ;;  %v4060_v49 = vadd.f32 %v3912_v14, %v3911_v50  ;;  %v5208_v52 = vsel %vm5176_vm5, %v13780_v44, 1.0  ;;  %v13813_v56 = vmul.f32 %v4166_v22, %v17926_v24  ;;  %v17930_v50 = vld [vmem:[#allocation214_spill] sm:$0xff]  ;;  %v17948_v44 = vld [vmem:[#allocation357_spill] sm:$0xff] }
 0x497   : > { %vm13794_vm8 = vmand %vm13741_vm7, %vm1734_vm0  ;;  %17923 = vst [vmem:[#allocation21_spill] sm:$0xff] %v13800_v29  ;;  %6667 = vlog2.f32 %v17928_v48  ;;  %v3908_v14 = vmul.f32 %v17930_v50, %v17929_v30  ;;  %v13818_v26 = vadd.f32 %v5069_v54, %v4925_v8  ;;  %v3914_v3 = vmul.f32 %v13346_v6, %v17931_v2  ;;  %v6654_v24 = vpop.eup %6653  ;;  %v13843_v54 = vpop.xlane.xlu0 %3963  ;;  %v17940_v8 = vld [vmem:[#allocation352_spill] sm:$0xff] }
 0x498   : > { %vm13807_vm12 = vmand %vm13761_vm4, %vm1735_vm6  ;;  %17927 = vst [vmem:[#allocation255_spill] sm:$0xff] %v13813_v56  ;;  %6669 = vrcp.f32 %v5206_v10  ;;  %v4061_v29 = vadd.f32 %v4060_v49, %v3913_v13  ;;  %vm17932_vm0 = vcmp.eq.s32.totalorder %v7614_v57, 1  ;;  %vm17933_vm6 = vcmp.eq.f32.partialorder %v17897_v40, %v7578_v42  ;;  %v13849_v10 = vpop.xlane.xlu1 %4982  ;;  %v13851_v16 = vpop.eup %6655  ;;  %v18021_v56 = vld [vmem:[#allocation367_spill] sm:$0xff] }
 0x499   : > { %vm13827_vm7 = vmand %vm17933_vm6, %vm17932_vm0  ;;  %v5209_v2 = vsel %vm5177_vm9, %v13782_v5, 1.0  ;;  %v4055_v40 = vadd.f32 %v3908_v14, %v3907_v27  ;;  %vm1736_vm4 = vcmp.ne.s32.totalorder %v17862_v39, %v17128_v28  ;;  %vm1737_vm1 = vcmp.ne.s32.totalorder %v17862_v39, %v17131_v31  ;;  %17938 = vst [vmem:[#allocation392_spill] sm:$0xff] %v13849_v10  ;;  %v13868_v48 = vpop.eup %6657  ;;  %v17945_v14 = vld [vmem:[#allocation87_spill] sm:$0xff]  ;;  %v17946_v5 = vld [vmem:[#allocation6_spill] sm:$0xff] }
 0x49a   : > { %vm13836_vm15 = vmand %vm13694_vm2, %vm1731_vm14  ;;  %17939 = vst [vmem:[#allocation38_spill] sm:$0xff] %v13851_v16  ;;  %vm1742_vm14 = vcmp.ne.s32.totalorder %v17940_v8, %v16483_v18  ;;  %6671 = vrcp.f32 %v5208_v52  ;;  %v5268_v13 = vsub.f32 %v13843_v54, %v13749_v53  ;;  %v4754_v49 = vmul.f32 0.6931472, %v6654_v24  ;;  %v17947_v16 = vld [vmem:[#allocation91_spill] sm:$0xff]  ;;  %v13887_v24 = vpop.eup %6659 }
 0x49b   : > { %vm13859_vm2 = vmand %vm13776_vm13, %vm1736_vm4  ;;  %v13866_v39 = vsel %vm13794_vm8, 1.0, %v15949_v21  ;;  %17944 = vst [vmem:[#allocation31_spill] sm:$0xff] %v13868_v48  ;;  %v3909_v52 = vmul.f32 %v17946_v5, %v17945_v14  ;;  %v3910_v53 = vmul.f32 %v17948_v44, %v17947_v16  ;;  %v13883_v37 = vsel %vm13807_vm12, 1.0, %v15949_v21  ;;  %v13900_v14 = vpop.eup %6661  ;;  %v13904_v48 = vpop.xlane.xlu0 %3968 }
 0x49c   : > { %17943 = vst [vmem:[#allocation36_spill] sm:$0xff] %v13866_v39  ;;  %vm13876_vm3 = vmand %vm13827_vm7, %vm1737_vm1  ;;  %vm1732_vm13 = vcmp.ne.s32.totalorder %v17855_v47, %v17128_v28  ;;  %vm1743_vm8 = vcmp.ne.s32.totalorder %v17940_v8, %v16485_v15  ;;  %6673 = vrcp.f32 %v5209_v2  ;;  %v4930_v22 = vmul.f32 %v13137_v45, %v4754_v49 }
 0x49d   : > { %17951 = vst [vmem:[#allocation388_spill] sm:$0xff] %v13883_v37  ;;  %17952 = vst [vmem:[#allocation201_spill] sm:$0xff] %v13887_v24  ;;  %v4062_v54 = vadd.f32 %v4061_v29, %v3914_v3  ;;  %v4277_v16 = vadd.f32 %v13883_v37, %v13866_v39  ;;  %v17956_v24 = vld [vmem:[#allocation348_spill] sm:$0xff]  ;;  %v4056_v2 = vadd.f32 %v4055_v40, %v3909_v52  ;;  %v13920_v62 = vsel %vm13727_vm10, 1.0, %v15949_v21  ;;  %v13927_v3 = vpop.xlane.xlu1 %4185  ;;  %v17965_v52 = vld [vmem:[#allocation386_spill] sm:$0xff] }
 0x49e   : > { %vm13896_vm5 = vmand %vm13711_vm11, %vm1732_vm13  ;;  %17955 = vst [vmem:[#allocation37_spill] sm:$0xff] %v13900_v14  ;;  %vm1738_vm9 = vcmp.ne.s32.totalorder %v17956_v24, %v16483_v18  ;;  %vm1733_vm12 = vcmp.ne.s32.totalorder %v17855_v47, %v17131_v31  ;;  %vm17958_vm6 = vcmp.eq.f32.partialorder %v17873_v19, %v7578_v42  ;;  %v13925_v29 = vsel %vm13836_vm15, 1.0, %v15949_v21  ;;  %v6664_v30 = vpop.eup %6663  ;;  %v18039_v47 = vld [vmem:[#allocation99_spill] sm:$0xff] }
 0x49f   : > { %17957 = vst [vmem:[#allocation254_spill] sm:$0xff] %v13904_v48  ;;  %vm13913_vm11 = vmand %vm17958_vm6, %vm17932_vm0  ;;  %v5076_v19 = vadd.f32 %v13702_v36, %v4930_v22  ;;  %v13935_v49 = vsel %vm13859_vm2, 1.0, %v15949_v21  ;;  %v13940_v35 = vsel %vm13876_vm3, 1.0, %v15949_v21  ;;  %vm17964_vm10 = vcmp.eq.s32.totalorder %v6965_v60, 1  ;;  %v17969_v22 = vld [vmem:[#allocation379_spill] sm:$0xff]  ;;  %v13960_v58 = vpop.eup %6665 }
 0x4a0   : > { %17961 = vst [vmem:[#allocation395_spill] sm:$0xff] %v13927_v3  ;;  %17962 = vst [vmem:[#allocation389_spill] sm:$0xff] %v13935_v49  ;;  %vm17966_vm7 = vcmp.eq.f32.partialorder %v17965_v52, %v6962_v59  ;;  %v13954_v36 = vsel %vm13896_vm5, 1.0, %v15949_v21  ;;  %v4272_v27 = vadd.f32 %v13925_v29, %v13920_v62  ;;  %v4764_v38 = vmul.f32 0.6931472, %v13217_v11  ;;  %v17973_v11 = vld [vmem:[#allocation176_spill] sm:$0xff] }
 0x4a1   : > { %17963 = vst [vmem:[#allocation134_spill] sm:$0xff] %v13940_v35  ;;  %vm13947_vm15 = vmand %vm17966_vm7, %vm17964_vm10  ;;  %v4766_v14 = vmul.f32 0.6931472, %v17969_v22  ;;  %vm1739_vm4 = vcmp.ne.s32.totalorder %v17956_v24, %v16485_v15  ;;  %5077 = vadd.xlane.f32.xlu0 %v5076_v19  ;;  %v4278_v48 = vadd.f32 %v13935_v49, %v4277_v16  ;;  %6675 = vlog2.f32 %v17973_v11  ;;  %v17974_v22 = vld [vmem:[#allocation238_spill] sm:$0xff]  ;;  %v6668_v39 = vpop.eup %6667  ;;  %v4988_v16 = vpop.xlane.xlu0 %4987  ;;  %v17980_v19 = vld [vmem:[#allocation177_spill] sm:$0xff] }
 0x4a2   : > { %17970 = vst [vmem:[#allocation137_spill] sm:$0xff] %v13960_v58  ;;  %vm13970_vm1 = vmand %vm13913_vm11, %vm1733_vm12  ;;  %v4756_v3 = vmul.f32 0.6931472, %v17974_v22  ;;  %v17975_v58 = vld [vmem:[#allocation252_spill] sm:$0xff]  ;;  %vm17976_vm2 = vcmp.eq.s32.totalorder %v6976_v1, 1  ;;  %vm17977_vm3 = vcmp.eq.f32.partialorder %v17965_v52, %v6973_v0  ;;  %vm5459_vm5 = vcmask 7168   ;;  %v13990_v49 = vpop.xlane.xlu1 %4992  ;;  %v13992_v32 = vpop.eup %6669 }
 0x4a3   : > { %v4758_v37 = vmul.f32 0.6931472, %v17975_v58  ;;  %vm13982_vm13 = vmand %vm17977_vm3, %vm17976_vm2  ;;  %v4273_v45 = vadd.f32 %v13954_v36, %v4272_v27  ;;  %v4768_v11 = vmul.f32 0.6931472, %v17980_v19  ;;  %v4935_v22 = vmul.f32 %v13280_v7, %v4764_v38  ;;  %17981 = vst [vmem:[#allocation380_spill] sm:$0xff] %v13990_v49  ;;  %v17988_v7 = vld [vmem:[#allocation249_spill] sm:$0xff] }
 0x4a4   : > { %v4936_v58 = vmul.f32 %v13308_v12, %v4766_v14  ;;  %17982 = vst [vmem:[#allocation35_spill] sm:$0xff] %v13992_v32  ;;  %vm17983_vm12 = vmmov %vm17964_vm10  ;;  %vm17985_vm0 = vcmp.eq.f32.partialorder %v17984_v55, %v6962_v59  ;;  %v5300_v27 = vsub.f32 %v5268_v13, %v4988_v16  ;;  %v4746_v10 = vmul.f32 0.6931472, %v6668_v39  ;;  %v18082_v12 = vld [vmem:[#allocation186_spill] sm:$0xff] }
 0x4a5   : > { %vm13999_vm6 = vmand %vm17985_vm0, %vm17983_vm12  ;;  %v14003_v19 = vadd.f32 %v4056_v2, %v3910_v53  ;;  %6677 = vlog2.f32 %v17988_v7  ;;  %vm17989_vm11 = vcmp.eq.s32.totalorder %v7583_v61, 1  ;;  %vm17990_vm10 = vcmp.eq.f32.partialorder %v17965_v52, %v7560_v34  ;;  %v14022_v2 = vpop.eup %6671  ;;  %4063 = vadd.xlane.f32.xlu0 %v4062_v54 }
 0x4a6   : > { %vm14011_vm7 = vmand %vm17990_vm10, %vm17989_vm11  ;;  %v14018_v14 = vsel %vm13970_vm1, 1.0, %v15949_v21  ;;  %v5084_v13 = vadd.f32 %v4936_v58, %v4935_v22  ;;  %v4931_v39 = vmul.f32 %v17920_v63, %v4756_v3  ;;  %v4932_v53 = vmul.f32 %v17930_v50, %v4758_v37  ;;  %17993 = vst [vmem:[#allocation359_spill] sm:$0xff] %v14022_v2  ;;  %v17997_v22 = vld [vmem:[#allocation14_spill] sm:$0xff]  ;;  %v17998_v63 = vld [vmem:[#allocation97_spill] sm:$0xff]  ;;  %v14068_v2 = vpop.xlane.xlu1 %3978  ;;  %v14070_v32 = vpop.eup %6673 }
 0x4a7   : > { %vm17994_vm3 = vcmp.eq.f32.partialorder %v17984_v55, %v6973_v0  ;;  %v5334_v16 = vmul.f32 %v6664_v30, %v5300_v27  ;;  %v4926_v20 = vmul.f32 %v17809_v9, %v4746_v10  ;;  %v4760_v58 = vmul.f32 0.6931472, %v17997_v22  ;;  %v17999_v37 = vld [vmem:[#allocation323_spill] sm:$0xff]  ;;  %v18001_v3 = vld [vmem:[#allocation366_spill] sm:$0xff]  ;;  %v14059_v10 = vpop.xlane.xlu0 %3973  ;;  %18009 = vst [vmem:[#allocation277_spill] sm:$0xff] %v14068_v2  ;;  %18010 = vst [vmem:[#allocation278_spill] sm:$0xff] %v14070_v32 }
 0x4a8   : > { %vm14029_vm12 = vmand %vm17994_vm3, %vm17976_vm2  ;;  %v3919_v50 = vmul.f32 %v13580_v25, %v17998_v63  ;;  %vm18000_vm11 = vcmp.eq.s32.totalorder %v6965_v60, 1  ;;  %vm18002_vm10 = vcmp.eq.f32.partialorder %v18001_v3, %v6962_v59  ;;  %18007 = vst [vmem:[#allocation275_spill] sm:$0xff] %v14059_v10  ;;  %v4279_v54 = vadd.f32 %v13940_v35, %v4278_v48  ;;  %v18008_v22 = vld [vmem:[#allocation98_spill] sm:$0xff]  ;;  %v18017_v32 = vld [vmem:[#allocation100_spill] sm:$0xff] }
 0x4a9   : > { %vm14046_vm2 = vmand %vm18002_vm10, %vm18000_vm11  ;;  %v14063_v27 = vadd.f32 %v14018_v14, %v4273_v45  ;;  %v4937_v7 = vmul.f32 %v13333_v41, %v4768_v11  ;;  %v3920_v63 = vmul.f32 %v13585_v46, %v18008_v22  ;;  %v5396_v48 = vmul.f32 -0.07, %v5334_v16  ;;  %v18018_v16 = vld [vmem:[#allocation94_spill] sm:$0xff]  ;;  %v18019_v35 = vld [vmem:[#allocation3_spill] sm:$0xff] }
 0x4aa   : > { %vm14055_vm3 = vmand %vm13999_vm6, %vm1742_vm14  ;;  %vm18011_vm14 = vcmp.eq.s32.totalorder %v7583_v61, 1  ;;  %vm18012_vm6 = vcmp.eq.f32.partialorder %v17984_v55, %v7560_v34  ;;  %v5071_v45 = vadd.f32 %v13818_v26, %v4926_v20  ;;  %v5079_v11 = vadd.f32 %v4932_v53, %v4931_v39  ;;  %v18020_v41 = vld [vmem:[#allocation96_spill] sm:$0xff]  ;;  %v18024_v53 = vld [vmem:[#allocation193_spill] sm:$0xff]  ;;  %4280 = vadd.xlane.f32.xlu0 %v4279_v54 }
 0x4ab   : > { %vm14077_vm11 = vmand %vm18012_vm6, %vm18011_vm14  ;;  %v3921_v2 = vmul.f32 %v13622_v23, %v18017_v32  ;;  %v4070_v49 = vadd.f32 %v3920_v63, %v3919_v50  ;;  %v3915_v4 = vmul.f32 %v18019_v35, %v18018_v16  ;;  %v3916_v26 = vmul.f32 %v18021_v56, %v18020_v41  ;;  %v14115_v63 = vpop.xlane.xlu0 %4190  ;;  %v18033_v9 = vld [vmem:[#allocation368_spill] sm:$0xff]  ;;  %v18076_v10 = vld [vmem:[#allocation185_spill] sm:$0xff] }
 0x4ac   : > { %vm14089_vm10 = vmand %vm14029_vm12, %vm1743_vm8  ;;  %v5428_v38 = vmul.f32 %v18024_v53, %v5396_v48  ;;  %5072 = vadd.xlane.f32.xlu1 %v5071_v45  ;;  %v5085_v32 = vadd.f32 %v5084_v13, %v4937_v7  ;;  %v4933_v20 = vmul.f32 %v17946_v5, %v4760_v58  ;;  %v14113_v50 = vsel %vm14055_vm3, 1.0, %v15949_v21  ;;  %18025 = vst [vmem:[#allocation142_spill] sm:$0xff] %v14115_v63  ;;  %v6676_v13 = vpop.eup %6675  ;;  %v18030_v58 = vld [vmem:[#allocation364_spill] sm:$0xff]  ;;  %v14148_v48 = vpop.xlane.xlu1 %4195 }
 0x4ad   : > { %vm14104_vm14 = vmand %vm13947_vm15, %vm1738_vm9  ;;  %v4071_v41 = vadd.f32 %v4070_v49, %v3921_v2  ;;  %v4065_v40 = vadd.f32 %v3916_v26, %v3915_v4  ;;  %vm1744_vm8 = vcmp.ne.s32.totalorder %v17940_v8, %v17128_v28  ;;  %vm1745_vm9 = vcmp.ne.s32.totalorder %v17940_v8, %v17131_v31  ;;  %v18031_v4 = vld [vmem:[#allocation101_spill] sm:$0xff]  ;;  %v18032_v2 = vld [vmem:[#allocation95_spill] sm:$0xff]  ;;  %18036 = vst [vmem:[#allocation261_spill] sm:$0xff] %v14148_v48 }
 0x4ae   : > { %vm18026_vm15 = vcmp.eq.s32.totalorder %v7614_v57, 1  ;;  %vm18027_vm12 = vcmp.eq.f32.partialorder %v17984_v55, %v7578_v42  ;;  %vm1750_vm3 = vcmp.ne.s32.totalorder %v18030_v58, %v16483_v18  ;;  %vm5179_vm0 = vcmp.gt.f32.partialorder %v14115_v63, 0.0  ;;  %vm14139_vm1 = vmand %vm14077_vm11, %vm1744_vm8 }
 0x4af   : > { %vm14126_vm6 = vmand %vm18027_vm12, %vm18026_vm15  ;;  %v3922_v49 = vmul.f32 %v13640_v33, %v18031_v4  ;;  %v3917_v54 = vmul.f32 %v18033_v9, %v18032_v2  ;;  %v14146_v7 = vsel %vm14089_vm10, 1.0, %v15949_v21  ;;  %vm1751_vm11 = vcmp.ne.s32.totalorder %v18030_v58, %v16485_v15  ;;  %v6678_v26 = vpop.eup %6677  ;;  %v18040_v4 = vld [vmem:[#allocation8_spill] sm:$0xff]  ;;  %v14192_v5 = vpop.xlane.xlu0 %4997 }
 0x4b0   : > { %vm14155_vm15 = vmand %vm13982_vm13, %vm1739_vm4  ;;  %v5211_v43 = vsel %vm5179_vm0, %v14115_v63, 1.0  ;;  %v4770_v16 = vmul.f32 0.6931472, %v6676_v13  ;;  %v5080_v22 = vadd.f32 %v5079_v11, %v4933_v20  ;;  %vm1740_vm10 = vcmp.ne.s32.totalorder %v17956_v24, %v17128_v28  ;;  %4058 = vadd.xlane.f32.xlu1 %v14003_v19  ;;  %18045 = vst [vmem:[#allocation216_spill] sm:$0xff] %v14192_v5  ;;  %v18066_v63 = vld [vmem:[#allocation144_spill] sm:$0xff] }
 0x4b1   : > { %v14165_v53 = vsel %vm5459_vm5, %v5428_v38, 0.0  ;;  %v3918_v2 = vmul.f32 %v18040_v4, %v18039_v47  ;;  %v4066_v48 = vadd.f32 %v4065_v40, %v3917_v54  ;;  %vm2022_vm4 = vmand %vm14126_vm6, %vm1745_vm9  ;;  %v4287_v11 = vadd.f32 %v14146_v7, %v14113_v50  ;;  %v18063_v47 = vld [vmem:[#allocation11_spill] sm:$0xff]  ;;  %v18096_v19 = vld [vmem:[#allocation108_spill] sm:$0xff] }
 0x4b2   : > { %vm18041_vm13 = vcmp.eq.s32.totalorder %v6976_v1, 1  ;;  %vm18042_vm0 = vcmp.eq.f32.partialorder %v18001_v3, %v6973_v0  ;;  %v4938_v38 = vmul.f32 %v13346_v6, %v4770_v16  ;;  %v4762_v20 = vmul.f32 0.6931472, %v6678_v26  ;;  %vm14200_vm9 = vmand %vm14011_vm7, %vm1740_vm10 }
 0x4b3   : > { %vm14182_vm8 = vmand %vm18042_vm0, %vm18041_vm13  ;;  %v4072_v40 = vadd.f32 %v4071_v41, %v3922_v49  ;;  %v14190_v8 = vsel %vm14139_vm1, 1.0, %v15949_v21  ;;  %6679 = vrcp.f32 %v5211_v43  ;;  %v14207_v6 = vsel %vm14104_vm14, 1.0, %v15949_v21  ;;  %v14214_v49 = vpop.xlane.xlu1 %5002 }
 0x4b4   : > { %v4288_v13 = vadd.f32 %v14190_v8, %v4287_v11  ;;  %v14212_v41 = vsel %vm14155_vm15, 1.0, %v15949_v21  ;;  %18048 = vst [vmem:[#allocation25_spill] sm:$0xff] %v14214_v49  ;;  %v5086_v55 = vadd.f32 %v5085_v32, %v4938_v38  ;;  %v14217_v43 = vsel %vm2022_vm4, 1.0, %v15949_v21  ;;  %4275 = vadd.xlane.f32.xlu1 %v14063_v27  ;;  %v18064_v11 = vld [vmem:[#allocation178_spill] sm:$0xff] }
 0x4b5   : > { %vm1741_vm7 = vcmp.ne.s32.totalorder %v17956_v24, %v17131_v31  ;;  %vm18049_vm1 = vcmp.eq.s32.totalorder %v7614_v57, 1  ;;  %vm18050_vm14 = vcmp.eq.f32.partialorder %v17965_v52, %v7578_v42  ;;  %v4282_v39 = vadd.f32 %v14212_v41, %v14207_v6  ;;  %v18117_v24 = vld [vmem:[#allocation27_spill] sm:$0xff] }
 0x4b6   : > { %vm14226_vm12 = vmand %vm18050_vm14, %vm18049_vm1  ;;  %vm18053_vm6 = vcmp.eq.s32.totalorder %v7583_v61, 1  ;;  %vm18054_vm15 = vcmp.eq.f32.partialorder %v18001_v3, %v7560_v34  ;;  %vm18057_vm4 = vcmp.ne.s32.totalorder %v17999_v37, %v16483_v18  ;;  %vm18060_vm0 = vcmp.ne.s32.totalorder %v17999_v37, %v16485_v15  ;;  %5087 = vadd.xlane.f32.xlu0 %v5086_v55 }
 0x4b7   : > { %vm14237_vm10 = vmand %vm18054_vm15, %vm18053_vm6  ;;  %v4934_v16 = vmul.f32 %v17948_v44, %v4762_v20  ;;  %v4067_v26 = vadd.f32 %v4066_v48, %v3918_v2  ;;  %v4780_v30 = vmul.f32 0.6931472, %v18063_v47  ;;  %v4782_v38 = vmul.f32 0.6931472, %v18064_v11  ;;  %v18070_v44 = vld [vmem:[#allocation41_spill] sm:$0xff]  ;;  %v18071_v2 = vld [vmem:[#allocation272_spill] sm:$0xff]  ;;  %v14280_v11 = vpop.xlane.xlu0 %3983  ;;  %v14294_v5 = vpop.xlane.xlu1 %3988 }
 0x4b8   : > { %vm14246_vm13 = vmand %vm14046_vm2, %vm18057_vm4  ;;  %vm18065_vm2 = vcmp.eq.s32.totalorder %v6965_v60, 1  ;;  %vm18067_vm14 = vcmp.eq.f32.partialorder %v18066_v63, %v6962_v59  ;;  %v14275_v27 = vsel %vm14200_vm9, 1.0, %v15949_v21  ;;  %v4784_v48 = vmul.f32 0.6931472, %v18070_v44  ;;  %v18072_v20 = vld [vmem:[#allocation166_spill] sm:$0xff]  ;;  %18073 = vst [vmem:[#allocation30_spill] sm:$0xff] %v14280_v11 }
 0x4b9   : > { %vm14255_vm1 = vmand %vm14182_vm8, %vm18060_vm0  ;;  %6681 = vlog2.f32 %v18071_v2  ;;  %v4772_v47 = vmul.f32 0.6931472, %v18072_v20  ;;  %v5081_v49 = vadd.f32 %v5080_v22, %v4934_v16  ;;  %v4943_v54 = vmul.f32 %v13580_v25, %v4780_v30  ;;  %18077 = vst [vmem:[#allocation308_spill] sm:$0xff] %v14294_v5  ;;  %v18083_v25 = vld [vmem:[#allocation362_spill] sm:$0xff] }
 0x4ba   : > { %vm14268_vm6 = vmand %vm18067_vm14, %vm18065_vm2  ;;  %v4944_v44 = vmul.f32 %v13585_v46, %v4782_v38  ;;  %v4774_v2 = vmul.f32 0.6931472, %v18076_v10  ;;  %vm18078_vm9 = vcmp.eq.s32.totalorder %v6976_v1, 1  ;;  %vm18079_vm15 = vcmp.eq.f32.partialorder %v18066_v63, %v6973_v0  ;;  %4073 = vadd.xlane.f32.xlu0 %v4072_v40 }
 0x4bb   : > { %vm14287_vm8 = vmand %vm14226_vm12, %vm1741_vm7  ;;  %v4283_v22 = vadd.f32 %v14275_v27, %v4282_v39  ;;  %v4776_v16 = vmul.f32 0.6931472, %v18082_v12  ;;  %6683 = vlog2.f32 %v18083_v25  ;;  %v4939_v46 = vmul.f32 %v18019_v35, %v4772_v47  ;;  %5082 = vadd.xlane.f32.xlu1 %v5081_v49  ;;  %v18088_v39 = vld [vmem:[#allocation105_spill] sm:$0xff]  ;;  %v18089_v12 = vld [vmem:[#allocation106_spill] sm:$0xff] }
 0x4bc   : > { %vm14301_vm4 = vmand %vm18079_vm15, %vm18078_vm9  ;;  %vm18084_vm7 = vcmp.eq.s32.totalorder %v7583_v61, 1  ;;  %vm18085_vm12 = vcmp.eq.f32.partialorder %v18066_v63, %v7560_v34  ;;  %v5094_v30 = vadd.f32 %v4944_v44, %v4943_v54  ;;  %v4940_v38 = vmul.f32 %v18021_v56, %v4774_v2  ;;  %v18092_v54 = vld [vmem:[#allocation102_spill] sm:$0xff]  ;;  %v14341_v2 = vpop.xlane.xlu0 %4200  ;;  %v18110_v35 = vld [vmem:[#allocation381_spill] sm:$0xff] }
 0x4bd   : > { %vm14314_vm0 = vmand %vm18085_vm12, %vm18084_vm7  ;;  %v3927_v20 = vmul.f32 %v13920_v62, %v18088_v39  ;;  %v3928_v25 = vmul.f32 %v13925_v29, %v18089_v12  ;;  %v4289_v49 = vadd.f32 %v14217_v43, %v4288_v13  ;;  %v14336_v56 = vsel %vm14287_vm8, 1.0, %v15949_v21  ;;  %18093 = vst [vmem:[#allocation280_spill] sm:$0xff] %v14341_v2  ;;  %v14356_v12 = vpop.xlane.xlu1 %4205 }
 0x4be   : > { %vm14328_vm2 = vmand %vm14268_vm6, %vm1750_vm3  ;;  %v4945_v47 = vmul.f32 %v13622_v23, %v4784_v48  ;;  %v3923_v44 = vmul.f32 %v13502_v17, %v18092_v54  ;;  %v5089_v13 = vadd.f32 %v4940_v38, %v4939_v46  ;;  %v3929_v55 = vmul.f32 %v13954_v36, %v18096_v19  ;;  %v18097_v23 = vld [vmem:[#allocation104_spill] sm:$0xff]  ;;  %18098 = vst [vmem:[#allocation402_spill] sm:$0xff] %v14356_v12  ;;  %v14373_v46 = vpop.eup %6679  ;;  %v18106_v19 = vld [vmem:[#allocation19_spill] sm:$0xff] }
 0x4bf   : > { %vm14348_vm3 = vmand %vm14301_vm4, %vm1751_vm11  ;;  %v4080_v39 = vadd.f32 %v3928_v25, %v3927_v20  ;;  %v3924_v48 = vmul.f32 %v13507_v51, %v18097_v23  ;;  %v4284_v54 = vadd.f32 %v14336_v56, %v4283_v22  ;;  %v4941_v5 = vmul.f32 %v18033_v9, %v4776_v16  ;;  %18103 = vst [vmem:[#allocation183_spill] sm:$0xff] %v14373_v46  ;;  %v18104_v22 = vld [vmem:[#allocation109_spill] sm:$0xff]  ;;  %v18105_v25 = vld [vmem:[#allocation103_spill] sm:$0xff] }
 0x4c0   : > { %vm1752_vm11 = vcmp.ne.s32.totalorder %v18030_v58, %v17128_v28  ;;  %vm1753_vm14 = vcmp.ne.s32.totalorder %v18030_v58, %v17131_v31  ;;  %vm18099_vm6 = vcmp.eq.s32.totalorder %v7614_v57, 1  ;;  %vm18100_vm8 = vcmp.eq.f32.partialorder %v18066_v63, %v7578_v42  ;;  %4068 = vadd.xlane.f32.xlu1 %v4067_v26  ;;  %4290 = vadd.xlane.f32.xlu0 %v4289_v49  ;;  %v14393_v10 = vpop.xlane.xlu0 %5007  ;;  %v18128_v58 = vld [vmem:[#allocation187_spill] sm:$0xff] }
 0x4c1   : > { %vm14369_vm9 = vmand %vm18100_vm8, %vm18099_vm6  ;;  %v3930_v9 = vmul.f32 %v14018_v14, %v18104_v22  ;;  %v4081_v16 = vadd.f32 %v4080_v39, %v3929_v55  ;;  %v4075_v38 = vadd.f32 %v3924_v48, %v3923_v44  ;;  %v14382_v20 = vsel %vm14328_vm2, 1.0, %v15949_v21  ;;  %18108 = vst [vmem:[#allocation182_spill] sm:$0xff] %v14393_v10  ;;  %v18109_v55 = vld [vmem:[#allocation107_spill] sm:$0xff]  ;;  %v14411_v40 = vpop.xlane.xlu1 %5012 }
 0x4c2   : > { %vm2029_vm15 = vmand %vm14314_vm0, %vm1752_vm11  ;;  %v5095_v63 = vadd.f32 %v5094_v30, %v4945_v47  ;;  %v3925_v23 = vmul.f32 %v18106_v19, %v18105_v25  ;;  %v14389_v26 = vsel %vm14348_vm3, 1.0, %v15949_v21  ;;  %vm1748_vm4 = vcmp.ne.s32.totalorder %v17999_v37, %v17128_v28  ;;  %18114 = vst [vmem:[#allocation372_spill] sm:$0xff] %v14411_v40  ;;  %v18120_v40 = vld [vmem:[#allocation349_spill] sm:$0xff]  ;;  %v18130_v10 = vld [vmem:[#allocation271_spill] sm:$0xff] }
 0x4c3   : > { %18107 = vst [vmem:[#allocation184_spill] sm:$0xff] %v14389_v26  ;;  %v5090_v44 = vadd.f32 %v5089_v13, %v4941_v5  ;;  %v3926_v39 = vmul.f32 %v18110_v35, %v18109_v55  ;;  %vm14402_vm7 = vmand %vm14369_vm9, %vm1753_vm14  ;;  %v14407_v49 = vsel %vm2029_vm15, 1.0, %v15949_v21  ;;  %v4297_v47 = vadd.f32 %v14389_v26, %v14382_v20  ;;  %v6682_v5 = vpop.eup %6681  ;;  %v18131_v26 = vld [vmem:[#allocation9_spill] sm:$0xff] }
 0x4c4   : > { %18113 = vst [vmem:[#allocation10_spill] sm:$0xff] %v14407_v49  ;;  %vm1749_vm12 = vcmp.ne.s32.totalorder %v17999_v37, %v17131_v31  ;;  %vm14417_vm0 = vmand %vm14237_vm10, %vm1748_vm4  ;;  %v14424_v13 = vsel %vm14246_vm13, 1.0, %v15949_v21  ;;  %v14429_v48 = vsel %vm14255_vm1, 1.0, %v15949_v21  ;;  %v4796_v22 = vmul.f32 0.6931472, %v18117_v24  ;;  %4285 = vadd.xlane.f32.xlu1 %v4284_v54 }
 0x4c5   : > { %v4786_v25 = vmul.f32 0.6931472, %v6682_v5  ;;  %v4082_v55 = vadd.f32 %v4081_v16, %v3930_v9  ;;  %v4076_v32 = vadd.f32 %v4075_v38, %v3925_v23  ;;  %v4298_v46 = vadd.f32 %v14407_v49, %v4297_v47  ;;  %vm18118_vm10 = vmmov %vm18099_vm6  ;;  %v6684_v52 = vpop.eup %6683  ;;  %v18121_v9 = vld [vmem:[#allocation237_spill] sm:$0xff]  ;;  %v18122_v38 = vld [vmem:[#allocation243_spill] sm:$0xff]  ;;  %v14449_v23 = vpop.xlane.xlu0 %3993 }
 0x4c6   : > { %vm18119_vm2 = vcmp.eq.f32.partialorder %v18001_v3, %v7578_v42  ;;  %vm1754_vm3 = vcmp.ne.s32.totalorder %v18120_v40, %v16483_v18  ;;  %v14443_v45 = vsel %vm14402_vm7, 1.0, %v15949_v21  ;;  %v4292_v54 = vadd.f32 %v14429_v48, %v14424_v13  ;;  %18123 = vst [vmem:[#allocation373_spill] sm:$0xff] %v14449_v23  ;;  %v14460_v24 = vpop.xlane.xlu1 %3998  ;;  %v18184_v18 = vld [vmem:[#allocation122_spill] sm:$0xff] }
 0x4c7   : > { %vm1898_vm13 = vmand %vm18119_vm2, %vm18118_vm10  ;;  %v4798_v16 = vmul.f32 0.6931472, %v18121_v9  ;;  %6685 = vlog2.f32 %v18122_v38  ;;  %vm1755_vm1 = vcmp.ne.s32.totalorder %v18120_v40, %v16485_v15  ;;  %v4946_v3 = vmul.f32 %v13640_v33, %v4786_v25  ;;  %18124 = vst [vmem:[#allocation174_spill] sm:$0xff] %v14460_v24  ;;  %v18127_v33 = vld [vmem:[#allocation337_spill] sm:$0xff] }
 0x4c8   : > { %v4778_v47 = vmul.f32 0.6931472, %v6684_v52  ;;  %v14457_v30 = vsel %vm14417_vm0, 1.0, %v15949_v21  ;;  %v4951_v5 = vmul.f32 %v13920_v62, %v4796_v22  ;;  %vm14465_vm11 = vmand %vm1898_vm13, %vm1749_vm12  ;;  %v4800_v25 = vmul.f32 0.6931472, %v18127_v33  ;;  %v18129_v22 = vld [vmem:[#allocation213_spill] sm:$0xff] }
 0x4c9   : > { %v4293_v38 = vadd.f32 %v14457_v30, %v4292_v54  ;;  %v4952_v52 = vmul.f32 %v13925_v29, %v4798_v16  ;;  %v4788_v12 = vmul.f32 0.6931472, %v18128_v58  ;;  %v5096_v23 = vadd.f32 %v5095_v63, %v4946_v3  ;;  %v14478_v54 = vpop.xlane.xlu0 %4210  ;;  %v18132_v63 = vld [vmem:[#allocation392_spill] sm:$0xff]  ;;  %v18133_v16 = vld [vmem:[#allocation286_spill] sm:$0xff] }
 0x4ca   : > { %v4942_v62 = vmul.f32 %v18040_v4, %v4778_v47  ;;  %v4790_v24 = vmul.f32 0.6931472, %v18129_v22  ;;  %v4792_v2 = vmul.f32 0.6931472, %v18130_v10  ;;  %v4077_v37 = vadd.f32 %v4076_v32, %v3926_v39  ;;  %v18134_v10 = vld [vmem:[#allocation284_spill] sm:$0xff]  ;;  %v14490_v3 = vpop.xlane.xlu1 %4215 }
 0x4cb   : > { %v5104_v49 = vadd.f32 %v4952_v52, %v4951_v5  ;;  %6687 = vlog2.f32 %v18131_v26  ;;  %v4947_v11 = vmul.f32 %v13502_v17, %v4788_v12  ;;  %5097 = vadd.xlane.f32.xlu0 %v5096_v23  ;;  %v14483_v29 = vsel %vm14465_vm11, 1.0, %v15949_v21  ;;  %v18136_v26 = vld [vmem:[#allocation113_spill] sm:$0xff]  ;;  %v18137_v23 = vld [vmem:[#allocation114_spill] sm:$0xff]  ;;  %v18140_v58 = vld [vmem:[#allocation36_spill] sm:$0xff] }
 0x4cc   : > { %v5091_v33 = vadd.f32 %v5090_v44, %v4942_v62  ;;  %v4948_v4 = vmul.f32 %v13507_v51, %v4790_v24  ;;  %v18135_v39 = vsub.f32 %v18133_v16, %v18134_v10  ;;  %v4299_v17 = vadd.f32 %v14443_v45, %v4298_v46  ;;  %v18138_v24 = vld [vmem:[#allocation32_spill] sm:$0xff]  ;;  %v18139_v52 = vld [vmem:[#allocation110_spill] sm:$0xff]  ;;  %v18142_v46 = vld [vmem:[#allocation387_spill] sm:$0xff] }
 0x4cd   : > { %v4953_v12 = vmul.f32 %v13954_v36, %v4800_v25  ;;  %v3935_v44 = vmul.f32 %v14207_v6, %v18136_v26  ;;  %v3936_v47 = vmul.f32 %v14212_v41, %v18137_v23  ;;  %v4294_v51 = vadd.f32 %v14483_v29, %v4293_v38  ;;  %v18146_v22 = vld [vmem:[#allocation116_spill] sm:$0xff]  ;;  %v14516_v16 = vpop.xlane.xlu0 %5017  ;;  %v18154_v10 = vld [vmem:[#allocation118_spill] sm:$0xff] }
 0x4ce   : > { %v5299_v32 = vsub.f32 %v18135_v39, %v18132_v63  ;;  %5092 = vadd.xlane.f32.xlu1 %v5091_v33  ;;  %v4949_v5 = vmul.f32 %v18106_v19, %v4792_v2  ;;  %v3931_v62 = vmul.f32 %v18140_v58, %v18139_v52  ;;  %vm18141_vm14 = vcmp.eq.s32.totalorder %v6965_v60, 1  ;;  %v18147_v2 = vld [vmem:[#allocation112_spill] sm:$0xff]  ;;  %v18162_v23 = vld [vmem:[#allocation202_spill] sm:$0xff]  ;;  %v18164_v52 = vld [vmem:[#allocation111_spill] sm:$0xff] }
 0x4cf   : > { %vm18143_vm6 = vcmp.eq.f32.partialorder %v18142_v46, %v6962_v59  ;;  %v5099_v25 = vadd.f32 %v4948_v4, %v4947_v11  ;;  %v3937_v38 = vmul.f32 %v14275_v27, %v18146_v22  ;;  %v4090_v33 = vadd.f32 %v3936_v47, %v3935_v44  ;;  %v18148_v19 = vld [vmem:[#allocation388_spill] sm:$0xff]  ;;  %4083 = vadd.xlane.f32.xlu0 %v4082_v55  ;;  %v18153_v4 = vld [vmem:[#allocation395_spill] sm:$0xff]  ;;  %v14542_v44 = vpop.xlane.xlu1 %5022 }
 0x4d0   : > { %v5332_v9 = vmul.f32 %v18138_v24, %v5299_v32  ;;  %vm14508_vm8 = vmand %vm18143_vm6, %vm18141_vm14  ;;  %v3932_v63 = vmul.f32 %v18148_v19, %v18147_v2  ;;  %vm18149_vm9 = vcmp.eq.s32.totalorder %v6976_v1, 1  ;;  %vm18150_vm15 = vcmp.eq.f32.partialorder %v18142_v46, %v6973_v0  ;;  %v18159_v55 = vld [vmem:[#allocation120_spill] sm:$0xff]  ;;  %v18163_v24 = vld [vmem:[#allocation117_spill] sm:$0xff] }
 0x4d1   : > { %vm14523_vm4 = vmand %vm18150_vm15, %vm18149_vm9  ;;  %v5105_v60 = vadd.f32 %v5104_v49, %v4953_v12  ;;  %vm5178_vm7 = vcmp.gt.f32.partialorder %v18153_v4, 0.0  ;;  %v3939_v39 = vmul.f32 %v14113_v50, %v18154_v10  ;;  %v6686_v32 = vpop.eup %6685  ;;  %vm18155_vm12 = vcmp.eq.s32.totalorder %v7583_v61, 1  ;;  %v18170_v2 = vld [vmem:[#allocation119_spill] sm:$0xff]  ;;  %v14571_v10 = vpop.xlane.xlu0 %4003  ;;  %v18175_v0 = vld [vmem:[#allocation216_spill] sm:$0xff] }
 0x4d2   : > { %v5395_v11 = vmul.f32 -0.07, %v5332_v9  ;;  %vm18156_vm0 = vcmp.eq.f32.partialorder %v18142_v46, %v7560_v34  ;;  %v4091_v1 = vadd.f32 %v4090_v33, %v3937_v38  ;;  %v4085_v26 = vadd.f32 %v3932_v63, %v3931_v62  ;;  %vm14549_vm2 = vmand %vm14508_vm8, %vm1754_vm3  ;;  %4078 = vadd.xlane.f32.xlu1 %v4077_v37  ;;  %v18165_v62 = vld [vmem:[#allocation389_spill] sm:$0xff]  ;;  %v18168_v37 = vld [vmem:[#allocation115_spill] sm:$0xff] }
 0x4d3   : > { %vm14535_vm10 = vmand %vm18156_vm0, %vm18155_vm12  ;;  %v5210_v49 = vsel %vm5178_vm7, %v18153_v4, 1.0  ;;  %v3940_v12 = vmul.f32 %v14146_v7, %v18159_v55  ;;  %v4802_v61 = vmul.f32 0.6931472, %v6686_v32  ;;  %v3938_v9 = vmul.f32 %v14336_v56, %v18163_v24  ;;  %v18169_v38 = vld [vmem:[#allocation134_spill] sm:$0xff]  ;;  %4300 = vadd.xlane.f32.xlu0 %v4299_v17 }
 0x4d4   : > { %v5427_v47 = vmul.f32 %v18162_v23, %v5395_v11  ;;  %v3933_v22 = vmul.f32 %v18165_v62, %v18164_v52  ;;  %vm14563_vm13 = vmand %vm14523_vm4, %vm1755_vm1  ;;  %v5100_v36 = vadd.f32 %v5099_v25, %v4949_v5  ;;  %v3934_v33 = vmul.f32 %v18169_v38, %v18168_v37  ;;  %v18180_v23 = vld [vmem:[#allocation254_spill] sm:$0xff]  ;;  %v18183_v52 = vld [vmem:[#allocation121_spill] sm:$0xff] }
 0x4d5   : > { %v3941_v63 = vmul.f32 %v14190_v8, %v18170_v2  ;;  %v4095_v11 = vadd.f32 %v3940_v12, %v3939_v39  ;;  %v4954_v32 = vmul.f32 %v14018_v14, %v4802_v61  ;;  %6689 = vrcp.f32 %v5210_v49  ;;  %v6688_v59 = vpop.eup %6687  ;;  %v14612_v61 = vpop.xlane.xlu0 %4220  ;;  %v18185_v2 = vld [vmem:[#allocation123_spill] sm:$0xff] }
 0x4d6   : > { %v5460_v15 = vsel %vm5459_vm5, %v5427_v47, 0.0  ;;  %vm1756_vm3 = vcmp.ne.s32.totalorder %v18120_v40, %v17128_v28  ;;  %v4092_v25 = vadd.f32 %v4091_v1, %v3938_v9  ;;  %v14585_v17 = vsel %vm14549_vm2, 1.0, %v15949_v21  ;;  %4295 = vadd.xlane.f32.xlu1 %v4294_v51  ;;  %v18176_v1 = vld [vmem:[#allocation275_spill] sm:$0xff]  ;;  %v18181_v47 = vld [vmem:[#allocation276_spill] sm:$0xff] }
 0x4d7   : > { %v14578_v5 = vadd.f32 %v14165_v53, %v5460_v15  ;;  %v4096_v55 = vadd.f32 %v4095_v11, %v3941_v63  ;;  %vm2033_vm1 = vmand %vm14535_vm10, %vm1756_vm3  ;;  %v5106_v14 = vadd.f32 %v5105_v60, %v4954_v32  ;;  %v4794_v39 = vmul.f32 0.6931472, %v6688_v59  ;;  %v18186_v32 = vld [vmem:[#allocation35_spill] sm:$0xff]  ;;  %v18187_v59 = vld [vmem:[#allocation124_spill] sm:$0xff] }
 0x4d8   : > { %v4086_v49 = vadd.f32 %v4085_v26, %v3933_v22  ;;  %v14590_v28 = vsel %vm14563_vm13, 1.0, %v15949_v21  ;;  %vm1757_vm11 = vcmp.ne.s32.totalorder %v18120_v40, %v17131_v31  ;;  %vm18171_vm14 = vcmp.eq.s32.totalorder %v7614_v57, 1  ;;  %v18177_v26 = vld [vmem:[#allocation255_spill] sm:$0xff]  ;;  %v14614_v57 = vpop.xlane.xlu1 %4008  ;;  %v18194_v53 = vld [vmem:[#allocation273_spill] sm:$0xff] }
 0x4d9   : > { %vm18172_vm6 = vcmp.eq.f32.partialorder %v18142_v46, %v7578_v42  ;;  %v14604_v51 = vsel %vm2033_vm1, 1.0, %v15949_v21  ;;  %v4302_v60 = vadd.f32 %v14590_v28, %v14585_v17  ;;  %v18178_v12 = vsub.f32 %v18176_v1, %v18177_v26  ;;  %5107 = vadd.xlane.f32.xlu0 %v5106_v14  ;;  %v18179_v46 = vld [vmem:[#allocation380_spill] sm:$0xff] }
 0x4da   : > { %vm14599_vm8 = vmand %vm18172_vm6, %vm18171_vm14  ;;  %v4950_v42 = vmul.f32 %v18110_v35, %v4794_v39  ;;  %v18182_v24 = vsub.f32 %v18180_v23, %v18181_v47  ;;  %v3943_v22 = vmul.f32 %v14424_v13, %v18183_v52  ;;  %v3944_v37 = vmul.f32 %v14429_v48, %v18184_v18  ;;  %v18192_v23 = vld [vmem:[#allocation223_spill] sm:$0xff]  ;;  %v18196_v18 = vld [vmem:[#allocation20_spill] sm:$0xff] }
 0x4db   : > { %v5302_v34 = vsub.f32 %v18178_v12, %v18175_v0  ;;  %v3942_v63 = vmul.f32 %v14217_v43, %v18185_v2  ;;  %v4303_v11 = vadd.f32 %v14604_v51, %v4302_v60  ;;  %v3945_v35 = vmul.f32 %v14457_v30, %v18187_v59  ;;  %vm14636_vm9 = vmand %vm14599_vm8, %vm1757_vm11  ;;  %v18190_v0 = vld [vmem:[#allocation21_spill] sm:$0xff]  ;;  %v18191_v12 = vld [vmem:[#allocation274_spill] sm:$0xff] }
 0x4dc   : > { %v5301_v9 = vsub.f32 %v18182_v24, %v18179_v46  ;;  %v5101_v14 = vadd.f32 %v5100_v36, %v4950_v42  ;;  %v4100_v26 = vadd.f32 %v3944_v37, %v3943_v22  ;;  %v4804_v60 = vmul.f32 0.6931472, %v18191_v12  ;;  %v18193_v24 = vld [vmem:[#allocation365_spill] sm:$0xff]  ;;  %v14644_v42 = vpop.xlane.xlu0 %5027  ;;  %v18195_v22 = vld [vmem:[#allocation207_spill] sm:$0xff]  ;;  %v14656_v2 = vpop.xlane.xlu1 %4225  ;;  %v18203_v12 = vld [vmem:[#allocation184_spill] sm:$0xff] }
 0x4dd   : > { %v5338_v15 = vmul.f32 %v18186_v32, %v5302_v34  ;;  %v4087_v46 = vadd.f32 %v4086_v49, %v3934_v33  ;;  %v4806_v47 = vmul.f32 0.6931472, %v18192_v23  ;;  %v4808_v36 = vmul.f32 0.6931472, %v18193_v24  ;;  %4093 = vadd.xlane.f32.xlu0 %v4092_v25 }
 0x4de   : > { %v5336_v1 = vmul.f32 %v18190_v0, %v5301_v9  ;;  %5102 = vadd.xlane.f32.xlu1 %v5101_v14  ;;  %v4101_v40 = vadd.f32 %v4100_v26, %v3945_v35  ;;  %6691 = vlog2.f32 %v18194_v53  ;;  %v4955_v52 = vmul.f32 %v18140_v58, %v4804_v60  ;;  %v18198_v58 = vld [vmem:[#allocation125_spill] sm:$0xff]  ;;  %v18200_v14 = vld [vmem:[#allocation135_spill] sm:$0xff]  ;;  %v18201_v0 = vld [vmem:[#allocation30_spill] sm:$0xff] }
 0x4df   : > { %v5398_v34 = vmul.f32 -0.07, %v5338_v15  ;;  %v4097_v9 = vadd.f32 %v4096_v55, %v3942_v63  ;;  %v14651_v33 = vsel %vm14636_vm9, 1.0, %v15949_v21  ;;  %v4956_v49 = vmul.f32 %v18148_v19, %v4806_v47  ;;  %v14658_v25 = vpop.eup %6689  ;;  %v18197_v15 = vld [vmem:[#allocation194_spill] sm:$0xff]  ;;  %v18202_v26 = vld [vmem:[#allocation128_spill] sm:$0xff]  ;;  %v18205_v53 = vld [vmem:[#allocation229_spill] sm:$0xff] }
 0x4e0   : > { %v5397_v31 = vmul.f32 -0.07, %v5336_v1  ;;  %v5240_v37 = vmul.f32 %v18196_v18, %v18195_v22  ;;  %v4304_v32 = vadd.f32 %v14651_v33, %v4303_v11  ;;  %v3946_v55 = vmul.f32 %v14483_v29, %v18198_v58  ;;  %v18199_v63 = vld [vmem:[#allocation126_spill] sm:$0xff]  ;;  %v14670_v23 = vpop.xlane.xlu0 %4013 }
 0x4e1   : > { %v3947_v35 = vmul.f32 %v14382_v20, %v18199_v63  ;;  %v5430_v39 = vmul.f32 %v18200_v14, %v5398_v34  ;;  %v5109_v19 = vadd.f32 %v4956_v49, %v4955_v52  ;;  %v3948_v60 = vmul.f32 %v18203_v12, %v18202_v26  ;;  %4098 = vadd.xlane.f32.xlu0 %v4097_v9  ;;  %v18206_v52 = vld [vmem:[#allocation127_spill] sm:$0xff]  ;;  %v18207_v49 = vld [vmem:[#allocation10_spill] sm:$0xff]  ;;  %v18209_v63 = vld [vmem:[#allocation353_spill] sm:$0xff] }
 0x4e2   : > { %v5429_v59 = vmul.f32 %v18197_v15, %v5397_v31  ;;  %v5272_v1 = vsub.f32 %v18201_v0, %v5240_v37  ;;  %4088 = vadd.xlane.f32.xlu1 %v4087_v46  ;;  %v4102_v47 = vadd.f32 %v4101_v40, %v3946_v55  ;;  %v4957_v24 = vmul.f32 %v18165_v62, %v4808_v36  ;;  %v18204_v31 = vld [vmem:[#allocation139_spill] sm:$0xff]  ;;  %v18208_v15 = vld [vmem:[#allocation28_spill] sm:$0xff]  ;;  %v18210_v46 = vld [vmem:[#allocation393_spill] sm:$0xff] }
 0x4e3   : > { %v5239_v22 = vmul.f32 %v18205_v53, %v18204_v31  ;;  %v3949_v18 = vmul.f32 %v18207_v49, %v18206_v52  ;;  %v4105_v37 = vadd.f32 %v3948_v60, %v3947_v35  ;;  %v4812_v58 = vmul.f32 0.6931472, %v18208_v15  ;;  %v18211_v0 = vld [vmem:[#allocation376_spill] sm:$0xff]  ;;  %v18213_v36 = vld [vmem:[#allocation277_spill] sm:$0xff]  ;;  %v14689_v35 = vpop.xlane.xlu1 %5032  ;;  %v18229_v21 = vld [vmem:[#allocation38_spill] sm:$0xff] }
 0x4e4   : > { %v5463_v11 = vsel %vm5459_vm5, %v5429_v59, 0.0  ;;  %v4814_v14 = vmul.f32 0.6931472, %v18209_v63  ;;  %v4816_v9 = vmul.f32 0.6931472, %v18210_v46  ;;  %6693 = vlog2.f32 %v18211_v0  ;;  %v18212_v40 = vld [vmem:[#allocation280_spill] sm:$0xff]  ;;  %v14687_v26 = vpop.xlane.xlu0 %4230 }
 0x4e5   : > { %v5464_v34 = vadd.f32 %v5463_v11, %v14578_v5  ;;  %vm5181_vm15 = vcmp.gt.f32.partialorder %v18212_v40, 0.0  ;;  %v5465_v62 = vsel %vm5459_vm5, %v5430_v39, 0.0  ;;  %v5271_v59 = vsub.f32 %v18213_v36, %v5239_v22  ;;  %18214 = vst [vmem:[#allocation250_spill] sm:$0xff] %v14687_v26  ;;  %18215 = vst [vmem:[#allocation44_spill] sm:$0xff] %v14689_v35  ;;  %4103 = vadd.xlane.f32.xlu0 %v4102_v47  ;;  %v18216_v11 = vld [vmem:[#allocation131_spill] sm:$0xff]  ;;  %v18217_v22 = vld [vmem:[#allocation261_spill] sm:$0xff] }
 0x4e6   : > { %v4106_v55 = vadd.f32 %v4105_v37, %v3949_v18  ;;  %v4959_v5 = vmul.f32 %v14207_v6, %v4812_v58  ;;  %4305 = vadd.xlane.f32.xlu1 %v4304_v32  ;;  %v5110_v60 = vadd.f32 %v5109_v19, %v4957_v24  ;;  %v3950_v31 = vmul.f32 %v14443_v45, %v18216_v11  ;;  %v18218_v6 = vld [vmem:[#allocation129_spill] sm:$0xff]  ;;  %v18219_v37 = vld [vmem:[#allocation130_spill] sm:$0xff]  ;;  %v18220_v15 = vld [vmem:[#allocation132_spill] sm:$0xff] }
 0x4e7   : > { %v4960_v53 = vmul.f32 %v14212_v41, %v4814_v14  ;;  %v14695_v52 = vsel %vm5181_vm15, %v18212_v40, 1.0  ;;  %v4961_v39 = vmul.f32 %v14275_v27, %v4816_v9  ;;  %vm5180_vm4 = vcmp.gt.f32.partialorder %v18217_v22, 0.0  ;;  %v18221_v41 = vld [vmem:[#allocation369_spill] sm:$0xff]  ;;  %v18222_v0 = vld [vmem:[#allocation23_spill] sm:$0xff]  ;;  %v18223_v9 = vld [vmem:[#allocation222_spill] sm:$0xff] }
 0x4e8   : > { %v3951_v18 = vmul.f32 %v14585_v17, %v18218_v6  ;;  %v3952_v32 = vmul.f32 %v14590_v28, %v18219_v37  ;;  %v6692_v47 = vpop.eup %6691  ;;  %v4107_v19 = vadd.f32 %v4106_v55, %v3950_v31  ;;  %v3953_v58 = vmul.f32 %v14604_v51, %v18220_v15  ;;  %v14708_v11 = vpop.xlane.xlu0 %5037  ;;  %v18224_v6 = vld [vmem:[#allocation133_spill] sm:$0xff]  ;;  %v18225_v26 = vld [vmem:[#allocation136_spill] sm:$0xff] }
 0x4e9   : > { %v5114_v24 = vadd.f32 %v4960_v53, %v4959_v5  ;;  %v4820_v63 = vmul.f32 0.6931472, %v18221_v41  ;;  %v4810_v14 = vmul.f32 0.6931472, %v6692_v47  ;;  %v4822_v27 = vmul.f32 0.6931472, %v18222_v0  ;;  %v14718_v15 = vpop.xlane.xlu1 %4018 }
 0x4ea   : > { %v4110_v46 = vadd.f32 %v3952_v32, %v3951_v18  ;;  %v4824_v36 = vmul.f32 0.6931472, %v18223_v9  ;;  %4108 = vadd.xlane.f32.xlu0 %v4107_v19  ;;  %v3954_v37 = vmul.f32 %v14651_v33, %v18224_v6  ;;  %6695 = vlog2.f32 %v18225_v26  ;;  %v18226_v5 = vld [vmem:[#allocation182_spill] sm:$0xff]  ;;  %v18227_v41 = vld [vmem:[#allocation359_spill] sm:$0xff]  ;;  %v18228_v9 = vld [vmem:[#allocation25_spill] sm:$0xff] }
 0x4eb   : > { %v4963_v55 = vmul.f32 %v14113_v50, %v4820_v63  ;;  %v5304_v31 = vsub.f32 %v5272_v1, %v18226_v5  ;;  %v4958_v53 = vmul.f32 %v18169_v38, %v4810_v14  ;;  %v4964_v18 = vmul.f32 %v14146_v7, %v4822_v27  ;;  %v18230_v1 = vld [vmem:[#allocation31_spill] sm:$0xff]  ;;  %v18231_v14 = vld [vmem:[#allocation137_spill] sm:$0xff] }
 0x4ec   : > { %v4111_v47 = vadd.f32 %v4110_v46, %v3953_v58  ;;  %v4965_v32 = vmul.f32 %v14190_v8, %v4824_v36  ;;  %v5466_v0 = vadd.f32 %v5465_v62, %v5464_v34  ;;  %v5303_v6 = vsub.f32 %v5271_v59, %v18228_v9  ;;  %v14724_v38 = vpop.xlane.xlu0 %4023  ;;  %v18232_v46 = vld [vmem:[#allocation201_spill] sm:$0xff] }
 0x4ed   : > { %v5342_v19 = vmul.f32 %v18227_v41, %v5304_v31  ;;  %v4844_v26 = vmul.f32 0.6931472, %v18229_v21  ;;  %v5111_v35 = vadd.f32 %v5110_v60, %v4958_v53  ;;  %v5119_v63 = vadd.f32 %v4964_v18, %v4963_v55  ;;  %v18233_v36 = vld [vmem:[#allocation37_spill] sm:$0xff] }
 0x4ee   : > { %v4112_v50 = vadd.f32 %v4111_v47, %v3954_v37  ;;  %v4846_v5 = vmul.f32 0.6931472, %v18230_v1  ;;  %v6694_v58 = vpop.eup %6693  ;;  %v5115_v7 = vadd.f32 %v5114_v24, %v4961_v39  ;;  %v5340_v8 = vmul.f32 %v18231_v14, %v5303_v6  ;;  %v18234_v47 = vld [vmem:[#allocation287_spill] sm:$0xff]  ;;  %v18235_v18 = vld [vmem:[#allocation29_spill] sm:$0xff] }
 0x4ef   : > { %v4848_v27 = vmul.f32 0.6931472, %v18232_v46  ;;  %v4850_v31 = vmul.f32 0.6931472, %v18233_v36  ;;  %5112 = vadd.xlane.f32.xlu1 %v5111_v35  ;;  %v4818_v34 = vmul.f32 0.6931472, %v6694_v58  ;;  %v5120_v62 = vadd.f32 %v5119_v63, %v4965_v32 }
 0x4f0   : > { %4113 = vadd.xlane.f32.xlu0 %v4112_v50  ;;  %v4975_v21 = vmul.f32 %v14585_v17, %v4844_v26  ;;  %v4976_v59 = vmul.f32 %v14590_v28, %v4846_v5  ;;  %v5212_v60 = vsel %vm5180_vm4, %v18217_v22, 1.0  ;;  %v5400_v37 = vmul.f32 -0.07, %v5342_v19  ;;  %v14738_v32 = vpop.xlane.xlu0 %4240  ;;  %v14740_v17 = vpop.xlane.xlu1 %4235  ;;  %v18236_v28 = vld [vmem:[#allocation197_spill] sm:$0xff]  ;;  %v18237_v26 = vld [vmem:[#allocation240_spill] sm:$0xff]  ;;  %v18238_v50 = vld [vmem:[#allocation226_spill] sm:$0xff] }
 0x4f1   : > { %v5399_v39 = vmul.f32 -0.07, %v5340_v8  ;;  %v4977_v24 = vmul.f32 %v14604_v51, %v4848_v27  ;;  %v4962_v55 = vmul.f32 %v14336_v56, %v4818_v34  ;;  %v4828_v35 = vmul.f32 0.6931472, %v18234_v47  ;;  %v18239_v58 = vld [vmem:[#allocation205_spill] sm:$0xff]  ;;  %v18246_v47 = vld [vmem:[#allocation351_spill] sm:$0xff] }
 0x4f2   : > { %v5134_v53 = vadd.f32 %v4976_v59, %v4975_v21  ;;  %v4830_v41 = vmul.f32 0.6931472, %v18235_v18  ;;  %v4978_v6 = vmul.f32 %v14651_v33, %v4850_v31  ;;  %v4832_v19 = vmul.f32 0.6931472, %v18237_v26  ;;  %v18241_v21 = vld [vmem:[#allocation168_spill] sm:$0xff]  ;;  %v18247_v18 = vld [vmem:[#allocation373_spill] sm:$0xff] }
 0x4f3   : > { %v5431_v9 = vmul.f32 %v18236_v28, %v5399_v39  ;;  %6697 = vlog2.f32 %v18238_v50  ;;  %v5116_v51 = vadd.f32 %v5115_v7, %v4962_v55  ;;  %v4967_v56 = vmul.f32 %v14424_v13, %v4828_v35  ;;  %v18240_v7 = vld [vmem:[#allocation2_spill] sm:$0xff]  ;;  %v18249_v26 = vld [vmem:[#allocation308_spill] sm:$0xff] }
 0x4f4   : > { %v5135_v63 = vadd.f32 %v5134_v53, %v4977_v24  ;;  %v4968_v1 = vmul.f32 %v14429_v48, %v4830_v41  ;;  %v6696_v5 = vpop.eup %6695  ;;  %6699 = vrcp.f32 %v5212_v60  ;;  %v5432_v14 = vmul.f32 %v18239_v58, %v5400_v37  ;;  %v14751_v34 = vpop.xlane.xlu0 %5047  ;;  %v18242_v48 = vld [vmem:[#allocation181_spill] sm:$0xff]  ;;  %v18243_v60 = vld [vmem:[#allocation24_spill] sm:$0xff]  ;;  %v18244_v37 = vld [vmem:[#allocation382_spill] sm:$0xff] }
 0x4f5   : > { %v5467_v8 = vsel %vm5459_vm5, %v5431_v9, 0.0  ;;  %v4969_v46 = vmul.f32 %v14457_v30, %v4832_v19  ;;  %5117 = vadd.xlane.f32.xlu1 %v5116_v51  ;;  %v4826_v33 = vmul.f32 0.6931472, %v6696_v5  ;;  %v5242_v13 = vmul.f32 %v18153_v4, %v18240_v7  ;;  %v18245_v53 = vld [vmem:[#allocation285_spill] sm:$0xff]  ;;  %v14762_v35 = vpop.xlane.xlu1 %5042  ;;  %v18248_v9 = vld [vmem:[#allocation402_spill] sm:$0xff]  ;;  %v18251_v5 = vld [vmem:[#allocation215_spill] sm:$0xff] }
 0x4f6   : > { %v5468_v27 = vadd.f32 %v5467_v8, %v5466_v0  ;;  %v5136_v36 = vadd.f32 %v5135_v63, %v4978_v6  ;;  %v5124_v31 = vadd.f32 %v4968_v1, %v4967_v56  ;;  %v5241_v59 = vmul.f32 %v18242_v48, %v18241_v21  ;;  %v6751_v8 = vld [vmem:[%s6906_s26 + $0x58] sm:$0xff] }
 0x4f7   : > { %v4836_v39 = vmul.f32 0.6931472, %v18243_v60  ;;  %v4838_v24 = vmul.f32 0.6931472, %v18244_v37  ;;  %v4966_v55 = vmul.f32 %v14217_v43, %v4826_v33  ;;  %v4840_v0 = vmul.f32 0.6931472, %v18245_v53 }
 0x4f8   : > { %5137 = vadd.xlane.f32.xlu0 %v5136_v36  ;;  %v5125_v30 = vadd.f32 %v5124_v31, %v4969_v46  ;;  %6701 = vlog2.f32 %v18246_v47  ;;  %v5274_v41 = vsub.f32 %v18247_v18, %v5242_v13  ;;  %vm5182_vm7 = vcmp.gt.f32.partialorder %v18248_v9, 0.0  ;;  %v14771_v51 = vpop.xlane.xlu0 %4033  ;;  %v18252_v33 = vld [vmem:[#allocation180_spill] sm:$0xff]  ;;  %v18257_v53 = vld [vmem:[#allocation209_spill] sm:$0xff] }
 0x4f9   : > { %v4971_v4 = vmul.f32 %v14382_v20, %v4836_v39  ;;  %v4972_v28 = vmul.f32 %v18203_v12, %v4838_v24  ;;  %v5121_v6 = vadd.f32 %v5120_v62, %v4966_v55  ;;  %v5469_v43 = vsel %vm5459_vm5, %v5432_v14, 0.0  ;;  %v18250_v12 = vld [vmem:[#allocation372_spill] sm:$0xff]  ;;  %v14787_v13 = vpop.xlane.xlu1 %4028 }
 0x4fa   : > { %v5273_v19 = vsub.f32 %v18249_v26, %v5241_v59  ;;  %v5214_v50 = vsel %vm5182_vm7, %v18248_v9, 1.0  ;;  %v4973_v63 = vmul.f32 %v18207_v49, %v4840_v0  ;;  %v5306_v1 = vsub.f32 %v5274_v41, %v14516_v16  ;;  %v18253_v16 = vld [vmem:[#allocation142_spill] sm:$0xff]  ;;  %v18256_v39 = vld [vmem:[#allocation148_spill] sm:$0xff]  ;;  %v18259_v26 = vld [vmem:[#allocation195_spill] sm:$0xff] }
 0x4fb   : > { %v5129_v56 = vadd.f32 %v4972_v28, %v4971_v4  ;;  %v5470_v20 = vadd.f32 %v5469_v43, %v5468_v27  ;;  %6703 = vrcp.f32 %v14695_v52  ;;  %5122 = vadd.xlane.f32.xlu1 %v5121_v6  ;;  %vm5183_vm12 = vcmp.gt.f32.partialorder %v14478_v54, 0.0  ;;  %v18254_v52 = vld [vmem:[#allocation278_spill] sm:$0xff] }
 0x4fc   : > { %v5305_v62 = vsub.f32 %v5273_v19, %v18250_v12  ;;  %v5244_v58 = vmul.f32 %v18217_v22, %v18251_v5  ;;  %vm296_vm0 = vcmp.gt.f32.partialorder %v6751_v8, -1.5  ;;  %6705 = vrcp.f32 %v5214_v50  ;;  %v14789_v22 = vpop.xlane.xlu0 %4250  ;;  %v18255_v59 = vld [vmem:[#allocation174_spill] sm:$0xff]  ;;  %v18260_v50 = vld [vmem:[#allocation183_spill] sm:$0xff] }
 0x4fd   : > { %v6698_v14 = vpop.eup %6697  ;;  %v5130_v46 = vadd.f32 %v5129_v56, %v4973_v63  ;;  %v5346_v49 = vmul.f32 %v14658_v25, %v5306_v1  ;;  %v5243_v27 = vmul.f32 %v18253_v16, %v18252_v33  ;;  %vm5184_vm10 = vcmp.gt.f32.partialorder %v14490_v3, 0.0  ;;  %v18258_v6 = vld [vmem:[#allocation22_spill] sm:$0xff]  ;;  %v18262_v16 = vld [vmem:[#allocation44_spill] sm:$0xff] }
 0x4fe   : > { %v4834_v36 = vmul.f32 0.6931472, %v6698_v14  ;;  %v5344_v31 = vmul.f32 %v18254_v52, %v5305_v62  ;;  %v5276_v7 = vsub.f32 %v14571_v10, %v5244_v58  ;;  %v6700_v21 = vpop.eup %6699  ;;  %v5215_v48 = vsel %vm5183_vm12, %v14478_v54, 1.0  ;;  %v18261_v14 = vld [vmem:[#allocation210_spill] sm:$0xff] }
 0x4ff   : > { %v5402_v25 = vmul.f32 -0.07, %v5346_v49  ;;  %v5275_v60 = vsub.f32 %v18255_v59, %v5243_v27  ;;  %v5246_v37 = vmul.f32 %v18248_v9, %v18256_v39  ;;  %vm5185_vm2 = vcmp.gt.f32.partialorder %v14612_v61, 0.0  ;;  %v18265_v59 = vld [vmem:[#allocation149_spill] sm:$0xff] }
 0x500   : > { %v4970_v24 = vmul.f32 %v14483_v29, %v4834_v36  ;;  %v5401_v10 = vmul.f32 -0.07, %v5344_v31  ;;  %v5308_v55 = vsub.f32 %v5276_v7, %v14644_v42  ;;  %v5216_v47 = vsel %vm5184_vm10, %v14490_v3, 1.0  ;;  %v14813_v1 = vpop.xlane.xlu0 %5057  ;;  %v18263_v31 = vld [vmem:[#allocation203_spill] sm:$0xff] }
 0x501   : > { %v5434_v0 = vmul.f32 %v18257_v53, %v5402_v25  ;;  %v5307_v18 = vsub.f32 %v5275_v60, %v14542_v44  ;;  %v5278_v41 = vsub.f32 %v14670_v23, %v5246_v37  ;;  %v5245_v29 = vmul.f32 %v18212_v40, %v18259_v26  ;;  %v6752_v37 = vld [vmem:[%s6906_s26 + $0x60] sm:$0xff] }
 0x502   : > { %v6702_v4 = vpop.eup %6701  ;;  %v5126_v28 = vadd.f32 %v5125_v30, %v4970_v24  ;;  %v5433_v43 = vmul.f32 %v18258_v6, %v5401_v10  ;;  %v5350_v9 = vmul.f32 %v6700_v21, %v5308_v55  ;;  %6707 = vrcp.f32 %v5215_v48  ;;  %v14811_v30 = vpop.xlane.xlu1 %4245 }
 0x503   : > { %v4842_v19 = vmul.f32 0.6931472, %v6702_v4  ;;  %v5217_v42 = vsel %vm5185_vm2, %v14612_v61, 1.0  ;;  %v5348_v63 = vmul.f32 %v18260_v50, %v5307_v18  ;;  %6709 = vrcp.f32 %v5216_v47 }
 0x504   : > { %5127 = vadd.xlane.f32.xlu1 %v5126_v28  ;;  %v5471_v56 = vsel %vm5459_vm5, %v5433_v43, 0.0  ;;  %v5404_v44 = vmul.f32 -0.07, %v5350_v9  ;;  %v5277_v23 = vsub.f32 %v14614_v57, %v5245_v29  ;;  %v5473_v40 = vsel %vm5459_vm5, %v5434_v0, 0.0  ;;  %v4044_v53 = vpop.xlane.xlu0 %4043 }
 0x505   : > { %v4974_v12 = vmul.f32 %v14443_v45, %v4842_v19  ;;  %v5472_v62 = vadd.f32 %v5471_v56, %v5470_v20  ;;  %v5403_v5 = vmul.f32 -0.07, %v5348_v63  ;;  %v6704_v58 = vpop.eup %6703  ;;  %vm5186_vm13 = vcmp.gt.f32.partialorder %v14656_v2, 0.0  ;;  %v18270_v63 = vld [vmem:[#allocation154_spill] sm:$0xff] }
 0x506   : > { %v5436_v49 = vmul.f32 %v18261_v14, %v5404_v44  ;;  %v5310_v33 = vsub.f32 %v5278_v41, %v14708_v11  ;;  %v5309_v57 = vsub.f32 %v5277_v23, %v18262_v16  ;;  %v6706_v27 = vpop.eup %6705  ;;  %v5218_v45 = vsel %vm5186_vm13, %v14656_v2, 1.0  ;;  %v5053_v55 = vpop.xlane.xlu1 %5052  ;;  %v6753_v41 = vld [vmem:[%s6906_s26 + $0x68] sm:$0xff]  ;;  %v6754_v16 = vld [vmem:[%s6906_s26 + $0x70] sm:$0xff] }
 0x507   : > { %v5131_v36 = vadd.f32 %v5130_v46, %v4974_v12  ;;  %v5474_v52 = vadd.f32 %v5473_v40, %v5472_v62  ;;  %v5435_v7 = vmul.f32 %v18263_v31, %v5403_v5  ;;  %v18264_v21 = vmov 0.0   ;;  %v18266_v46 = vld [vmem:[#allocation211_spill] sm:$0xff] }
 0x508   : > { %v5620_v20 = vsel %vm296_vm0, 1.0, %v18264_v21  ;;  %6711 = vrcp.f32 %v5217_v42  ;;  %v5354_v48 = vmul.f32 %v6706_v27, %v5310_v33  ;;  %v5352_v25 = vmul.f32 %v6704_v58, %v5309_v57  ;;  %v18269_v42 = vld [vmem:[#allocation150_spill] sm:$0xff]  ;;  %v14852_v58 = vpop.xlane.xlu0 %4260  ;;  %v6755_v57 = vld [vmem:[%s6906_s26 + $0x78] sm:$0xff] }
 0x509   : > { %5132 = vadd.xlane.f32.xlu1 %v5131_v36  ;;  %v5475_v11 = vsel %vm5459_vm5, %v5435_v7, 0.0  ;;  %6713 = vrcp.f32 %v5218_v45  ;;  %v5248_v60 = vmul.f32 %v14490_v3, %v18265_v59  ;;  %v5247_v39 = vmul.f32 %v14478_v54, %v18266_v46  ;;  %v18267_v54 = vld [vmem:[#allocation206_spill] sm:$0xff] }
 0x50a   : > { %vm297_vm3 = vcmp.gt.f32.partialorder %v6752_v37, -1.5  ;;  %v5476_v24 = vadd.f32 %v5475_v11, %v5474_v52  ;;  %v5406_v10 = vmul.f32 -0.07, %v5354_v48  ;;  %v5405_v8 = vmul.f32 -0.07, %v5352_v25  ;;  %v4039_v5 = vpop.xlane.xlu1 %4038 }
 0x50b   : > { %v5477_v0 = vsel %vm5459_vm5, %v5436_v49, 0.0  ;;  %v5280_v47 = vsub.f32 %v14724_v38, %v5248_v60  ;;  %v5279_v18 = vsub.f32 %v14718_v15, %v5247_v39  ;;  %vm5188_vm1 = vcmp.gt.f32.partialorder %v14740_v17, 0.0  ;;  %v18268_v15 = vld [vmem:[#allocation250_spill] sm:$0xff] }
 0x50c   : > { %vm298_vm11 = vcmp.gt.f32.partialorder %v6753_v41, -1.5  ;;  %v5438_v3 = vmul.f32 %v5620_v20, %v5406_v10  ;;  %v5478_v4 = vadd.f32 %v5477_v0, %v5476_v24  ;;  %v5437_v28 = vmul.f32 %v18267_v54, %v5405_v8  ;;  %v6708_v6 = vpop.eup %6707  ;;  %v5068_v37 = vpop.xlane.xlu0 %5067  ;;  %v18272_v0 = vld [vmem:[#allocation156_spill] sm:$0xff] }
 0x50d   : > { %v5621_v43 = vsel %vm297_vm3, 1.0, %v18264_v21  ;;  %v5220_v9 = vsel %vm5188_vm1, %v14740_v17, 1.0  ;;  %v5312_v26 = vsub.f32 %v5280_v47, %v14751_v34  ;;  %v5311_v38 = vsub.f32 %v5279_v18, %v14762_v35  ;;  %v6710_v29 = vpop.eup %6709 }
 0x50e   : > { %vm5187_vm14 = vcmp.gt.f32.partialorder %v18268_v15, 0.0  ;;  %v5479_v19 = vsel %vm5459_vm5, %v5437_v28, 0.0  ;;  %v5250_v50 = vmul.f32 %v14656_v2, %v18269_v42  ;;  %v5249_v56 = vmul.f32 %v14612_v61, %v18270_v63  ;;  %v14863_v39 = vpop.xlane.xlu1 %4255 }
 0x50f   : > { %v5622_v44 = vsel %vm298_vm11, 1.0, %v18264_v21  ;;  %v5480_v23 = vadd.f32 %v5479_v19, %v5478_v4  ;;  %v5358_v12 = vmul.f32 %v6710_v29, %v5312_v26  ;;  %v5356_v34 = vmul.f32 %v6708_v6, %v5311_v38  ;;  %v6756_v6 = vld [vmem:[%s6906_s26 + $0x80] sm:$0xff] }
 0x510   : > { %v5481_v35 = vsel %vm5459_vm5, %v5438_v3, 0.0  ;;  %6715 = vrcp.f32 %v5220_v9  ;;  %v5282_v40 = vsub.f32 %v14771_v51, %v5250_v50  ;;  %v5281_v62 = vsub.f32 %v14787_v13, %v5249_v56  ;;  %v18271_v13 = vld [vmem:[#allocation151_spill] sm:$0xff] }
 0x511   : > { %v5219_v2 = vsel %vm5187_vm14, %v18268_v15, 1.0  ;;  %v5408_v61 = vmul.f32 -0.07, %v5358_v12  ;;  %v5482_v14 = vadd.f32 %v5481_v35, %v5480_v23  ;;  %v5407_v49 = vmul.f32 -0.07, %v5356_v34  ;;  %v4054_v35 = vpop.xlane.xlu0 %4053 }
 0x512   : > { %v6712_v33 = vpop.eup %6711  ;;  %vm299_vm6 = vcmp.gt.f32.partialorder %v6754_v16, -1.5  ;;  %vm300_vm8 = vcmp.gt.f32.partialorder %v6755_v57, -1.5  ;;  %v5314_v27 = vsub.f32 %v5282_v40, %v14813_v1  ;;  %v5313_v36 = vsub.f32 %v5281_v62, %v5053_v55  ;;  %v5063_v28 = vpop.xlane.xlu1 %5062 }
 0x513   : > { %v6714_v52 = vpop.eup %6713  ;;  %v5440_v51 = vmul.f32 %v5622_v44, %v5408_v61  ;;  %v5439_v31 = vmul.f32 %v5621_v43, %v5407_v49  ;;  %v5252_v7 = vmul.f32 %v14740_v17, %v18271_v13  ;;  %6717 = vrcp.f32 %v5219_v2  ;;  %v6757_v43 = vld [vmem:[%s6906_s26 + $0x88] sm:$0xff]  ;;  %v18273_v61 = vld [vmem:[#allocation152_spill] sm:$0xff] }
 0x514   : > { %v5362_v45 = vmul.f32 %v6714_v52, %v5314_v27  ;;  %v5360_v20 = vmul.f32 %v6712_v33, %v5313_v36  ;;  %v5623_v48 = vsel %vm299_vm6, 1.0, %v18264_v21  ;;  %v5624_v25 = vsel %vm300_vm8, 1.0, %v18264_v21  ;;  %v18274_v27 = vld [vmem:[#allocation159_spill] sm:$0xff] }
 0x515   : > { %v5483_v11 = vsel %vm5459_vm5, %v5439_v31, 0.0  ;;  %v5284_v59 = vsub.f32 %v4044_v53, %v5252_v7  ;;  %v5485_v17 = vsel %vm5459_vm5, %v5440_v51, 0.0  ;;  %v5251_v47 = vmul.f32 %v18268_v15, %v18272_v0  ;;  %v14879_v62 = vpop.xlane.xlu0 %4270 }
 0x516   : > { %v5484_v60 = vadd.f32 %v5483_v11, %v5482_v14  ;;  %v5410_v46 = vmul.f32 -0.07, %v5362_v45  ;;  %v5409_v1 = vmul.f32 -0.07, %v5360_v20  ;;  %vm301_vm9 = vcmp.gt.f32.partialorder %v6756_v6, -1.5  ;;  %v6758_v45 = vld [vmem:[%s6906_s26 + $0x90] sm:$0xff] }
 0x517   : > { %v5316_v24 = vsub.f32 %v5284_v59, %v5068_v37  ;;  %v5283_v3 = vsub.f32 %v4039_v5, %v5251_v47  ;;  %vm302_vm15 = vcmp.gt.f32.partialorder %v6757_v43, -1.5  ;;  %v5625_v15 = vsel %vm301_vm9, 1.0, %v18264_v21  ;;  %v4049_v5 = vpop.xlane.xlu1 %4048  ;;  %v6759_v20 = vld [vmem:[%s6906_s26 + $0x98] sm:$0xff] }
 0x518   : > { %v5442_v10 = vmul.f32 %v5624_v25, %v5410_v46  ;;  %v5486_v8 = vadd.f32 %v5485_v17, %v5484_v60  ;;  %v5441_v55 = vmul.f32 %v5623_v48, %v5409_v1  ;;  %v5626_v42 = vsel %vm302_vm15, 1.0, %v18264_v21 }
 0x519   : > { %v5315_v26 = vsub.f32 %v5283_v3, %v5063_v28  ;;  %vm5190_vm4 = vcmp.gt.f32.partialorder %v14811_v30, 0.0  ;;  %vm5189_vm7 = vcmp.gt.f32.partialorder %v14738_v32, 0.0  ;;  %v5254_v14 = vmul.f32 %v14811_v30, %v18273_v61 }
 0x51a   : > { %v6716_v18 = vpop.eup %6715  ;;  %v5487_v53 = vsel %vm5459_vm5, %v5441_v55, 0.0  ;;  %v5489_v54 = vsel %vm5459_vm5, %v5442_v10, 0.0  ;;  %v5222_v40 = vsel %vm5190_vm4, %v14811_v30, 1.0  ;;  %v5221_v2 = vsel %vm5189_vm7, %v14738_v32, 1.0 }
 0x51b   : > { %v5488_v41 = vadd.f32 %v5487_v53, %v5486_v8  ;;  %v5366_v4 = vmul.f32 %v6716_v18, %v5316_v24  ;;  %6719 = vrcp.f32 %v5222_v40  ;;  %v5286_v33 = vsub.f32 %v4054_v35, %v5254_v14  ;;  %v14884_v16 = vpop.xlane.xlu1 %4265  ;;  %v18276_v35 = vld [vmem:[#allocation153_spill] sm:$0xff] }
 0x51c   : > { %6721 = vrcp.f32 %v5221_v2  ;;  %v5253_v36 = vmul.f32 %v14738_v32, %v18274_v27  ;;  %vm303_vm12 = vcmp.gt.f32.partialorder %v6758_v45, -1.5  ;;  %vm304_vm0 = vcmp.gt.f32.partialorder %v6759_v20, -1.5  ;;  %v18277_v2 = vld [vmem:[#allocation239_spill] sm:$0xff] }
 0x51d   : > { %v5490_v9 = vadd.f32 %v5489_v54, %v5488_v41  ;;  %v6718_v38 = vpop.eup %6717  ;;  %v5412_v29 = vmul.f32 -0.07, %v5366_v4  ;;  %v5627_v60 = vsel %vm303_vm12, 1.0, %v18264_v21  ;;  %v5628_v32 = vsel %vm304_vm0, 1.0, %v18264_v21  ;;  %v18278_v45 = vld [vmem:[#allocation155_spill] sm:$0xff] }
 0x51e   : > { %v5364_v19 = vmul.f32 %v6718_v38, %v5315_v26  ;;  %v5285_v31 = vsub.f32 %v4049_v5, %v5253_v36  ;;  %vm5191_vm10 = vcmp.gt.f32.partialorder %v14789_v22, 0.0  ;;  %vm5192_vm2 = vcmp.gt.f32.partialorder %v14863_v39, 0.0  ;;  %v6760_v36 = vld [vmem:[%s6906_s26 + $0xa0] sm:$0xff] }
 0x51f   : > { %v5444_v63 = vmul.f32 %v5626_v42, %v5412_v29  ;;  %v5223_v38 = vsel %vm5191_vm10, %v14789_v22, 1.0  ;;  %vm5193_vm13 = vcmp.gt.f32.partialorder %v14852_v58, 0.0  ;;  %v18275_v42 = vld [vmem:[#allocation162_spill] sm:$0xff]  ;;  %vm5195_vm3 = vcmp.gt.f32.partialorder %v14879_v62, 0.0 }
 0x520   : > { %v5411_v50 = vmul.f32 -0.07, %v5364_v19  ;;  %6723 = vrcp.f32 %v5223_v38  ;;  %vm5194_vm1 = vcmp.gt.f32.partialorder %v14884_v16, 0.0  ;;  %v5257_v61 = vmul.f32 %v14852_v58, %v18277_v2  ;;  %v6764_v2 = vld [vmem:[%s6906_s26 + $0xc0] sm:$0xff] }
 0x521   : > { %v5493_v12 = vsel %vm5459_vm5, %v5444_v63, 0.0  ;;  %v5225_v63 = vsel %vm5193_vm13, %v14852_v58, 1.0  ;;  %v5226_v5 = vsel %vm5194_vm1, %v14884_v16, 1.0  ;;  %vm305_vm14 = vcmp.gt.f32.partialorder %v6760_v36, -1.5  ;;  %v6765_v36 = vld [vmem:[%s6906_s26 + $0xc8] sm:$0xff] }
 0x522   : > { %v5443_v56 = vmul.f32 %v5625_v15, %v5411_v50  ;;  %v5224_v15 = vsel %vm5192_vm2, %v14863_v39, 1.0  ;;  %v5255_v50 = vmul.f32 %v14789_v22, %v18275_v42  ;;  %v5256_v22 = vmul.f32 %v14863_v39, %v18276_v35 }
 0x523   : > { %6725 = vrcp.f32 %v5224_v15  ;;  %v5258_v20 = vmul.f32 %v14884_v16, %v18278_v45  ;;  %vm309_vm0 = vcmp.gt.f32.partialorder %v6764_v2, -1.5  ;;  %vm310_vm2 = vcmp.gt.f32.partialorder %v6765_v36, -1.5 }
 0x524   : > { %v5491_v44 = vsel %vm5459_vm5, %v5443_v56, 0.0  ;;  %6727 = vrcp.f32 %v5225_v63 }
 0x525   : > { %v5492_v23 = vadd.f32 %v5491_v44, %v5490_v9  ;;  %v6720_v51 = vpop.eup %6719 }
 0x526   : > { %v6722_v48 = vpop.eup %6721 }
 0x527   : > { %v5494_v34 = vadd.f32 %v5493_v12, %v5492_v23 }
 0x52a   : > { %v6724_v40 = vpop.eup %6723 }
 0x52e   : > { %v5078_v49 = vpop.xlane.xlu0 %5077 }
 0x52f   : > { %v5318_v57 = vsub.f32 %v5286_v33, %v5078_v49 }
 0x531   : > { %v5370_v13 = vmul.f32 %v6720_v51, %v5318_v57 }
 0x532   : > { %v14888_v52 = vpop.xlane.xlu0 %4063 }
 0x533   : > { %v5414_v25 = vmul.f32 -0.07, %v5370_v13  ;;  %v5288_v14 = vsub.f32 %v14888_v52, %v5256_v22  ;;  %v5629_v13 = vsel %vm305_vm14, 1.0, %v18264_v21 }
 0x535   : > { %v5446_v37 = vmul.f32 %v5628_v32, %v5414_v25 }
 0x537   : > { %v14892_v59 = vpop.xlane.xlu0 %4280  ;;  %v5497_v0 = vsel %vm5459_vm5, %v5446_v37, 0.0 }
 0x538   : > { %vm5197_vm6 = vcmp.gt.f32.partialorder %v14892_v59, 0.0 }
 0x539   : > { %v5073_v7 = vpop.xlane.xlu1 %5072 }
 0x53a   : > { %v5317_v30 = vsub.f32 %v5285_v31, %v5073_v7  ;;  %v6726_v31 = vpop.eup %6725  ;;  %v5229_v7 = vsel %vm5197_vm6, %v14892_v59, 1.0 }
 0x53b   : > { %v6728_v25 = vpop.eup %6727 }
 0x53c   : > { %v5368_v11 = vmul.f32 %v6722_v48, %v5317_v30  ;;  %v18279_v30 = vld [vmem:[#allocation165_spill] sm:$0xff] }
 0x53d   : > { %v4059_v46 = vpop.xlane.xlu1 %4058  ;;  %v5259_v48 = vmul.f32 %v14879_v62, %v18279_v30 }
 0x53e   : > { %v5413_v1 = vmul.f32 -0.07, %v5368_v11  ;;  %v5287_v56 = vsub.f32 %v4059_v46, %v5255_v50  ;;  %v6761_v11 = vld [vmem:[%s6906_s26 + $0xb0] sm:$0xff]  ;;  %v18281_v50 = vld [vmem:[#allocation167_spill] sm:$0xff] }
 0x53f   : > { %vm307_vm9 = vcmp.gt.f32.partialorder %v6761_v11, -1.5  ;;  %v5261_v63 = vmul.f32 %v14892_v59, %v18281_v50 }
 0x540   : > { %v5445_v17 = vmul.f32 %v5627_v60, %v5413_v1 }
 0x541   : > { %v14896_v24 = vpop.xlane.xlu1 %4275 }
 0x542   : > { %v5495_v10 = vsel %vm5459_vm5, %v5445_v17, 0.0  ;;  %vm5196_vm11 = vcmp.gt.f32.partialorder %v14896_v24, 0.0 }
 0x543   : > { %v5088_v8 = vpop.xlane.xlu0 %5087  ;;  %v5496_v55 = vadd.f32 %v5495_v10, %v5494_v34  ;;  %v5227_v34 = vsel %vm5195_vm3, %v14879_v62, 1.0  ;;  %v5228_v58 = vsel %vm5196_vm11, %v14896_v24, 1.0  ;;  %v6762_v10 = vld [vmem:[%s6906_s26 + $0xa8] sm:$0xff] }
 0x544   : > { %6729 = vrcp.f32 %v5227_v34  ;;  %v5320_v39 = vsub.f32 %v5288_v14, %v5088_v8  ;;  %vm306_vm4 = vcmp.gt.f32.partialorder %v6762_v10, -1.5 }
 0x545   : > { %v14900_v47 = vadd.f32 %v5497_v0, %v5496_v55  ;;  %6731 = vrcp.f32 %v5226_v5  ;;  %v5630_v38 = vsel %vm306_vm4, 1.0, %v18264_v21 }
 0x546   : > { %6733 = vrcp.f32 %v5228_v58  ;;  %v5374_v60 = vmul.f32 %v6726_v31, %v5320_v39  ;;  %v18283_v58 = vld [vmem:[#allocation169_spill] sm:$0xff] }
 0x547   : > { %v14902_v53 = vpop.xlane.xlu0 %4073  ;;  %6735 = vrcp.f32 %v5229_v7  ;;  %v5633_v7 = vsel %vm309_vm0, 1.0, %v18264_v21 }
 0x548   : > { %v5083_v18 = vpop.xlane.xlu1 %5082  ;;  %v5290_v46 = vsub.f32 %v14902_v53, %v5258_v20  ;;  %v18280_v53 = vld [vmem:[#allocation157_spill] sm:$0xff]  ;;  %v5416_v15 = vmul.f32 -0.07, %v5374_v60  ;;  %v6766_v60 = vld [vmem:[%s6906_s26 + $0xd0] sm:$0xff] }
 0x549   : > { %v5319_v12 = vsub.f32 %v5287_v56, %v5083_v18  ;;  %v5631_v18 = vsel %vm307_vm9, 1.0, %v18264_v21  ;;  %vm311_vm3 = vcmp.gt.f32.partialorder %v6766_v60, -1.5 }
 0x54b   : > { %v5372_v49 = vmul.f32 %v6724_v40, %v5319_v12  ;;  %v18282_v12 = vld [vmem:[#allocation160_spill] sm:$0xff] }
 0x54d   : > { %v4069_v41 = vpop.xlane.xlu1 %4068  ;;  %v14904_v3 = vpop.xlane.xlu0 %4290  ;;  %v5415_v52 = vmul.f32 -0.07, %v5372_v49 }
 0x54e   : > { %v5289_v57 = vsub.f32 %v4069_v41, %v5257_v61  ;;  %vm5199_vm15 = vcmp.gt.f32.partialorder %v14904_v3, 0.0  ;;  %v6763_v41 = vld [vmem:[%s6906_s26 + $0xb8] sm:$0xff] }
 0x54f   : > { %v5447_v62 = vmul.f32 %v5629_v13, %v5415_v52  ;;  %v5231_v8 = vsel %vm5199_vm15, %v14904_v3, 1.0  ;;  %vm308_vm7 = vcmp.gt.f32.partialorder %v6763_v41, -1.5  ;;  %v18284_v41 = vld [vmem:[#allocation164_spill] sm:$0xff] }
 0x550   : > { %v5632_v59 = vsel %vm308_vm7, 1.0, %v18264_v21 }
 0x551   : > { %v14906_v4 = vpop.xlane.xlu1 %4285 }
 0x552   : > { %vm5198_vm8 = vcmp.gt.f32.partialorder %v14906_v4, 0.0  ;;  %v5262_v34 = vmul.f32 %v14906_v4, %v18282_v12 }
 0x553   : > { %v5230_v1 = vsel %vm5198_vm8, %v14906_v4, 1.0  ;;  %v5448_v4 = vmul.f32 %v5630_v38, %v5416_v15  ;;  %v6768_v38 = vld [vmem:[%s6906_s26 + $0xe0] sm:$0xff]  ;;  %v18285_v15 = vld [vmem:[#allocation163_spill] sm:$0xff] }
 0x554   : > { %6737 = vrcp.f32 %v5230_v1  ;;  %vm313_vm11 = vcmp.gt.f32.partialorder %v6768_v38, -1.5 }
 0x555   : > { %6739 = vrcp.f32 %v5231_v8  ;;  %v5501_v30 = vsel %vm5459_vm5, %v5448_v4, 0.0 }
 0x558   : > { %v14908_v54 = vpop.xlane.xlu0 %5097 }
 0x559   : > { %v5322_v55 = vsub.f32 %v5290_v46, %v14908_v54 }
 0x55b   : > { %v5093_v28 = vpop.xlane.xlu1 %5092 }
 0x55c   : > { %v14910_v6 = vpop.xlane.xlu0 %4083  ;;  %v5321_v51 = vsub.f32 %v5289_v57, %v5093_v28  ;;  %v5260_v28 = vmul.f32 %v14896_v24, %v18280_v53 }
 0x55e   : > { %v5376_v37 = vmul.f32 %v6728_v25, %v5321_v51  ;;  %v5292_v56 = vsub.f32 %v14910_v6, %v5260_v28  ;;  %v5263_v51 = vmul.f32 %v14904_v3, %v18283_v58 }
 0x55f   : > { %v14912_v43 = vpop.xlane.xlu1 %4078 }
 0x560   : > { %v14914_v9 = vpop.xlane.xlu0 %4300  ;;  %v5291_v16 = vsub.f32 %v14912_v43, %v5259_v48  ;;  %v6730_v43 = vpop.eup %6729  ;;  %v5417_v42 = vmul.f32 -0.07, %v5376_v37 }
 0x561   : > { %v6732_v54 = vpop.eup %6731  ;;  %vm5201_vm13 = vcmp.gt.f32.partialorder %v14914_v9, 0.0 }
 0x562   : > { %v5378_v24 = vmul.f32 %v6732_v54, %v5322_v55  ;;  %v5449_v61 = vmul.f32 %v5631_v18, %v5417_v42  ;;  %v6734_v57 = vpop.eup %6733 }
 0x563   : > { %v14917_v26 = vpop.xlane.xlu1 %4295 }
 0x564   : > { %vm5200_vm12 = vcmp.gt.f32.partialorder %v14917_v26, 0.0  ;;  %v5503_v3 = vsel %vm5459_vm5, %v5449_v61, 0.0  ;;  %v5264_v42 = vmul.f32 %v14917_v26, %v18285_v15 }
 0x565   : > { %v5232_v39 = vsel %vm5200_vm12, %v14917_v26, 1.0  ;;  %v5637_v26 = vsel %vm313_vm11, 1.0, %v18264_v21 }
 0x566   : > { %v14920_v29 = vpop.xlane.xlu0 %5107  ;;  %6741 = vrcp.f32 %v5232_v39 }
 0x567   : > { %v5324_v6 = vsub.f32 %v5292_v56, %v14920_v29  ;;  %v5418_v29 = vmul.f32 -0.07, %v5378_v24 }
 0x569   : > { %v5450_v37 = vmul.f32 %v5632_v59, %v5418_v29 }
 0x56a   : > { %v14928_v44 = vpop.xlane.xlu0 %4093 }
 0x56b   : > { %v5103_v19 = vpop.xlane.xlu1 %5102  ;;  %v5294_v14 = vsub.f32 %v14928_v44, %v5262_v34  ;;  %v6736_v44 = vpop.eup %6735 }
 0x56c   : > { %v5323_v0 = vsub.f32 %v5291_v16, %v5103_v19  ;;  %v5499_v19 = vsel %vm5459_vm5, %v5447_v62, 0.0  ;;  %v6738_v11 = vpop.eup %6737  ;;  %v5634_v62 = vsel %vm310_vm2, 1.0, %v18264_v21 }
 0x56d   : > { %v6740_v10 = vpop.eup %6739 }
 0x56e   : > { %v14942_v33 = vpop.xlane.xlu0 %4098  ;;  %v5380_v22 = vmul.f32 %v6730_v43, %v5323_v0  ;;  %v6767_v0 = vld [vmem:[%s6906_s26 + $0xd8] sm:$0xff]  ;;  %v5635_v43 = vsel %vm311_vm3, 1.0, %v18264_v21 }
 0x56f   : > { %v14931_v23 = vpop.xlane.xlu1 %4088  ;;  %v5295_v45 = vsub.f32 %v14942_v33, %v5263_v51  ;;  %v5233_v33 = vsel %vm5201_vm13, %v14914_v9, 1.0  ;;  %vm312_vm1 = vcmp.gt.f32.partialorder %v6767_v0, -1.5 }
 0x570   : > { %v5293_v40 = vsub.f32 %v14931_v23, %v5261_v63  ;;  %v5500_v23 = vadd.f32 %v5499_v19, %v14900_v47  ;;  %v5419_v52 = vmul.f32 -0.07, %v5380_v22  ;;  %v5382_v47 = vmul.f32 %v6734_v57, %v5324_v6  ;;  %v6769_v22 = vld [vmem:[%s6906_s26 + $0xe8] sm:$0xff]  ;;  %v6742_v61 = vpop.eup %6741 }
 0x571   : > { %v5505_v63 = vsel %vm5459_vm5, %v5450_v37, 0.0  ;;  %vm314_vm14 = vcmp.gt.f32.partialorder %v6769_v22, -1.5 }
 0x572   : > { %v14958_v32 = vpop.xlane.xlu0 %4103  ;;  %v5502_v46 = vadd.f32 %v5501_v30, %v5500_v23  ;;  %v5451_v16 = vmul.f32 %v5633_v7, %v5419_v52  ;;  %v5420_v55 = vmul.f32 -0.07, %v5382_v47  ;;  %v6770_v7 = vld [vmem:[%s6906_s26 + $0xf8] sm:$0xff]  ;;  %v6771_v47 = vld [vmem:[%s6906_s26 + $0xf0] sm:$0xff] }
 0x573   : > { %v14944_v27 = vpop.xlane.xlu1 %4305  ;;  %v5296_v24 = vsub.f32 %v14958_v32, %v5264_v42  ;;  %v5638_v32 = vsel %vm314_vm14, 1.0, %v18264_v21  ;;  %vm316_vm6 = vcmp.gt.f32.partialorder %v6770_v7, -1.5  ;;  %vm315_vm8 = vcmp.gt.f32.partialorder %v6771_v47, -1.5 }
 0x574   : > { %vm5202_vm10 = vcmp.gt.f32.partialorder %v14944_v27, 0.0  ;;  %v5504_v8 = vadd.f32 %v5503_v3, %v5502_v46  ;;  %v5266_v53 = vmul.f32 %v14944_v27, %v18284_v41  ;;  %v5507_v54 = vsel %vm5459_vm5, %v5451_v16, 0.0 }
 0x575   : > { %v5234_v31 = vsel %vm5202_vm10, %v14944_v27, 1.0  ;;  %v5636_v27 = vsel %vm312_vm1, 1.0, %v18264_v21  ;;  %v5452_v12 = vmul.f32 %v5634_v62, %v5420_v55  ;;  %v5639_v60 = vsel %vm315_vm8, 1.0, %v18264_v21 }
 0x576   : > { %6743 = vrcp.f32 %v5234_v31  ;;  %v5506_v34 = vadd.f32 %v5505_v63, %v5504_v8 }
 0x577   : > { %v14978_v35 = vpop.xlane.xlu0 %4108  ;;  %6745 = vrcp.f32 %v5233_v33  ;;  %v5509_v23 = vsel %vm5459_vm5, %v5452_v12, 0.0 }
 0x578   : > { %v5508_v6 = vadd.f32 %v5507_v54, %v5506_v34 }
 0x57a   : > { %v5510_v31 = vadd.f32 %v5509_v23, %v5508_v6 }
 0x57c   : > { %v5113_v17 = vpop.xlane.xlu1 %5112 }
 0x57d   : > { %v5325_v49 = vsub.f32 %v5293_v40, %v5113_v17  ;;  %v4114_v20 = vpop.xlane.xlu0 %4113 }
 0x57e   : > { %v5298_v56 = vsub.f32 %v4114_v20, %v5266_v53 }
 0x57f   : > { %v5384_v48 = vmul.f32 %v6736_v44, %v5325_v49 }
 0x580   : > { %v6744_v36 = vpop.eup %6743 }
 0x581   : > { %v5421_v18 = vmul.f32 -0.07, %v5384_v48  ;;  %v6746_v20 = vpop.eup %6745 }
 0x582   : > { %v5118_v5 = vpop.xlane.xlu1 %5117 }
 0x583   : > { %v5326_v13 = vsub.f32 %v5294_v14, %v5118_v5  ;;  %v5453_v40 = vmul.f32 %v5635_v43, %v5421_v18  ;;  %v18286_v14 = vld [vmem:[#allocation172_spill] sm:$0xff] }
 0x584   : > { %v5265_v49 = vmul.f32 %v14914_v9, %v18286_v14 }
 0x585   : > { %v5386_v17 = vmul.f32 %v6738_v11, %v5326_v13  ;;  %v5138_v50 = vpop.xlane.xlu0 %5137  ;;  %v5511_v58 = vsel %vm5459_vm5, %v5453_v40, 0.0 }
 0x586   : > { %v5330_v59 = vsub.f32 %v5298_v56, %v5138_v50  ;;  %v5297_v51 = vsub.f32 %v14978_v35, %v5265_v49  ;;  %v5512_v30 = vadd.f32 %v5511_v58, %v5510_v31  ;;  %v5640_v35 = vsel %vm316_vm6, 1.0, %v18264_v21 }
 0x587   : > { %v5422_v19 = vmul.f32 -0.07, %v5386_v17 }
 0x588   : > { %v5123_v25 = vpop.xlane.xlu1 %5122  ;;  %v5394_v52 = vmul.f32 %v6744_v36, %v5330_v59 }
 0x589   : > { %v5327_v1 = vsub.f32 %v5295_v45, %v5123_v25  ;;  %v5454_v57 = vmul.f32 %v5636_v27, %v5422_v19 }
 0x58a   : > { %v5426_v25 = vmul.f32 -0.07, %v5394_v52 }
 0x58b   : > { %v5388_v28 = vmul.f32 %v6740_v10, %v5327_v1  ;;  %v5513_v9 = vsel %vm5459_vm5, %v5454_v57, 0.0 }
 0x58c   : > { %v5514_v46 = vadd.f32 %v5513_v9, %v5512_v30  ;;  %v5458_v16 = vmul.f32 %v5640_v35, %v5426_v25 }
 0x58d   : > { %v5423_v5 = vmul.f32 -0.07, %v5388_v28 }
 0x58e   : > { %v5521_v55 = vsel %vm5459_vm5, %v5458_v16, 0.0 }
 0x58f   : > { %v5455_v29 = vmul.f32 %v5637_v26, %v5423_v5 }
 0x591   : > { %v5128_v2 = vpop.xlane.xlu1 %5127  ;;  %v5515_v48 = vsel %vm5459_vm5, %v5455_v29, 0.0 }
 0x592   : > { %v5328_v4 = vsub.f32 %v5296_v24, %v5128_v2  ;;  %v5516_v33 = vadd.f32 %v5515_v48, %v5514_v46 }
 0x594   : > { %v5390_v39 = vmul.f32 %v6742_v61, %v5328_v4 }
 0x596   : > { %v5424_v13 = vmul.f32 -0.07, %v5390_v39  ;;  %v5133_v44 = vpop.xlane.xlu1 %5132 }
 0x597   : > { %v5329_v45 = vsub.f32 %v5297_v51, %v5133_v44 }
 0x598   : > { %v5456_v3 = vmul.f32 %v5638_v32, %v5424_v13 }
 0x599   : > { %v5392_v11 = vmul.f32 %v6746_v20, %v5329_v45 }
 0x59a   : > { %v5517_v1 = vsel %vm5459_vm5, %v5456_v3, 0.0 }
 0x59b   : > { %v5425_v37 = vmul.f32 -0.07, %v5392_v11  ;;  %v5518_v10 = vadd.f32 %v5517_v1, %v5516_v33 }
 0x59d   : > { %v5457_v17 = vmul.f32 %v5639_v60, %v5425_v37 }
 0x59f   : > { %v5519_v62 = vsel %vm5459_vm5, %v5457_v17, 0.0 }
 0x5a0   : > { %v5520_v8 = vadd.f32 %v5519_v62, %v5518_v10 }
 0x5a2   : > { %v5522_v0 = vadd.f32 %v5521_v55, %v5520_v8 }
 0x5a4   : > { %5523 = vadd.xlane.f32.xlu1 %v5522_v0 }
 0x631   : > { %v5524_v18 = vpop.xlane.xlu1 %5523 }
 0x632   : > { %v5525_v41 = vrot.slane %v5524_v18, 4 }
 0x634   : > { %v5526_v21 = vadd.f32 %v5525_v41, %v5524_v18 }
 0x636   : > { %v5527_v53 = vrot.slane %v5526_v21, 2 }
 0x638   : > { %v5528_v28 = vadd.f32 %v5527_v53, %v5526_v21 }
 0x63a   : > { %v5529_v43 = vrot.slane %v5528_v28, 1 }
 0x63c   : > { %v5530_v38 = vadd.f32 %v5529_v43, %v5528_v28 }
 0x63e   : > { %6044 = vpush %v5530_v38 }
 0x66f   : > { %s6045_s28 = spop %6044 }
 0x670   : > { %v5532_v15 = vstv %s6045_s28 }
 0x671   : > { %5533 = vst [vmem:[%s219_s27] sm:$0xff] %v5532_v15 }
 0x672 PF: > { %s14_s15 = sadd.s32 1, %s6778_s15  }
 0x673   : > { %p11_p5 = scmp.ge.s32.totalorder %s14_s15, 4  }
 0x675   :  { %13 = sbr.rel (!%p11_p5) target bundleno = 1 (0x1), region = 69 }

</bundles_post_ra>
